<compile_context>
chip_gen: v5e
topology: v5e:2x2
jax: 0.10.0
libtpu: 0.0.40
codegen_flags: <defaults>
</compile_context>

<pallas_src>
import functools

import jax
import jax.numpy as jnp
from jax.experimental import pallas as pl
from jax.experimental.pallas import tpu as pltpu


# ----------------------------------------------------------------------------
# Fused RDB kernel: one grid step == one batch image.
#   x_ref    : (1, H, W, Cin)     NHWC input block
#   wd_ref   : (L, K*K*Ct, G)     dense conv weights, input-channel axis zero-
#                                 padded to Ct, rows ordered (tap-major,
#                                 channel-minor) to match the patch scratch
#   w1_ref   : (Ct, Cin)          1x1 conv weight
#   out_ref  : (1, H, W, Cin)     output block
#   feat_ref : (H+2P, W+2P, Ct)   zero-padded growing feature map (VMEM scratch)
#   patch_ref: (H, W, K*K*Ct)     im2col patches (VMEM scratch)
# ----------------------------------------------------------------------------
def _rdb_fused_kernel(x_ref, wd_ref, w1_ref, out_ref, feat_ref, patch_ref, *,
                      H, W, K, P, Cin, G, L, Ct):
    KK = K * K

    # Zero the scratches. The zero border of feat_ref provides the conv
    # padding; zero patch columns for not-yet-computed channels pair with the
    # zero-padded weights so they contribute nothing.
    feat_ref[...] = jnp.zeros_like(feat_ref)
    patch_ref[...] = jnp.zeros_like(patch_ref)

    x = x_ref[0]                                              # (H, W, Cin)
    feat_ref[P:P + H, P:P + W, 0:Cin] = x.astype(jnp.float32)

    cur = Cin       # channels currently materialized in feat_ref
    patched = 0     # channels already scattered into patch_ref
    for _layer in range(L):                                   # static unroll
        # Scatter only the newly produced channels [patched:cur] into all
        # K*K taps of the im2col scratch (shifted reads from the padded
        # feature map; border zeros give the conv padding for free).
        for ky in range(K):
            for kx in range(K):
                t = ky * K + kx
                patch_ref[:, :, t * Ct + patched: t * Ct + cur] = (
                    feat_ref[ky:ky + H, kx:kx + W, patched:cur])
        patched = cur

        # One wide MXU matmul per dense layer (contraction = K*K*Ct).
        p_all = patch_ref[...].reshape(H * W, KK * Ct)
        acc = jnp.dot(p_all, wd_ref[_layer],
                      preferred_element_type=jnp.float32)     # (H*W, G) f32
        acc = jnp.maximum(acc, 0.2 * acc)                     # LeakyReLU(0.2)
        feat_ref[P:P + H, P:P + W, cur:cur + G] = acc.reshape(H, W, G)
        cur += G

    # Final 1x1 conv over all concatenated channels + residual add, in f32.
    f = feat_ref[P:P + H, P:P + W, :].reshape(H * W, Ct)
    y = jnp.dot(f, w1_ref[...], preferred_element_type=jnp.float32)
    y = y + x.reshape(H * W, Cin).astype(jnp.float32)
    out_ref[...] = y.reshape(1, H, W, Cin).astype(out_ref.dtype)


# ----------------------------------------------------------------------------
# Weight packing (done once at init, not in the forward hot path).
# ----------------------------------------------------------------------------
def _pack_dense_weights(dense_hwio, ct):
    """Stack per-layer HWIO weights (K, K, C_i, G) into (L, K*K*Ct, G).

    The input-channel axis is zero-padded to Ct and rows are ordered
    (tap-major, channel-minor), i.e. row index = (ky*K + kx)*Ct + c, matching
    the im2col patch column layout used inside the kernel.
    """
    packed = []
    for w in dense_hwio:
        k, _, c, g = w.shape
        wp = jnp.pad(w, ((0, 0), (0, 0), (0, ct - c), (0, 0)))
        packed.append(wp.reshape(k * k * ct, g))
    return jnp.stack(packed, axis=0)


def init_rdb_params(key, in_channels, growth_rate, size_k, num_layer=3,
                    dtype=jnp.float32):
    c = in_channels
    keys = jax.random.split(key, num_layer + 1)
    dense = []
    for i in range(num_layer):
        # PyTorch Conv2d weight is (G, Cin, K, K); we store HWIO = (K, K, Cin, G).
        fan_in = c * size_k * size_k
        w = jax.random.normal(keys[i], (size_k, size_k, c, growth_rate),
                              dtype) * (1.0 / jnp.sqrt(fan_in))
        dense.append(w)
        c += growth_rate
    # 1x1 conv: PyTorch (Cout, Ctot, 1, 1) -> stored as (Ctot, Cout).
    w1 = jax.random.normal(keys[-1], (c, in_channels), dtype) * (1.0 / jnp.sqrt(c))
    return {
        "dense": dense,                         # HWIO list (used by reference)
        "w1x1": w1,                             # (Ct, Cin)
        "wd_packed": _pack_dense_weights(dense, c),   # (L, K*K*Ct, G)
        "size_k": size_k,
    }


# ----------------------------------------------------------------------------
# Forward: single fused pallas_call, grid over batch.
# ----------------------------------------------------------------------------
def rdb_forward(params, x_nchw, size_p):
    dense = params["dense"]
    w1 = params["w1x1"]
    wd = params["wd_packed"]

    L = len(dense)
    K = dense[0].shape[0]
    G = dense[0].shape[-1]
    N, Cin, H, W = x_nchw.shape
    Ct = Cin + L * G
    P = size_p
    # The PyTorch module's channel concat requires 'same' spatial size.
    assert K == 2 * P + 1, "RDB assumes size_k == 2*size_p + 1"

    x = jnp.transpose(x_nchw, (0, 2, 3, 1))     # NCHW -> NHWC (one XLA op)

    kernel = functools.partial(_rdb_fused_kernel, H=H, W=W, K=K, P=P,
                               Cin=Cin, G=G, L=L, Ct=Ct)

    flops = 2 * N * H * W * (L * (K * K * Ct) * G + Ct * Cin)
    bytes_accessed = 4 * (2 * N * H * W * Cin + wd.size + w1.size)

    y = pl.pallas_call(
        kernel,
        out_shape=jax.ShapeDtypeStruct((N, H, W, Cin), x.dtype),
        grid_spec=pltpu.PrefetchScalarGridSpec(
            num_scalar_prefetch=0,
            grid=(N,),
            in_specs=[
                pl.BlockSpec((1, H, W, Cin), lambda n: (n, 0, 0, 0)),
                pl.BlockSpec((L, K * K * Ct, G), lambda n: (0, 0, 0)),
                pl.BlockSpec((Ct, Cin), lambda n: (0, 0)),
            ],
            out_specs=pl.BlockSpec((1, H, W, Cin), lambda n: (n, 0, 0, 0)),
            scratch_shapes=[
                pltpu.VMEM((H + 2 * P, W + 2 * P, Ct), jnp.float32),
                pltpu.VMEM((H, W, K * K * Ct), jnp.float32),
            ]),
        compiler_params=pltpu.CompilerParams(
            dimension_semantics=("parallel",),        # v7x: 2 TCs split batch
            vmem_limit_bytes=32 * 1024 * 1024),
        cost_estimate=pl.CostEstimate(flops=flops, transcendentals=0,
                                      bytes_accessed=bytes_accessed),
    )(x, wd, w1)

    return jnp.transpose(y, (0, 3, 1, 2))       # NHWC -> NCHW


# ----------------------------------------------------------------------------
# Pure-JAX reference (independent impl via lax.conv) for a sanity check.
# ----------------------------------------------------------------------------
def rdb_reference(params, x_nchw, size_p):
    x = jnp.transpose(x_nchw, (0, 2, 3, 1))
    feat = x
    for w in params["dense"]:
        dn = jax.lax.conv_dimension_numbers(feat.shape, w.shape,
                                            ("NHWC", "HWIO", "NHWC"))
        out = jax.lax.conv_general_dilated(
            feat, w, window_strides=(1, 1),
            padding=[(size_p, size_p), (size_p, size_p)],
            dimension_numbers=dn, precision=jax.lax.Precision.HIGHEST)
        out = jnp.maximum(out, 0.2 * out)
        feat = jnp.concatenate([feat, out], axis=-1)
    Ct, Co = params["w1x1"].shape
    w1 = params["w1x1"].reshape(1, 1, Ct, Co)
    dn1 = jax.lax.conv_dimension_numbers(feat.shape, w1.shape,
                                         ("NHWC", "HWIO", "NHWC"))
    y = jax.lax.conv_general_dilated(
        feat, w1, window_strides=(1, 1), padding="VALID",
        dimension_numbers=dn1, precision=jax.lax.Precision.HIGHEST)
    y = y + x
    return jnp.transpose(y, (0, 3, 1, 2))


if __name__ == "__main__":
    # RDB(in_channels=4, growthRate=4, size_k=3, size_p=1, num_layer=3),
    # input x of shape (2, 4, 16, 16) NCHW.
    in_channels, growth_rate, size_k, size_p, num_layer = 4, 4, 3, 1, 3
    key = jax.random.PRNGKey(0)
    kp, kx = jax.random.split(key)
    params = init_rdb_params(kp, in_channels, growth_rate, size_k, num_layer)
    x = jax.random.normal(kx, (2, in_channels, 16, 16), jnp.float32)

    out = jax.block_until_ready(rdb_forward(params, x, size_p))
    ref = jax.block_until_ready(rdb_reference(params, x, size_p))

    assert out.shape == x.shape
    err = float(jnp.max(jnp.abs(out - ref)))
    assert jnp.allclose(out, ref, atol=1e-4, rtol=1e-4), (
        "mismatch vs reference: max abs err = %e" % err)

    print("KERNEL_OK")
</pallas_src>

<mosaic_0001>
module attributes {stable_mosaic.version = 11 : i64} {
  func.func @_rdb_fused_kernel(%arg0: i32, %arg1: memref<1x16x16x4xf32, #tpu.memory_space<vmem>>, %arg2: memref<3x144x4xf32, #tpu.memory_space<vmem>>, %arg3: memref<16x4xf32, #tpu.memory_space<vmem>>, %arg4: memref<1x16x16x4xf32, #tpu.memory_space<vmem>>, %arg5: memref<18x18x16xf32, #tpu.memory_space<vmem>>, %arg6: memref<16x16x144xf32, #tpu.memory_space<vmem>>) attributes {dimension_semantics = [#tpu.dimension_semantics<parallel>], iteration_bounds = array<i64: 2>, scalar_prefetch = 0 : i64, scratch_operands = 2 : i64, tpu.core_type = #tpu.core_type<tc>, window_params = [{transform_indices = @transform_0, window_bounds = array<i64: 1, 16, 16, 4>}, {pipeline_mode = #tpu.pipeline_mode<synchronous>, transform_indices = @transform_1, window_bounds = array<i64: 3, 144, 4>}, {pipeline_mode = #tpu.pipeline_mode<synchronous>, transform_indices = @transform_2, window_bounds = array<i64: 16, 4>}, {transform_indices = @transform_3, window_bounds = array<i64: 1, 16, 16, 4>}]} {
    %cst = arith.constant 0.000000e+00 : f32
    %0 = vector.broadcast %cst : f32 to vector<18x18x16xf32>
    %c0 = arith.constant 0 : index
    %c0_0 = arith.constant 0 : index
    %c0_1 = arith.constant 0 : index
    %1 = vector.load %arg5[%c0, %c0_0, %c0_1] : memref<18x18x16xf32, #tpu.memory_space<vmem>>, vector<18x18x16xf32>
    tpu.vector_store %arg5[%c0, %c0_0, %c0_1], %0 {strides = array<i32>} : memref<18x18x16xf32, #tpu.memory_space<vmem>>, vector<18x18x16xf32>,
    %cst_2 = arith.constant 0.000000e+00 : f32
    %2 = vector.broadcast %cst_2 : f32 to vector<16x16x144xf32>
    %c0_3 = arith.constant 0 : index
    %c0_4 = arith.constant 0 : index
    %c0_5 = arith.constant 0 : index
    %3 = vector.load %arg6[%c0_3, %c0_4, %c0_5] : memref<16x16x144xf32, #tpu.memory_space<vmem>>, vector<16x16x144xf32>
    tpu.vector_store %arg6[%c0_3, %c0_4, %c0_5], %2 {strides = array<i32>} : memref<16x16x144xf32, #tpu.memory_space<vmem>>, vector<16x16x144xf32>,
    %c0_6 = arith.constant 0 : index
    %c0_7 = arith.constant 0 : index
    %c0_8 = arith.constant 0 : index
    %c0_9 = arith.constant 0 : index
    %4 = vector.load %arg1[%c0_6, %c0_7, %c0_8, %c0_9] : memref<1x16x16x4xf32, #tpu.memory_space<vmem>>, vector<1x16x16x4xf32>
    %5 = vector.shape_cast %4 : vector<1x16x16x4xf32> to vector<16x16x4xf32>
    %c1 = arith.constant 1 : index
    %c1_10 = arith.constant 1 : index
    %c0_11 = arith.constant 0 : index
    %6 = vector.load %arg5[%c1, %c1_10, %c0_11] : memref<18x18x16xf32, #tpu.memory_space<vmem>>, vector<16x16x4xf32>
    tpu.vector_store %arg5[%c1, %c1_10, %c0_11], %5 {strides = array<i32>} : memref<18x18x16xf32, #tpu.memory_space<vmem>>, vector<16x16x4xf32>,
    %c0_12 = arith.constant 0 : index
    %c0_13 = arith.constant 0 : index
    %c0_14 = arith.constant 0 : index
    %7 = vector.load %arg5[%c0_12, %c0_13, %c0_14] : memref<18x18x16xf32, #tpu.memory_space<vmem>>, vector<16x16x4xf32>
    %c0_15 = arith.constant 0 : index
    %c0_16 = arith.constant 0 : index
    %c0_17 = arith.constant 0 : index
    %8 = vector.load %arg6[%c0_15, %c0_16, %c0_17] : memref<16x16x144xf32, #tpu.memory_space<vmem>>, vector<16x16x4xf32>
    tpu.vector_store %arg6[%c0_15, %c0_16, %c0_17], %7 {strides = array<i32>} : memref<16x16x144xf32, #tpu.memory_space<vmem>>, vector<16x16x4xf32>,
    %c0_18 = arith.constant 0 : index
    %c1_19 = arith.constant 1 : index
    %c0_20 = arith.constant 0 : index
    %9 = vector.load %arg5[%c0_18, %c1_19, %c0_20] : memref<18x18x16xf32, #tpu.memory_space<vmem>>, vector<16x16x4xf32>
    %c0_21 = arith.constant 0 : index
    %c0_22 = arith.constant 0 : index
    %c16 = arith.constant 16 : index
    %10 = vector.load %arg6[%c0_21, %c0_22, %c16] : memref<16x16x144xf32, #tpu.memory_space<vmem>>, vector<16x16x4xf32>
    tpu.vector_store %arg6[%c0_21, %c0_22, %c16], %9 {strides = array<i32>} : memref<16x16x144xf32, #tpu.memory_space<vmem>>, vector<16x16x4xf32>,
    %c0_23 = arith.constant 0 : index
    %c2 = arith.constant 2 : index
    %c0_24 = arith.constant 0 : index
    %11 = vector.load %arg5[%c0_23, %c2, %c0_24] : memref<18x18x16xf32, #tpu.memory_space<vmem>>, vector<16x16x4xf32>
    %c0_25 = arith.constant 0 : index
    %c0_26 = arith.constant 0 : index
    %c32 = arith.constant 32 : index
    %12 = vector.load %arg6[%c0_25, %c0_26, %c32] : memref<16x16x144xf32, #tpu.memory_space<vmem>>, vector<16x16x4xf32>
    tpu.vector_store %arg6[%c0_25, %c0_26, %c32], %11 {strides = array<i32>} : memref<16x16x144xf32, #tpu.memory_space<vmem>>, vector<16x16x4xf32>,
    %c1_27 = arith.constant 1 : index
    %c0_28 = arith.constant 0 : index
    %c0_29 = arith.constant 0 : index
    %13 = vector.load %arg5[%c1_27, %c0_28, %c0_29] : memref<18x18x16xf32, #tpu.memory_space<vmem>>, vector<16x16x4xf32>
    %c0_30 = arith.constant 0 : index
    %c0_31 = arith.constant 0 : index
    %c48 = arith.constant 48 : index
    %14 = vector.load %arg6[%c0_30, %c0_31, %c48] : memref<16x16x144xf32, #tpu.memory_space<vmem>>, vector<16x16x4xf32>
    tpu.vector_store %arg6[%c0_30, %c0_31, %c48], %13 {strides = array<i32>} : memref<16x16x144xf32, #tpu.memory_space<vmem>>, vector<16x16x4xf32>,
    %c1_32 = arith.constant 1 : index
    %c1_33 = arith.constant 1 : index
    %c0_34 = arith.constant 0 : index
    %15 = vector.load %arg5[%c1_32, %c1_33, %c0_34] : memref<18x18x16xf32, #tpu.memory_space<vmem>>, vector<16x16x4xf32>
    %c0_35 = arith.constant 0 : index
    %c0_36 = arith.constant 0 : index
    %c64 = arith.constant 64 : index
    %16 = vector.load %arg6[%c0_35, %c0_36, %c64] : memref<16x16x144xf32, #tpu.memory_space<vmem>>, vector<16x16x4xf32>
    tpu.vector_store %arg6[%c0_35, %c0_36, %c64], %15 {strides = array<i32>} : memref<16x16x144xf32, #tpu.memory_space<vmem>>, vector<16x16x4xf32>,
    %c1_37 = arith.constant 1 : index
    %c2_38 = arith.constant 2 : index
    %c0_39 = arith.constant 0 : index
    %17 = vector.load %arg5[%c1_37, %c2_38, %c0_39] : memref<18x18x16xf32, #tpu.memory_space<vmem>>, vector<16x16x4xf32>
    %c0_40 = arith.constant 0 : index
    %c0_41 = arith.constant 0 : index
    %c80 = arith.constant 80 : index
    %18 = vector.load %arg6[%c0_40, %c0_41, %c80] : memref<16x16x144xf32, #tpu.memory_space<vmem>>, vector<16x16x4xf32>
    tpu.vector_store %arg6[%c0_40, %c0_41, %c80], %17 {strides = array<i32>} : memref<16x16x144xf32, #tpu.memory_space<vmem>>, vector<16x16x4xf32>,
    %c2_42 = arith.constant 2 : index
    %c0_43 = arith.constant 0 : index
    %c0_44 = arith.constant 0 : index
    %19 = vector.load %arg5[%c2_42, %c0_43, %c0_44] : memref<18x18x16xf32, #tpu.memory_space<vmem>>, vector<16x16x4xf32>
    %c0_45 = arith.constant 0 : index
    %c0_46 = arith.constant 0 : index
    %c96 = arith.constant 96 : index
    %20 = vector.load %arg6[%c0_45, %c0_46, %c96] : memref<16x16x144xf32, #tpu.memory_space<vmem>>, vector<16x16x4xf32>
    tpu.vector_store %arg6[%c0_45, %c0_46, %c96], %19 {strides = array<i32>} : memref<16x16x144xf32, #tpu.memory_space<vmem>>, vector<16x16x4xf32>,
    %c2_47 = arith.constant 2 : index
    %c1_48 = arith.constant 1 : index
    %c0_49 = arith.constant 0 : index
    %21 = vector.load %arg5[%c2_47, %c1_48, %c0_49] : memref<18x18x16xf32, #tpu.memory_space<vmem>>, vector<16x16x4xf32>
    %c0_50 = arith.constant 0 : index
    %c0_51 = arith.constant 0 : index
    %c112 = arith.constant 112 : index
    %22 = vector.load %arg6[%c0_50, %c0_51, %c112] : memref<16x16x144xf32, #tpu.memory_space<vmem>>, vector<16x16x4xf32>
    tpu.vector_store %arg6[%c0_50, %c0_51, %c112], %21 {strides = array<i32>} : memref<16x16x144xf32, #tpu.memory_space<vmem>>, vector<16x16x4xf32>,
    %c2_52 = arith.constant 2 : index
    %c2_53 = arith.constant 2 : index
    %c0_54 = arith.constant 0 : index
    %23 = vector.load %arg5[%c2_52, %c2_53, %c0_54] : memref<18x18x16xf32, #tpu.memory_space<vmem>>, vector<16x16x4xf32>
    %c0_55 = arith.constant 0 : index
    %c0_56 = arith.constant 0 : index
    %c128 = arith.constant 128 : index
    %24 = vector.load %arg6[%c0_55, %c0_56, %c128] : memref<16x16x144xf32, #tpu.memory_space<vmem>>, vector<16x16x4xf32>
    tpu.vector_store %arg6[%c0_55, %c0_56, %c128], %23 {strides = array<i32>} : memref<16x16x144xf32, #tpu.memory_space<vmem>>, vector<16x16x4xf32>,
    %c0_57 = arith.constant 0 : index
    %c0_58 = arith.constant 0 : index
    %c0_59 = arith.constant 0 : index
    %25 = vector.load %arg6[%c0_57, %c0_58, %c0_59] : memref<16x16x144xf32, #tpu.memory_space<vmem>>, vector<16x16x144xf32>
    %26 = vector.shape_cast %25 : vector<16x16x144xf32> to vector<256x144xf32>
    %c0_60 = arith.constant 0 : index
    %c0_61 = arith.constant 0 : index
    %c0_62 = arith.constant 0 : index
    %27 = vector.load %arg2[%c0_60, %c0_61, %c0_62] : memref<3x144x4xf32, #tpu.memory_space<vmem>>, vector<1x144x4xf32>
    %28 = vector.shape_cast %27 : vector<1x144x4xf32> to vector<144x4xf32>
    %cst_63 = arith.constant dense<0.000000e+00> : vector<256x4xf32>
    %29 = tpu.matmul %26, %28, %cst_63 {dimension_numbers = #tpu.dot_dimension_numbers<[1], [0], [0], [1], [0, 0, 1, 1], [], []>} : vector<256x144xf32>, vector<144x4xf32>, vector<256x4xf32> -> vector<256x4xf32>
    %cst_64 = arith.constant 2.000000e-01 : f32
    %30 = vector.broadcast %cst_64 : f32 to vector<256x4xf32>
    %31 = arith.mulf %30, %29 : vector<256x4xf32>
    %32 = arith.maximumf %29, %31 : vector<256x4xf32>
    %33 = vector.shape_cast %32 : vector<256x4xf32> to vector<16x16x4xf32>
    %c1_65 = arith.constant 1 : index
    %c1_66 = arith.constant 1 : index
    %c4 = arith.constant 4 : index
    %34 = vector.load %arg5[%c1_65, %c1_66, %c4] : memref<18x18x16xf32, #tpu.memory_space<vmem>>, vector<16x16x4xf32>
    tpu.vector_store %arg5[%c1_65, %c1_66, %c4], %33 {strides = array<i32>} : memref<18x18x16xf32, #tpu.memory_space<vmem>>, vector<16x16x4xf32>,
    %c0_67 = arith.constant 0 : index
    %c0_68 = arith.constant 0 : index
    %c4_69 = arith.constant 4 : index
    %35 = vector.load %arg5[%c0_67, %c0_68, %c4_69] : memref<18x18x16xf32, #tpu.memory_space<vmem>>, vector<16x16x4xf32>
    %c0_70 = arith.constant 0 : index
    %c0_71 = arith.constant 0 : index
    %c4_72 = arith.constant 4 : index
    %36 = vector.load %arg6[%c0_70, %c0_71, %c4_72] : memref<16x16x144xf32, #tpu.memory_space<vmem>>, vector<16x16x4xf32>
    tpu.vector_store %arg6[%c0_70, %c0_71, %c4_72], %35 {strides = array<i32>} : memref<16x16x144xf32, #tpu.memory_space<vmem>>, vector<16x16x4xf32>,
    %c0_73 = arith.constant 0 : index
    %c1_74 = arith.constant 1 : index
    %c4_75 = arith.constant 4 : index
    %37 = vector.load %arg5[%c0_73, %c1_74, %c4_75] : memref<18x18x16xf32, #tpu.memory_space<vmem>>, vector<16x16x4xf32>
    %c0_76 = arith.constant 0 : index
    %c0_77 = arith.constant 0 : index
    %c20 = arith.constant 20 : index
    %38 = vector.load %arg6[%c0_76, %c0_77, %c20] : memref<16x16x144xf32, #tpu.memory_space<vmem>>, vector<16x16x4xf32>
    tpu.vector_store %arg6[%c0_76, %c0_77, %c20], %37 {strides = array<i32>} : memref<16x16x144xf32, #tpu.memory_space<vmem>>, vector<16x16x4xf32>,
    %c0_78 = arith.constant 0 : index
    %c2_79 = arith.constant 2 : index
    %c4_80 = arith.constant 4 : index
    %39 = vector.load %arg5[%c0_78, %c2_79, %c4_80] : memref<18x18x16xf32, #tpu.memory_space<vmem>>, vector<16x16x4xf32>
    %c0_81 = arith.constant 0 : index
    %c0_82 = arith.constant 0 : index
    %c36 = arith.constant 36 : index
    %40 = vector.load %arg6[%c0_81, %c0_82, %c36] : memref<16x16x144xf32, #tpu.memory_space<vmem>>, vector<16x16x4xf32>
    tpu.vector_store %arg6[%c0_81, %c0_82, %c36], %39 {strides = array<i32>} : memref<16x16x144xf32, #tpu.memory_space<vmem>>, vector<16x16x4xf32>,
    %c1_83 = arith.constant 1 : index
    %c0_84 = arith.constant 0 : index
    %c4_85 = arith.constant 4 : index
    %41 = vector.load %arg5[%c1_83, %c0_84, %c4_85] : memref<18x18x16xf32, #tpu.memory_space<vmem>>, vector<16x16x4xf32>
    %c0_86 = arith.constant 0 : index
    %c0_87 = arith.constant 0 : index
    %c52 = arith.constant 52 : index
    %42 = vector.load %arg6[%c0_86, %c0_87, %c52] : memref<16x16x144xf32, #tpu.memory_space<vmem>>, vector<16x16x4xf32>
    tpu.vector_store %arg6[%c0_86, %c0_87, %c52], %41 {strides = array<i32>} : memref<16x16x144xf32, #tpu.memory_space<vmem>>, vector<16x16x4xf32>,
    %c1_88 = arith.constant 1 : index
    %c1_89 = arith.constant 1 : index
    %c4_90 = arith.constant 4 : index
    %43 = vector.load %arg5[%c1_88, %c1_89, %c4_90] : memref<18x18x16xf32, #tpu.memory_space<vmem>>, vector<16x16x4xf32>
    %c0_91 = arith.constant 0 : index
    %c0_92 = arith.constant 0 : index
    %c68 = arith.constant 68 : index
    %44 = vector.load %arg6[%c0_91, %c0_92, %c68] : memref<16x16x144xf32, #tpu.memory_space<vmem>>, vector<16x16x4xf32>
    tpu.vector_store %arg6[%c0_91, %c0_92, %c68], %43 {strides = array<i32>} : memref<16x16x144xf32, #tpu.memory_space<vmem>>, vector<16x16x4xf32>,
    %c1_93 = arith.constant 1 : index
    %c2_94 = arith.constant 2 : index
    %c4_95 = arith.constant 4 : index
    %45 = vector.load %arg5[%c1_93, %c2_94, %c4_95] : memref<18x18x16xf32, #tpu.memory_space<vmem>>, vector<16x16x4xf32>
    %c0_96 = arith.constant 0 : index
    %c0_97 = arith.constant 0 : index
    %c84 = arith.constant 84 : index
    %46 = vector.load %arg6[%c0_96, %c0_97, %c84] : memref<16x16x144xf32, #tpu.memory_space<vmem>>, vector<16x16x4xf32>
    tpu.vector_store %arg6[%c0_96, %c0_97, %c84], %45 {strides = array<i32>} : memref<16x16x144xf32, #tpu.memory_space<vmem>>, vector<16x16x4xf32>,
    %c2_98 = arith.constant 2 : index
    %c0_99 = arith.constant 0 : index
    %c4_100 = arith.constant 4 : index
    %47 = vector.load %arg5[%c2_98, %c0_99, %c4_100] : memref<18x18x16xf32, #tpu.memory_space<vmem>>, vector<16x16x4xf32>
    %c0_101 = arith.constant 0 : index
    %c0_102 = arith.constant 0 : index
    %c100 = arith.constant 100 : index
    %48 = vector.load %arg6[%c0_101, %c0_102, %c100] : memref<16x16x144xf32, #tpu.memory_space<vmem>>, vector<16x16x4xf32>
    tpu.vector_store %arg6[%c0_101, %c0_102, %c100], %47 {strides = array<i32>} : memref<16x16x144xf32, #tpu.memory_space<vmem>>, vector<16x16x4xf32>,
    %c2_103 = arith.constant 2 : index
    %c1_104 = arith.constant 1 : index
    %c4_105 = arith.constant 4 : index
    %49 = vector.load %arg5[%c2_103, %c1_104, %c4_105] : memref<18x18x16xf32, #tpu.memory_space<vmem>>, vector<16x16x4xf32>
    %c0_106 = arith.constant 0 : index
    %c0_107 = arith.constant 0 : index
    %c116 = arith.constant 116 : index
    %50 = vector.load %arg6[%c0_106, %c0_107, %c116] : memref<16x16x144xf32, #tpu.memory_space<vmem>>, vector<16x16x4xf32>
    tpu.vector_store %arg6[%c0_106, %c0_107, %c116], %49 {strides = array<i32>} : memref<16x16x144xf32, #tpu.memory_space<vmem>>, vector<16x16x4xf32>,
    %c2_108 = arith.constant 2 : index
    %c2_109 = arith.constant 2 : index
    %c4_110 = arith.constant 4 : index
    %51 = vector.load %arg5[%c2_108, %c2_109, %c4_110] : memref<18x18x16xf32, #tpu.memory_space<vmem>>, vector<16x16x4xf32>
    %c0_111 = arith.constant 0 : index
    %c0_112 = arith.constant 0 : index
    %c132 = arith.constant 132 : index
    %52 = vector.load %arg6[%c0_111, %c0_112, %c132] : memref<16x16x144xf32, #tpu.memory_space<vmem>>, vector<16x16x4xf32>
    tpu.vector_store %arg6[%c0_111, %c0_112, %c132], %51 {strides = array<i32>} : memref<16x16x144xf32, #tpu.memory_space<vmem>>, vector<16x16x4xf32>,
    %c0_113 = arith.constant 0 : index
    %c0_114 = arith.constant 0 : index
    %c0_115 = arith.constant 0 : index
    %53 = vector.load %arg6[%c0_113, %c0_114, %c0_115] : memref<16x16x144xf32, #tpu.memory_space<vmem>>, vector<16x16x144xf32>
    %54 = vector.shape_cast %53 : vector<16x16x144xf32> to vector<256x144xf32>
    %c1_116 = arith.constant 1 : index
    %c0_117 = arith.constant 0 : index
    %c0_118 = arith.constant 0 : index
    %55 = vector.load %arg2[%c1_116, %c0_117, %c0_118] : memref<3x144x4xf32, #tpu.memory_space<vmem>>, vector<1x144x4xf32>
    %56 = vector.shape_cast %55 : vector<1x144x4xf32> to vector<144x4xf32>
    %cst_119 = arith.constant dense<0.000000e+00> : vector<256x4xf32>
    %57 = tpu.matmul %54, %56, %cst_119 {dimension_numbers = #tpu.dot_dimension_numbers<[1], [0], [0], [1], [0, 0, 1, 1], [], []>} : vector<256x144xf32>, vector<144x4xf32>, vector<256x4xf32> -> vector<256x4xf32>
    %cst_120 = arith.constant 2.000000e-01 : f32
    %58 = vector.broadcast %cst_120 : f32 to vector<256x4xf32>
    %59 = arith.mulf %58, %57 : vector<256x4xf32>
    %60 = arith.maximumf %57, %59 : vector<256x4xf32>
    %61 = vector.shape_cast %60 : vector<256x4xf32> to vector<16x16x4xf32>
    %c1_121 = arith.constant 1 : index
    %c1_122 = arith.constant 1 : index
    %c8 = arith.constant 8 : index
    %62 = vector.load %arg5[%c1_121, %c1_122, %c8] : memref<18x18x16xf32, #tpu.memory_space<vmem>>, vector<16x16x4xf32>
    tpu.vector_store %arg5[%c1_121, %c1_122, %c8], %61 {strides = array<i32>} : memref<18x18x16xf32, #tpu.memory_space<vmem>>, vector<16x16x4xf32>,
    %c0_123 = arith.constant 0 : index
    %c0_124 = arith.constant 0 : index
    %c8_125 = arith.constant 8 : index
    %63 = vector.load %arg5[%c0_123, %c0_124, %c8_125] : memref<18x18x16xf32, #tpu.memory_space<vmem>>, vector<16x16x4xf32>
    %c0_126 = arith.constant 0 : index
    %c0_127 = arith.constant 0 : index
    %c8_128 = arith.constant 8 : index
    %64 = vector.load %arg6[%c0_126, %c0_127, %c8_128] : memref<16x16x144xf32, #tpu.memory_space<vmem>>, vector<16x16x4xf32>
    tpu.vector_store %arg6[%c0_126, %c0_127, %c8_128], %63 {strides = array<i32>} : memref<16x16x144xf32, #tpu.memory_space<vmem>>, vector<16x16x4xf32>,
    %c0_129 = arith.constant 0 : index
    %c1_130 = arith.constant 1 : index
    %c8_131 = arith.constant 8 : index
    %65 = vector.load %arg5[%c0_129, %c1_130, %c8_131] : memref<18x18x16xf32, #tpu.memory_space<vmem>>, vector<16x16x4xf32>
    %c0_132 = arith.constant 0 : index
    %c0_133 = arith.constant 0 : index
    %c24 = arith.constant 24 : index
    %66 = vector.load %arg6[%c0_132, %c0_133, %c24] : memref<16x16x144xf32, #tpu.memory_space<vmem>>, vector<16x16x4xf32>
    tpu.vector_store %arg6[%c0_132, %c0_133, %c24], %65 {strides = array<i32>} : memref<16x16x144xf32, #tpu.memory_space<vmem>>, vector<16x16x4xf32>,
    %c0_134 = arith.constant 0 : index
    %c2_135 = arith.constant 2 : index
    %c8_136 = arith.constant 8 : index
    %67 = vector.load %arg5[%c0_134, %c2_135, %c8_136] : memref<18x18x16xf32, #tpu.memory_space<vmem>>, vector<16x16x4xf32>
    %c0_137 = arith.constant 0 : index
    %c0_138 = arith.constant 0 : index
    %c40 = arith.constant 40 : index
    %68 = vector.load %arg6[%c0_137, %c0_138, %c40] : memref<16x16x144xf32, #tpu.memory_space<vmem>>, vector<16x16x4xf32>
    tpu.vector_store %arg6[%c0_137, %c0_138, %c40], %67 {strides = array<i32>} : memref<16x16x144xf32, #tpu.memory_space<vmem>>, vector<16x16x4xf32>,
    %c1_139 = arith.constant 1 : index
    %c0_140 = arith.constant 0 : index
    %c8_141 = arith.constant 8 : index
    %69 = vector.load %arg5[%c1_139, %c0_140, %c8_141] : memref<18x18x16xf32, #tpu.memory_space<vmem>>, vector<16x16x4xf32>
    %c0_142 = arith.constant 0 : index
    %c0_143 = arith.constant 0 : index
    %c56 = arith.constant 56 : index
    %70 = vector.load %arg6[%c0_142, %c0_143, %c56] : memref<16x16x144xf32, #tpu.memory_space<vmem>>, vector<16x16x4xf32>
    tpu.vector_store %arg6[%c0_142, %c0_143, %c56], %69 {strides = array<i32>} : memref<16x16x144xf32, #tpu.memory_space<vmem>>, vector<16x16x4xf32>,
    %c1_144 = arith.constant 1 : index
    %c1_145 = arith.constant 1 : index
    %c8_146 = arith.constant 8 : index
    %71 = vector.load %arg5[%c1_144, %c1_145, %c8_146] : memref<18x18x16xf32, #tpu.memory_space<vmem>>, vector<16x16x4xf32>
    %c0_147 = arith.constant 0 : index
    %c0_148 = arith.constant 0 : index
    %c72 = arith.constant 72 : index
    %72 = vector.load %arg6[%c0_147, %c0_148, %c72] : memref<16x16x144xf32, #tpu.memory_space<vmem>>, vector<16x16x4xf32>
    tpu.vector_store %arg6[%c0_147, %c0_148, %c72], %71 {strides = array<i32>} : memref<16x16x144xf32, #tpu.memory_space<vmem>>, vector<16x16x4xf32>,
    %c1_149 = arith.constant 1 : index
    %c2_150 = arith.constant 2 : index
    %c8_151 = arith.constant 8 : index
    %73 = vector.load %arg5[%c1_149, %c2_150, %c8_151] : memref<18x18x16xf32, #tpu.memory_space<vmem>>, vector<16x16x4xf32>
    %c0_152 = arith.constant 0 : index
    %c0_153 = arith.constant 0 : index
    %c88 = arith.constant 88 : index
    %74 = vector.load %arg6[%c0_152, %c0_153, %c88] : memref<16x16x144xf32, #tpu.memory_space<vmem>>, vector<16x16x4xf32>
    tpu.vector_store %arg6[%c0_152, %c0_153, %c88], %73 {strides = array<i32>} : memref<16x16x144xf32, #tpu.memory_space<vmem>>, vector<16x16x4xf32>,
    %c2_154 = arith.constant 2 : index
    %c0_155 = arith.constant 0 : index
    %c8_156 = arith.constant 8 : index
    %75 = vector.load %arg5[%c2_154, %c0_155, %c8_156] : memref<18x18x16xf32, #tpu.memory_space<vmem>>, vector<16x16x4xf32>
    %c0_157 = arith.constant 0 : index
    %c0_158 = arith.constant 0 : index
    %c104 = arith.constant 104 : index
    %76 = vector.load %arg6[%c0_157, %c0_158, %c104] : memref<16x16x144xf32, #tpu.memory_space<vmem>>, vector<16x16x4xf32>
    tpu.vector_store %arg6[%c0_157, %c0_158, %c104], %75 {strides = array<i32>} : memref<16x16x144xf32, #tpu.memory_space<vmem>>, vector<16x16x4xf32>,
    %c2_159 = arith.constant 2 : index
    %c1_160 = arith.constant 1 : index
    %c8_161 = arith.constant 8 : index
    %77 = vector.load %arg5[%c2_159, %c1_160, %c8_161] : memref<18x18x16xf32, #tpu.memory_space<vmem>>, vector<16x16x4xf32>
    %c0_162 = arith.constant 0 : index
    %c0_163 = arith.constant 0 : index
    %c120 = arith.constant 120 : index
    %78 = vector.load %arg6[%c0_162, %c0_163, %c120] : memref<16x16x144xf32, #tpu.memory_space<vmem>>, vector<16x16x4xf32>
    tpu.vector_store %arg6[%c0_162, %c0_163, %c120], %77 {strides = array<i32>} : memref<16x16x144xf32, #tpu.memory_space<vmem>>, vector<16x16x4xf32>,
    %c2_164 = arith.constant 2 : index
    %c2_165 = arith.constant 2 : index
    %c8_166 = arith.constant 8 : index
    %79 = vector.load %arg5[%c2_164, %c2_165, %c8_166] : memref<18x18x16xf32, #tpu.memory_space<vmem>>, vector<16x16x4xf32>
    %c0_167 = arith.constant 0 : index
    %c0_168 = arith.constant 0 : index
    %c136 = arith.constant 136 : index
    %80 = vector.load %arg6[%c0_167, %c0_168, %c136] : memref<16x16x144xf32, #tpu.memory_space<vmem>>, vector<16x16x4xf32>
    tpu.vector_store %arg6[%c0_167, %c0_168, %c136], %79 {strides = array<i32>} : memref<16x16x144xf32, #tpu.memory_space<vmem>>, vector<16x16x4xf32>,
    %c0_169 = arith.constant 0 : index
    %c0_170 = arith.constant 0 : index
    %c0_171 = arith.constant 0 : index
    %81 = vector.load %arg6[%c0_169, %c0_170, %c0_171] : memref<16x16x144xf32, #tpu.memory_space<vmem>>, vector<16x16x144xf32>
    %82 = vector.shape_cast %81 : vector<16x16x144xf32> to vector<256x144xf32>
    %c2_172 = arith.constant 2 : index
    %c0_173 = arith.constant 0 : index
    %c0_174 = arith.constant 0 : index
    %83 = vector.load %arg2[%c2_172, %c0_173, %c0_174] : memref<3x144x4xf32, #tpu.memory_space<vmem>>, vector<1x144x4xf32>
    %84 = vector.shape_cast %83 : vector<1x144x4xf32> to vector<144x4xf32>
    %cst_175 = arith.constant dense<0.000000e+00> : vector<256x4xf32>
    %85 = tpu.matmul %82, %84, %cst_175 {dimension_numbers = #tpu.dot_dimension_numbers<[1], [0], [0], [1], [0, 0, 1, 1], [], []>} : vector<256x144xf32>, vector<144x4xf32>, vector<256x4xf32> -> vector<256x4xf32>
    %cst_176 = arith.constant 2.000000e-01 : f32
    %86 = vector.broadcast %cst_176 : f32 to vector<256x4xf32>
    %87 = arith.mulf %86, %85 : vector<256x4xf32>
    %88 = arith.maximumf %85, %87 : vector<256x4xf32>
    %89 = vector.shape_cast %88 : vector<256x4xf32> to vector<16x16x4xf32>
    %c1_177 = arith.constant 1 : index
    %c1_178 = arith.constant 1 : index
    %c12 = arith.constant 12 : index
    %90 = vector.load %arg5[%c1_177, %c1_178, %c12] : memref<18x18x16xf32, #tpu.memory_space<vmem>>, vector<16x16x4xf32>
    tpu.vector_store %arg5[%c1_177, %c1_178, %c12], %89 {strides = array<i32>} : memref<18x18x16xf32, #tpu.memory_space<vmem>>, vector<16x16x4xf32>,
    %c1_179 = arith.constant 1 : index
    %c1_180 = arith.constant 1 : index
    %c0_181 = arith.constant 0 : index
    %91 = vector.load %arg5[%c1_179, %c1_180, %c0_181] : memref<18x18x16xf32, #tpu.memory_space<vmem>>, vector<16x16x16xf32>
    %92 = vector.shape_cast %91 : vector<16x16x16xf32> to vector<256x16xf32>
    %c0_182 = arith.constant 0 : index
    %c0_183 = arith.constant 0 : index
    %93 = vector.load %arg3[%c0_182, %c0_183] : memref<16x4xf32, #tpu.memory_space<vmem>>, vector<16x4xf32>
    %cst_184 = arith.constant dense<0.000000e+00> : vector<256x4xf32>
    %94 = tpu.matmul %92, %93, %cst_184 {dimension_numbers = #tpu.dot_dimension_numbers<[1], [0], [0], [1], [0, 0, 1, 1], [], []>} : vector<256x16xf32>, vector<16x4xf32>, vector<256x4xf32> -> vector<256x4xf32>
    %95 = vector.shape_cast %5 : vector<16x16x4xf32> to vector<256x4xf32>
    %96 = arith.addf %94, %95 : vector<256x4xf32>
    %97 = vector.shape_cast %96 : vector<256x4xf32> to vector<1x16x16x4xf32>
    %c0_185 = arith.constant 0 : index
    %c0_186 = arith.constant 0 : index
    %c0_187 = arith.constant 0 : index
    %c0_188 = arith.constant 0 : index
    %98 = vector.load %arg4[%c0_185, %c0_186, %c0_187, %c0_188] : memref<1x16x16x4xf32, #tpu.memory_space<vmem>>, vector<1x16x16x4xf32>
    tpu.vector_store %arg4[%c0_185, %c0_186, %c0_187, %c0_188], %97 {strides = array<i32>} : memref<1x16x16x4xf32, #tpu.memory_space<vmem>>, vector<1x16x16x4xf32>,
    return
  }
  func.func @transform_0(%arg0: i32) -> (i32, i32, i32, i32) {
    %c0_i32 = arith.constant 0 : i32
    %c0_i32_0 = arith.constant 0 : i32
    %c0_i32_1 = arith.constant 0 : i32
    %c0_i32_2 = arith.constant 0 : i32
    return %arg0, %c0_i32, %c0_i32_0, %c0_i32_1 : i32, i32, i32, i32
  }
  func.func @transform_1(%arg0: i32) -> (i32, i32, i32) {
    %c0_i32 = arith.constant 0 : i32
    %c0_i32_0 = arith.constant 0 : i32
    %c0_i32_1 = arith.constant 0 : i32
    %c0_i32_2 = arith.constant 0 : i32
    return %c0_i32, %c0_i32_0, %c0_i32_1 : i32, i32, i32
  }
  func.func @transform_2(%arg0: i32) -> (i32, i32) {
    %c0_i32 = arith.constant 0 : i32
    %c0_i32_0 = arith.constant 0 : i32
    %c0_i32_1 = arith.constant 0 : i32
    return %c0_i32, %c0_i32_0 : i32, i32
  }
  func.func @transform_3(%arg0: i32) -> (i32, i32, i32, i32) {
    %c0_i32 = arith.constant 0 : i32
    %c0_i32_0 = arith.constant 0 : i32
    %c0_i32_1 = arith.constant 0 : i32
    %c0_i32_2 = arith.constant 0 : i32
    return %arg0, %c0_i32, %c0_i32_0, %c0_i32_1 : i32, i32, i32, i32
  }
}

</mosaic_0001>

<bundles_post_ra>
// kernel: tpu_custom_call.1
= control target key start
LH: loop header
LB: loop body
LE: loop exit
PB: predicated region body
PF: predicated region fallthrough
CT: control target
= control target key end

     0   :  { %s7271_s12 = smov 0   ;;  %s11089_s0 = inlined_call_operand.vmem [shape: f32[2,16,16,4], index: 0, kind: input, shape index: {}]   ;;  %s11090_s1 = inlined_call_operand.vmem [shape: f32[3,144,4], index: 1, kind: input, shape index: {}]   ;;  %s11091_s2 = inlined_call_operand.vmem [shape: f32[16,4], index: 2, kind: input, shape index: {}]   ;;  %s11092_s3 = inlined_call_operand.vmem [shape: f32[2,16,16,4], index: 3, kind: output, shape index: {}]  }
   0x1 LB: > { %s7014_s13 = sadd.s32 4294967295, %s7238_s12   ;;  %p7018_p0 = scmp.ge.s32.totalorder %s7238_s12, 1  ;;  %s7238_s12 = sphi %s7271_s12, %s13_s12  }
   0x2   : > { %p137_p1 = scmp.lt.s32.totalorder %s7238_s12, 3 }
   0x4   : > { %p138_p2 = pnand %p7018_p0, %p137_p1 }
   0x6   : > { %141 = sbr.rel (%p138_p2) target bundleno = 3294 (0xcde), region = 32 }
   0xb   : > { %vm171_vm0 = vcmask 130048   ;;  %v7240_v0 = vmov 0.0   ;;  %s7241_s14 = smov 16   ;;  %vm174_vm1 = vcmask 123904   ;;  %p161_p3 = scmp.lt.s32.totalorder %s7014_s13, 1  ;;  %vm324_vm2 = vcmask 31744  }
   0xc   : > { %172 = vst.msk [vmem:[#allocation2] sm:$0xff] %vm171_vm0, %v7240_v0  ;;  %vm581_vm3 = vcmask 162944   ;;  %s7242_s19 = smov 32   ;;  %s7243_s20 = smov 48   ;;  %vm774_vm4 = vcmask 294144   ;;  %vm967_vm5 = vcmask 425344  }
   0xd   : > { %173 = vst.msk [vmem:[#allocation2 + $0x8] sm:$0xff] %vm171_vm0, %v7240_v0  ;;  %s11319_s13 = smov (!%p161_p3, %s7014_s13), 1  ;;  %s7244_s21 = smov 64   ;;  %vm1160_vm6 = vcmask 556544   ;;  %vm1353_vm7 = vcmask 687744   ;;  %vm1547_vm8 = vcmask 818944  }
   0xe   : > { %176 = vst.msk [vmem:[#allocation2 + $0x18] sm:$0xff] %vm171_vm0, %v7240_v0  ;;  %s7189_s15 = sshll.u32 %s11319_s13, 8  ;;  %s7245_s22 = smov 80   ;;  %vm1740_vm9 = vcmask 950144   ;;  %vm2433_vm10 = vcmask 64544   ;;  %vm2690_vm11 = vcmask 195744  }
   0xf   : > { %177 = vst.msk [vmem:[#allocation2 + $0x20] sm:$0xff] %vm171_vm0, %v7240_v0  ;;  %s7487_s18 = scalar_lea.vmem %s11089_s0, %s7189_s15  ;;  %s7246_s23 = smov 96   ;;  %vm2883_vm12 = vcmask 326944   ;;  %vm3076_vm13 = vcmask 458144   ;;  %vm3269_vm14 = vcmask 589344   ;;  %vm3462_vm15 = vcmask 720544  }
  0x10   : > { %179 = vst.msk [vmem:[#allocation2 + $0x30] sm:$0xff] %vm171_vm0, %v7240_v0  ;;  %v7496_v3 = vld [vmem:[%s7487_s18] sm:$0xff]  ;;  %v7506_v5 = vld [vmem:[%s7487_s18 + $0x8] sm:$0xff]  ;;  %v7511_v6 = vld [vmem:[%s7487_s18 + $0x38] sm:$0xff]  ;;  %s7247_s24 = smov 112   ;;  %s7248_s27 = smov 4  }
  0x11   : > { %180 = vst.msk [vmem:[#allocation2 + $0x38] sm:$0xff] %vm171_vm0, %v7240_v0  ;;  %v7501_v4 = vld [vmem:[%s7487_s18 + $0x20] sm:$0xff]  ;;  %v7516_v7 = vld [vmem:[%s7487_s18 + $0x10] sm:$0xff]  ;;  %v7521_v8 = vld [vmem:[%s7487_s18 + $0x28] sm:$0xff]  ;;  %s7249_s7 = smov 8   ;;  %s7250_s8 = smov 12  }
  0x12   : > { %182 = vst.msk [vmem:[#allocation2 + $0x48] sm:$0xff] %vm171_vm0, %v7240_v0  ;;  %v7526_v9 = vld [vmem:[%s7487_s18 + $0x50] sm:$0xff]  ;;  %v7531_v10 = vld [vmem:[%s7487_s18 + $0x18] sm:$0xff]  ;;  %v7536_v11 = vld [vmem:[%s7487_s18 + $0x40] sm:$0xff] }
  0x13   : > { %183 = vst.msk [vmem:[#allocation2 + $0x50] sm:$0xff] %vm171_vm0, %v7240_v0  ;;  %v7541_v12 = vld [vmem:[%s7487_s18 + $0x68] sm:$0xff]  ;;  %v7548_v14 = vld [vmem:[%s7487_s18 + $0x30] sm:$0xff]  ;;  %v7557_v16 = vld [vmem:[%s7487_s18 + $0x58] sm:$0xff] }
  0x14   : > { %v421_v1 = vld [vmem:[#allocation2 + $0x1] sm:$0xff]  ;;  %185 = vst.msk [vmem:[#allocation2 + $0x60] sm:$0xff] %vm171_vm0, %v7240_v0  ;;  %v7576_v20 = vld [vmem:[%s7487_s18 + $0x70] sm:$0xff]  ;;  %v7591_v23 = vld [vmem:[%s7487_s18 + $0x98] sm:$0xff] }
  0x15   : > { %485 = vrot.lane.b32.xlu0 %v421_v1, %s7241_s14  ;;  %186 = vst.msk [vmem:[#allocation2 + $0x68] sm:$0xff] %vm171_vm0, %v7240_v0  ;;  %v7564_v17 = vld [vmem:[%s7487_s18 + $0x80] sm:$0xff]  ;;  %v7569_v18 = vld [vmem:[%s7487_s18 + $0x48] sm:$0xff]  ;;  %v7618_v29 = vld [vmem:[%s7487_s18 + $0xb0] sm:$0xff] }
  0x16   : > { %188 = vst.msk [vmem:[#allocation2 + $0x78] sm:$0xff] %vm171_vm0, %v7240_v0  ;;  %v7594_v24 = vld [vmem:[%s7487_s18 + $0x60] sm:$0xff]  ;;  %v7601_v25 = vld [vmem:[%s7487_s18 + $0x88] sm:$0xff]  ;;  %v7621_v30 = vld [vmem:[%s7487_s18 + $0x78] sm:$0xff] }
  0x17   : > { %189 = vst.msk [vmem:[#allocation2 + $0x80] sm:$0xff] %vm171_vm0, %v7240_v0  ;;  %v7628_v31 = vld [vmem:[%s7487_s18 + $0xa0] sm:$0xff]  ;;  %v7645_v35 = vld [vmem:[%s7487_s18 + $0xc8] sm:$0xff]  ;;  %v7648_v36 = vld [vmem:[%s7487_s18 + $0x90] sm:$0xff] }
  0x18   : > { %191 = vst.msk [vmem:[#allocation2 + $0x90] sm:$0xff] %vm171_vm0, %v7240_v0  ;;  %v7655_v37 = vld [vmem:[%s7487_s18 + $0xb8] sm:$0xff]  ;;  %v7672_v41 = vld [vmem:[%s7487_s18 + $0xe0] sm:$0xff]  ;;  %v7675_v42 = vld [vmem:[%s7487_s18 + $0xa8] sm:$0xff] }
  0x19   : > { %192 = vst.msk [vmem:[#allocation2 + $0x98] sm:$0xff] %vm171_vm0, %v7240_v0  ;;  %v7682_v43 = vld [vmem:[%s7487_s18 + $0xd0] sm:$0xff]  ;;  %v7699_v47 = vld [vmem:[%s7487_s18 + $0xc0] sm:$0xff]  ;;  %v7702_v48 = vld [vmem:[%s7487_s18 + $0xe8] sm:$0xff] }
  0x1a   : > { %194 = vst.msk [vmem:[#allocation2 + $0xa8] sm:$0xff] %vm171_vm0, %v7240_v0  ;;  %v7721_v52 = vld [vmem:[%s7487_s18 + $0xd8] sm:$0xff]  ;;  %v357_v63 = vld [vmem:[#allocation2] sm:$0xff] }
  0x1b   : > { %195 = vst.msk [vmem:[#allocation2 + $0xb0] sm:$0xff] %vm171_vm0, %v7240_v0 }
  0x1c   : > { %197 = vst.msk [vmem:[#allocation2 + $0xc0] sm:$0xff] %vm171_vm0, %v7240_v0 }
  0x1d   : > { %198 = vst.msk [vmem:[#allocation2 + $0xc8] sm:$0xff] %vm171_vm0, %v7240_v0 }
  0x1e   : > { %200 = vst.msk [vmem:[#allocation2 + $0xd8] sm:$0xff] %vm171_vm0, %v7240_v0 }
  0x1f   : > { %201 = vst.msk [vmem:[#allocation2 + $0xe0] sm:$0xff] %vm171_vm0, %v7240_v0 }
  0x20   : > { %203 = vst.msk [vmem:[#allocation2 + $0xf0] sm:$0xff] %vm171_vm0, %v7240_v0 }
  0x21   : > { %204 = vst.msk [vmem:[#allocation2 + $0xf8] sm:$0xff] %vm171_vm0, %v7240_v0 }
  0x22   : > { %206 = vst.msk [vmem:[#allocation2 + $0x108] sm:$0xff] %vm171_vm0, %v7240_v0 }
  0x23   : > { %207 = vst.msk [vmem:[#allocation2 + $0x110] sm:$0xff] %vm171_vm0, %v7240_v0 }
  0x24   : > { %209 = vst.msk [vmem:[#allocation2 + $0x120] sm:$0xff] %vm171_vm0, %v7240_v0 }
  0x25   : > { %210 = vst.msk [vmem:[#allocation2 + $0x128] sm:$0xff] %vm171_vm0, %v7240_v0 }
  0x26   : > { %212 = vst.msk [vmem:[#allocation2 + $0x138] sm:$0xff] %vm171_vm0, %v7240_v0 }
  0x27   : > { %213 = vst.msk [vmem:[#allocation2 + $0x140] sm:$0xff] %vm171_vm0, %v7240_v0 }
  0x28   : > { %215 = vst.msk [vmem:[#allocation2 + $0x150] sm:$0xff] %vm171_vm0, %v7240_v0 }
  0x29   : > { %216 = vst.msk [vmem:[#allocation2 + $0x158] sm:$0xff] %vm171_vm0, %v7240_v0 }
  0x2a   : > { %218 = vst.msk [vmem:[#allocation2 + $0x168] sm:$0xff] %vm171_vm0, %v7240_v0 }
  0x2b   : > { %219 = vst.msk [vmem:[#allocation2 + $0x170] sm:$0xff] %vm171_vm0, %v7240_v0 }
  0x2c   : > { %221 = vst.msk [vmem:[#allocation2 + $0x180] sm:$0xff] %vm171_vm0, %v7240_v0 }
  0x2d   : > { %222 = vst.msk [vmem:[#allocation2 + $0x188] sm:$0xff] %vm171_vm0, %v7240_v0 }
  0x2e   : > { %224 = vst.msk [vmem:[#allocation2 + $0x198] sm:$0xff] %vm171_vm0, %v7240_v0 }
  0x2f   : > { %225 = vst.msk [vmem:[#allocation2 + $0x1a0] sm:$0xff] %vm171_vm0, %v7240_v0 }
  0x30   : > { %227 = vst [vmem:[#allocation3] sm:$0xff] %v7240_v0 }
  0x31   : > { %228 = vst.msk [vmem:[#allocation3 + $0x8] sm:$0xff] %vm171_vm0, %v7240_v0 }
  0x32   : > { %229 = vst [vmem:[#allocation3 + $0x10] sm:$0xff] %v7240_v0 }
  0x33   : > { %230 = vst.msk [vmem:[#allocation3 + $0x18] sm:$0xff] %vm171_vm0, %v7240_v0 }
  0x34   : > { %231 = vst [vmem:[#allocation3 + $0x20] sm:$0xff] %v7240_v0 }
  0x35   : > { %232 = vst.msk [vmem:[#allocation3 + $0x28] sm:$0xff] %vm171_vm0, %v7240_v0 }
  0x36   : > { %233 = vst [vmem:[#allocation3 + $0x30] sm:$0xff] %v7240_v0 }
  0x37   : > { %234 = vst.msk [vmem:[#allocation3 + $0x38] sm:$0xff] %vm171_vm0, %v7240_v0 }
  0x38   : > { %235 = vst [vmem:[#allocation3 + $0x40] sm:$0xff] %v7240_v0 }
  0x39   : > { %236 = vst.msk [vmem:[#allocation3 + $0x48] sm:$0xff] %vm171_vm0, %v7240_v0 }
  0x3a   : > { %237 = vst [vmem:[#allocation3 + $0x50] sm:$0xff] %v7240_v0 }
  0x3b   : > { %238 = vst.msk [vmem:[#allocation3 + $0x58] sm:$0xff] %vm171_vm0, %v7240_v0 }
  0x3c   : > { %239 = vst [vmem:[#allocation3 + $0x60] sm:$0xff] %v7240_v0 }
  0x3d   : > { %240 = vst.msk [vmem:[#allocation3 + $0x68] sm:$0xff] %vm171_vm0, %v7240_v0 }
  0x3e   : > { %241 = vst [vmem:[#allocation3 + $0x70] sm:$0xff] %v7240_v0 }
  0x3f   : > { %242 = vst.msk [vmem:[#allocation3 + $0x78] sm:$0xff] %vm171_vm0, %v7240_v0 }
  0x40   : > { %243 = vst [vmem:[#allocation3 + $0x80] sm:$0xff] %v7240_v0 }
  0x41   : > { %244 = vst.msk [vmem:[#allocation3 + $0x88] sm:$0xff] %vm171_vm0, %v7240_v0 }
  0x42   : > { %245 = vst [vmem:[#allocation3 + $0x90] sm:$0xff] %v7240_v0 }
  0x43   : > { %246 = vst.msk [vmem:[#allocation3 + $0x98] sm:$0xff] %vm171_vm0, %v7240_v0 }
  0x44   : > { %247 = vst [vmem:[#allocation3 + $0xa0] sm:$0xff] %v7240_v0 }
  0x45   : > { %248 = vst.msk [vmem:[#allocation3 + $0xa8] sm:$0xff] %vm171_vm0, %v7240_v0 }
  0x46   : > { %249 = vst [vmem:[#allocation3 + $0xb0] sm:$0xff] %v7240_v0 }
  0x47   : > { %250 = vst.msk [vmem:[#allocation3 + $0xb8] sm:$0xff] %vm171_vm0, %v7240_v0 }
  0x48   : > { %251 = vst [vmem:[#allocation3 + $0xc0] sm:$0xff] %v7240_v0 }
  0x49   : > { %252 = vst.msk [vmem:[#allocation3 + $0xc8] sm:$0xff] %vm171_vm0, %v7240_v0 }
  0x4a   : > { %253 = vst [vmem:[#allocation3 + $0xd0] sm:$0xff] %v7240_v0 }
  0x4b   : > { %254 = vst.msk [vmem:[#allocation3 + $0xd8] sm:$0xff] %vm171_vm0, %v7240_v0 }
  0x4c   : > { %255 = vst [vmem:[#allocation3 + $0xe0] sm:$0xff] %v7240_v0 }
  0x4d   : > { %256 = vst.msk [vmem:[#allocation3 + $0xe8] sm:$0xff] %vm171_vm0, %v7240_v0 }
  0x4e   : > { %257 = vst [vmem:[#allocation3 + $0xf0] sm:$0xff] %v7240_v0 }
  0x4f   : > { %258 = vst.msk [vmem:[#allocation3 + $0xf8] sm:$0xff] %vm171_vm0, %v7240_v0 }
  0x50   : > { %259 = vst [vmem:[#allocation3 + $0x100] sm:$0xff] %v7240_v0 }
  0x51   : > { %260 = vst.msk [vmem:[#allocation3 + $0x108] sm:$0xff] %vm171_vm0, %v7240_v0 }
  0x52   : > { %261 = vst [vmem:[#allocation3 + $0x110] sm:$0xff] %v7240_v0 }
  0x53   : > { %262 = vst.msk [vmem:[#allocation3 + $0x118] sm:$0xff] %vm171_vm0, %v7240_v0 }
  0x54   : > { %263 = vst [vmem:[#allocation3 + $0x120] sm:$0xff] %v7240_v0 }
  0x55   : > { %264 = vst.msk [vmem:[#allocation3 + $0x128] sm:$0xff] %vm171_vm0, %v7240_v0 }
  0x56   : > { %265 = vst [vmem:[#allocation3 + $0x130] sm:$0xff] %v7240_v0 }
  0x57   : > { %266 = vst.msk [vmem:[#allocation3 + $0x138] sm:$0xff] %vm171_vm0, %v7240_v0 }
  0x58   : > { %267 = vst [vmem:[#allocation3 + $0x140] sm:$0xff] %v7240_v0 }
  0x59   : > { %268 = vst.msk [vmem:[#allocation3 + $0x148] sm:$0xff] %vm171_vm0, %v7240_v0 }
  0x5a   : > { %269 = vst [vmem:[#allocation3 + $0x150] sm:$0xff] %v7240_v0 }
  0x5b   : > { %270 = vst.msk [vmem:[#allocation3 + $0x158] sm:$0xff] %vm171_vm0, %v7240_v0 }
  0x5c   : > { %271 = vst [vmem:[#allocation3 + $0x160] sm:$0xff] %v7240_v0 }
  0x5d   : > { %272 = vst.msk [vmem:[#allocation3 + $0x168] sm:$0xff] %vm171_vm0, %v7240_v0 }
  0x5e   : > { %273 = vst [vmem:[#allocation3 + $0x170] sm:$0xff] %v7240_v0 }
  0x5f   : > { %274 = vst.msk [vmem:[#allocation3 + $0x178] sm:$0xff] %vm171_vm0, %v7240_v0 }
  0x60   : > { %275 = vst [vmem:[#allocation3 + $0x180] sm:$0xff] %v7240_v0 }
  0x61   : > { %276 = vst.msk [vmem:[#allocation3 + $0x188] sm:$0xff] %vm171_vm0, %v7240_v0 }
  0x62   : > { %277 = vst [vmem:[#allocation3 + $0x190] sm:$0xff] %v7240_v0 }
  0x63   : > { %278 = vst.msk [vmem:[#allocation3 + $0x198] sm:$0xff] %vm171_vm0, %v7240_v0 }
  0x64   : > { %279 = vst [vmem:[#allocation3 + $0x1a0] sm:$0xff] %v7240_v0 }
  0x65   : > { %280 = vst.msk [vmem:[#allocation3 + $0x1a8] sm:$0xff] %vm171_vm0, %v7240_v0 }
  0x66   : > { %281 = vst [vmem:[#allocation3 + $0x1b0] sm:$0xff] %v7240_v0 }
  0x67   : > { %282 = vst.msk [vmem:[#allocation3 + $0x1b8] sm:$0xff] %vm171_vm0, %v7240_v0 }
  0x68   : > { %283 = vst [vmem:[#allocation3 + $0x1c0] sm:$0xff] %v7240_v0 }
  0x69   : > { %284 = vst.msk [vmem:[#allocation3 + $0x1c8] sm:$0xff] %vm171_vm0, %v7240_v0 }
  0x6a   : > { %285 = vst [vmem:[#allocation3 + $0x1d0] sm:$0xff] %v7240_v0 }
  0x6b   : > { %286 = vst.msk [vmem:[#allocation3 + $0x1d8] sm:$0xff] %vm171_vm0, %v7240_v0 }
  0x6c   : > { %287 = vst [vmem:[#allocation3 + $0x1e0] sm:$0xff] %v7240_v0 }
  0x6d   : > { %288 = vst.msk [vmem:[#allocation3 + $0x1e8] sm:$0xff] %vm171_vm0, %v7240_v0 }
  0x6e   : > { %289 = vst [vmem:[#allocation3 + $0x1f0] sm:$0xff] %v7240_v0 }
  0x6f   : > { %290 = vst.msk [vmem:[#allocation3 + $0x1f8] sm:$0xff] %vm171_vm0, %v7240_v0 }
  0x70   : > { %175 = vst.msk [vmem:[#allocation2 + $0x10] sm:$0x3] %vm174_vm1, %v7240_v0 }
  0x71   : > { %178 = vst.msk [vmem:[#allocation2 + $0x28] sm:$0x3] %vm174_vm1, %v7240_v0 }
  0x72   : > { %181 = vst.msk [vmem:[#allocation2 + $0x40] sm:$0x3] %vm174_vm1, %v7240_v0 }
  0x73   : > { %184 = vst.msk [vmem:[#allocation2 + $0x58] sm:$0x3] %vm174_vm1, %v7240_v0 }
  0x74   : > { %187 = vst.msk [vmem:[#allocation2 + $0x70] sm:$0x3] %vm174_vm1, %v7240_v0 }
  0x75   : > { %190 = vst.msk [vmem:[#allocation2 + $0x88] sm:$0x3] %vm174_vm1, %v7240_v0 }
  0x76   : > { %193 = vst.msk [vmem:[#allocation2 + $0xa0] sm:$0x3] %vm174_vm1, %v7240_v0 }
  0x77   : > { %v422_v2 = vld [vmem:[#allocation2 + $0x9] sm:$0xff]  ;;  %196 = vst.msk [vmem:[#allocation2 + $0xb8] sm:$0x3] %vm174_vm1, %v7240_v0 }
  0x78   : > { %487 = vrot.lane.b32.xlu0 %v422_v2, %s7241_s14  ;;  %199 = vst.msk [vmem:[#allocation2 + $0xd0] sm:$0x3] %vm174_vm1, %v7240_v0  ;;  %v615_v61 = vld [vmem:[#allocation2 + $0xa] sm:$0xff] }
  0x79   : > { %202 = vst.msk [vmem:[#allocation2 + $0xe8] sm:$0x3] %vm174_vm1, %v7240_v0 }
  0x7a   : > { %205 = vst.msk [vmem:[#allocation2 + $0x100] sm:$0x3] %vm174_vm1, %v7240_v0 }
  0x7b   : > { %208 = vst.msk [vmem:[#allocation2 + $0x118] sm:$0x3] %vm174_vm1, %v7240_v0 }
  0x7c   : > { %211 = vst.msk [vmem:[#allocation2 + $0x130] sm:$0x3] %vm174_vm1, %v7240_v0 }
  0x7d   : > { %214 = vst.msk [vmem:[#allocation2 + $0x148] sm:$0x3] %vm174_vm1, %v7240_v0 }
  0x7e   : > { %217 = vst.msk [vmem:[#allocation2 + $0x160] sm:$0x3] %vm174_vm1, %v7240_v0 }
  0x7f   : > { %220 = vst.msk [vmem:[#allocation2 + $0x178] sm:$0x3] %vm174_vm1, %v7240_v0 }
  0x80   : > { %11168 = vst [vmem:[#allocation4_spill] sm:$0xff] %v7496_v3 }
  0x81   : > { %223 = vst.msk [vmem:[#allocation2 + $0x190] sm:$0x3] %vm174_vm1, %v7240_v0 }
  0x82   : > { %11169 = vst [vmem:[#allocation5_spill] sm:$0xff] %v7501_v4 }
  0x83   : > { %226 = vst.msk [vmem:[#allocation2 + $0x1a8] sm:$0x3] %vm174_vm1, %v7240_v0  ;;  %vm3655_vm1 = vcmask 851744  }
  0x84   : > { %11170 = vst [vmem:[#allocation6_spill] sm:$0xff] %v7506_v5 }
  0x85   : > { %325 = vst.msk [vmem:[#allocation2 + $0x19] sm:$0xff] %vm324_vm2, %v7496_v3 }
  0x86   : > { %11171 = vst [vmem:[#allocation7_spill] sm:$0xff] %v7511_v6 }
  0x87   : > { %329 = vst.msk [vmem:[#allocation2 + $0x49] sm:$0xff] %vm324_vm2, %v7501_v4  ;;  %v486_v62 = vpop.permute.xlu0 %485 }
  0x88   : > { %11172 = vst [vmem:[#allocation8_spill] sm:$0xff] %v7516_v7 }
  0x89   : > { %326 = vst.msk [vmem:[#allocation2 + $0x21] sm:$0xff] %vm324_vm2, %v7506_v5 }
  0x8a   : > { %11173 = vst [vmem:[#allocation9_spill] sm:$0xff] %v7521_v8 }
  0x8b   : > { %332 = vst.msk [vmem:[#allocation2 + $0x69] sm:$0xff] %vm324_vm2, %v7511_v6 }
  0x8c   : > { %11174 = vst [vmem:[#allocation10_spill] sm:$0xff] %v7526_v9  ;;  %v7543_v13 = vld [vmem:[#allocation2 + $0x19] sm:$0xff] }
  0x8d   : > { %327 = vst.msk [vmem:[#allocation2 + $0x31] sm:$0xff] %vm324_vm2, %v7516_v7  ;;  %489 = vrot.lane.b32.xlu1 %v7543_v13, %s7241_s14 }
  0x8e   : > { %11175 = vst [vmem:[#allocation11_spill] sm:$0xff] %v7531_v10  ;;  %v7552_v15 = vld [vmem:[#allocation2 + $0x49] sm:$0xff] }
  0x8f   : > { %330 = vst.msk [vmem:[#allocation2 + $0x51] sm:$0xff] %vm324_vm2, %v7521_v8  ;;  %497 = vrot.lane.b32.xlu0 %v7552_v15, %s7241_s14 }
  0x90   : > { %11176 = vst [vmem:[#allocation12_spill] sm:$0xff] %v7536_v11  ;;  %v7582_v21 = vld [vmem:[#allocation2 + $0x21] sm:$0xff] }
  0x91   : > { %335 = vst.msk [vmem:[#allocation2 + $0x91] sm:$0xff] %vm324_vm2, %v7526_v9 }
  0x92   : > { %11177 = vst [vmem:[#allocation13_spill] sm:$0xff] %v7541_v12  ;;  %v7586_v22 = vld [vmem:[#allocation2 + $0x69] sm:$0xff] }
  0x93   : > { %328 = vst.msk [vmem:[#allocation2 + $0x39] sm:$0xff] %vm324_vm2, %v7531_v10 }
  0x94   : > { %11178 = vst [vmem:[#allocation14_spill] sm:$0xff] %v7548_v14  ;;  %v7571_v19 = vld [vmem:[#allocation2 + $0x31] sm:$0xff] }
  0x95   : > { %333 = vst.msk [vmem:[#allocation2 + $0x79] sm:$0xff] %vm324_vm2, %v7536_v11  ;;  %493 = vrot.lane.b32.xlu2 %v7571_v19, %s7241_s14  ;;  %491 = vrot.lane.b32.xlu1 %v7582_v21, %s7241_s14  ;;  %v7761_v0 = vld [vmem:[#allocation2 + $0x30] sm:$0xff] }
  0x96   : > { %11179 = vst [vmem:[#allocation15_spill] sm:$0xff] %v7557_v16  ;;  %v7613_v27 = vld [vmem:[#allocation2 + $0x51] sm:$0xff] }
  0x97   : > { %338 = vst.msk [vmem:[#allocation2 + $0xb1] sm:$0xff] %vm324_vm2, %v7541_v12  ;;  %503 = vrot.lane.b32.xlu0 %v7586_v22, %s7241_s14 }
  0x98   : > { %11180 = vst [vmem:[#allocation16_spill] sm:$0xff] %v7564_v17  ;;  %v7615_v28 = vld [vmem:[#allocation2 + $0x91] sm:$0xff] }
  0x99   : > { %331 = vst.msk [vmem:[#allocation2 + $0x61] sm:$0xff] %vm324_vm2, %v7548_v14 }
  0x9a   : > { %11181 = vst [vmem:[#allocation17_spill] sm:$0xff] %v7569_v18  ;;  %v7605_v26 = vld [vmem:[#allocation2 + $0x39] sm:$0xff] }
  0x9b   : > { %336 = vst.msk [vmem:[#allocation2 + $0x99] sm:$0xff] %vm324_vm2, %v7557_v16  ;;  %v7855_v16 = vld [vmem:[#allocation2 + $0x6a] sm:$0xff] }
  0x9c   : > { %11182 = vst [vmem:[#allocation18_spill] sm:$0xff] %v7576_v20  ;;  %v7640_v33 = vld [vmem:[#allocation2 + $0x79] sm:$0xff] }
  0x9d   : > { %341 = vst.msk [vmem:[#allocation2 + $0xd9] sm:$0xff] %vm324_vm2, %v7564_v17  ;;  %495 = vrot.lane.b32.xlu2 %v7605_v26, %s7241_s14  ;;  %499 = vrot.lane.b32.xlu1 %v7613_v27, %s7241_s14  ;;  %v7830_v17 = vld [vmem:[#allocation2 + $0x50] sm:$0xff] }
  0x9e   : > { %334 = vst.msk [vmem:[#allocation2 + $0x81] sm:$0xff] %vm324_vm2, %v7569_v18  ;;  %v7642_v34 = vld [vmem:[#allocation2 + $0xb1] sm:$0xff] }
  0x9f   : > { %339 = vst.msk [vmem:[#allocation2 + $0xc1] sm:$0xff] %vm324_vm2, %v7576_v20  ;;  %509 = vrot.lane.b32.xlu0 %v7615_v28, %s7241_s14 }
  0xa0   : > { %11183 = vst [vmem:[#allocation19_spill] sm:$0xff] %v7591_v23  ;;  %v7632_v32 = vld [vmem:[#allocation2 + $0x61] sm:$0xff] }
  0xa1   : > { %11184 = vst [vmem:[#allocation20_spill] sm:$0xff] %v7594_v24 }
  0xa2   : > { %344 = vst.msk [vmem:[#allocation2 + $0xf9] sm:$0xff] %vm324_vm2, %v7591_v23  ;;  %v7667_v39 = vld [vmem:[#allocation2 + $0x99] sm:$0xff]  ;;  %v7821_v23 = vld [vmem:[#allocation2 + $0x68] sm:$0xff] }
  0xa3   : > { %11185 = vst [vmem:[#allocation21_spill] sm:$0xff] %v7601_v25  ;;  %v7878_v14 = vld [vmem:[#allocation2 + $0x92] sm:$0xff] }
  0xa4   : > { %337 = vst.msk [vmem:[#allocation2 + $0xa9] sm:$0xff] %vm324_vm2, %v7594_v24  ;;  %v7669_v40 = vld [vmem:[#allocation2 + $0xd9] sm:$0xff] }
  0xa5   : > { %342 = vst.msk [vmem:[#allocation2 + $0xe1] sm:$0xff] %vm324_vm2, %v7601_v25  ;;  %501 = vrot.lane.b32.xlu2 %v7632_v32, %s7241_s14  ;;  %505 = vrot.lane.b32.xlu1 %v7640_v33, %s7241_s14  ;;  %v7659_v38 = vld [vmem:[#allocation2 + $0x81] sm:$0xff]  ;;  %v7827_v25 = vld [vmem:[#allocation2 + $0x4a] sm:$0xff]  ;;  %v7851_v24 = vld [vmem:[#allocation2 + $0x78] sm:$0xff] }
  0xa6   : > { %11186 = vst [vmem:[#allocation22_spill] sm:$0xff] %v7618_v29  ;;  %v7694_v45 = vld [vmem:[#allocation2 + $0xc1] sm:$0xff] }
  0xa7   : > { %11187 = vst [vmem:[#allocation23_spill] sm:$0xff] %v7621_v30  ;;  %515 = vrot.lane.b32.xlu0 %v7642_v34, %s7241_s14 }
  0xa8   : > { %347 = vst.msk [vmem:[#allocation2 + $0x121] sm:$0xff] %vm324_vm2, %v7618_v29  ;;  %v7816_v29 = vld [vmem:[#allocation2 + $0x7a] sm:$0xff] }
  0xa9   : > { %11188 = vst [vmem:[#allocation24_spill] sm:$0xff] %v7628_v31  ;;  %v7696_v46 = vld [vmem:[#allocation2 + $0xf9] sm:$0xff] }
  0xaa   : > { %340 = vst.msk [vmem:[#allocation2 + $0xc9] sm:$0xff] %vm324_vm2, %v7621_v30  ;;  %v7842_v30 = vld [vmem:[#allocation2 + $0x9a] sm:$0xff] }
  0xab   : > { %345 = vst.msk [vmem:[#allocation2 + $0x109] sm:$0xff] %vm324_vm2, %v7628_v31  ;;  %v7686_v44 = vld [vmem:[#allocation2 + $0xa9] sm:$0xff] }
  0xac   : > { %11189 = vst [vmem:[#allocation25_spill] sm:$0xff] %v7645_v35  ;;  %v7716_v50 = vld [vmem:[#allocation2 + $0xe1] sm:$0xff]  ;;  %v7872_v11 = vld [vmem:[#allocation2 + $0xb0] sm:$0xff] }
  0xad   : > { %11190 = vst [vmem:[#allocation26_spill] sm:$0xff] %v7648_v36  ;;  %507 = vrot.lane.b32.xlu2 %v7659_v38, %s7241_s14  ;;  %511 = vrot.lane.b32.xlu1 %v7667_v39, %s7241_s14  ;;  %v7849_v12 = vld [vmem:[#allocation2 + $0xa8] sm:$0xff] }
  0xae   : > { %350 = vst.msk [vmem:[#allocation2 + $0x141] sm:$0xff] %vm324_vm2, %v7645_v35  ;;  %v7796_v35 = vld [vmem:[#allocation2 + $0x48] sm:$0xff] }
  0xaf   : > { %11191 = vst [vmem:[#allocation27_spill] sm:$0xff] %v7655_v37  ;;  %521 = vrot.lane.b32.xlu0 %v7669_v40, %s7241_s14  ;;  %v7718_v51 = vld [vmem:[#allocation2 + $0x121] sm:$0xff]  ;;  %v7890_v10 = vld [vmem:[#allocation2 + $0xaa] sm:$0xff] }
  0xb0   : > { %343 = vst.msk [vmem:[#allocation2 + $0xf1] sm:$0xff] %vm324_vm2, %v7648_v36  ;;  %v7823_v36 = vld [vmem:[#allocation2 + $0x80] sm:$0xff] }
  0xb1   : > { %348 = vst.msk [vmem:[#allocation2 + $0x129] sm:$0xff] %vm324_vm2, %v7655_v37  ;;  %v7710_v49 = vld [vmem:[#allocation2 + $0xc9] sm:$0xff]  ;;  %v7814_v37 = vld [vmem:[#allocation2 + $0x3a] sm:$0xff] }
  0xb2   : > { %11192 = vst [vmem:[#allocation28_spill] sm:$0xff] %v7672_v41  ;;  %v7733_v54 = vld [vmem:[#allocation2 + $0x109] sm:$0xff] }
  0xb3   : > { %11193 = vst [vmem:[#allocation29_spill] sm:$0xff] %v7675_v42  ;;  %v7867_v9 = vld [vmem:[#allocation2 + $0xc2] sm:$0xff] }
  0xb4   : > { %353 = vst.msk [vmem:[#allocation2 + $0x169] sm:$0xff] %vm324_vm2, %v7672_v41  ;;  %v7778_v41 = vld [vmem:[#allocation2 + $0x38] sm:$0xff]  ;;  %v7874_v6 = vld [vmem:[#allocation2 + $0xc8] sm:$0xff] }
  0xb5   : > { %11194 = vst [vmem:[#allocation30_spill] sm:$0xff] %v7682_v43  ;;  %513 = vrot.lane.b32.xlu2 %v7686_v44, %s7241_s14  ;;  %517 = vrot.lane.b32.xlu1 %v7694_v45, %s7241_s14  ;;  %v7735_v55 = vld [vmem:[#allocation2 + $0x141] sm:$0xff] }
  0xb6   : > { %346 = vst.msk [vmem:[#allocation2 + $0x111] sm:$0xff] %vm324_vm2, %v7675_v42  ;;  %v7894_v7 = vld [vmem:[#allocation2 + $0xe2] sm:$0xff] }
  0xb7   : > { %351 = vst.msk [vmem:[#allocation2 + $0x151] sm:$0xff] %vm324_vm2, %v7682_v43  ;;  %527 = vrot.lane.b32.xlu0 %v7696_v46, %s7241_s14  ;;  %v7729_v53 = vld [vmem:[#allocation2 + $0xf1] sm:$0xff] }
  0xb8   : > { %11195 = vst [vmem:[#allocation31_spill] sm:$0xff] %v7699_v47  ;;  %v7745_v57 = vld [vmem:[#allocation2 + $0x129] sm:$0xff]  ;;  %v7792_v43 = vld [vmem:[#allocation2 + $0x52] sm:$0xff] }
  0xb9   : > { %11196 = vst [vmem:[#allocation32_spill] sm:$0xff] %v7702_v48  ;;  %v7901_v3 = vld [vmem:[#allocation2 + $0xf0] sm:$0xff] }
  0xba   : > { %349 = vst.msk [vmem:[#allocation2 + $0x139] sm:$0xff] %vm324_vm2, %v7699_v47  ;;  %v7802_v47 = vld [vmem:[#allocation2 + $0x22] sm:$0xff] }
  0xbb   : > { %354 = vst.msk [vmem:[#allocation2 + $0x171] sm:$0xff] %vm324_vm2, %v7702_v48  ;;  %v7747_v58 = vld [vmem:[#allocation2 + $0x169] sm:$0xff]  ;;  %v7774_v48 = vld [vmem:[#allocation2 + $0x32] sm:$0xff] }
  0xbc   : > { %11197 = vst [vmem:[#allocation33_spill] sm:$0xff] %v7721_v52 }
  0xbd   : > { %519 = vrot.lane.b32.xlu2 %v7710_v49, %s7241_s14  ;;  %523 = vrot.lane.b32.xlu1 %v7716_v50, %s7241_s14  ;;  %352 = vst.msk [vmem:[#allocation2 + $0x159] sm:$0xff] %vm324_vm2, %v7721_v52  ;;  %v7741_v56 = vld [vmem:[#allocation2 + $0x111] sm:$0xff]  ;;  %v7790_v52 = vld [vmem:[#allocation2 + $0x1a] sm:$0xff] }
  0xbe   : > { %v7757_v60 = vld [vmem:[#allocation2 + $0x151] sm:$0xff]  ;;  %389 = vst.msk [vmem:[#allocation3] sm:$0xff] %vm324_vm2, %v357_v63 }
  0xbf   : > { %533 = vrot.lane.b32.xlu0 %v7718_v51, %s7241_s14  ;;  %582 = vst.msk [vmem:[#allocation3] sm:$0xff] %vm581_vm3, %v486_v62  ;;  %v614_v62 = vld [vmem:[#allocation2 + $0x2] sm:$0xff]  ;;  %v7783_v63 = vld [vmem:[#allocation2 + $0x18] sm:$0xff] }
  0xc0   : > { %393 = vst.msk [vmem:[#allocation3 + $0x40] sm:$0xff] %vm324_vm2, %v7761_v0 }
  0xc1   : > { %v7753_v59 = vld [vmem:[#allocation2 + $0x139] sm:$0xff]  ;;  %11199 = vst [vmem:[#allocation35_spill] sm:$0xff] %v7774_v48 }
  0xc2   : > { %v7772_v2 = vld [vmem:[#allocation2 + $0x171] sm:$0xff]  ;;  %394 = vst.msk [vmem:[#allocation3 + $0x50] sm:$0xff] %vm324_vm2, %v7778_v41 }
  0xc3   : > { %11198 = vst [vmem:[#allocation34_spill] sm:$0xff] %v7772_v2 }
  0xc4   : > { %v7764_v1 = vld [vmem:[#allocation2 + $0x159] sm:$0xff]  ;;  %391 = vst.msk [vmem:[#allocation3 + $0x20] sm:$0xff] %vm324_vm2, %v7783_v63 }
  0xc5   : > { %525 = vrot.lane.b32.xlu2 %v7729_v53, %s7241_s14  ;;  %529 = vrot.lane.b32.xlu1 %v7733_v54, %s7241_s14  ;;  %11200 = vst [vmem:[#allocation36_spill] sm:$0xff] %v7790_v52 }
  0xc6   : > { %11201 = vst [vmem:[#allocation37_spill] sm:$0xff] %v7792_v43 }
  0xc7   : > { %539 = vrot.lane.b32.xlu0 %v7735_v55, %s7241_s14  ;;  %11202 = vst [vmem:[#allocation38_spill] sm:$0xff] %v7802_v47 }
  0xc8   : > { %395 = vst.msk [vmem:[#allocation3 + $0x60] sm:$0xff] %vm324_vm2, %v7796_v35 }
  0xc9   : > { %11203 = vst [vmem:[#allocation39_spill] sm:$0xff] %v7814_v37 }
  0xca   : > { %11204 = vst [vmem:[#allocation40_spill] sm:$0xff] %v7816_v29 }
  0xcb   : > { %11205 = vst [vmem:[#allocation41_spill] sm:$0xff] %v7827_v25 }
  0xcc   : > { %398 = vst.msk [vmem:[#allocation3 + $0x90] sm:$0xff] %vm324_vm2, %v7821_v23 }
  0xcd   : > { %531 = vrot.lane.b32.xlu2 %v7741_v56, %s7241_s14  ;;  %535 = vrot.lane.b32.xlu1 %v7745_v57, %s7241_s14  ;;  %400 = vst.msk [vmem:[#allocation3 + $0xb0] sm:$0xff] %vm324_vm2, %v7823_v36 }
  0xce   : > { %396 = vst.msk [vmem:[#allocation3 + $0x70] sm:$0xff] %vm324_vm2, %v7830_v17 }
  0xcf   : > { %545 = vrot.lane.b32.xlu0 %v7747_v58, %s7241_s14  ;;  %11207 = vst [vmem:[#allocation43_spill] sm:$0xff] %v7842_v30 }
  0xd0   : > { %11208 = vst [vmem:[#allocation44_spill] sm:$0xff] %v7855_v16 }
  0xd1   : > { %403 = vst.msk [vmem:[#allocation3 + $0xe0] sm:$0xff] %vm324_vm2, %v7849_v12 }
  0xd2   : > { %399 = vst.msk [vmem:[#allocation3 + $0xa0] sm:$0xff] %vm324_vm2, %v7851_v24 }
  0xd3   : > { %11210 = vst [vmem:[#allocation46_spill] sm:$0xff] %v7867_v9 }
  0xd4   : > { %11211 = vst [vmem:[#allocation47_spill] sm:$0xff] %v7878_v14 }
  0xd5   : > { %537 = vrot.lane.b32.xlu2 %v7753_v59, %s7241_s14  ;;  %541 = vrot.lane.b32.xlu1 %v7757_v60, %s7241_s14  ;;  %404 = vst.msk [vmem:[#allocation3 + $0xf0] sm:$0xff] %vm324_vm2, %v7872_v11 }
  0xd6   : > { %406 = vst.msk [vmem:[#allocation3 + $0x110] sm:$0xff] %vm324_vm2, %v7874_v6 }
  0xd7   : > { %680 = vrot.lane.b32.xlu0 %v615_v61, %s7242_s19  ;;  %v358_v61 = vld [vmem:[#allocation2 + $0x8] sm:$0xff]  ;;  %11212 = vst [vmem:[#allocation48_spill] sm:$0xff] %v7890_v10 }
  0xd8   : > { %390 = vst.msk [vmem:[#allocation3 + $0x10] sm:$0xff] %vm324_vm2, %v358_v61  ;;  %v7798_v61 = vld [vmem:[#allocation2 + $0x60] sm:$0xff] }
  0xd9   : > { %397 = vst.msk [vmem:[#allocation3 + $0x80] sm:$0xff] %vm324_vm2, %v7798_v61 }
  0xda   : > { %11213 = vst [vmem:[#allocation49_spill] sm:$0xff] %v7894_v7 }
  0xdb   : > { %409 = vst.msk [vmem:[#allocation3 + $0x140] sm:$0xff] %vm324_vm2, %v7901_v3 }
  0xdd   : > { %543 = vrot.lane.b32.xlu2 %v7764_v1, %s7241_s14  ;;  %547 = vrot.lane.b32.xlu1 %v7772_v2, %s7241_s14  ;;  %v8009_v2 = vld [vmem:[#allocation2 + $0x150] sm:$0xff] }
  0xde   : > { %417 = vst.msk [vmem:[#allocation3 + $0x1c0] sm:$0xff] %vm324_vm2, %v8009_v2 }
  0xdf   : > { %686 = vrot.lane.b32.xlu0 %v7774_v48, %s7242_s19  ;;  %v7982_v48 = vld [vmem:[#allocation2 + $0x158] sm:$0xff] }
  0xe0   : > { %418 = vst.msk [vmem:[#allocation3 + $0x1d0] sm:$0xff] %vm324_vm2, %v7982_v48 }
  0xe5   : > { %678 = vrot.lane.b32.xlu2 %v614_v62, %s7242_s19  ;;  %682 = vrot.lane.b32.xlu1 %v7790_v52, %s7242_s19  ;;  %v7806_v62 = vld [vmem:[#allocation2 + $0x20] sm:$0xff]  ;;  %v8002_v52 = vld [vmem:[#allocation2 + $0x172] sm:$0xff] }
  0xe6   : > { %392 = vst.msk [vmem:[#allocation3 + $0x30] sm:$0xff] %vm324_vm2, %v7806_v62 }
  0xe7   : > { %692 = vrot.lane.b32.xlu0 %v7792_v43, %s7242_s19  ;;  %v7955_v43 = vld [vmem:[#allocation2 + $0x138] sm:$0xff]  ;;  %11225 = vst [vmem:[#allocation61_spill] sm:$0xff] %v8002_v52 }
  0xe8   : > { %415 = vst.msk [vmem:[#allocation3 + $0x1a0] sm:$0xff] %vm324_vm2, %v7955_v43 }
  0xea   : > { %v488_v31 = vpop.permute.xlu0 %487 }
  0xeb   : > { %583 = vst.msk [vmem:[#allocation3 + $0x10] sm:$0xff] %vm581_vm3, %v488_v31  ;;  %v7847_v31 = vld [vmem:[#allocation2 + $0x90] sm:$0xff] }
  0xec   : > { %401 = vst.msk [vmem:[#allocation3 + $0xc0] sm:$0xff] %vm324_vm2, %v7847_v31 }
  0xed   : > { %684 = vrot.lane.b32.xlu2 %v7802_v47, %s7242_s19  ;;  %688 = vrot.lane.b32.xlu1 %v7814_v37, %s7242_s19  ;;  %v7975_v37 = vld [vmem:[#allocation2 + $0x152] sm:$0xff] }
  0xee   : > { %11222 = vst [vmem:[#allocation58_spill] sm:$0xff] %v7975_v37  ;;  %v8028_v47 = vld [vmem:[#allocation2 + $0x170] sm:$0xff] }
  0xef   : > { %v494_v42 = vpop.permute.xlu2 %493  ;;  %698 = vrot.lane.b32.xlu0 %v7816_v29, %s7242_s19  ;;  %v7928_v29 = vld [vmem:[#allocation2 + $0x110] sm:$0xff]  ;;  %420 = vst.msk [vmem:[#allocation3 + $0x1f0] sm:$0xff] %vm324_vm2, %v8028_v47 }
  0xf0   : > { %586 = vst.msk [vmem:[#allocation3 + $0x40] sm:$0xff] %vm581_vm3, %v494_v42  ;;  %v7840_v42 = vld [vmem:[#allocation2 + $0x62] sm:$0xff] }
  0xf1   : > { %11206 = vst [vmem:[#allocation42_spill] sm:$0xff] %v7840_v42 }
  0xf2   : > { %412 = vst.msk [vmem:[#allocation3 + $0x170] sm:$0xff] %vm324_vm2, %v7928_v29 }
  0xf5   : > { %690 = vrot.lane.b32.xlu2 %v7827_v25, %s7242_s19  ;;  %694 = vrot.lane.b32.xlu1 %v7840_v42, %s7242_s19  ;;  %v7948_v42 = vld [vmem:[#allocation2 + $0x12a] sm:$0xff] }
  0xf6   : > { %11219 = vst [vmem:[#allocation55_spill] sm:$0xff] %v7948_v42 }
  0xf7   : > { %v496_v20 = vpop.permute.xlu2 %495  ;;  %704 = vrot.lane.b32.xlu0 %v7842_v30, %s7242_s19  ;;  %v7921_v30 = vld [vmem:[#allocation2 + $0x10a] sm:$0xff] }
  0xf8   : > { %587 = vst.msk [vmem:[#allocation3 + $0x50] sm:$0xff] %vm581_vm3, %v496_v20  ;;  %v7865_v20 = vld [vmem:[#allocation2 + $0x82] sm:$0xff] }
  0xf9   : > { %11209 = vst [vmem:[#allocation45_spill] sm:$0xff] %v7865_v20 }
  0xfa   : > { %11216 = vst [vmem:[#allocation52_spill] sm:$0xff] %v7921_v30 }
  0xfd   : > { %696 = vrot.lane.b32.xlu2 %v7855_v16, %s7242_s19  ;;  %700 = vrot.lane.b32.xlu1 %v7865_v20, %s7242_s19 }
  0xff   : > { %v502_v18 = vpop.permute.xlu2 %501  ;;  %710 = vrot.lane.b32.xlu0 %v7867_v9, %s7242_s19  ;;  %v490_v8 = vpop.permute.xlu1 %489 }
 0x100   : > { %590 = vst.msk [vmem:[#allocation3 + $0x80] sm:$0xff] %vm581_vm3, %v502_v18  ;;  %v7884_v18 = vld [vmem:[#allocation2 + $0x98] sm:$0xff] }
 0x101   : > { %584 = vst.msk [vmem:[#allocation3 + $0x20] sm:$0xff] %vm581_vm3, %v490_v8  ;;  %v498_v4 = vpop.permute.xlu0 %497  ;;  %v7899_v8 = vld [vmem:[#allocation2 + $0xd8] sm:$0xff] }
 0x102   : > { %588 = vst.msk [vmem:[#allocation3 + $0x60] sm:$0xff] %vm581_vm3, %v498_v4  ;;  %v7905_v4 = vld [vmem:[#allocation2 + $0xb2] sm:$0xff] }
 0x103   : > { %402 = vst.msk [vmem:[#allocation3 + $0xd0] sm:$0xff] %vm324_vm2, %v7884_v18 }
 0x104   : > { %11214 = vst [vmem:[#allocation50_spill] sm:$0xff] %v7905_v4 }
 0x105   : > { %702 = vrot.lane.b32.xlu2 %v7878_v14, %s7242_s19  ;;  %706 = vrot.lane.b32.xlu1 %v7890_v10, %s7242_s19  ;;  %407 = vst.msk [vmem:[#allocation3 + $0x120] sm:$0xff] %vm324_vm2, %v7899_v8 }
 0x107   : > { %v508_v5 = vpop.permute.xlu2 %507  ;;  %716 = vrot.lane.b32.xlu0 %v7894_v7, %s7242_s19  ;;  %v492_v9 = vpop.permute.xlu1 %491  ;;  %v7917_v7 = vld [vmem:[#allocation2 + $0xca] sm:$0xff] }
 0x108   : > { %593 = vst.msk [vmem:[#allocation3 + $0xb0] sm:$0xff] %vm581_vm3, %v508_v5  ;;  %v7911_v5 = vld [vmem:[#allocation2 + $0xc0] sm:$0xff] }
 0x109   : > { %585 = vst.msk [vmem:[#allocation3 + $0x30] sm:$0xff] %vm581_vm3, %v492_v9  ;;  %v504_v10 = vpop.permute.xlu0 %503  ;;  %v7926_v9 = vld [vmem:[#allocation2 + $0xf8] sm:$0xff] }
 0x10a   : > { %591 = vst.msk [vmem:[#allocation3 + $0x90] sm:$0xff] %vm581_vm3, %v504_v10  ;;  %v7932_v10 = vld [vmem:[#allocation2 + $0xda] sm:$0xff] }
 0x10b   : > { %11215 = vst [vmem:[#allocation51_spill] sm:$0xff] %v7917_v7 }
 0x10c   : > { %405 = vst.msk [vmem:[#allocation3 + $0x100] sm:$0xff] %vm324_vm2, %v7911_v5 }
 0x10d   : > { %708 = vrot.lane.b32.xlu2 %v7905_v4, %s7242_s19  ;;  %712 = vrot.lane.b32.xlu1 %v7917_v7, %s7242_s19  ;;  %11217 = vst [vmem:[#allocation53_spill] sm:$0xff] %v7932_v10 }
 0x10e   : > { %410 = vst.msk [vmem:[#allocation3 + $0x150] sm:$0xff] %vm324_vm2, %v7926_v9 }
 0x10f   : > { %v514_v20 = vpop.permute.xlu2 %513  ;;  %722 = vrot.lane.b32.xlu0 %v7921_v30, %s7242_s19  ;;  %v500_v4 = vpop.permute.xlu1 %499  ;;  %v7944_v30 = vld [vmem:[#allocation2 + $0xf2] sm:$0xff] }
 0x110   : > { %596 = vst.msk [vmem:[#allocation3 + $0xe0] sm:$0xff] %vm581_vm3, %v514_v20  ;;  %v7938_v20 = vld [vmem:[#allocation2 + $0xe0] sm:$0xff] }
 0x111   : > { %589 = vst.msk [vmem:[#allocation3 + $0x70] sm:$0xff] %vm581_vm3, %v500_v4  ;;  %v510_v7 = vpop.permute.xlu0 %509  ;;  %v7953_v4 = vld [vmem:[#allocation2 + $0x120] sm:$0xff] }
 0x112   : > { %594 = vst.msk [vmem:[#allocation3 + $0xc0] sm:$0xff] %vm581_vm3, %v510_v7  ;;  %v7959_v7 = vld [vmem:[#allocation2 + $0xfa] sm:$0xff] }
 0x113   : > { %11218 = vst [vmem:[#allocation54_spill] sm:$0xff] %v7944_v30 }
 0x114   : > { %408 = vst.msk [vmem:[#allocation3 + $0x130] sm:$0xff] %vm324_vm2, %v7938_v20 }
 0x115   : > { %714 = vrot.lane.b32.xlu2 %v7932_v10, %s7242_s19  ;;  %718 = vrot.lane.b32.xlu1 %v7944_v30, %s7242_s19  ;;  %11220 = vst [vmem:[#allocation56_spill] sm:$0xff] %v7959_v7 }
 0x116   : > { %413 = vst.msk [vmem:[#allocation3 + $0x180] sm:$0xff] %vm324_vm2, %v7953_v4 }
 0x117   : > { %v520_v14 = vpop.permute.xlu2 %519  ;;  %728 = vrot.lane.b32.xlu0 %v7948_v42, %s7242_s19  ;;  %v506_v10 = vpop.permute.xlu1 %505  ;;  %v7971_v42 = vld [vmem:[#allocation2 + $0x112] sm:$0xff] }
 0x118   : > { %599 = vst.msk [vmem:[#allocation3 + $0x110] sm:$0xff] %vm581_vm3, %v520_v14  ;;  %v7965_v14 = vld [vmem:[#allocation2 + $0x108] sm:$0xff] }
 0x119   : > { %592 = vst.msk [vmem:[#allocation3 + $0xa0] sm:$0xff] %vm581_vm3, %v506_v10  ;;  %v516_v30 = vpop.permute.xlu0 %515  ;;  %v7980_v10 = vld [vmem:[#allocation2 + $0x140] sm:$0xff] }
 0x11a   : > { %597 = vst.msk [vmem:[#allocation3 + $0xf0] sm:$0xff] %vm581_vm3, %v516_v30  ;;  %v7986_v30 = vld [vmem:[#allocation2 + $0x122] sm:$0xff] }
 0x11b   : > { %11221 = vst [vmem:[#allocation57_spill] sm:$0xff] %v7971_v42 }
 0x11c   : > { %411 = vst.msk [vmem:[#allocation3 + $0x160] sm:$0xff] %vm324_vm2, %v7965_v14 }
 0x11d   : > { %720 = vrot.lane.b32.xlu2 %v7959_v7, %s7242_s19  ;;  %724 = vrot.lane.b32.xlu1 %v7971_v42, %s7242_s19  ;;  %11223 = vst [vmem:[#allocation59_spill] sm:$0xff] %v7986_v30 }
 0x11e   : > { %416 = vst.msk [vmem:[#allocation3 + $0x1b0] sm:$0xff] %vm324_vm2, %v7980_v10 }
 0x11f   : > { %v526_v16 = vpop.permute.xlu2 %525  ;;  %734 = vrot.lane.b32.xlu0 %v7975_v37, %s7242_s19  ;;  %v512_v7 = vpop.permute.xlu1 %511  ;;  %v7998_v37 = vld [vmem:[#allocation2 + $0x13a] sm:$0xff] }
 0x120   : > { %602 = vst.msk [vmem:[#allocation3 + $0x140] sm:$0xff] %vm581_vm3, %v526_v16  ;;  %v7992_v16 = vld [vmem:[#allocation2 + $0x128] sm:$0xff] }
 0x121   : > { %595 = vst.msk [vmem:[#allocation3 + $0xd0] sm:$0xff] %vm581_vm3, %v512_v7  ;;  %v522_v42 = vpop.permute.xlu0 %521  ;;  %v8007_v7 = vld [vmem:[#allocation2 + $0x168] sm:$0xff] }
 0x122   : > { %600 = vst.msk [vmem:[#allocation3 + $0x120] sm:$0xff] %vm581_vm3, %v522_v42  ;;  %v8013_v42 = vld [vmem:[#allocation2 + $0x142] sm:$0xff] }
 0x123   : > { %11224 = vst [vmem:[#allocation60_spill] sm:$0xff] %v7998_v37 }
 0x124   : > { %414 = vst.msk [vmem:[#allocation3 + $0x190] sm:$0xff] %vm324_vm2, %v7992_v16 }
 0x125   : > { %726 = vrot.lane.b32.xlu2 %v7986_v30, %s7242_s19  ;;  %730 = vrot.lane.b32.xlu1 %v7998_v37, %s7242_s19  ;;  %11226 = vst [vmem:[#allocation62_spill] sm:$0xff] %v8013_v42  ;;  %v8023_v37 = vld [vmem:[#allocation2 + $0x15a] sm:$0xff] }
 0x126   : > { %419 = vst.msk [vmem:[#allocation3 + $0x1e0] sm:$0xff] %vm324_vm2, %v8007_v7 }
 0x127   : > { %v532_v25 = vpop.permute.xlu2 %531  ;;  %740 = vrot.lane.b32.xlu0 %v8002_v52, %s7242_s19  ;;  %v518_v30 = vpop.permute.xlu1 %517  ;;  %11227 = vst [vmem:[#allocation63_spill] sm:$0xff] %v8023_v37 }
 0x128   : > { %605 = vst.msk [vmem:[#allocation3 + $0x170] sm:$0xff] %vm581_vm3, %v532_v25 }
 0x129   : > { %598 = vst.msk [vmem:[#allocation3 + $0x100] sm:$0xff] %vm581_vm3, %v518_v30  ;;  %v528_v25 = vpop.permute.xlu0 %527  ;;  %v8032_v30 = vld [vmem:[#allocation2 + $0x16a] sm:$0xff] }
 0x12a   : > { %603 = vst.msk [vmem:[#allocation3 + $0x150] sm:$0xff] %vm581_vm3, %v528_v25 }
 0x12d   : > { %732 = vrot.lane.b32.xlu2 %v8013_v42, %s7242_s19  ;;  %736 = vrot.lane.b32.xlu1 %v8023_v37, %s7242_s19 }
 0x12f   : > { %v538_v52 = vpop.permute.xlu2 %537  ;;  %875 = vrot.lane.b32.xlu0 %v7761_v0, %s7243_s20  ;;  %v524_v25 = vpop.permute.xlu1 %523 }
 0x130   : > { %608 = vst.msk [vmem:[#allocation3 + $0x1a0] sm:$0xff] %vm581_vm3, %v538_v52 }
 0x131   : > { %601 = vst.msk [vmem:[#allocation3 + $0x130] sm:$0xff] %vm581_vm3, %v524_v25  ;;  %v534_v42 = vpop.permute.xlu0 %533 }
 0x132   : > { %606 = vst.msk [vmem:[#allocation3 + $0x180] sm:$0xff] %vm581_vm3, %v534_v42 }
 0x135   : > { %738 = vrot.lane.b32.xlu2 %v8032_v30, %s7242_s19  ;;  %871 = vrot.lane.b32.xlu1 %v7783_v63, %s7243_s20 }
 0x137   : > { %v544_v52 = vpop.permute.xlu2 %543  ;;  %881 = vrot.lane.b32.xlu0 %v7830_v17, %s7243_s20  ;;  %v530_v0 = vpop.permute.xlu1 %529 }
 0x138   : > { %611 = vst.msk [vmem:[#allocation3 + $0x1d0] sm:$0xff] %vm581_vm3, %v544_v52 }
 0x139   : > { %604 = vst.msk [vmem:[#allocation3 + $0x160] sm:$0xff] %vm581_vm3, %v530_v0  ;;  %v540_v37 = vpop.permute.xlu0 %539 }
 0x13a   : > { %609 = vst.msk [vmem:[#allocation3 + $0x1b0] sm:$0xff] %vm581_vm3, %v540_v37 }
 0x13d   : > { %873 = vrot.lane.b32.xlu2 %v7806_v62, %s7243_s20  ;;  %877 = vrot.lane.b32.xlu1 %v7778_v41, %s7243_s20 }
 0x13f   : > { %v679_v42 = vpop.permute.xlu2 %678  ;;  %887 = vrot.lane.b32.xlu0 %v7851_v24, %s7243_s20  ;;  %v536_v63 = vpop.permute.xlu1 %535 }
 0x140   : > { %775 = vst.msk [vmem:[#allocation3] sm:$0xff] %vm774_vm4, %v679_v42 }
 0x141   : > { %607 = vst.msk [vmem:[#allocation3 + $0x190] sm:$0xff] %vm581_vm3, %v536_v63  ;;  %v546_v25 = vpop.permute.xlu0 %545 }
 0x142   : > { %612 = vst.msk [vmem:[#allocation3 + $0x1e0] sm:$0xff] %vm581_vm3, %v546_v25  ;;  %v8087_v25 = vld [vmem:[%s7487_s18 + $0xf0] sm:$0xff] }
 0x143   : > { %11228 = vst [vmem:[#allocation64_spill] sm:$0xff] %v8087_v25 }
 0x144   : > { %355 = vst.msk [vmem:[#allocation2 + $0x181] sm:$0xff] %vm324_vm2, %v8087_v25 }
 0x145   : > { %879 = vrot.lane.b32.xlu2 %v7796_v35, %s7243_s20  ;;  %883 = vrot.lane.b32.xlu1 %v7798_v61, %s7243_s20 }
 0x147   : > { %v685_v37 = vpop.permute.xlu2 %684  ;;  %893 = vrot.lane.b32.xlu0 %v7884_v18, %s7243_s20  ;;  %v542_v41 = vpop.permute.xlu1 %541 }
 0x148   : > { %778 = vst.msk [vmem:[#allocation3 + $0x30] sm:$0xff] %vm774_vm4, %v685_v37 }
 0x149   : > { %610 = vst.msk [vmem:[#allocation3 + $0x1c0] sm:$0xff] %vm581_vm3, %v542_v41  ;;  %v681_v62 = vpop.permute.xlu0 %680  ;;  %v8097_v41 = vld [vmem:[%s7487_s18 + $0xf8] sm:$0xff] }
 0x14a   : > { %776 = vst.msk [vmem:[#allocation3 + $0x10] sm:$0xff] %vm774_vm4, %v681_v62 }
 0x14b   : > { %11229 = vst [vmem:[#allocation65_spill] sm:$0xff] %v8097_v41 }
 0x14c   : > { %356 = vst.msk [vmem:[#allocation2 + $0x189] sm:$0xff] %vm324_vm2, %v8097_v41 }
 0x14d   : > { %885 = vrot.lane.b32.xlu2 %v7821_v23, %s7243_s20  ;;  %889 = vrot.lane.b32.xlu1 %v7823_v36, %s7243_s20 }
 0x14f   : > { %v691_v52 = vpop.permute.xlu2 %690  ;;  %899 = vrot.lane.b32.xlu0 %v7911_v5, %s7243_s20  ;;  %v548_v35 = vpop.permute.xlu1 %547 }
 0x150   : > { %781 = vst.msk [vmem:[#allocation3 + $0x60] sm:$0xff] %vm774_vm4, %v691_v52 }
 0x151   : > { %613 = vst.msk [vmem:[#allocation3 + $0x1f0] sm:$0xff] %vm581_vm3, %v548_v35  ;;  %v687_v61 = vpop.permute.xlu0 %686  ;;  %vm3848_vm3 = vcmask 982944  }
 0x152   : > { %779 = vst.msk [vmem:[#allocation3 + $0x40] sm:$0xff] %vm774_vm4, %v687_v61 }
 0x155   : > { %891 = vrot.lane.b32.xlu2 %v7847_v31, %s7243_s20  ;;  %895 = vrot.lane.b32.xlu1 %v7849_v12, %s7243_s20 }
 0x157   : > { %v697_v0 = vpop.permute.xlu2 %696  ;;  %905 = vrot.lane.b32.xlu0 %v7938_v20, %s7243_s20  ;;  %v683_v36 = vpop.permute.xlu1 %682 }
 0x158   : > { %784 = vst.msk [vmem:[#allocation3 + $0x90] sm:$0xff] %vm774_vm4, %v697_v0 }
 0x159   : > { %777 = vst.msk [vmem:[#allocation3 + $0x20] sm:$0xff] %vm774_vm4, %v683_v36  ;;  %v693_v42 = vpop.permute.xlu0 %692 }
 0x15a   : > { %782 = vst.msk [vmem:[#allocation3 + $0x70] sm:$0xff] %vm774_vm4, %v693_v42 }
 0x15d   : > { %897 = vrot.lane.b32.xlu2 %v7872_v11, %s7243_s20  ;;  %901 = vrot.lane.b32.xlu1 %v7874_v6, %s7243_s20 }
 0x15f   : > { %v703_v63 = vpop.permute.xlu2 %702  ;;  %911 = vrot.lane.b32.xlu0 %v7965_v14, %s7243_s20  ;;  %v689_v12 = vpop.permute.xlu1 %688 }
 0x160   : > { %787 = vst.msk [vmem:[#allocation3 + $0xc0] sm:$0xff] %vm774_vm4, %v703_v63 }
 0x161   : > { %780 = vst.msk [vmem:[#allocation3 + $0x50] sm:$0xff] %vm774_vm4, %v689_v12  ;;  %v699_v37 = vpop.permute.xlu0 %698  ;;  %v8140_v12 = vld [vmem:[#allocation2 + $0x180] sm:$0xff] }
 0x162   : > { %785 = vst.msk [vmem:[#allocation3 + $0xa0] sm:$0xff] %vm774_vm4, %v699_v37 }
 0x165   : > { %903 = vrot.lane.b32.xlu2 %v7899_v8, %s7243_s20  ;;  %907 = vrot.lane.b32.xlu1 %v7901_v3, %s7243_s20 }
 0x167   : > { %v709_v6 = vpop.permute.xlu2 %708  ;;  %917 = vrot.lane.b32.xlu0 %v7992_v16, %s7243_s20  ;;  %v695_v62 = vpop.permute.xlu1 %694 }
 0x168   : > { %790 = vst.msk [vmem:[#allocation3 + $0xf0] sm:$0xff] %vm774_vm4, %v709_v6 }
 0x169   : > { %783 = vst.msk [vmem:[#allocation3 + $0x80] sm:$0xff] %vm774_vm4, %v695_v62  ;;  %v705_v52 = vpop.permute.xlu0 %704 }
 0x16a   : > { %788 = vst.msk [vmem:[#allocation3 + $0xd0] sm:$0xff] %vm774_vm4, %v705_v52 }
 0x16d   : > { %909 = vrot.lane.b32.xlu2 %v7926_v9, %s7243_s20  ;;  %913 = vrot.lane.b32.xlu1 %v7928_v29, %s7243_s20 }
 0x16f   : > { %v715_v35 = vpop.permute.xlu2 %714  ;;  %923 = vrot.lane.b32.xlu0 %v8009_v2, %s7243_s20  ;;  %v701_v3 = vpop.permute.xlu1 %700 }
 0x170   : > { %793 = vst.msk [vmem:[#allocation3 + $0x120] sm:$0xff] %vm774_vm4, %v715_v35 }
 0x171   : > { %786 = vst.msk [vmem:[#allocation3 + $0xb0] sm:$0xff] %vm774_vm4, %v701_v3  ;;  %v711_v61 = vpop.permute.xlu0 %710 }
 0x172   : > { %791 = vst.msk [vmem:[#allocation3 + $0x100] sm:$0xff] %vm774_vm4, %v711_v61 }
 0x175   : > { %915 = vrot.lane.b32.xlu2 %v7953_v4, %s7243_s20  ;;  %919 = vrot.lane.b32.xlu1 %v7955_v43, %s7243_s20 }
 0x177   : > { %v721_v0 = vpop.permute.xlu2 %720  ;;  %929 = vrot.lane.b32.xlu0 %v8028_v47, %s7243_s20  ;;  %v707_v29 = vpop.permute.xlu1 %706 }
 0x178   : > { %796 = vst.msk [vmem:[#allocation3 + $0x150] sm:$0xff] %vm774_vm4, %v721_v0 }
 0x179   : > { %789 = vst.msk [vmem:[#allocation3 + $0xe0] sm:$0xff] %vm774_vm4, %v707_v29  ;;  %v717_v36 = vpop.permute.xlu0 %716 }
 0x17a   : > { %794 = vst.msk [vmem:[#allocation3 + $0x130] sm:$0xff] %vm774_vm4, %v717_v36  ;;  %v11231_v36 = vld [vmem:[#allocation34_spill] sm:$0xff] }
 0x17d   : > { %921 = vrot.lane.b32.xlu2 %v7980_v10, %s7243_s20  ;;  %925 = vrot.lane.b32.xlu1 %v7982_v48, %s7243_s20 }
 0x17f   : > { %v727_v42 = vpop.permute.xlu2 %726  ;;  %1064 = vrot.lane.b32.xlu0 %v7543_v13, %s7244_s21  ;;  %v713_v43 = vpop.permute.xlu1 %712  ;;  %v8147_v13 = vld [vmem:[#allocation2 + $0x188] sm:$0xff] }
 0x180   : > { %799 = vst.msk [vmem:[#allocation3 + $0x180] sm:$0xff] %vm774_vm4, %v727_v42 }
 0x181   : > { %792 = vst.msk [vmem:[#allocation3 + $0x110] sm:$0xff] %vm774_vm4, %v713_v43  ;;  %v723_v63 = vpop.permute.xlu0 %722 }
 0x182   : > { %797 = vst.msk [vmem:[#allocation3 + $0x160] sm:$0xff] %vm774_vm4, %v723_v63 }
 0x185   : > { %927 = vrot.lane.b32.xlu2 %v8007_v7, %s7243_s20  ;;  %931 = vrot.lane.b32.xlu1 %v8140_v12, %s7243_s20 }
 0x187   : > { %v733_v37 = vpop.permute.xlu2 %732  ;;  %1070 = vrot.lane.b32.xlu0 %v7605_v26, %s7244_s21  ;;  %v719_v6 = vpop.permute.xlu1 %718 }
 0x188   : > { %802 = vst.msk [vmem:[#allocation3 + $0x1b0] sm:$0xff] %vm774_vm4, %v733_v37  ;;  %v11233_v37 = vld [vmem:[#allocation36_spill] sm:$0xff] }
 0x189   : > { %795 = vst.msk [vmem:[#allocation3 + $0x140] sm:$0xff] %vm774_vm4, %v719_v6  ;;  %v729_v62 = vpop.permute.xlu0 %728 }
 0x18a   : > { %800 = vst.msk [vmem:[#allocation3 + $0x190] sm:$0xff] %vm774_vm4, %v729_v62  ;;  %v11234_v62 = vld [vmem:[#allocation35_spill] sm:$0xff] }
 0x18d   : > { %933 = vrot.lane.b32.xlu2 %v8147_v13, %s7243_s20  ;;  %1066 = vrot.lane.b32.xlu1 %v7582_v21, %s7244_s21 }
 0x18f   : > { %v739_v52 = vpop.permute.xlu2 %738  ;;  %1076 = vrot.lane.b32.xlu0 %v7632_v32, %s7244_s21  ;;  %v725_v26 = vpop.permute.xlu1 %724 }
 0x190   : > { %805 = vst.msk [vmem:[#allocation3 + $0x1e0] sm:$0xff] %vm774_vm4, %v739_v52  ;;  %v11235_v52 = vld [vmem:[#allocation44_spill] sm:$0xff] }
 0x191   : > { %798 = vst.msk [vmem:[#allocation3 + $0x170] sm:$0xff] %vm774_vm4, %v725_v26  ;;  %v735_v35 = vpop.permute.xlu0 %734 }
 0x192   : > { %803 = vst.msk [vmem:[#allocation3 + $0x1c0] sm:$0xff] %vm774_vm4, %v735_v35 }
 0x195   : > { %1068 = vrot.lane.b32.xlu2 %v7571_v19, %s7244_s21  ;;  %1072 = vrot.lane.b32.xlu1 %v7552_v15, %s7244_s21 }
 0x197   : > { %v874_v3 = vpop.permute.xlu2 %873  ;;  %1082 = vrot.lane.b32.xlu0 %v7659_v38, %s7244_s21  ;;  %v731_v21 = vpop.permute.xlu1 %730 }
 0x198   : > { %969 = vst.msk [vmem:[#allocation3 + $0x10] sm:$0xff] %vm967_vm5, %v874_v3  ;;  %v11236_v3 = vld [vmem:[#allocation39_spill] sm:$0xff] }
 0x199   : > { %801 = vst.msk [vmem:[#allocation3 + $0x1a0] sm:$0xff] %vm774_vm4, %v731_v21  ;;  %v741_v32 = vpop.permute.xlu0 %740 }
 0x19a   : > { %806 = vst.msk [vmem:[#allocation3 + $0x1f0] sm:$0xff] %vm774_vm4, %v741_v32  ;;  %v11237_v32 = vld [vmem:[#allocation37_spill] sm:$0xff] }
 0x19d   : > { %1074 = vrot.lane.b32.xlu2 %v7613_v27, %s7244_s21  ;;  %1078 = vrot.lane.b32.xlu1 %v7586_v22, %s7244_s21 }
 0x19f   : > { %v880_v19 = vpop.permute.xlu2 %879  ;;  %1088 = vrot.lane.b32.xlu0 %v7686_v44, %s7244_s21  ;;  %v737_v15 = vpop.permute.xlu1 %736 }
 0x1a0   : > { %972 = vst.msk [vmem:[#allocation3 + $0x40] sm:$0xff] %vm967_vm5, %v880_v19  ;;  %v11238_v19 = vld [vmem:[#allocation47_spill] sm:$0xff] }
 0x1a1   : > { %804 = vst.msk [vmem:[#allocation3 + $0x1d0] sm:$0xff] %vm774_vm4, %v737_v15  ;;  %v876_v38 = vpop.permute.xlu0 %875  ;;  %vm4542_vm4 = vcmask 97344  }
 0x1a2   : > { %970 = vst.msk [vmem:[#allocation3 + $0x20] sm:$0xff] %vm967_vm5, %v876_v38 }
 0x1a5   : > { %1080 = vrot.lane.b32.xlu2 %v7640_v33, %s7244_s21  ;;  %1084 = vrot.lane.b32.xlu1 %v7615_v28, %s7244_s21 }
 0x1a7   : > { %v886_v61 = vpop.permute.xlu2 %885  ;;  %1094 = vrot.lane.b32.xlu0 %v7710_v49, %s7244_s21  ;;  %v872_v22 = vpop.permute.xlu1 %871 }
 0x1a8   : > { %975 = vst.msk [vmem:[#allocation3 + $0x70] sm:$0xff] %vm967_vm5, %v886_v61  ;;  %v11239_v61 = vld [vmem:[#allocation42_spill] sm:$0xff] }
 0x1a9   : > { %968 = vst.msk [vmem:[#allocation3] sm:$0xff] %vm967_vm5, %v872_v22  ;;  %v882_v27 = vpop.permute.xlu0 %881 }
 0x1aa   : > { %973 = vst.msk [vmem:[#allocation3 + $0x50] sm:$0xff] %vm967_vm5, %v882_v27  ;;  %v11240_v27 = vld [vmem:[#allocation40_spill] sm:$0xff] }
 0x1ad   : > { %1086 = vrot.lane.b32.xlu2 %v7667_v39, %s7244_s21  ;;  %1090 = vrot.lane.b32.xlu1 %v7642_v34, %s7244_s21 }
 0x1af   : > { %v892_v44 = vpop.permute.xlu2 %891  ;;  %1100 = vrot.lane.b32.xlu0 %v7729_v53, %s7244_s21  ;;  %v878_v28 = vpop.permute.xlu1 %877 }
 0x1b0   : > { %978 = vst.msk [vmem:[#allocation3 + $0xa0] sm:$0xff] %vm967_vm5, %v892_v44  ;;  %v11241_v44 = vld [vmem:[#allocation50_spill] sm:$0xff] }
 0x1b1   : > { %971 = vst.msk [vmem:[#allocation3 + $0x30] sm:$0xff] %vm967_vm5, %v878_v28  ;;  %v888_v33 = vpop.permute.xlu0 %887 }
 0x1b2   : > { %976 = vst.msk [vmem:[#allocation3 + $0x80] sm:$0xff] %vm967_vm5, %v888_v33 }
 0x1b5   : > { %1092 = vrot.lane.b32.xlu2 %v7694_v45, %s7244_s21  ;;  %1096 = vrot.lane.b32.xlu1 %v7669_v40, %s7244_s21 }
 0x1b7   : > { %v898_v49 = vpop.permute.xlu2 %897  ;;  %1106 = vrot.lane.b32.xlu0 %v7741_v56, %s7244_s21  ;;  %v884_v34 = vpop.permute.xlu1 %883 }
 0x1b8   : > { %981 = vst.msk [vmem:[#allocation3 + $0xd0] sm:$0xff] %vm967_vm5, %v898_v49  ;;  %v11242_v49 = vld [vmem:[#allocation45_spill] sm:$0xff] }
 0x1b9   : > { %974 = vst.msk [vmem:[#allocation3 + $0x60] sm:$0xff] %vm967_vm5, %v884_v34  ;;  %v894_v39 = vpop.permute.xlu0 %893 }
 0x1ba   : > { %979 = vst.msk [vmem:[#allocation3 + $0xb0] sm:$0xff] %vm967_vm5, %v894_v39  ;;  %v11243_v39 = vld [vmem:[#allocation43_spill] sm:$0xff] }
 0x1bd   : > { %1098 = vrot.lane.b32.xlu2 %v7716_v50, %s7244_s21  ;;  %1102 = vrot.lane.b32.xlu1 %v7696_v46, %s7244_s21 }
 0x1bf   : > { %v904_v53 = vpop.permute.xlu2 %903  ;;  %1112 = vrot.lane.b32.xlu0 %v7753_v59, %s7244_s21  ;;  %v890_v40 = vpop.permute.xlu1 %889  ;;  %v8225_v59 = vld [vmem:[#allocation2 + $0x181] sm:$0xff] }
 0x1c0   : > { %984 = vst.msk [vmem:[#allocation3 + $0x100] sm:$0xff] %vm967_vm5, %v904_v53  ;;  %v11244_v53 = vld [vmem:[#allocation53_spill] sm:$0xff] }
 0x1c1   : > { %977 = vst.msk [vmem:[#allocation3 + $0x90] sm:$0xff] %vm967_vm5, %v890_v40  ;;  %v900_v45 = vpop.permute.xlu0 %899 }
 0x1c2   : > { %982 = vst.msk [vmem:[#allocation3 + $0xe0] sm:$0xff] %vm967_vm5, %v900_v45 }
 0x1c5   : > { %1104 = vrot.lane.b32.xlu2 %v7733_v54, %s7244_s21  ;;  %1108 = vrot.lane.b32.xlu1 %v7718_v51, %s7244_s21 }
 0x1c7   : > { %v910_v56 = vpop.permute.xlu2 %909  ;;  %1118 = vrot.lane.b32.xlu0 %v7764_v1, %s7244_s21  ;;  %v896_v46 = vpop.permute.xlu1 %895 }
 0x1c8   : > { %987 = vst.msk [vmem:[#allocation3 + $0x130] sm:$0xff] %vm967_vm5, %v910_v56  ;;  %v11245_v56 = vld [vmem:[#allocation48_spill] sm:$0xff] }
 0x1c9   : > { %980 = vst.msk [vmem:[#allocation3 + $0xc0] sm:$0xff] %vm967_vm5, %v896_v46  ;;  %v906_v50 = vpop.permute.xlu0 %905 }
 0x1ca   : > { %985 = vst.msk [vmem:[#allocation3 + $0x110] sm:$0xff] %vm967_vm5, %v906_v50  ;;  %v11246_v50 = vld [vmem:[#allocation46_spill] sm:$0xff] }
 0x1cd   : > { %1110 = vrot.lane.b32.xlu2 %v7745_v57, %s7244_s21  ;;  %1114 = vrot.lane.b32.xlu1 %v7735_v55, %s7244_s21  ;;  %v11230_v55 = vld [vmem:[#allocation38_spill] sm:$0xff] }
 0x1cf   : > { %v916_v54 = vpop.permute.xlu2 %915  ;;  %1124 = vrot.lane.b32.xlu0 %v8225_v59, %s7244_s21  ;;  %v902_v51 = vpop.permute.xlu1 %901 }
 0x1d0   : > { %990 = vst.msk [vmem:[#allocation3 + $0x160] sm:$0xff] %vm967_vm5, %v916_v54  ;;  %v11247_v54 = vld [vmem:[#allocation56_spill] sm:$0xff] }
 0x1d1   : > { %983 = vst.msk [vmem:[#allocation3 + $0xf0] sm:$0xff] %vm967_vm5, %v902_v51  ;;  %v912_v1 = vpop.permute.xlu0 %911 }
 0x1d2   : > { %988 = vst.msk [vmem:[#allocation3 + $0x140] sm:$0xff] %vm967_vm5, %v912_v1 }
 0x1d5   : > { %1116 = vrot.lane.b32.xlu2 %v7757_v60, %s7244_s21  ;;  %1120 = vrot.lane.b32.xlu1 %v7747_v58, %s7244_s21  ;;  %v8245_v60 = vld [vmem:[#allocation2 + $0x189] sm:$0xff]  ;;  %v11232_v58 = vld [vmem:[#allocation41_spill] sm:$0xff] }
 0x1d7   : > { %v922_v57 = vpop.permute.xlu2 %921  ;;  %1259 = vrot.lane.b32.xlu0 %v11230_v55, %s7245_s22  ;;  %v908_v0 = vpop.permute.xlu1 %907 }
 0x1d8   : > { %993 = vst.msk [vmem:[#allocation3 + $0x190] sm:$0xff] %vm967_vm5, %v922_v57  ;;  %v11248_v57 = vld [vmem:[#allocation51_spill] sm:$0xff] }
 0x1d9   : > { %986 = vst.msk [vmem:[#allocation3 + $0x120] sm:$0xff] %vm967_vm5, %v908_v0  ;;  %v918_v29 = vpop.permute.xlu0 %917  ;;  %v11249_v0 = vld [vmem:[#allocation49_spill] sm:$0xff] }
 0x1da   : > { %991 = vst.msk [vmem:[#allocation3 + $0x170] sm:$0xff] %vm967_vm5, %v918_v29  ;;  %v11250_v29 = vld [vmem:[#allocation59_spill] sm:$0xff] }
 0x1dd   : > { %1122 = vrot.lane.b32.xlu2 %v11231_v36, %s7244_s21  ;;  %1126 = vrot.lane.b32.xlu1 %v8245_v60, %s7244_s21 }
 0x1df   : > { %v928_v42 = vpop.permute.xlu2 %927  ;;  %1265 = vrot.lane.b32.xlu0 %v11232_v58, %s7245_s22  ;;  %v914_v43 = vpop.permute.xlu1 %913  ;;  %v11251_v58 = vld [vmem:[#allocation54_spill] sm:$0xff] }
 0x1e0   : > { %996 = vst.msk [vmem:[#allocation3 + $0x1c0] sm:$0xff] %vm967_vm5, %v928_v42 }
 0x1e1   : > { %989 = vst.msk [vmem:[#allocation3 + $0x150] sm:$0xff] %vm967_vm5, %v914_v43  ;;  %v924_v63 = vpop.permute.xlu0 %923 }
 0x1e2   : > { %994 = vst.msk [vmem:[#allocation3 + $0x1a0] sm:$0xff] %vm967_vm5, %v924_v63  ;;  %v11252_v63 = vld [vmem:[#allocation52_spill] sm:$0xff] }
 0x1e5   : > { %1257 = vrot.lane.b32.xlu2 %v11233_v37, %s7245_s22  ;;  %1261 = vrot.lane.b32.xlu1 %v11234_v62, %s7245_s22  ;;  %v11253_v37 = vld [vmem:[#allocation62_spill] sm:$0xff] }
 0x1e7   : > { %v934_v6 = vpop.permute.xlu2 %933  ;;  %1271 = vrot.lane.b32.xlu0 %v11235_v52, %s7245_s22  ;;  %v920_v26 = vpop.permute.xlu1 %919  ;;  %v11254_v52 = vld [vmem:[#allocation57_spill] sm:$0xff] }
 0x1e8   : > { %999 = vst.msk [vmem:[#allocation3 + $0x1f0] sm:$0xff] %vm967_vm5, %v934_v6 }
 0x1e9   : > { %992 = vst.msk [vmem:[#allocation3 + $0x180] sm:$0xff] %vm967_vm5, %v920_v26  ;;  %v930_v35 = vpop.permute.xlu0 %929 }
 0x1ea   : > { %997 = vst.msk [vmem:[#allocation3 + $0x1d0] sm:$0xff] %vm967_vm5, %v930_v35  ;;  %v11255_v35 = vld [vmem:[#allocation55_spill] sm:$0xff] }
 0x1ed   : > { %1263 = vrot.lane.b32.xlu2 %v11236_v3, %s7245_s22  ;;  %1267 = vrot.lane.b32.xlu1 %v11237_v32, %s7245_s22  ;;  %v11256_v32 = vld [vmem:[#allocation60_spill] sm:$0xff] }
 0x1ef   : > { %v1069_v21 = vpop.permute.xlu2 %1068  ;;  %1277 = vrot.lane.b32.xlu0 %v11238_v19, %s7245_s22  ;;  %v926_v15 = vpop.permute.xlu1 %925  ;;  %v1224_v19 = vld [vmem:[#allocation2 + $0x18a] sm:$0xff] }
 0x1f0   : > { %1163 = vst.msk [vmem:[#allocation3 + $0x20] sm:$0xff] %vm1160_vm6, %v1069_v21 }
 0x1f1   : > { %995 = vst.msk [vmem:[#allocation3 + $0x1b0] sm:$0xff] %vm967_vm5, %v926_v15  ;;  %v1065_v38 = vpop.permute.xlu0 %1064 }
 0x1f2   : > { %1161 = vst.msk [vmem:[#allocation3] sm:$0xff] %vm1160_vm6, %v1065_v38  ;;  %v11257_v38 = vld [vmem:[#allocation58_spill] sm:$0xff] }
 0x1f5   : > { %1269 = vrot.lane.b32.xlu2 %v11239_v61, %s7245_s22  ;;  %1273 = vrot.lane.b32.xlu1 %v11240_v27, %s7245_s22  ;;  %v1389_v27 = vld [vmem:[#allocation2 + $0x48] sm:$0xff] }
 0x1f7   : > { %v1075_v22 = vpop.permute.xlu2 %1074  ;;  %1283 = vrot.lane.b32.xlu0 %v11241_v44, %s7245_s22  ;;  %v932_v28 = vpop.permute.xlu1 %931 }
 0x1f8   : > { %1166 = vst.msk [vmem:[#allocation3 + $0x50] sm:$0xff] %vm1160_vm6, %v1075_v22  ;;  %v11258_v22 = vld [vmem:[#allocation63_spill] sm:$0xff] }
 0x1f9   : > { %998 = vst.msk [vmem:[#allocation3 + $0x1e0] sm:$0xff] %vm967_vm5, %v932_v28  ;;  %v1071_v33 = vpop.permute.xlu0 %1070  ;;  %v11259_v28 = vld [vmem:[#allocation61_spill] sm:$0xff]  ;;  %vm4799_vm5 = vcmask 228544  }
 0x1fa   : > { %1164 = vst.msk [vmem:[#allocation3 + $0x30] sm:$0xff] %vm1160_vm6, %v1071_v33  ;;  %v1223_v33 = vld [vmem:[#allocation2 + $0x182] sm:$0xff] }
 0x1fd   : > { %1275 = vrot.lane.b32.xlu2 %v11242_v49, %s7245_s22  ;;  %1279 = vrot.lane.b32.xlu1 %v11243_v39, %s7245_s22  ;;  %v1387_v39 = vld [vmem:[#allocation2 + $0x30] sm:$0xff] }
 0x1ff   : > { %v1081_v34 = vpop.permute.xlu2 %1080  ;;  %1289 = vrot.lane.b32.xlu0 %v11244_v53, %s7245_s22  ;;  %v1067_v40 = vpop.permute.xlu1 %1066 }
 0x200   : > { %1169 = vst.msk [vmem:[#allocation3 + $0x80] sm:$0xff] %vm1160_vm6, %v1081_v34 }
 0x201   : > { %1162 = vst.msk [vmem:[#allocation3 + $0x10] sm:$0xff] %vm1160_vm6, %v1067_v40  ;;  %v1077_v45 = vpop.permute.xlu0 %1076  ;;  %v1388_v40 = vld [vmem:[#allocation2 + $0x38] sm:$0xff] }
 0x202   : > { %1167 = vst.msk [vmem:[#allocation3 + $0x60] sm:$0xff] %vm1160_vm6, %v1077_v45 }
 0x205   : > { %1281 = vrot.lane.b32.xlu2 %v11245_v56, %s7245_s22  ;;  %1285 = vrot.lane.b32.xlu1 %v11246_v50, %s7245_s22 }
 0x207   : > { %v1087_v46 = vpop.permute.xlu2 %1086  ;;  %1295 = vrot.lane.b32.xlu0 %v11247_v54, %s7245_s22  ;;  %v1073_v51 = vpop.permute.xlu1 %1072 }
 0x208   : > { %1172 = vst.msk [vmem:[#allocation3 + $0xb0] sm:$0xff] %vm1160_vm6, %v1087_v46 }
 0x209   : > { %1165 = vst.msk [vmem:[#allocation3 + $0x40] sm:$0xff] %vm1160_vm6, %v1073_v51  ;;  %v1083_v1 = vpop.permute.xlu0 %1082 }
 0x20a   : > { %1170 = vst.msk [vmem:[#allocation3 + $0x90] sm:$0xff] %vm1160_vm6, %v1083_v1 }
 0x20d   : > { %1287 = vrot.lane.b32.xlu2 %v11248_v57, %s7245_s22  ;;  %1291 = vrot.lane.b32.xlu1 %v11249_v0, %s7245_s22 }
 0x20f   : > { %v1093_v55 = vpop.permute.xlu2 %1092  ;;  %1301 = vrot.lane.b32.xlu0 %v11250_v29, %s7245_s22  ;;  %v1079_v36 = vpop.permute.xlu1 %1078 }
 0x210   : > { %1175 = vst.msk [vmem:[#allocation3 + $0xe0] sm:$0xff] %vm1160_vm6, %v1093_v55 }
 0x211   : > { %1168 = vst.msk [vmem:[#allocation3 + $0x70] sm:$0xff] %vm1160_vm6, %v1079_v36  ;;  %v1089_v42 = vpop.permute.xlu0 %1088 }
 0x212   : > { %1173 = vst.msk [vmem:[#allocation3 + $0xc0] sm:$0xff] %vm1160_vm6, %v1089_v42 }
 0x215   : > { %1293 = vrot.lane.b32.xlu2 %v11251_v58, %s7245_s22  ;;  %1297 = vrot.lane.b32.xlu1 %v11252_v63, %s7245_s22 }
 0x217   : > { %v1099_v43 = vpop.permute.xlu2 %1098  ;;  %1307 = vrot.lane.b32.xlu0 %v11253_v37, %s7245_s22  ;;  %v1085_v6 = vpop.permute.xlu1 %1084 }
 0x218   : > { %1178 = vst.msk [vmem:[#allocation3 + $0x110] sm:$0xff] %vm1160_vm6, %v1099_v43 }
 0x219   : > { %1171 = vst.msk [vmem:[#allocation3 + $0xa0] sm:$0xff] %vm1160_vm6, %v1085_v6  ;;  %v1095_v62 = vpop.permute.xlu0 %1094 }
 0x21a   : > { %1176 = vst.msk [vmem:[#allocation3 + $0xf0] sm:$0xff] %vm1160_vm6, %v1095_v62  ;;  %v1580_v62 = vld [vmem:[#allocation2 + $0x31] sm:$0xff] }
 0x21d   : > { %1299 = vrot.lane.b32.xlu2 %v11254_v52, %s7245_s22  ;;  %1303 = vrot.lane.b32.xlu1 %v11255_v35, %s7245_s22 }
 0x21f   : > { %v1105_v26 = vpop.permute.xlu2 %1104  ;;  %1313 = vrot.lane.b32.xlu0 %v8032_v30, %s7245_s22  ;;  %v1091_v3 = vpop.permute.xlu1 %1090 }
 0x220   : > { %1181 = vst.msk [vmem:[#allocation3 + $0x140] sm:$0xff] %vm1160_vm6, %v1105_v26  ;;  %v1583_v26 = vld [vmem:[#allocation2 + $0x51] sm:$0xff] }
 0x221   : > { %1174 = vst.msk [vmem:[#allocation3 + $0xd0] sm:$0xff] %vm1160_vm6, %v1091_v3  ;;  %v1101_v21 = vpop.permute.xlu0 %1100  ;;  %v1418_v3 = vld [vmem:[#allocation2 + $0x1a0] sm:$0xff] }
 0x222   : > { %1179 = vst.msk [vmem:[#allocation3 + $0x120] sm:$0xff] %vm1160_vm6, %v1101_v21 }
 0x225   : > { %1305 = vrot.lane.b32.xlu2 %v11256_v32, %s7245_s22  ;;  %1309 = vrot.lane.b32.xlu1 %v11257_v38, %s7245_s22  ;;  %v1586_v38 = vld [vmem:[#allocation2 + $0x79] sm:$0xff] }
 0x227   : > { %v1111_v15 = vpop.permute.xlu2 %1110  ;;  %1319 = vrot.lane.b32.xlu0 %v1224_v19, %s7245_s22  ;;  %v1097_v61 = vpop.permute.xlu1 %1096  ;;  %v8436_v19 = vld [vmem:[%s11090_s1 + $0x80] sm:$0xff] }
 0x228   : > { %1184 = vst.msk [vmem:[#allocation3 + $0x170] sm:$0xff] %vm1160_vm6, %v1111_v15  ;;  %v1581_v15 = vld [vmem:[#allocation2 + $0x39] sm:$0xff] }
 0x229   : > { %1177 = vst.msk [vmem:[#allocation3 + $0x100] sm:$0xff] %vm1160_vm6, %v1097_v61  ;;  %v1107_v30 = vpop.permute.xlu0 %1106 }
 0x22a   : > { %1182 = vst.msk [vmem:[#allocation3 + $0x150] sm:$0xff] %vm1160_vm6, %v1107_v30 }
 0x22d   : > { %1311 = vrot.lane.b32.xlu2 %v11258_v22, %s7245_s22  ;;  %1315 = vrot.lane.b32.xlu1 %v11259_v28, %s7245_s22  ;;  %v1774_v22 = vld [vmem:[#allocation2 + $0x3a] sm:$0xff] }
 0x22e   : > { %1806 = vst.msk [vmem:[#allocation3 + $0x18] sm:$0xff] %vm324_vm2, %v1774_v22  ;;  %v1913_v22 = vld [vmem:[%s11090_s1 + $0x60] sm:$0xff] }
 0x22f   : > { %v1117_v44 = vpop.permute.xlu2 %1116  ;;  %1455 = vrot.lane.b32.xlu0 %v1389_v27, %s7246_s23  ;;  %v1103_v49 = vpop.permute.xlu1 %1102  ;;  %v1582_v27 = vld [vmem:[#allocation2 + $0x49] sm:$0xff] }
 0x230   : > { %1187 = vst.msk [vmem:[#allocation3 + $0x1a0] sm:$0xff] %vm1160_vm6, %v1117_v44 }
 0x231   : > { %1180 = vst.msk [vmem:[#allocation3 + $0x130] sm:$0xff] %vm1160_vm6, %v1103_v49  ;;  %v1113_v34 = vpop.permute.xlu0 %1112  ;;  %v1589_v49 = vld [vmem:[#allocation2 + $0x99] sm:$0xff] }
 0x232   : > { %1185 = vst.msk [vmem:[#allocation3 + $0x180] sm:$0xff] %vm1160_vm6, %v1113_v34 }
 0x235   : > { %1317 = vrot.lane.b32.xlu2 %v1223_v33, %s7245_s22  ;;  %1451 = vrot.lane.b32.xlu1 %v1387_v39, %s7246_s23  ;;  %v1584_v33 = vld [vmem:[#allocation2 + $0x61] sm:$0xff] }
 0x236   : > { %v1840_v39 = vld [vmem:[#allocation3 + $0x18] sm:$0xff] }
 0x237   : > { %v1123_v53 = vpop.permute.xlu2 %1122  ;;  %1461 = vrot.lane.b32.xlu0 %v7821_v23, %s7246_s23  ;;  %v1109_v45 = vpop.permute.xlu1 %1108  ;;  %v1391_v23 = vld [vmem:[#allocation2 + $0x60] sm:$0xff] }
 0x238   : > { %1190 = vst.msk [vmem:[#allocation3 + $0x1d0] sm:$0xff] %vm1160_vm6, %v1123_v53  ;;  %v1775_v53 = vld [vmem:[#allocation2 + $0x4a] sm:$0xff] }
 0x239   : > { %1183 = vst.msk [vmem:[#allocation3 + $0x160] sm:$0xff] %vm1160_vm6, %v1109_v45  ;;  %v1119_v56 = vpop.permute.xlu0 %1118 }
 0x23a   : > { %1188 = vst.msk [vmem:[#allocation3 + $0x1b0] sm:$0xff] %vm1160_vm6, %v1119_v56 }
 0x23b   : > { %1807 = vst.msk [vmem:[#allocation3 + $0x28] sm:$0xff] %vm324_vm2, %v1775_v53  ;;  %v1605_v53 = vld [vmem:[#allocation2 + $0x159] sm:$0xff] }
 0x23d   : > { %1453 = vrot.lane.b32.xlu2 %v1388_v40, %s7246_s23  ;;  %1457 = vrot.lane.b32.xlu1 %v7830_v17, %s7246_s23  ;;  %v1394_v17 = vld [vmem:[#allocation2 + $0x80] sm:$0xff]  ;;  %v1585_v40 = vld [vmem:[#allocation2 + $0x69] sm:$0xff] }
 0x23f   : > { %v1258_v46 = vpop.permute.xlu2 %1257  ;;  %1467 = vrot.lane.b32.xlu0 %v7847_v31, %s7246_s23  ;;  %v1115_v50 = vpop.permute.xlu1 %1114 }
 0x240   : > { %1354 = vst.msk [vmem:[#allocation3] sm:$0xff] %vm1353_vm7, %v1258_v46  ;;  %v1587_v46 = vld [vmem:[#allocation2 + $0x81] sm:$0xff] }
 0x241   : > { %1186 = vst.msk [vmem:[#allocation3 + $0x190] sm:$0xff] %vm1160_vm6, %v1115_v50  ;;  %v1125_v54 = vpop.permute.xlu0 %1124 }
 0x242   : > { %1191 = vst.msk [vmem:[#allocation3 + $0x1e0] sm:$0xff] %vm1160_vm6, %v1125_v54  ;;  %v1842_v54 = vld [vmem:[#allocation3 + $0x28] sm:$0xff] }
 0x245   : > { %1459 = vrot.lane.b32.xlu2 %v1391_v23, %s7246_s23  ;;  %1463 = vrot.lane.b32.xlu1 %v7851_v24, %s7246_s23  ;;  %v1397_v24 = vld [vmem:[#allocation2 + $0xa8] sm:$0xff] }
 0x246   : > { %v1592_v23 = vld [vmem:[#allocation2 + $0xc1] sm:$0xff] }
 0x247   : > { %v1264_v51 = vpop.permute.xlu2 %1263  ;;  %1473 = vrot.lane.b32.xlu0 %v7872_v11, %s7246_s23  ;;  %v1121_v31 = vpop.permute.xlu1 %1120 }
 0x248   : > { %1357 = vst.msk [vmem:[#allocation3 + $0x30] sm:$0xff] %vm1353_vm7, %v1264_v51  ;;  %v1776_v51 = vld [vmem:[#allocation2 + $0x52] sm:$0xff] }
 0x249   : > { %1189 = vst.msk [vmem:[#allocation3 + $0x1c0] sm:$0xff] %vm1160_vm6, %v1121_v31  ;;  %v1260_v1 = vpop.permute.xlu0 %1259 }
 0x24a   : > { %1355 = vst.msk [vmem:[#allocation3 + $0x10] sm:$0xff] %vm1353_vm7, %v1260_v1 }
 0x24b   : > { %1808 = vst.msk [vmem:[#allocation3 + $0x38] sm:$0xff] %vm324_vm2, %v1776_v51 }
 0x24d   : > { %1465 = vrot.lane.b32.xlu2 %v1394_v17, %s7246_s23  ;;  %1469 = vrot.lane.b32.xlu1 %v7884_v18, %s7246_s23  ;;  %v1400_v18 = vld [vmem:[#allocation2 + $0xc8] sm:$0xff]  ;;  %v1588_v17 = vld [vmem:[#allocation2 + $0x91] sm:$0xff] }
 0x24f   : > { %v1270_v57 = vpop.permute.xlu2 %1269  ;;  %1479 = vrot.lane.b32.xlu0 %v7899_v8, %s7246_s23  ;;  %v1127_v11 = vpop.permute.xlu1 %1126 }
 0x250   : > { %1360 = vst.msk [vmem:[#allocation3 + $0x60] sm:$0xff] %vm1353_vm7, %v1270_v57  ;;  %v1590_v57 = vld [vmem:[#allocation2 + $0xa9] sm:$0xff] }
 0x251   : > { %1192 = vst.msk [vmem:[#allocation3 + $0x1f0] sm:$0xff] %vm1160_vm6, %v1127_v11  ;;  %v1266_v55 = vpop.permute.xlu0 %1265  ;;  %vm4992_vm6 = vcmask 359744  }
 0x252   : > { %1358 = vst.msk [vmem:[#allocation3 + $0x40] sm:$0xff] %vm1353_vm7, %v1266_v55  ;;  %v1844_v55 = vld [vmem:[#allocation3 + $0x38] sm:$0xff] }
 0x255   : > { %1471 = vrot.lane.b32.xlu2 %v1397_v24, %s7246_s23  ;;  %1475 = vrot.lane.b32.xlu1 %v7911_v5, %s7246_s23  ;;  %v1403_v5 = vld [vmem:[#allocation2 + $0xf0] sm:$0xff]  ;;  %v1595_v24 = vld [vmem:[#allocation2 + $0xe1] sm:$0xff] }
 0x257   : > { %v1276_v0 = vpop.permute.xlu2 %1275  ;;  %1485 = vrot.lane.b32.xlu0 %v7926_v9, %s7246_s23  ;;  %v1262_v8 = vpop.permute.xlu1 %1261 }
 0x258   : > { %1363 = vst.msk [vmem:[#allocation3 + $0x90] sm:$0xff] %vm1353_vm7, %v1276_v0  ;;  %v1777_v0 = vld [vmem:[#allocation2 + $0x62] sm:$0xff] }
 0x259   : > { %1356 = vst.msk [vmem:[#allocation3 + $0x20] sm:$0xff] %vm1353_vm7, %v1262_v8  ;;  %v1272_v29 = vpop.permute.xlu0 %1271 }
 0x25a   : > { %1361 = vst.msk [vmem:[#allocation3 + $0x70] sm:$0xff] %vm1353_vm7, %v1272_v29 }
 0x25b   : > { %1809 = vst.msk [vmem:[#allocation3 + $0x48] sm:$0xff] %vm324_vm2, %v1777_v0  ;;  %v1783_v0 = vld [vmem:[#allocation2 + $0xaa] sm:$0xff] }
 0x25c   : > { %1815 = vst.msk [vmem:[#allocation3 + $0xa8] sm:$0xff] %vm324_vm2, %v1783_v0 }
 0x25d   : > { %1477 = vrot.lane.b32.xlu2 %v1400_v18, %s7246_s23  ;;  %1481 = vrot.lane.b32.xlu1 %v7938_v20, %s7246_s23  ;;  %v1406_v20 = vld [vmem:[#allocation2 + $0x110] sm:$0xff] }
 0x25e   : > { %v1591_v18 = vld [vmem:[#allocation2 + $0xb1] sm:$0xff] }
 0x25f   : > { %v1282_v36 = vpop.permute.xlu2 %1281  ;;  %1491 = vrot.lane.b32.xlu0 %v7953_v4, %s7246_s23  ;;  %v1268_v9 = vpop.permute.xlu1 %1267 }
 0x260   : > { %1366 = vst.msk [vmem:[#allocation3 + $0xc0] sm:$0xff] %vm1353_vm7, %v1282_v36  ;;  %v1593_v36 = vld [vmem:[#allocation2 + $0xc9] sm:$0xff] }
 0x261   : > { %1359 = vst.msk [vmem:[#allocation3 + $0x50] sm:$0xff] %vm1353_vm7, %v1268_v9  ;;  %v1278_v42 = vpop.permute.xlu0 %1277 }
 0x262   : > { %1364 = vst.msk [vmem:[#allocation3 + $0xa0] sm:$0xff] %vm1353_vm7, %v1278_v42  ;;  %v1846_v42 = vld [vmem:[#allocation3 + $0x48] sm:$0xff] }
 0x265   : > { %1483 = vrot.lane.b32.xlu2 %v1403_v5, %s7246_s23  ;;  %1487 = vrot.lane.b32.xlu1 %v7965_v14, %s7246_s23  ;;  %v1409_v14 = vld [vmem:[#allocation2 + $0x138] sm:$0xff]  ;;  %v1598_v5 = vld [vmem:[#allocation2 + $0x109] sm:$0xff] }
 0x267   : > { %v1288_v58 = vpop.permute.xlu2 %1287  ;;  %1497 = vrot.lane.b32.xlu0 %v7980_v10, %s7246_s23  ;;  %v1274_v4 = vpop.permute.xlu1 %1273 }
 0x268   : > { %1369 = vst.msk [vmem:[#allocation3 + $0xf0] sm:$0xff] %vm1353_vm7, %v1288_v58  ;;  %v1778_v58 = vld [vmem:[#allocation2 + $0x6a] sm:$0xff] }
 0x269   : > { %1362 = vst.msk [vmem:[#allocation3 + $0x80] sm:$0xff] %vm1353_vm7, %v1274_v4  ;;  %v1284_v43 = vpop.permute.xlu0 %1283 }
 0x26a   : > { %1367 = vst.msk [vmem:[#allocation3 + $0xd0] sm:$0xff] %vm1353_vm7, %v1284_v43 }
 0x26b   : > { %1810 = vst.msk [vmem:[#allocation3 + $0x58] sm:$0xff] %vm324_vm2, %v1778_v58  ;;  %v1858_v58 = vld [vmem:[#allocation3 + $0xa8] sm:$0xff] }
 0x26d   : > { %1489 = vrot.lane.b32.xlu2 %v1406_v20, %s7246_s23  ;;  %1493 = vrot.lane.b32.xlu1 %v7992_v16, %s7246_s23  ;;  %v1594_v20 = vld [vmem:[#allocation2 + $0xd9] sm:$0xff] }
 0x26f   : > { %v1294_v63 = vpop.permute.xlu2 %1293  ;;  %1503 = vrot.lane.b32.xlu0 %v8007_v7, %s7246_s23  ;;  %v1280_v10 = vpop.permute.xlu1 %1279 }
 0x270   : > { %1372 = vst.msk [vmem:[#allocation3 + $0x120] sm:$0xff] %vm1353_vm7, %v1294_v63  ;;  %v1596_v63 = vld [vmem:[#allocation2 + $0xf1] sm:$0xff] }
 0x271   : > { %1365 = vst.msk [vmem:[#allocation3 + $0xb0] sm:$0xff] %vm1353_vm7, %v1280_v10  ;;  %v1290_v37 = vpop.permute.xlu0 %1289 }
 0x272   : > { %1370 = vst.msk [vmem:[#allocation3 + $0x100] sm:$0xff] %vm1353_vm7, %v1290_v37  ;;  %v1848_v37 = vld [vmem:[#allocation3 + $0x58] sm:$0xff] }
 0x275   : > { %1495 = vrot.lane.b32.xlu2 %v1409_v14, %s7246_s23  ;;  %1499 = vrot.lane.b32.xlu1 %v8009_v2, %s7246_s23  ;;  %v1601_v14 = vld [vmem:[#allocation2 + $0x129] sm:$0xff] }
 0x277   : > { %v1300_v6 = vpop.permute.xlu2 %1299  ;;  %1509 = vrot.lane.b32.xlu0 %v8147_v13, %s7246_s23  ;;  %v1286_v16 = vpop.permute.xlu1 %1285 }
 0x278   : > { %1375 = vst.msk [vmem:[#allocation3 + $0x150] sm:$0xff] %vm1353_vm7, %v1300_v6  ;;  %v1779_v6 = vld [vmem:[#allocation2 + $0x7a] sm:$0xff] }
 0x279   : > { %1368 = vst.msk [vmem:[#allocation3 + $0xe0] sm:$0xff] %vm1353_vm7, %v1286_v16  ;;  %v1296_v7 = vpop.permute.xlu0 %1295  ;;  %v1597_v16 = vld [vmem:[#allocation2 + $0xf9] sm:$0xff] }
 0x27a   : > { %1373 = vst.msk [vmem:[#allocation3 + $0x130] sm:$0xff] %vm1353_vm7, %v1296_v7 }
 0x27b   : > { %1811 = vst.msk [vmem:[#allocation3 + $0x68] sm:$0xff] %vm324_vm2, %v1779_v6 }
 0x27d   : > { %1501 = vrot.lane.b32.xlu2 %v7982_v48, %s7246_s23  ;;  %1505 = vrot.lane.b32.xlu1 %v8028_v47, %s7246_s23  ;;  %v1417_v48 = vld [vmem:[#allocation2 + $0x198] sm:$0xff] }
 0x27e   : > { %v1773_v47 = vld [vmem:[#allocation2 + $0x32] sm:$0xff] }
 0x27f   : > { %v1306_v52 = vpop.permute.xlu2 %1305  ;;  %1644 = vrot.lane.b32.xlu0 %v1580_v62, %s7247_s24  ;;  %v1292_v2 = vpop.permute.xlu1 %1291  ;;  %1805 = vst.msk [vmem:[#allocation3 + $0x8] sm:$0xff] %vm324_vm2, %v1773_v47 }
 0x280   : > { %1378 = vst.msk [vmem:[#allocation3 + $0x180] sm:$0xff] %vm1353_vm7, %v1306_v52  ;;  %v1599_v52 = vld [vmem:[#allocation2 + $0x111] sm:$0xff] }
 0x281   : > { %1371 = vst.msk [vmem:[#allocation3 + $0x110] sm:$0xff] %vm1353_vm7, %v1292_v2  ;;  %v1302_v13 = vpop.permute.xlu0 %1301  ;;  %v1604_v2 = vld [vmem:[#allocation2 + $0x151] sm:$0xff] }
 0x282   : > { %1376 = vst.msk [vmem:[#allocation3 + $0x160] sm:$0xff] %vm1353_vm7, %v1302_v13 }
 0x285   : > { %1507 = vrot.lane.b32.xlu2 %v8140_v12, %s7246_s23  ;;  %1511 = vrot.lane.b32.xlu1 %v1417_v48, %s7246_s23  ;;  %v8431_v12 = vld [vmem:[%s11090_s1 + $0x88] sm:$0xff]  ;;  %v1850_v48 = vld [vmem:[#allocation3 + $0x68] sm:$0xff] }
 0x286   : > { %2142 = vmatpush.msra.mxu1 %v8431_v12  ;;  %v1838_v30 = vld [vmem:[#allocation3 + $0x8] sm:$0xff] }
 0x287   : > { %v1312_v35 = vpop.permute.xlu2 %1311  ;;  %1650 = vrot.lane.b32.xlu0 %v1583_v26, %s7247_s24  ;;  %v1298_v21 = vpop.permute.xlu1 %1297  ;;  %v1780_v26 = vld [vmem:[#allocation2 + $0x82] sm:$0xff] }
 0x288   : > { %1381 = vst.msk [vmem:[#allocation3 + $0x1b0] sm:$0xff] %vm1353_vm7, %v1312_v35  ;;  %2143 = vmatpush.msra.mxu1 %v8436_v19  ;;  %v1600_v35 = vld [vmem:[#allocation2 + $0x121] sm:$0xff] }
 0x289   : > { %1374 = vst.msk [vmem:[#allocation3 + $0x140] sm:$0xff] %vm1353_vm7, %v1298_v21  ;;  %v1308_v32 = vpop.permute.xlu0 %1307  ;;  %7023 = vmatmul.msk.f32.vlgmr.msra.gmra.mxu1 %vm171_vm0, %v1838_v30  ;;  %v1916_v21 = vld [vmem:[%s11090_s1 + $0x78] sm:$0xff] }
 0x28a   : > { %1379 = vst.msk [vmem:[#allocation3 + $0x190] sm:$0xff] %vm1353_vm7, %v1308_v32  ;;  %v1915_v32 = vld [vmem:[%s11090_s1 + $0x70] sm:$0xff]  ;;  %2015 = vmatpush.msra.mxu0 %v1916_v21  ;;  %7191 = vmatpush.msra.mxu2 %v1916_v21 }
 0x28b   : > { %1812 = vst.msk [vmem:[#allocation3 + $0x78] sm:$0xff] %vm324_vm2, %v1780_v26  ;;  %v1607_v30 = vld [vmem:[#allocation2 + $0x171] sm:$0xff] }
 0x28c   : > { %2016 = vmatpush.msra.mxu0 %v1915_v32  ;;  %7192 = vmatpush.msra.mxu2 %v1915_v32 }
 0x28d   : > { %1513 = vrot.lane.b32.xlu2 %v1418_v3, %s7246_s23  ;;  %1646 = vrot.lane.b32.xlu1 %v1581_v15, %s7247_s24  ;;  %v1602_v15 = vld [vmem:[#allocation2 + $0x139] sm:$0xff] }
 0x28f   : > { %v1318_v61 = vpop.permute.xlu2 %1317  ;;  %1656 = vrot.lane.b32.xlu0 %v1586_v38, %s7247_s24  ;;  %v1304_v44 = vpop.permute.xlu1 %1303  ;;  %v1914_v38 = vld [vmem:[%s11090_s1 + $0x68] sm:$0xff] }
 0x290   : > { %1384 = vst.msk [vmem:[#allocation3 + $0x1e0] sm:$0xff] %vm1353_vm7, %v1318_v61  ;;  %2017 = vmatpush.msra.mxu0 %v1914_v38  ;;  %7193 = vmatpush.msra.mxu2 %v1914_v38 }
 0x291   : > { %1377 = vst.msk [vmem:[#allocation3 + $0x170] sm:$0xff] %vm1353_vm7, %v1304_v44  ;;  %v1314_v28 = vpop.permute.xlu0 %1313  ;;  %7024 = vmatmul.msk.f32.gmra.mxu1 %vm171_vm0, %v1840_v39  ;;  %v1781_v44 = vld [vmem:[#allocation2 + $0x92] sm:$0xff] }
 0x292   : > { %1382 = vst.msk [vmem:[#allocation3 + $0x1c0] sm:$0xff] %vm1353_vm7, %v1314_v28  ;;  %v1603_v28 = vld [vmem:[#allocation2 + $0x141] sm:$0xff]  ;;  %2018 = vmatpush.msra.mxu0 %v1913_v22  ;;  %v1911_v39 = vld [vmem:[%s11090_s1 + $0x50] sm:$0xff]  ;;  %7194 = vmatpush.msra.mxu2 %v1913_v22 }
 0x293   : > { %1813 = vst.msk [vmem:[#allocation3 + $0x88] sm:$0xff] %vm324_vm2, %v1781_v44 }
 0x295   : > { %1648 = vrot.lane.b32.xlu2 %v1582_v27, %s7247_s24  ;;  %1652 = vrot.lane.b32.xlu1 %v1584_v33, %s7247_s24  ;;  %v1852_v27 = vld [vmem:[#allocation3 + $0x78] sm:$0xff] }
 0x297   : > { %v1454_v34 = vpop.permute.xlu2 %1453  ;;  %1662 = vrot.lane.b32.xlu0 %v1589_v49, %s7247_s24  ;;  %v1310_v45 = vpop.permute.xlu1 %1309 }
 0x298   : > { %1549 = vst.msk [vmem:[#allocation3 + $0x10] sm:$0xff] %vm1547_vm8, %v1454_v34  ;;  %v1912_v34 = vld [vmem:[%s11090_s1 + $0x58] sm:$0xff] }
 0x299   : > { %1380 = vst.msk [vmem:[#allocation3 + $0x1a0] sm:$0xff] %vm1353_vm7, %v1310_v45  ;;  %v1320_v56 = vpop.permute.xlu0 %1319  ;;  %7025 = vmatmul.msk.f32.gmra.mxu1 %vm171_vm0, %v1842_v54  ;;  %2019 = vmatpush.msra.mxu0 %v1912_v34 }
 0x29a   : > { %1385 = vst.msk [vmem:[#allocation3 + $0x1f0] sm:$0xff] %vm1353_vm7, %v1320_v56  ;;  %v1909_v56 = vld [vmem:[%s11090_s1 + $0x40] sm:$0xff]  ;;  %7195 = vmatpush.msra.mxu2 %v1912_v34 }
 0x29b   : > { %2020 = vmatpush.msra.mxu0 %v1911_v39 }
 0x29c   : > { %7196 = vmatpush.msra.mxu2 %v1911_v39 }
 0x29d   : > { %1654 = vrot.lane.b32.xlu2 %v1585_v40, %s7247_s24  ;;  %1658 = vrot.lane.b32.xlu1 %v1587_v46, %s7247_s24  ;;  %v1910_v40 = vld [vmem:[%s11090_s1 + $0x48] sm:$0xff]  ;;  %v1854_v46 = vld [vmem:[#allocation3 + $0x88] sm:$0xff] }
 0x29e   : > { %2021 = vmatpush.msra.mxu0 %v1910_v40  ;;  %7197 = vmatpush.msra.mxu2 %v1910_v40 }
 0x29f   : > { %v1460_v50 = vpop.permute.xlu2 %1459  ;;  %1668 = vrot.lane.b32.xlu0 %v1592_v23, %s7247_s24  ;;  %v1316_v31 = vpop.permute.xlu1 %1315  ;;  %v1782_v23 = vld [vmem:[#allocation2 + $0x9a] sm:$0xff] }
 0x2a0   : > { %1552 = vst.msk [vmem:[#allocation3 + $0x40] sm:$0xff] %vm1547_vm8, %v1460_v50  ;;  %v1606_v50 = vld [vmem:[#allocation2 + $0x169] sm:$0xff]  ;;  %2022 = vmatpush.msra.mxu0 %v1909_v56  ;;  %7198 = vmatpush.msra.mxu2 %v1909_v56 }
 0x2a1   : > { %1383 = vst.msk [vmem:[#allocation3 + $0x1d0] sm:$0xff] %vm1353_vm7, %v1316_v31  ;;  %v1456_v1 = vpop.permute.xlu0 %1455  ;;  %7026 = vmatmul.msk.f32.gmra.mxu1 %vm171_vm0, %v1844_v55  ;;  %v1907_v31 = vld [vmem:[%s11090_s1 + $0x30] sm:$0xff]  ;;  %vm5185_vm7 = vcmask 490944  }
 0x2a2   : > { %1550 = vst.msk [vmem:[#allocation3 + $0x20] sm:$0xff] %vm1547_vm8, %v1456_v1  ;;  %v1610_v1 = vld [vmem:[#allocation2 + $0x199] sm:$0xff]  ;;  %v1791_v56 = vld [vmem:[#allocation2 + $0x10a] sm:$0xff] }
 0x2a3   : > { %1814 = vst.msk [vmem:[#allocation3 + $0x98] sm:$0xff] %vm324_vm2, %v1782_v23 }
 0x2a4   : > { %1823 = vst.msk [vmem:[#allocation3 + $0x128] sm:$0xff] %vm324_vm2, %v1791_v56  ;;  %v1802_v56 = vld [vmem:[#allocation2 + $0x18a] sm:$0xff] }
 0x2a5   : > { %1660 = vrot.lane.b32.xlu2 %v1588_v17, %s7247_s24  ;;  %1664 = vrot.lane.b32.xlu1 %v1590_v57, %s7247_s24  ;;  %v1908_v17 = vld [vmem:[%s11090_s1 + $0x38] sm:$0xff]  ;;  %v1906_v57 = vld [vmem:[%s11090_s1 + $0x28] sm:$0xff]  ;;  %1834 = vst.msk [vmem:[#allocation3 + $0x1d8] sm:$0xff] %vm324_vm2, %v1802_v56 }
 0x2a6   : > { %2023 = vmatpush.msra.mxu0 %v1908_v17  ;;  %7199 = vmatpush.msra.mxu2 %v1908_v17  ;;  %v1792_v17 = vld [vmem:[#allocation2 + $0x112] sm:$0xff] }
 0x2a7   : > { %v1466_v11 = vpop.permute.xlu2 %1465  ;;  %1674 = vrot.lane.b32.xlu0 %v1595_v24, %s7247_s24  ;;  %v1452_v8 = vpop.permute.xlu1 %1451  ;;  %1824 = vst.msk [vmem:[#allocation3 + $0x138] sm:$0xff] %vm324_vm2, %v1792_v17  ;;  %v1803_v17 = vld [vmem:[#allocation2 + $0x19a] sm:$0xff] }
 0x2a8   : > { %1555 = vst.msk [vmem:[#allocation3 + $0x70] sm:$0xff] %vm1547_vm8, %v1466_v11  ;;  %2024 = vmatpush.msra.mxu0 %v1907_v31  ;;  %v1905_v11 = vld [vmem:[%s11090_s1 + $0x20] sm:$0xff]  ;;  %7200 = vmatpush.msra.mxu2 %v1907_v31 }
 0x2a9   : > { %1548 = vst.msk [vmem:[#allocation3] sm:$0xff] %vm1547_vm8, %v1452_v8  ;;  %v1462_v29 = vpop.permute.xlu0 %1461  ;;  %7027 = vmatmul.msk.f32.gmra.mxu1 %vm171_vm0, %v1846_v42  ;;  %v1901_v42 = vld [vmem:[%s11090_s1] sm:$0xff] }
 0x2aa   : > { %1553 = vst.msk [vmem:[#allocation3 + $0x50] sm:$0xff] %vm1547_vm8, %v1462_v29  ;;  %2025 = vmatpush.msra.mxu0 %v1906_v57  ;;  %v1856_v55 = vld [vmem:[#allocation3 + $0x98] sm:$0xff]  ;;  %v1904_v29 = vld [vmem:[%s11090_s1 + $0x18] sm:$0xff]  ;;  %7201 = vmatpush.msra.mxu2 %v1906_v57 }
 0x2ab   : > { %1835 = vst.msk [vmem:[#allocation3 + $0x1e8] sm:$0xff] %vm324_vm2, %v1803_v17 }
 0x2ac   : > { %2026 = vmatpush.msra.mxu0 %v1905_v11  ;;  %7202 = vmatpush.msra.mxu2 %v1905_v11 }
 0x2ad   : > { %1666 = vrot.lane.b32.xlu2 %v1591_v18, %s7247_s24  ;;  %1670 = vrot.lane.b32.xlu1 %v1593_v36, %s7247_s24  ;;  %v1902_v36 = vld [vmem:[%s11090_s1 + $0x8] sm:$0xff] }
 0x2ae   : > { %2027 = vmatpush.msra.mxu0 %v1904_v29  ;;  %7203 = vmatpush.msra.mxu2 %v1904_v29  ;;  %v1876_v11 = vld [vmem:[#allocation3 + $0x138] sm:$0xff] }
 0x2af   : > { %v1472_v9 = vpop.permute.xlu2 %1471  ;;  %1680 = vrot.lane.b32.xlu0 %v1598_v5, %s7247_s24  ;;  %v1458_v4 = vpop.permute.xlu1 %1457  ;;  %v1611_v5 = vld [vmem:[#allocation2 + $0x1a1] sm:$0xff] }
 0x2b0   : > { %1558 = vst.msk [vmem:[#allocation3 + $0xa0] sm:$0xff] %vm1547_vm8, %v1472_v9 }
 0x2b1   : > { %1551 = vst.msk [vmem:[#allocation3 + $0x30] sm:$0xff] %vm1547_vm8, %v1458_v4  ;;  %v1468_v43 = vpop.permute.xlu0 %1467  ;;  %7028 = vmatmul.msk.f32.gmra.mxu1 %vm171_vm0, %v1848_v37 }
 0x2b2   : > { %1556 = vst.msk [vmem:[#allocation3 + $0x80] sm:$0xff] %vm1547_vm8, %v1468_v43 }
 0x2b5   : > { %1672 = vrot.lane.b32.xlu2 %v1594_v20, %s7247_s24  ;;  %1676 = vrot.lane.b32.xlu1 %v1596_v63, %s7247_s24 }
 0x2b7   : > { %v1478_v10 = vpop.permute.xlu2 %1477  ;;  %1686 = vrot.lane.b32.xlu0 %v1601_v14, %s7247_s24  ;;  %v1464_v7 = vpop.permute.xlu1 %1463  ;;  %v1785_v14 = vld [vmem:[#allocation2 + $0xc2] sm:$0xff] }
 0x2b8   : > { %1561 = vst.msk [vmem:[#allocation3 + $0xd0] sm:$0xff] %vm1547_vm8, %v1478_v10 }
 0x2b9   : > { %1554 = vst.msk [vmem:[#allocation3 + $0x60] sm:$0xff] %vm1547_vm8, %v1464_v7  ;;  %v1474_v62 = vpop.permute.xlu0 %1473  ;;  %7029 = vmatmul.msk.f32.gmra.mxu1 %vm171_vm0, %v1850_v48 }
 0x2ba   : > { %1559 = vst.msk [vmem:[#allocation3 + $0xb0] sm:$0xff] %vm1547_vm8, %v1474_v62 }
 0x2bb   : > { %1817 = vst.msk [vmem:[#allocation3 + $0xc8] sm:$0xff] %vm324_vm2, %v1785_v14 }
 0x2bd   : > { %1678 = vrot.lane.b32.xlu2 %v1597_v16, %s7247_s24  ;;  %1682 = vrot.lane.b32.xlu1 %v1599_v52, %s7247_s24  ;;  %v1786_v16 = vld [vmem:[#allocation2 + $0xca] sm:$0xff] }
 0x2be   : > { %1818 = vst.msk [vmem:[#allocation3 + $0xd8] sm:$0xff] %vm324_vm2, %v1786_v16 }
 0x2bf   : > { %v1484_v13 = vpop.permute.xlu2 %1483  ;;  %1692 = vrot.lane.b32.xlu0 %v1604_v2, %s7247_s24  ;;  %v1470_v47 = vpop.permute.xlu1 %1469  ;;  %v1787_v2 = vld [vmem:[#allocation2 + $0xda] sm:$0xff] }
 0x2c0   : > { %1564 = vst.msk [vmem:[#allocation3 + $0x100] sm:$0xff] %vm1547_vm8, %v1484_v13 }
 0x2c1   : > { %1557 = vst.msk [vmem:[#allocation3 + $0x90] sm:$0xff] %vm1547_vm8, %v1470_v47  ;;  %v1480_v3 = vpop.permute.xlu0 %1479  ;;  %7030 = vmatmul.msk.f32.gmra.mxu1 %vm171_vm0, %v1852_v27 }
 0x2c2   : > { %1562 = vst.msk [vmem:[#allocation3 + $0xe0] sm:$0xff] %vm1547_vm8, %v1480_v3  ;;  %v1788_v3 = vld [vmem:[#allocation2 + $0xe2] sm:$0xff] }
 0x2c3   : > { %1819 = vst.msk [vmem:[#allocation3 + $0xe8] sm:$0xff] %vm324_vm2, %v1787_v2 }
 0x2c4   : > { %1820 = vst.msk [vmem:[#allocation3 + $0xf8] sm:$0xff] %vm324_vm2, %v1788_v3  ;;  %v1798_v3 = vld [vmem:[#allocation2 + $0x15a] sm:$0xff] }
 0x2c5   : > { %1684 = vrot.lane.b32.xlu2 %v1600_v35, %s7247_s24  ;;  %1688 = vrot.lane.b32.xlu1 %v1602_v15, %s7247_s24  ;;  %v1864_v52 = vld [vmem:[#allocation3 + $0xd8] sm:$0xff]  ;;  %1830 = vst.msk [vmem:[#allocation3 + $0x198] sm:$0xff] %vm324_vm2, %v1798_v3 }
 0x2c7   : > { %v1490_v61 = vpop.permute.xlu2 %1489  ;;  %1698 = vrot.lane.b32.xlu0 %v1607_v30, %s7247_s24  ;;  %v1476_v33 = vpop.permute.xlu1 %1475 }
 0x2c8   : > { %1567 = vst.msk [vmem:[#allocation3 + $0x130] sm:$0xff] %vm1547_vm8, %v1490_v61  ;;  %v1789_v61 = vld [vmem:[#allocation2 + $0xf2] sm:$0xff] }
 0x2c9   : > { %1560 = vst.msk [vmem:[#allocation3 + $0xc0] sm:$0xff] %vm1547_vm8, %v1476_v33  ;;  %v1486_v49 = vpop.permute.xlu0 %1485  ;;  %7031 = vmatmul.msk.f32.gmra.mxu1 %vm171_vm0, %v1854_v46 }
 0x2ca   : > { %1565 = vst.msk [vmem:[#allocation3 + $0x110] sm:$0xff] %vm1547_vm8, %v1486_v49  ;;  %v1866_v47 = vld [vmem:[#allocation3 + $0xe8] sm:$0xff] }
 0x2cb   : > { %v1868_v38 = vld [vmem:[#allocation3 + $0xf8] sm:$0xff]  ;;  %1821 = vst.msk [vmem:[#allocation3 + $0x108] sm:$0xff] %vm324_vm2, %v1789_v61  ;;  %v1790_v49 = vld [vmem:[#allocation2 + $0xfa] sm:$0xff] }
 0x2cc   : > { %1822 = vst.msk [vmem:[#allocation3 + $0x118] sm:$0xff] %vm324_vm2, %v1790_v49  ;;  %v1888_v61 = vld [vmem:[#allocation3 + $0x198] sm:$0xff] }
 0x2cd   : > { %1690 = vrot.lane.b32.xlu2 %v1603_v28, %s7247_s24  ;;  %1694 = vrot.lane.b32.xlu1 %v1605_v53, %s7247_s24 }
 0x2cf   : > { %v1496_v45 = vpop.permute.xlu2 %1495  ;;  %v1482_v54 = vpop.permute.xlu1 %1481  ;;  %1704 = vrot.lane.b32.xlu0 %v1610_v1, %s7247_s24 }
 0x2d0   : > { %1570 = vst.msk [vmem:[#allocation3 + $0x160] sm:$0xff] %vm1547_vm8, %v1496_v45 }
 0x2d1   : > { %1563 = vst.msk [vmem:[#allocation3 + $0xf0] sm:$0xff] %vm1547_vm8, %v1482_v54  ;;  %v1492_v51 = vpop.permute.xlu0 %1491  ;;  %7032 = vmatmul.msk.f32.gmra.mxu1 %vm171_vm0, %v1856_v55  ;;  %v1793_v55 = vld [vmem:[#allocation2 + $0x122] sm:$0xff] }
 0x2d2   : > { %1568 = vst.msk [vmem:[#allocation3 + $0x140] sm:$0xff] %vm1547_vm8, %v1492_v51  ;;  %v1870_v33 = vld [vmem:[#allocation3 + $0x108] sm:$0xff] }
 0x2d3   : > { %v1872_v45 = vld [vmem:[#allocation3 + $0x118] sm:$0xff]  ;;  %v1874_v51 = vld [vmem:[#allocation3 + $0x128] sm:$0xff]  ;;  %1825 = vst.msk [vmem:[#allocation3 + $0x148] sm:$0xff] %vm324_vm2, %v1793_v55 }
 0x2d4   : > { %v1804_v55 = vld [vmem:[#allocation2 + $0x1a2] sm:$0xff] }
 0x2d5   : > { %1696 = vrot.lane.b32.xlu2 %v1606_v50, %s7247_s24  ;;  %1700 = vrot.lane.b32.xlu1 %v8225_v59, %s7247_s24  ;;  %v1903_v59 = vld [vmem:[%s11090_s1 + $0x10] sm:$0xff]  ;;  %1836 = vst.msk [vmem:[#allocation3 + $0x1f8] sm:$0xff] %vm324_vm2, %v1804_v55 }
 0x2d6   : > { %2028 = vmatpush.msra.mxu0 %v1903_v59  ;;  %7204 = vmatpush.msra.mxu2 %v1903_v59 }
 0x2d7   : > { %v1502_v24 = vpop.permute.xlu2 %1501  ;;  %v1488_v18 = vpop.permute.xlu1 %1487 }
 0x2d8   : > { %1573 = vst.msk [vmem:[#allocation3 + $0x190] sm:$0xff] %vm1547_vm8, %v1502_v24  ;;  %2029 = vmatpush.msra.mxu0 %v1902_v36  ;;  %7205 = vmatpush.msra.mxu2 %v1902_v36 }
 0x2d9   : > { %1566 = vst.msk [vmem:[#allocation3 + $0x120] sm:$0xff] %vm1547_vm8, %v1488_v18  ;;  %v1498_v8 = vpop.permute.xlu0 %1497  ;;  %7033 = vmatmul.msk.f32.gmra.mxu1 %vm171_vm0, %v1858_v58 }
 0x2da   : > { %1571 = vst.msk [vmem:[#allocation3 + $0x170] sm:$0xff] %vm1547_vm8, %v1498_v8  ;;  %2030 = vmatpush.msra.mxu0 %v1901_v42  ;;  %7206 = vmatpush.msra.mxu2 %v1901_v42  ;;  %v1878_v36 = vld [vmem:[#allocation3 + $0x148] sm:$0xff] }
 0x2dc   : > { %7207 = vmatpush.msrb.mxu2 %v8431_v12  ;;  %v1862_v12 = vld [vmem:[#allocation3 + $0xc8] sm:$0xff] }
 0x2dd   : > { %1702 = vrot.lane.b32.xlu2 %v8245_v60, %s7247_s24  ;;  %1706 = vrot.lane.b32.xlu1 %v1611_v5, %s7247_s24  ;;  %v1784_v60 = vld [vmem:[#allocation2 + $0xb2] sm:$0xff]  ;;  %v1794_v5 = vld [vmem:[#allocation2 + $0x12a] sm:$0xff] }
 0x2de   : > { %1816 = vst.msk [vmem:[#allocation3 + $0xb8] sm:$0xff] %vm324_vm2, %v1784_v60  ;;  %7208 = vmatpush.msrb.mxu2 %v8436_v19 }
 0x2df   : > { %v1508_v9 = vpop.permute.xlu2 %1507  ;;  %v1494_v20 = vpop.permute.xlu1 %1493  ;;  %1826 = vst.msk [vmem:[#allocation3 + $0x158] sm:$0xff] %vm324_vm2, %v1794_v5  ;;  %v1900_v5 = vld [vmem:[#allocation3 + $0x1f8] sm:$0xff] }
 0x2e0   : > { %1576 = vst.msk [vmem:[#allocation3 + $0x1c0] sm:$0xff] %vm1547_vm8, %v1508_v9 }
 0x2e1   : > { %1569 = vst.msk [vmem:[#allocation3 + $0x150] sm:$0xff] %vm1547_vm8, %v1494_v20  ;;  %v1504_v4 = vpop.permute.xlu0 %1503  ;;  %v1795_v20 = vld [vmem:[#allocation2 + $0x13a] sm:$0xff] }
 0x2e2   : > { %1574 = vst.msk [vmem:[#allocation3 + $0x1a0] sm:$0xff] %vm1547_vm8, %v1504_v4 }
 0x2e3   : > { %1827 = vst.msk [vmem:[#allocation3 + $0x168] sm:$0xff] %vm324_vm2, %v1795_v20 }
 0x2e4   : > { %3944 = vst.msk [vmem:[#allocation3 + $0x1f8] sm:$0xff] %vm2433_vm10, %v1804_v55 }
 0x2e5   : > { %v1860_v63 = vld [vmem:[#allocation3 + $0xb8] sm:$0xff] }
 0x2e6   : > { %7034 = vmatmul.msk.f32.gmra.mxu1 %vm171_vm0, %v1860_v63  ;;  %v1880_v60 = vld [vmem:[#allocation3 + $0x158] sm:$0xff] }
 0x2e7   : > { %v1514_v43 = vpop.permute.xlu2 %1513  ;;  %v1500_v10 = vpop.permute.xlu1 %1499 }
 0x2e8   : > { %1579 = vst.msk [vmem:[#allocation3 + $0x1f0] sm:$0xff] %vm1547_vm8, %v1514_v43 }
 0x2e9   : > { %1572 = vst.msk [vmem:[#allocation3 + $0x180] sm:$0xff] %vm1547_vm8, %v1500_v10  ;;  %v1510_v37 = vpop.permute.xlu0 %1509 }
 0x2ea   : > { %1577 = vst.msk [vmem:[#allocation3 + $0x1d0] sm:$0xff] %vm1547_vm8, %v1510_v37  ;;  %v1882_v37 = vld [vmem:[#allocation3 + $0x168] sm:$0xff] }
 0x2ee   : > { %7035 = vmatmul.msk.f32.gmra.mxu1 %vm171_vm0, %v1862_v12 }
 0x2ef   : > { %v1649_v6 = vpop.permute.xlu2 %1648  ;;  %v1506_v19 = vpop.permute.xlu1 %1505 }
 0x2f0   : > { %1743 = vst.msk [vmem:[#allocation3 + $0x20] sm:$0xff] %vm1740_vm9, %v1649_v6  ;;  %v1796_v6 = vld [vmem:[#allocation2 + $0x142] sm:$0xff] }
 0x2f1   : > { %1575 = vst.msk [vmem:[#allocation3 + $0x1b0] sm:$0xff] %vm1547_vm8, %v1506_v19  ;;  %v1645_v7 = vpop.permute.xlu0 %1644 }
 0x2f2   : > { %1741 = vst.msk [vmem:[#allocation3] sm:$0xff] %vm1740_vm9, %v1645_v7 }
 0x2f3   : > { %1828 = vst.msk [vmem:[#allocation3 + $0x178] sm:$0xff] %vm324_vm2, %v1796_v6 }
 0x2f6   : > { %7036 = vmatmul.msk.f32.gmra.mxu1 %vm171_vm0, %v1864_v52  ;;  %v1797_v52 = vld [vmem:[#allocation2 + $0x152] sm:$0xff] }
 0x2f7   : > { %v1655_v62 = vpop.permute.xlu2 %1654  ;;  %v1512_v13 = vpop.permute.xlu1 %1511  ;;  %v1841_v28 = vld [vmem:[#allocation3 + $0x20] sm:$0xff]  ;;  %1829 = vst.msk [vmem:[#allocation3 + $0x188] sm:$0xff] %vm324_vm2, %v1797_v52 }
 0x2f8   : > { %1746 = vst.msk [vmem:[#allocation3 + $0x50] sm:$0xff] %vm1740_vm9, %v1655_v62 }
 0x2f9   : > { %1578 = vst.msk [vmem:[#allocation3 + $0x1e0] sm:$0xff] %vm1547_vm8, %v1512_v13  ;;  %v1651_v48 = vpop.permute.xlu0 %1650  ;;  %v1837_v26 = vld [vmem:[#allocation3] sm:$0xff]  ;;  %vm5378_vm8 = vcmask 622144  }
 0x2fa   : > { %1744 = vst.msk [vmem:[#allocation3 + $0x30] sm:$0xff] %vm1740_vm9, %v1651_v48  ;;  %2031 = vmatmul.f32.vlgmr.msra.gmra.mxu0 %v1837_v26  ;;  %v1884_v62 = vld [vmem:[#allocation3 + $0x178] sm:$0xff] }
 0x2fe   : > { %7037 = vmatmul.msk.f32.gmra.mxu1 %vm171_vm0, %v1866_v47  ;;  %v1886_v47 = vld [vmem:[#allocation3 + $0x188] sm:$0xff] }
 0x2ff   : > { %v1661_v35 = vpop.permute.xlu2 %1660  ;;  %v1647_v21 = vpop.permute.xlu1 %1646  ;;  %v1847_v24 = vld [vmem:[#allocation3 + $0x50] sm:$0xff] }
 0x300   : > { %1749 = vst.msk [vmem:[#allocation3 + $0x80] sm:$0xff] %vm1740_vm9, %v1661_v35 }
 0x301   : > { %1742 = vst.msk [vmem:[#allocation3 + $0x10] sm:$0xff] %vm1740_vm9, %v1647_v21  ;;  %v1657_v32 = vpop.permute.xlu0 %1656  ;;  %v1843_v40 = vld [vmem:[#allocation3 + $0x30] sm:$0xff] }
 0x302   : > { %1747 = vst.msk [vmem:[#allocation3 + $0x60] sm:$0xff] %vm1740_vm9, %v1657_v32 }
 0x306   : > { %7038 = vmatmul.msk.f32.gmra.mxu1 %vm171_vm0, %v1868_v38  ;;  %v8629_v4 = vpop.f32.mrf.mxu1 }
 0x307   : > { %v1667_v15 = vpop.permute.xlu2 %1666  ;;  %v1653_v30 = vpop.permute.xlu1 %1652  ;;  %v1853_v16 = vld [vmem:[#allocation3 + $0x80] sm:$0xff] }
 0x308   : > { %1752 = vst.msk [vmem:[#allocation3 + $0xb0] sm:$0xff] %vm1740_vm9, %v1667_v15  ;;  %v1839_v22 = vld [vmem:[#allocation3 + $0x10] sm:$0xff] }
 0x309   : > { %1745 = vst.msk [vmem:[#allocation3 + $0x40] sm:$0xff] %vm1740_vm9, %v1653_v30  ;;  %2034 = vmatmul.f32.gmra.mxu0 %v1839_v22  ;;  %v1663_v27 = vpop.permute.xlu0 %1662  ;;  %v1849_v59 = vld [vmem:[#allocation3 + $0x60] sm:$0xff] }
 0x30a   : > { %1750 = vst.msk [vmem:[#allocation3 + $0x90] sm:$0xff] %vm1740_vm9, %v1663_v27  ;;  %v1799_v22 = vld [vmem:[#allocation2 + $0x16a] sm:$0xff] }
 0x30b   : > { %1831 = vst.msk [vmem:[#allocation3 + $0x1a8] sm:$0xff] %vm324_vm2, %v1799_v22 }
 0x30e   : > { %7039 = vmatmul.msk.f32.gmra.mxu1 %vm171_vm0, %v1870_v33  ;;  %v8638_v19 = vpop.f32.mrf.mxu1  ;;  %v1800_v33 = vld [vmem:[#allocation2 + $0x172] sm:$0xff] }
 0x30f   : > { %v1673_v44 = vpop.permute.xlu2 %1672  ;;  %v1659_v34 = vpop.permute.xlu1 %1658  ;;  %v1859_v30 = vld [vmem:[#allocation3 + $0xb0] sm:$0xff]  ;;  %1832 = vst.msk [vmem:[#allocation3 + $0x1b8] sm:$0xff] %vm324_vm2, %v1800_v33 }
 0x310   : > { %1755 = vst.msk [vmem:[#allocation3 + $0xe0] sm:$0xff] %vm1740_vm9, %v1673_v44  ;;  %v1845_v54 = vld [vmem:[#allocation3 + $0x40] sm:$0xff] }
 0x311   : > { %1748 = vst.msk [vmem:[#allocation3 + $0x70] sm:$0xff] %vm1740_vm9, %v1659_v34  ;;  %2037 = vmatmul.f32.gmra.mxu0 %v1841_v28  ;;  %v1669_v39 = vpop.permute.xlu0 %1668  ;;  %v1855_v2 = vld [vmem:[#allocation3 + $0x90] sm:$0xff] }
 0x312   : > { %1753 = vst.msk [vmem:[#allocation3 + $0xc0] sm:$0xff] %vm1740_vm9, %v1669_v39  ;;  %v1801_v39 = vld [vmem:[#allocation2 + $0x182] sm:$0xff] }
 0x313   : > { %1833 = vst.msk [vmem:[#allocation3 + $0x1c8] sm:$0xff] %vm324_vm2, %v1801_v39 }
 0x316   : > { %7040 = vmatmul.msk.f32.gmra.mxu1 %vm171_vm0, %v1872_v45  ;;  %v8645_v26 = vpop.f32.mrf.mxu1 }
 0x317   : > { %v1679_v53 = vpop.permute.xlu2 %1678  ;;  %v1665_v46 = vpop.permute.xlu1 %1664  ;;  %v1865_v45 = vld [vmem:[#allocation3 + $0xe0] sm:$0xff] }
 0x318   : > { %1758 = vst.msk [vmem:[#allocation3 + $0x110] sm:$0xff] %vm1740_vm9, %v1679_v53  ;;  %v1851_v58 = vld [vmem:[#allocation3 + $0x70] sm:$0xff] }
 0x319   : > { %1751 = vst.msk [vmem:[#allocation3 + $0xa0] sm:$0xff] %vm1740_vm9, %v1665_v46  ;;  %2040 = vmatmul.f32.gmra.mxu0 %v1843_v40  ;;  %v1675_v23 = vpop.permute.xlu0 %1674  ;;  %v1861_v28 = vld [vmem:[#allocation3 + $0xc0] sm:$0xff] }
 0x31a   : > { %1756 = vst.msk [vmem:[#allocation3 + $0xf0] sm:$0xff] %vm1740_vm9, %v1675_v23 }
 0x31e   : > { %7041 = vmatmul.msk.f32.gmra.mxu1 %vm171_vm0, %v1874_v51  ;;  %v8650_v15 = vpop.f32.mrf.mxu1 }
 0x31f   : > { %v1685_v50 = vpop.permute.xlu2 %1684  ;;  %v1671_v31 = vpop.permute.xlu1 %1670 }
 0x320   : > { %1761 = vst.msk [vmem:[#allocation3 + $0x140] sm:$0xff] %vm1740_vm9, %v1685_v50  ;;  %v1857_v21 = vld [vmem:[#allocation3 + $0xa0] sm:$0xff] }
 0x321   : > { %1754 = vst.msk [vmem:[#allocation3 + $0xd0] sm:$0xff] %vm1740_vm9, %v1671_v31  ;;  %2043 = vmatmul.f32.gmra.mxu0 %v1845_v54  ;;  %v1681_v1 = vpop.permute.xlu0 %1680  ;;  %v1867_v54 = vld [vmem:[#allocation3 + $0xf0] sm:$0xff] }
 0x322   : > { %1759 = vst.msk [vmem:[#allocation3 + $0x120] sm:$0xff] %vm1740_vm9, %v1681_v1 }
 0x326   : > { %7042 = vmatmul.msk.f32.gmra.mxu1 %vm171_vm0, %v1876_v11  ;;  %v8654_v44 = vpop.f32.mrf.mxu1 }
 0x327   : > { %v1691_v57 = vpop.permute.xlu2 %1690  ;;  %v1677_v0 = vpop.permute.xlu1 %1676 }
 0x328   : > { %1764 = vst.msk [vmem:[#allocation3 + $0x170] sm:$0xff] %vm1740_vm9, %v1691_v57  ;;  %v1863_v34 = vld [vmem:[#allocation3 + $0xd0] sm:$0xff] }
 0x329   : > { %1757 = vst.msk [vmem:[#allocation3 + $0x100] sm:$0xff] %vm1740_vm9, %v1677_v0  ;;  %2046 = vmatmul.f32.gmra.mxu0 %v1847_v24  ;;  %v1687_v18 = vpop.permute.xlu0 %1686  ;;  %v1890_v24 = vld [vmem:[#allocation3 + $0x1a8] sm:$0xff] }
 0x32a   : > { %1762 = vst.msk [vmem:[#allocation3 + $0x150] sm:$0xff] %vm1740_vm9, %v1687_v18  ;;  %v1898_v0 = vld [vmem:[#allocation3 + $0x1e8] sm:$0xff] }
 0x32b   : > { %3943 = vst.msk [vmem:[#allocation3 + $0x1e8] sm:$0xff] %vm2433_vm10, %v1803_v17 }
 0x32e   : > { %7043 = vmatmul.msk.f32.gmra.mxu1 %vm171_vm0, %v1878_v36  ;;  %v8657_v53 = vpop.f32.mrf.mxu1  ;;  %v1871_v36 = vld [vmem:[#allocation3 + $0x110] sm:$0xff] }
 0x32f   : > { %v1883_v8 = vld [vmem:[#allocation3 + $0x170] sm:$0xff]  ;;  %v1697_v29 = vpop.permute.xlu2 %1696  ;;  %v1683_v9 = vpop.permute.xlu1 %1682 }
 0x330   : > { %2100 = vmatmul.f32.vlgmr.msra.gmra.mxu2 %v1883_v8  ;;  %1767 = vst.msk [vmem:[#allocation3 + $0x1a0] sm:$0xff] %vm1740_vm9, %v1697_v29  ;;  %v1869_v11 = vld [vmem:[#allocation3 + $0x100] sm:$0xff]  ;;  %v1892_v8 = vld [vmem:[#allocation3 + $0x1b8] sm:$0xff] }
 0x331   : > { %1760 = vst.msk [vmem:[#allocation3 + $0x130] sm:$0xff] %vm1740_vm9, %v1683_v9  ;;  %2049 = vmatmul.f32.gmra.mxu0 %v1849_v59  ;;  %v1693_v42 = vpop.permute.xlu0 %1692  ;;  %v1879_v3 = vld [vmem:[#allocation3 + $0x150] sm:$0xff] }
 0x332   : > { %1765 = vst.msk [vmem:[#allocation3 + $0x180] sm:$0xff] %vm1740_vm9, %v1693_v42 }
 0x336   : > { %7044 = vmatmul.msk.f32.gmra.mxu1 %vm171_vm0, %v1880_v60  ;;  %v8661_v46 = vpop.f32.mrf.mxu1  ;;  %v1894_v60 = vld [vmem:[#allocation3 + $0x1c8] sm:$0xff] }
 0x337   : > { %v1689_v43 = vpop.permute.xlu1 %1688  ;;  %v1703_v10 = vpop.permute.xlu2 %1702  ;;  %v1889_v35 = vld [vmem:[#allocation3 + $0x1a0] sm:$0xff] }
 0x338   : > { %1763 = vst.msk [vmem:[#allocation3 + $0x160] sm:$0xff] %vm1740_vm9, %v1689_v43 }
 0x339   : > { %2052 = vmatmul.f32.gmra.mxu0 %v1851_v58  ;;  %v1885_v63 = vld [vmem:[#allocation3 + $0x180] sm:$0xff]  ;;  %v1699_v14 = vpop.permute.xlu0 %1698  ;;  %1770 = vst.msk [vmem:[#allocation3 + $0x1d0] sm:$0xff] %vm1740_vm9, %v1703_v10 }
 0x33a   : > { %2103 = vmatmul.f32.gmra.mxu2 %v1885_v63  ;;  %1768 = vst.msk [vmem:[#allocation3 + $0x1b0] sm:$0xff] %vm1740_vm9, %v1699_v14 }
 0x33e   : > { %7045 = vmatmul.msk.f32.gmra.mxu1 %vm171_vm0, %v1882_v37  ;;  %v8665_v57 = vpop.f32.mrf.mxu1  ;;  %v1896_v37 = vld [vmem:[#allocation3 + $0x1d8] sm:$0xff] }
 0x33f   : > { %v1695_v12 = vpop.permute.xlu1 %1694 }
 0x340   : > { %1766 = vst.msk [vmem:[#allocation3 + $0x190] sm:$0xff] %vm1740_vm9, %v1695_v12  ;;  %v1895_v49 = vld [vmem:[#allocation3 + $0x1d0] sm:$0xff] }
 0x341   : > { %2055 = vmatmul.f32.gmra.mxu0 %v1853_v16  ;;  %v1705_v7 = vpop.permute.xlu0 %1704  ;;  %v1891_v38 = vld [vmem:[#allocation3 + $0x1b0] sm:$0xff] }
 0x342   : > { %1771 = vst.msk [vmem:[#allocation3 + $0x1e0] sm:$0xff] %vm1740_vm9, %v1705_v7  ;;  %v1875_v12 = vld [vmem:[#allocation3 + $0x130] sm:$0xff] }
 0x346   : > { %7046 = vmatmul.msk.f32.gmra.mxu1 %vm171_vm0, %v1884_v62  ;;  %v8671_v29 = vpop.f32.mrf.mxu1 }
 0x347   : > { %v1887_v13 = vld [vmem:[#allocation3 + $0x190] sm:$0xff]  ;;  %v1701_v48 = vpop.permute.xlu1 %1700 }
 0x348   : > { %2106 = vmatmul.f32.gmra.mxu2 %v1887_v13  ;;  %1769 = vst.msk [vmem:[#allocation3 + $0x1c0] sm:$0xff] %vm1740_vm9, %v1701_v48 }
 0x349   : > { %2058 = vmatmul.f32.gmra.mxu0 %v1855_v2  ;;  %v1897_v40 = vld [vmem:[#allocation3 + $0x1e0] sm:$0xff] }
 0x34a   : > { %v1877_v2 = vld [vmem:[#allocation3 + $0x140] sm:$0xff] }
 0x34e   : > { %7047 = vmatmul.msk.f32.gmra.mxu1 %vm171_vm0, %v1886_v47  ;;  %v2172_v43 = vpop.f32.mrf.mxu1 }
 0x34f   : > { %v1707_v32 = vpop.permute.xlu1 %1706  ;;  %v1893_v27 = vld [vmem:[#allocation3 + $0x1c0] sm:$0xff] }
 0x350   : > { %2109 = vmatmul.f32.gmra.mxu2 %v1889_v35  ;;  %1772 = vst.msk [vmem:[#allocation3 + $0x1f0] sm:$0xff] %vm1740_vm9, %v1707_v32  ;;  %vm5571_vm9 = vcmask 753344  }
 0x351   : > { %2061 = vmatmul.f32.gmra.mxu0 %v1857_v21 }
 0x356   : > { %7048 = vmatmul.msk.f32.gmra.mxu1 %vm171_vm0, %v1888_v61 }
 0x357   : > { %v1899_v23 = vld [vmem:[#allocation3 + $0x1f0] sm:$0xff] }
 0x358   : > { %2112 = vmatmul.f32.gmra.mxu2 %v1891_v38 }
 0x359   : > { %2064 = vmatmul.f32.gmra.mxu0 %v1859_v30  ;;  %v1881_v30 = vld [vmem:[#allocation3 + $0x160] sm:$0xff] }
 0x360   : > { %2115 = vmatmul.f32.gmra.mxu2 %v1893_v27 }
 0x361   : > { %2067 = vmatmul.f32.gmra.mxu0 %v1861_v28 }
 0x368   : > { %2118 = vmatmul.f32.gmra.mxu2 %v1895_v49 }
 0x369   : > { %2070 = vmatmul.f32.gmra.mxu0 %v1863_v34 }
 0x370   : > { %2121 = vmatmul.f32.gmra.mxu2 %v1897_v40 }
 0x371   : > { %2073 = vmatmul.f32.gmra.mxu0 %v1865_v45 }
 0x377   : > { %v2032_v50 = vpop.f32.mrf.mxu0 }
 0x378   : > { %v2146_v51 = vadd.f32 %v8629_v4, %v2032_v50  ;;  %2124 = vmatmul.f32.gmra.mxu2 %v1899_v23  ;;  %v1873_v4 = vld [vmem:[#allocation3 + $0x120] sm:$0xff] }
 0x379   : > { %2076 = vmatmul.f32.gmra.mxu0 %v1867_v54 }
 0x37a   : > { %v2241_v31 = vmul.f32 0.2, %v2146_v51 }
 0x37c   : > { %v2273_v1 = vmax.f32 %v2146_v51, %v2241_v31 }
 0x37e   : > { %2337 = vrot.lane.b32.xlu2 %v2273_v1, %s7248_s27 }
 0x380   : > { %7049 = vmatmul.msk.f32.vlgmr.msrb.gmra.mxu2 %vm171_vm0, %v1890_v24 }
 0x381   : > { %2079 = vmatmul.f32.gmra.mxu0 %v1869_v11 }
 0x386   : > { %v2035_v18 = vpop.f32.mrf.mxu0 }
 0x387   : > { %v2149_v59 = vadd.f32 %v8638_v19, %v2035_v18  ;;  %v2175_v19 = vpop.f32.mrf.mxu1 }
 0x388   : > { %7050 = vmatmul.msk.f32.gmra.mxu2 %vm171_vm0, %v1892_v8 }
 0x389   : > { %v2242_v9 = vmul.f32 0.2, %v2149_v59  ;;  %2082 = vmatmul.f32.gmra.mxu0 %v1871_v36 }
 0x38b   : > { %v2274_v42 = vmax.f32 %v2149_v59, %v2242_v9 }
 0x38d   : > { %2339 = vrot.lane.b32.xlu0 %v2274_v42, %s7248_s27 }
 0x38e   : > { %v2038_v58 = vpop.f32.mrf.mxu0 }
 0x38f   : > { %v2152_v20 = vadd.f32 %v8645_v26, %v2038_v58  ;;  %v2178_v26 = vpop.f32.mrf.mxu1 }
 0x390   : > { %7051 = vmatmul.msk.f32.gmra.mxu2 %vm171_vm0, %v1894_v60 }
 0x391   : > { %v2243_v63 = vmul.f32 0.2, %v2152_v20  ;;  %2085 = vmatmul.f32.gmra.mxu0 %v1873_v4 }
 0x393   : > { %v2275_v14 = vmax.f32 %v2152_v20, %v2243_v63 }
 0x395   : > { %2341 = vrot.lane.b32.xlu1 %v2275_v14, %s7248_s27 }
 0x396   : > { %v2041_v10 = vpop.f32.mrf.mxu0 }
 0x397   : > { %v2155_v6 = vadd.f32 %v8650_v15, %v2041_v10  ;;  %v2181_v38 = vpop.f32.mrf.mxu1 }
 0x398   : > { %7052 = vmatmul.msk.f32.gmra.mxu2 %vm171_vm0, %v1896_v37 }
 0x399   : > { %v2244_v16 = vmul.f32 0.2, %v2155_v6  ;;  %2088 = vmatmul.f32.gmra.mxu0 %v1875_v12 }
 0x39b   : > { %v2276_v7 = vmax.f32 %v2155_v6, %v2244_v16 }
 0x39d   : > { %2343 = vrot.lane.b32.xlu2 %v2276_v7, %s7248_s27 }
 0x39e   : > { %v2044_v62 = vpop.f32.mrf.mxu0 }
 0x39f   : > { %v2158_v52 = vadd.f32 %v8654_v44, %v2044_v62  ;;  %v2184_v49 = vpop.f32.mrf.mxu1 }
 0x3a0   : > { %7053 = vmatmul.msk.f32.gmra.mxu2 %vm171_vm0, %v1898_v0 }
 0x3a1   : > { %v2245_v13 = vmul.f32 0.2, %v2158_v52  ;;  %2091 = vmatmul.f32.gmra.mxu0 %v1877_v2 }
 0x3a3   : > { %v2277_v48 = vmax.f32 %v2158_v52, %v2245_v13 }
 0x3a5   : > { %2345 = vrot.lane.b32.xlu0 %v2277_v48, %s7248_s27 }
 0x3a6   : > { %v2047_v35 = vpop.f32.mrf.mxu0 }
 0x3a7   : > { %v2161_v47 = vadd.f32 %v8657_v53, %v2047_v35 }
 0x3a8   : > { %7054 = vmatmul.msk.f32.gmra.mxu2 %vm171_vm0, %v1900_v5 }
 0x3a9   : > { %v2246_v21 = vmul.f32 0.2, %v2161_v47  ;;  %2094 = vmatmul.f32.gmra.mxu0 %v1879_v3 }
 0x3ab   : > { %v2278_v32 = vmax.f32 %v2161_v47, %v2246_v21 }
 0x3ad   : > { %2347 = vrot.lane.b32.xlu1 %v2278_v32, %s7248_s27 }
 0x3ae   : > { %v2050_v15 = vpop.f32.mrf.mxu0 }
 0x3af   : > { %v2164_v61 = vadd.f32 %v8661_v46, %v2050_v15  ;;  %v2187_v46 = vpop.f32.mrf.mxu1 }
 0x3b1   : > { %v2247_v22 = vmul.f32 0.2, %v2164_v61  ;;  %2097 = vmatmul.f32.gmra.mxu0 %v1881_v30 }
 0x3b3   : > { %v2279_v27 = vmax.f32 %v2164_v61, %v2247_v22  ;;  %v8692_v33 = vpop.f32.mrf.mxu2 }
 0x3b5   : > { %2349 = vrot.lane.b32.xlu2 %v2279_v27, %s7248_s27 }
 0x3b6   : > { %v2053_v44 = vpop.f32.mrf.mxu0 }
 0x3b7   : > { %v2167_v28 = vadd.f32 %v8665_v57, %v2053_v44  ;;  %v2190_v1 = vpop.f32.mrf.mxu1 }
 0x3b9   : > { %v2248_v34 = vmul.f32 0.2, %v2167_v28 }
 0x3bb   : > { %v2280_v39 = vmax.f32 %v2167_v28, %v2248_v34 }
 0x3bd   : > { %2351 = vrot.lane.b32.xlu0 %v2280_v39, %s7248_s27  ;;  %v8696_v56 = vpop.f32.mrf.mxu2 }
 0x3be   : > { %v2056_v53 = vpop.f32.mrf.mxu0 }
 0x3bf   : > { %v2170_v40 = vadd.f32 %v8671_v29, %v2056_v53  ;;  %v2193_v8 = vpop.f32.mrf.mxu1 }
 0x3c1   : > { %v2249_v45 = vmul.f32 0.2, %v2170_v40 }
 0x3c3   : > { %v2281_v23 = vmax.f32 %v2170_v40, %v2249_v45 }
 0x3c5   : > { %2353 = vrot.lane.b32.xlu1 %v2281_v23, %s7248_s27 }
 0x3c6   : > { %v2059_v50 = vpop.f32.mrf.mxu0 }
 0x3c7   : > { %v2173_v54 = vadd.f32 %v2172_v43, %v2059_v50  ;;  %v2196_v20 = vpop.f32.mrf.mxu1 }
 0x3c9   : > { %v2250_v51 = vmul.f32 0.2, %v2173_v54 }
 0x3cb   : > { %v2282_v17 = vmax.f32 %v2173_v54, %v2250_v51  ;;  %v8699_v31 = vpop.f32.mrf.mxu2 }
 0x3cd   : > { %2355 = vrot.lane.b32.xlu2 %v2282_v17, %s7248_s27 }
 0x3ce   : > { %v2062_v57 = vpop.f32.mrf.mxu0 }
 0x3cf   : > { %v2176_v24 = vadd.f32 %v2175_v19, %v2062_v57  ;;  %v2199_v6 = vpop.f32.mrf.mxu1 }
 0x3d1   : > { %v2251_v11 = vmul.f32 0.2, %v2176_v24 }
 0x3d3   : > { %v2283_v55 = vmax.f32 %v2176_v24, %v2251_v11  ;;  %v8702_v0 = vpop.f32.mrf.mxu2 }
 0x3d5   : > { %2357 = vrot.lane.b32.xlu0 %v2283_v55, %s7248_s27 }
 0x3d6   : > { %v2065_v18 = vpop.f32.mrf.mxu0 }
 0x3d7   : > { %v2179_v29 = vadd.f32 %v2178_v26, %v2065_v18  ;;  %v2202_v2 = vpop.f32.mrf.mxu1 }
 0x3d8   : > { %v2338_v59 = vpop.permute.xlu2 %2337 }
 0x3d9   : > { %v2252_v36 = vmul.f32 0.2, %v2179_v29  ;;  %2434 = vst.msk [vmem:[#allocation2 + $0x19] sm:$0xff] %vm2433_vm10, %v2338_v59 }
 0x3db   : > { %v2284_v5 = vmax.f32 %v2179_v29, %v2252_v36  ;;  %v8706_v9 = vpop.f32.mrf.mxu2 }
 0x3dd   : > { %2359 = vrot.lane.b32.xlu1 %v2284_v5, %s7248_s27 }
 0x3de   : > { %v2068_v42 = vpop.f32.mrf.mxu0 }
 0x3df   : > { %v2182_v58 = vadd.f32 %v2181_v38, %v2068_v42  ;;  %v2205_v32 = vpop.f32.mrf.mxu1 }
 0x3e0   : > { %v8709_v60 = vld [vmem:[#allocation2 + $0x18] sm:$0xff] }
 0x3e1   : > { %v2253_v4 = vmul.f32 0.2, %v2182_v58  ;;  %2500 = vst.msk [vmem:[#allocation3 + $0x20] sm:$0xff] %vm2433_vm10, %v8709_v60 }
 0x3e3   : > { %v2285_v43 = vmax.f32 %v2182_v58, %v2253_v4  ;;  %v8714_v14 = vpop.f32.mrf.mxu2 }
 0x3e5   : > { %2361 = vrot.lane.b32.xlu2 %v2285_v43, %s7248_s27  ;;  %v7072_v43 = vld [vmem:[%s11090_s1 + $0x118] sm:$0xff] }
 0x3e6   : > { %v2071_v63 = vpop.f32.mrf.mxu0  ;;  %7209 = vmatpush.msra.mxu3 %v7072_v43 }
 0x3e7   : > { %v2185_v10 = vadd.f32 %v2184_v49, %v2071_v63  ;;  %v2208_v39 = vpop.f32.mrf.mxu1 }
 0x3e9   : > { %v2254_v37 = vmul.f32 0.2, %v2185_v10 }
 0x3eb   : > { %v2286_v12 = vmax.f32 %v2185_v10, %v2254_v37  ;;  %v8717_v7 = vpop.f32.mrf.mxu2 }
 0x3ed   : > { %2363 = vrot.lane.b32.xlu0 %v2286_v12, %s7248_s27 }
 0x3ee   : > { %v2074_v16 = vpop.f32.mrf.mxu0 }
 0x3ef   : > { %v2188_v19 = vadd.f32 %v2187_v46, %v2074_v16  ;;  %v2211_v57 = vpop.f32.mrf.mxu1  ;;  %v7071_v16 = vld [vmem:[%s11090_s1 + $0x110] sm:$0xff] }
 0x3f0   : > { %7210 = vmatpush.msra.mxu3 %v7071_v16 }
 0x3f1   : > { %v2255_v62 = vmul.f32 0.2, %v2188_v19 }
 0x3f3   : > { %v2287_v52 = vmax.f32 %v2188_v19, %v2255_v62  ;;  %v8721_v47 = vpop.f32.mrf.mxu2 }
 0x3f5   : > { %2365 = vrot.lane.b32.xlu1 %v2287_v52, %s7248_s27 }
 0x3f6   : > { %v2077_v13 = vpop.f32.mrf.mxu0 }
 0x3f7   : > { %v2191_v48 = vadd.f32 %v2190_v1, %v2077_v13  ;;  %v2344_v26 = vpop.permute.xlu2 %2343  ;;  %v2214_v5 = vpop.f32.mrf.mxu1 }
 0x3f8   : > { %2437 = vst.msk [vmem:[#allocation2 + $0x39] sm:$0xff] %vm2433_vm10, %v2344_v26  ;;  %v2215_v10 = vadd.f32 %v2214_v5, %v8692_v33 }
 0x3f9   : > { %v2256_v35 = vmul.f32 0.2, %v2191_v48 }
 0x3fa   : > { %v2264_v19 = vmul.f32 0.2, %v2215_v10 }
 0x3fb   : > { %v2288_v3 = vmax.f32 %v2191_v48, %v2256_v35  ;;  %v8726_v27 = vpop.f32.mrf.mxu2 }
 0x3fd   : > { %2367 = vrot.lane.b32.xlu2 %v2288_v3, %s7248_s27  ;;  %v2296_v3 = vmax.f32 %v2215_v10, %v2264_v19  ;;  %v2531_v19 = vld [vmem:[#allocation2 + $0x9] sm:$0xff] }
 0x3fe   : > { %v2080_v21 = vpop.f32.mrf.mxu0 }
 0x3ff   : > { %v2194_v15 = vadd.f32 %v2193_v8, %v2080_v21  ;;  %v2340_v38 = vpop.permute.xlu0 %2339  ;;  %v3882_v61 = vld [vmem:[#allocation2 + $0x3a] sm:$0xff]  ;;  %v2217_v62 = vpop.f32.mrf.mxu1 }
 0x400   : > { %2435 = vst.msk [vmem:[#allocation2 + $0x21] sm:$0xff] %vm2433_vm10, %v2340_v38  ;;  %v2218_v35 = vadd.f32 %v2217_v62, %v8696_v56 }
 0x401   : > { %v2257_v30 = vmul.f32 0.2, %v2194_v15  ;;  %3914 = vst.msk [vmem:[#allocation3 + $0x18] sm:$0xff] %vm2433_vm10, %v3882_v61 }
 0x402   : > { %v2265_v38 = vmul.f32 0.2, %v2218_v35 }
 0x403   : > { %v2289_v22 = vmax.f32 %v2194_v15, %v2257_v30  ;;  %v2223_v46 = vpop.f32.mrf.mxu2 }
 0x404   : > { %v2224_v21 = vadd.f32 %v2223_v46, %v8702_v0  ;;  %v2297_v0 = vmax.f32 %v2218_v35, %v2265_v38  ;;  %v2532_v35 = vld [vmem:[#allocation2 + $0x19] sm:$0xff] }
 0x405   : > { %2369 = vrot.lane.b32.xlu0 %v2289_v22, %s7248_s27 }
 0x406   : > { %v2083_v44 = vpop.f32.mrf.mxu0  ;;  %v2267_v30 = vmul.f32 0.2, %v2224_v21 }
 0x407   : > { %v2197_v28 = vadd.f32 %v2196_v20, %v2083_v44  ;;  %v2342_v49 = vpop.permute.xlu1 %2341  ;;  %v8729_v34 = vld [vmem:[#allocation2 + $0x20] sm:$0xff]  ;;  %v2220_v56 = vpop.f32.mrf.mxu1 }
 0x408   : > { %2436 = vst.msk [vmem:[#allocation2 + $0x31] sm:$0xff] %vm2433_vm10, %v2342_v49  ;;  %v2221_v46 = vadd.f32 %v2220_v56, %v8699_v31  ;;  %v2533_v62 = vld [vmem:[#allocation2 + $0x21] sm:$0xff] }
 0x409   : > { %v2258_v53 = vmul.f32 0.2, %v2197_v28  ;;  %2501 = vst.msk [vmem:[#allocation3 + $0x30] sm:$0xff] %vm2433_vm10, %v8729_v34 }
 0x40b   : > { %v2290_v40 = vmax.f32 %v2197_v28, %v2258_v53  ;;  %v2226_v29 = vpop.f32.mrf.mxu2 }
 0x40c   : > { %v2227_v53 = vadd.f32 %v2226_v29, %v8706_v9 }
 0x40d   : > { %2371 = vrot.lane.b32.xlu1 %v2290_v40, %s7248_s27 }
 0x40e   : > { %v2086_v45 = vpop.f32.mrf.mxu0 }
 0x40f   : > { %v2200_v23 = vadd.f32 %v2199_v6, %v2086_v45  ;;  %v2350_v50 = vpop.permute.xlu2 %2349  ;;  %v8735_v54 = vld [vmem:[#allocation2 + $0x30] sm:$0xff]  ;;  %v8737_v51 = vld [vmem:[#allocation2 + $0x38] sm:$0xff] }
 0x410   : > { %2440 = vst.msk [vmem:[#allocation2 + $0x61] sm:$0xff] %vm2433_vm10, %v2350_v50  ;;  %v3881_v1 = vld [vmem:[#allocation2 + $0x32] sm:$0xff] }
 0x411   : > { %v2259_v17 = vmul.f32 0.2, %v2200_v23  ;;  %2502 = vst.msk [vmem:[#allocation3 + $0x40] sm:$0xff] %vm2433_vm10, %v8735_v54 }
 0x412   : > { %2503 = vst.msk [vmem:[#allocation3 + $0x50] sm:$0xff] %vm2433_vm10, %v8737_v51 }
 0x413   : > { %v2291_v24 = vmax.f32 %v2200_v23, %v2259_v17  ;;  %3913 = vst.msk [vmem:[#allocation3 + $0x8] sm:$0xff] %vm2433_vm10, %v3881_v1  ;;  %v2229_v37 = vpop.f32.mrf.mxu2  ;;  %v2268_v23 = vmul.f32 0.2, %v2227_v53 }
 0x414   : > { %v2230_v29 = vadd.f32 %v2229_v37, %v8714_v14  ;;  %v2530_v14 = vld [vmem:[#allocation2 + $0x1] sm:$0xff] }
 0x415   : > { %2373 = vrot.lane.b32.xlu2 %v2291_v24, %s7248_s27  ;;  %v2266_v24 = vmul.f32 0.2, %v2221_v46 }
 0x416   : > { %v2089_v11 = vpop.f32.mrf.mxu0 }
 0x417   : > { %v2203_v55 = vadd.f32 %v2202_v2, %v2089_v11  ;;  %v2346_v18 = vpop.permute.xlu0 %2345  ;;  %v8746_v8 = vld [vmem:[#allocation2 + $0x60] sm:$0xff] }
 0x418   : > { %2438 = vst.msk [vmem:[#allocation2 + $0x49] sm:$0xff] %vm2433_vm10, %v2346_v18  ;;  %v2298_v18 = vmax.f32 %v2221_v46, %v2266_v24 }
 0x419   : > { %v2260_v59 = vmul.f32 0.2, %v2203_v55  ;;  %2506 = vst.msk [vmem:[#allocation3 + $0x80] sm:$0xff] %vm2433_vm10, %v8746_v8 }
 0x41b   : > { %v2292_v36 = vmax.f32 %v2203_v55, %v2260_v59  ;;  %v2232_v15 = vpop.f32.mrf.mxu2 }
 0x41c   : > { %v2233_v40 = vadd.f32 %v2232_v15, %v8717_v7  ;;  %v2300_v7 = vmax.f32 %v2227_v53, %v2268_v23 }
 0x41d   : > { %2375 = vrot.lane.b32.xlu0 %v2292_v36, %s7248_s27 }
 0x41e   : > { %v2092_v42 = vpop.f32.mrf.mxu0  ;;  %v2270_v50 = vmul.f32 0.2, %v2233_v40 }
 0x41f   : > { %v2206_v58 = vadd.f32 %v2205_v32, %v2092_v42  ;;  %v2348_v20 = vpop.permute.xlu1 %2347  ;;  %v8752_v4 = vld [vmem:[#allocation2 + $0x48] sm:$0xff] }
 0x420   : > { %2439 = vst.msk [vmem:[#allocation2 + $0x51] sm:$0xff] %vm2433_vm10, %v2348_v20  ;;  %v2302_v11 = vmax.f32 %v2233_v40, %v2270_v50 }
 0x421   : > { %v2261_v63 = vmul.f32 0.2, %v2206_v58  ;;  %2504 = vst.msk [vmem:[#allocation3 + $0x60] sm:$0xff] %vm2433_vm10, %v8752_v4 }
 0x423   : > { %v2293_v6 = vmax.f32 %v2206_v58, %v2261_v63  ;;  %v2235_v17 = vpop.f32.mrf.mxu2  ;;  %v2269_v58 = vmul.f32 0.2, %v2230_v29 }
 0x424   : > { %v2236_v55 = vadd.f32 %v2235_v17, %v8721_v47 }
 0x425   : > { %2377 = vrot.lane.b32.xlu1 %v2293_v6, %s7248_s27  ;;  %v2301_v63 = vmax.f32 %v2230_v29, %v2269_v58 }
 0x426   : > { %v2095_v12 = vpop.f32.mrf.mxu0  ;;  %v2271_v59 = vmul.f32 0.2, %v2236_v55 }
 0x427   : > { %v2209_v52 = vadd.f32 %v2208_v39, %v2095_v12  ;;  %v2356_v2 = vpop.permute.xlu2 %2355  ;;  %v8765_v13 = vld [vmem:[#allocation2 + $0x50] sm:$0xff]  ;;  %v2299_v39 = vmax.f32 %v2224_v21, %v2267_v30  ;;  %v2535_v30 = vld [vmem:[#allocation2 + $0x39] sm:$0xff] }
 0x428   : > { %2443 = vst.msk [vmem:[#allocation2 + $0x81] sm:$0xff] %vm2433_vm10, %v2356_v2  ;;  %v3883_v33 = vld [vmem:[#allocation2 + $0x4a] sm:$0xff]  ;;  %v3884_v26 = vld [vmem:[#allocation2 + $0x52] sm:$0xff]  ;;  %v2303_v43 = vmax.f32 %v2236_v55, %v2271_v59 }
 0x429   : > { %v2262_v48 = vmul.f32 0.2, %v2209_v52  ;;  %2505 = vst.msk [vmem:[#allocation3 + $0x70] sm:$0xff] %vm2433_vm10, %v8765_v13 }
 0x42a   : > { %3915 = vst.msk [vmem:[#allocation3 + $0x28] sm:$0xff] %vm2433_vm10, %v3883_v33  ;;  %v2536_v33 = vld [vmem:[#allocation2 + $0x49] sm:$0xff] }
 0x42b   : > { %v2294_v32 = vmax.f32 %v2209_v52, %v2262_v48  ;;  %3916 = vst.msk [vmem:[#allocation3 + $0x38] sm:$0xff] %vm2433_vm10, %v3884_v26  ;;  %v2238_v20 = vpop.f32.mrf.mxu2  ;;  %v8831_v26 = vld [vmem:[#allocation2 + $0x31] sm:$0xff] }
 0x42c   : > { %v2239_v10 = vadd.f32 %v2238_v20, %v8726_v27 }
 0x42d   : > { %2383 = vrot.lane.b32.xlu1 %v2296_v3, %s7248_s27  ;;  %2379 = vrot.lane.b32.xlu2 %v2294_v32, %s7248_s27 }
 0x42e   : > { %v2098_v61 = vpop.f32.mrf.mxu0  ;;  %v2272_v12 = vmul.f32 0.2, %v2239_v10 }
 0x42f   : > { %v2212_v22 = vadd.f32 %v2211_v57, %v2098_v61  ;;  %v2352_v44 = vpop.permute.xlu0 %2351  ;;  %v8776_v28 = vld [vmem:[#allocation2 + $0x82] sm:$0xff]  ;;  %v8850_v61 = vld [vmem:[#allocation2 + $0x51] sm:$0xff] }
 0x430   : > { %2441 = vst.msk [vmem:[#allocation2 + $0x69] sm:$0xff] %vm2433_vm10, %v2352_v44  ;;  %v2304_v27 = vmax.f32 %v2239_v10, %v2272_v12 }
 0x431   : > { %v2263_v49 = vmul.f32 0.2, %v2212_v22  ;;  %3920 = vst.msk [vmem:[#allocation3 + $0x78] sm:$0xff] %vm2433_vm10, %v8776_v28 }
 0x433   : > { %v2295_v45 = vmax.f32 %v2212_v22, %v2263_v49 }
 0x435   : > { %2389 = vrot.lane.b32.xlu1 %v2299_v39, %s7248_s27  ;;  %2385 = vrot.lane.b32.xlu2 %v2297_v0, %s7248_s27  ;;  %v2538_v39 = vld [vmem:[#allocation2 + $0x61] sm:$0xff] }
 0x436   : > { %2381 = vrot.lane.b32.xlu0 %v2295_v45, %s7248_s27 }
 0x437   : > { %v2354_v1 = vpop.permute.xlu1 %2353  ;;  %v8787_v57 = vld [vmem:[#allocation2 + $0x68] sm:$0xff] }
 0x438   : > { %2442 = vst.msk [vmem:[#allocation2 + $0x79] sm:$0xff] %vm2433_vm10, %v2354_v1  ;;  %v3885_v9 = vld [vmem:[#allocation2 + $0x62] sm:$0xff]  ;;  %v3886_v31 = vld [vmem:[#allocation2 + $0x6a] sm:$0xff] }
 0x439   : > { %2507 = vst.msk [vmem:[#allocation3 + $0x90] sm:$0xff] %vm2433_vm10, %v8787_v57  ;;  %v3960_v48 = vld [vmem:[#allocation3 + $0x78] sm:$0xff] }
 0x43a   : > { %3917 = vst.msk [vmem:[#allocation3 + $0x48] sm:$0xff] %vm2433_vm10, %v3885_v9  ;;  %v2539_v38 = vld [vmem:[#allocation2 + $0x69] sm:$0xff]  ;;  %v2541_v1 = vld [vmem:[#allocation2 + $0x81] sm:$0xff] }
 0x43b   : > { %3918 = vst.msk [vmem:[#allocation3 + $0x58] sm:$0xff] %vm2433_vm10, %v3886_v31 }
 0x43d   : > { %2395 = vrot.lane.b32.xlu1 %v2302_v11, %s7248_s27  ;;  %2391 = vrot.lane.b32.xlu2 %v2300_v7, %s7248_s27 }
 0x43e   : > { %2387 = vrot.lane.b32.xlu0 %v2298_v18, %s7248_s27 }
 0x43f   : > { %v2362_v36 = vpop.permute.xlu2 %2361  ;;  %v8799_v5 = vld [vmem:[#allocation2 + $0x7a] sm:$0xff] }
 0x440   : > { %v8801_v42 = vld [vmem:[#allocation2 + $0x78] sm:$0xff]  ;;  %2446 = vst.msk [vmem:[#allocation2 + $0xa9] sm:$0xff] %vm2433_vm10, %v2362_v36  ;;  %v8804_v47 = vld [vmem:[#allocation2 + $0x80] sm:$0xff] }
 0x441   : > { %3919 = vst.msk [vmem:[#allocation3 + $0x68] sm:$0xff] %vm2433_vm10, %v8799_v5  ;;  %v8862_v0 = vld [vmem:[#allocation2 + $0x79] sm:$0xff] }
 0x442   : > { %2508 = vst.msk [vmem:[#allocation3 + $0xa0] sm:$0xff] %vm2433_vm10, %v8801_v42 }
 0x443   : > { %2509 = vst.msk [vmem:[#allocation3 + $0xb0] sm:$0xff] %vm2433_vm10, %v8804_v47 }
 0x445   : > { %2594 = vrot.lane.b32.xlu1 %v2530_v14, %s7241_s14  ;;  %2397 = vrot.lane.b32.xlu2 %v2303_v43, %s7248_s27 }
 0x446   : > { %2393 = vrot.lane.b32.xlu0 %v2301_v63, %s7248_s27 }
 0x447   : > { %v2358_v37 = vpop.permute.xlu0 %2357  ;;  %v8816_v6 = vld [vmem:[#allocation2 + $0xa8] sm:$0xff] }
 0x448   : > { %2444 = vst.msk [vmem:[#allocation2 + $0x91] sm:$0xff] %vm2433_vm10, %v2358_v37  ;;  %v3958_v16 = vld [vmem:[#allocation3 + $0x68] sm:$0xff]  ;;  %v2544_v18 = vld [vmem:[#allocation2 + $0xa9] sm:$0xff] }
 0x449   : > { %7079 = vmatmul.msk.f32.vlgmr.msra.gmra.mxu3 %vm171_vm0, %v3958_v16  ;;  %2512 = vst.msk [vmem:[#allocation3 + $0xe0] sm:$0xff] %vm2433_vm10, %v8816_v6 }
 0x44d   : > { %2600 = vrot.lane.b32.xlu1 %v2533_v62, %s7241_s14  ;;  %2596 = vrot.lane.b32.xlu2 %v2531_v19, %s7241_s14  ;;  %v2467_v62 = vld [vmem:[#allocation2 + $0x8] sm:$0xff] }
 0x44e   : > { %2399 = vrot.lane.b32.xlu0 %v2304_v27, %s7248_s27  ;;  %2499 = vst.msk [vmem:[#allocation3 + $0x10] sm:$0xff] %vm2433_vm10, %v2467_v62 }
 0x44f   : > { %v2360_v52 = vpop.permute.xlu1 %2359  ;;  %v8825_v2 = vld [vmem:[#allocation2 + $0x90] sm:$0xff] }
 0x450   : > { %2445 = vst.msk [vmem:[#allocation2 + $0x99] sm:$0xff] %vm2433_vm10, %v2360_v52  ;;  %v2542_v49 = vld [vmem:[#allocation2 + $0x91] sm:$0xff] }
 0x451   : > { %7080 = vmatmul.msk.f32.gmra.mxu3 %vm171_vm0, %v3960_v48  ;;  %2510 = vst.msk [vmem:[#allocation3 + $0xc0] sm:$0xff] %vm2433_vm10, %v8825_v2 }
 0x455   : > { %2606 = vrot.lane.b32.xlu1 %v2536_v33, %s7241_s14  ;;  %2602 = vrot.lane.b32.xlu2 %v8831_v26, %s7241_s14 }
 0x456   : > { %2598 = vrot.lane.b32.xlu0 %v2532_v35, %s7241_s14 }
 0x457   : > { %v2368_v3 = vpop.permute.xlu2 %2367  ;;  %v8837_v21 = vld [vmem:[#allocation2 + $0x92] sm:$0xff]  ;;  %v8839_v32 = vld [vmem:[#allocation2 + $0x9a] sm:$0xff] }
 0x458   : > { %2449 = vst.msk [vmem:[#allocation2 + $0xc9] sm:$0xff] %vm2433_vm10, %v2368_v3  ;;  %v8842_v15 = vld [vmem:[#allocation2 + $0x98] sm:$0xff] }
 0x459   : > { %3921 = vst.msk [vmem:[#allocation3 + $0x88] sm:$0xff] %vm2433_vm10, %v8837_v21  ;;  %v8882_v17 = vld [vmem:[#allocation2 + $0x99] sm:$0xff] }
 0x45a   : > { %3922 = vst.msk [vmem:[#allocation3 + $0x98] sm:$0xff] %vm2433_vm10, %v8839_v32 }
 0x45b   : > { %2511 = vst.msk [vmem:[#allocation3 + $0xd0] sm:$0xff] %vm2433_vm10, %v8842_v15 }
 0x45c   : > { %11260 = vst [vmem:[#allocation38_spill] sm:$0xff] %v8882_v17 }
 0x45d   : > { %2612 = vrot.lane.b32.xlu1 %v2539_v38, %s7241_s14  ;;  %2608 = vrot.lane.b32.xlu2 %v8850_v61, %s7241_s14 }
 0x45e   : > { %2604 = vrot.lane.b32.xlu0 %v2535_v30, %s7241_s14  ;;  %v2466_v30 = vld [vmem:[#allocation2] sm:$0xff] }
 0x45f   : > { %v2364_v22 = vpop.permute.xlu0 %2363  ;;  %v8856_v44 = vld [vmem:[#allocation2 + $0xca] sm:$0xff]  ;;  %2498 = vst.msk [vmem:[#allocation3] sm:$0xff] %vm2433_vm10, %v2466_v30 }
 0x460   : > { %2447 = vst.msk [vmem:[#allocation2 + $0xb1] sm:$0xff] %vm2433_vm10, %v2364_v22  ;;  %v3962_v56 = vld [vmem:[#allocation3 + $0x88] sm:$0xff]  ;;  %v2547_v58 = vld [vmem:[#allocation2 + $0xc9] sm:$0xff] }
 0x461   : > { %7081 = vmatmul.msk.f32.gmra.mxu3 %vm171_vm0, %v3962_v56  ;;  %3926 = vst.msk [vmem:[#allocation3 + $0xd8] sm:$0xff] %vm2433_vm10, %v8856_v44  ;;  %v3964_v46 = vld [vmem:[#allocation3 + $0x98] sm:$0xff] }
 0x465   : > { %2618 = vrot.lane.b32.xlu1 %v2542_v49, %s7241_s14  ;;  %2614 = vrot.lane.b32.xlu2 %v8862_v0, %s7241_s14 }
 0x466   : > { %2610 = vrot.lane.b32.xlu0 %v2538_v39, %s7241_s14 }
 0x467   : > { %v2366_v53 = vpop.permute.xlu1 %2365  ;;  %v8868_v40 = vld [vmem:[#allocation2 + $0xaa] sm:$0xff]  ;;  %v8870_v45 = vld [vmem:[#allocation2 + $0xb2] sm:$0xff] }
 0x468   : > { %2448 = vst.msk [vmem:[#allocation2 + $0xc1] sm:$0xff] %vm2433_vm10, %v2366_v53  ;;  %v8873_v23 = vld [vmem:[#allocation2 + $0xb0] sm:$0xff]  ;;  %v3972_v27 = vld [vmem:[#allocation3 + $0xd8] sm:$0xff] }
 0x469   : > { %7082 = vmatmul.msk.f32.gmra.mxu3 %vm171_vm0, %v3964_v46  ;;  %3923 = vst.msk [vmem:[#allocation3 + $0xa8] sm:$0xff] %vm2433_vm10, %v8868_v40  ;;  %v2545_v50 = vld [vmem:[#allocation2 + $0xb1] sm:$0xff] }
 0x46a   : > { %3924 = vst.msk [vmem:[#allocation3 + $0xb8] sm:$0xff] %vm2433_vm10, %v8870_v45 }
 0x46b   : > { %2513 = vst.msk [vmem:[#allocation3 + $0xf0] sm:$0xff] %vm2433_vm10, %v8873_v23 }
 0x46d   : > { %2624 = vrot.lane.b32.xlu1 %v2545_v50, %s7241_s14  ;;  %2620 = vrot.lane.b32.xlu2 %v8882_v17, %s7241_s14  ;;  %v9115_v17 = vld [vmem:[#allocation2 + $0x62] sm:$0xff] }
 0x46e   : > { %2616 = vrot.lane.b32.xlu0 %v2541_v1, %s7241_s14 }
 0x46f   : > { %v2374_v24 = vpop.permute.xlu2 %2373  ;;  %v8888_v9 = vld [vmem:[#allocation2 + $0xc2] sm:$0xff] }
 0x470   : > { %v8890_v31 = vld [vmem:[#allocation2 + $0xc0] sm:$0xff]  ;;  %2452 = vst.msk [vmem:[#allocation2 + $0xf1] sm:$0xff] %vm2433_vm10, %v2374_v24  ;;  %v3966_v7 = vld [vmem:[#allocation3 + $0xa8] sm:$0xff]  ;;  %v8893_v11 = vld [vmem:[#allocation2 + $0xc8] sm:$0xff] }
 0x471   : > { %7083 = vmatmul.msk.f32.gmra.mxu3 %vm171_vm0, %v3966_v7  ;;  %3925 = vst.msk [vmem:[#allocation3 + $0xc8] sm:$0xff] %vm2433_vm10, %v8888_v9  ;;  %v8902_v55 = vld [vmem:[#allocation2 + $0xc1] sm:$0xff] }
 0x472   : > { %2514 = vst.msk [vmem:[#allocation3 + $0x100] sm:$0xff] %vm2433_vm10, %v8890_v31  ;;  %v3968_v36 = vld [vmem:[#allocation3 + $0xb8] sm:$0xff] }
 0x473   : > { %2515 = vst.msk [vmem:[#allocation3 + $0x110] sm:$0xff] %vm2433_vm10, %v8893_v11 }
 0x474   : > { %11261 = vst [vmem:[#allocation34_spill] sm:$0xff] %v8902_v55 }
 0x475   : > { %2626 = vrot.lane.b32.xlu2 %v8902_v55, %s7241_s14 }
 0x476   : > { %2622 = vrot.lane.b32.xlu0 %v2544_v18, %s7241_s14 }
 0x477   : > { %v2370_v29 = vpop.permute.xlu0 %2369  ;;  %v8907_v59 = vld [vmem:[#allocation2 + $0xf0] sm:$0xff] }
 0x478   : > { %2450 = vst.msk [vmem:[#allocation2 + $0xd9] sm:$0xff] %vm2433_vm10, %v2370_v29  ;;  %v3970_v63 = vld [vmem:[#allocation3 + $0xc8] sm:$0xff] }
 0x479   : > { %7084 = vmatmul.msk.f32.gmra.mxu3 %vm171_vm0, %v3968_v36  ;;  %2518 = vst.msk [vmem:[#allocation3 + $0x140] sm:$0xff] %vm2433_vm10, %v8907_v59  ;;  %v2550_v10 = vld [vmem:[#allocation2 + $0xf1] sm:$0xff] }
 0x47e   : > { %2628 = vrot.lane.b32.xlu0 %v2547_v58, %s7241_s14 }
 0x47f   : > { %v2372_v20 = vpop.permute.xlu1 %2371  ;;  %v2548_v14 = vld [vmem:[#allocation2 + $0xd9] sm:$0xff] }
 0x480   : > { %v8914_v43 = vld [vmem:[#allocation2 + $0xd8] sm:$0xff]  ;;  %2451 = vst.msk [vmem:[#allocation2 + $0xe1] sm:$0xff] %vm2433_vm10, %v2372_v20  ;;  %2630 = vrot.lane.b32.xlu1 %v2548_v14, %s7241_s14 }
 0x481   : > { %7085 = vmatmul.msk.f32.gmra.mxu3 %vm171_vm0, %v3970_v63  ;;  %2516 = vst.msk [vmem:[#allocation3 + $0x120] sm:$0xff] %vm2433_vm10, %v8914_v43 }
 0x486   : > { %2634 = vrot.lane.b32.xlu0 %v2550_v10, %s7241_s14 }
 0x487   : > { %v2380_v37 = vpop.permute.xlu2 %2379  ;;  %v8922_v12 = vld [vmem:[#allocation2 + $0xe1] sm:$0xff] }
 0x488   : > { %11262 = vst [vmem:[#allocation41_spill] sm:$0xff] %v8922_v12  ;;  %v8924_v16 = vld [vmem:[#allocation2 + $0xda] sm:$0xff]  ;;  %v8926_v19 = vld [vmem:[#allocation2 + $0xe2] sm:$0xff]  ;;  %2632 = vrot.lane.b32.xlu2 %v8922_v12, %s7241_s14 }
 0x489   : > { %2455 = vst.msk [vmem:[#allocation2 + $0x111] sm:$0xff] %vm2433_vm10, %v2380_v37  ;;  %7086 = vmatmul.msk.f32.gmra.mxu3 %vm171_vm0, %v3972_v27  ;;  %v8934_v52 = vld [vmem:[#allocation2 + $0xe0] sm:$0xff] }
 0x48a   : > { %3927 = vst.msk [vmem:[#allocation3 + $0xe8] sm:$0xff] %vm2433_vm10, %v8924_v16  ;;  %v2723_v37 = vld [vmem:[#allocation2 + $0x2] sm:$0xff] }
 0x48b   : > { %3928 = vst.msk [vmem:[#allocation3 + $0xf8] sm:$0xff] %vm2433_vm10, %v8926_v19 }
 0x48c   : > { %2517 = vst.msk [vmem:[#allocation3 + $0x130] sm:$0xff] %vm2433_vm10, %v8934_v52 }
 0x48f   : > { %v2376_v48 = vpop.permute.xlu0 %2375  ;;  %v2386_v33 = vpop.permute.xlu2 %2385 }
 0x490   : > { %v2553_v35 = vld [vmem:[#allocation2 + $0x111] sm:$0xff]  ;;  %2453 = vst.msk [vmem:[#allocation2 + $0xf9] sm:$0xff] %vm2433_vm10, %v2376_v48 }
 0x491   : > { %v8941_v3 = vld [vmem:[#allocation2 + $0x112] sm:$0xff]  ;;  %2640 = vrot.lane.b32.xlu0 %v2553_v35, %s7241_s14  ;;  %2458 = vst.msk [vmem:[#allocation2 + $0x139] sm:$0xff] %vm2433_vm10, %v2386_v33 }
 0x492   : > { %v3974_v38 = vld [vmem:[#allocation3 + $0xe8] sm:$0xff]  ;;  %3932 = vst.msk [vmem:[#allocation3 + $0x138] sm:$0xff] %vm2433_vm10, %v8941_v3  ;;  %v3976_v53 = vld [vmem:[#allocation3 + $0xf8] sm:$0xff] }
 0x493   : > { %7087 = vmatmul.msk.f32.gmra.mxu3 %vm171_vm0, %v3974_v38 }
 0x497   : > { %v2378_v22 = vpop.permute.xlu1 %2377  ;;  %v2392_v56 = vpop.permute.xlu2 %2391  ;;  %v8950_v49 = vld [vmem:[#allocation2 + $0xf9] sm:$0xff] }
 0x498   : > { %11263 = vst [vmem:[#allocation36_spill] sm:$0xff] %v8950_v49  ;;  %v8952_v39 = vld [vmem:[#allocation2 + $0xf2] sm:$0xff]  ;;  %2636 = vrot.lane.b32.xlu1 %v8950_v49, %s7241_s14  ;;  %v8957_v50 = vld [vmem:[#allocation2 + $0xfa] sm:$0xff] }
 0x499   : > { %2454 = vst.msk [vmem:[#allocation2 + $0x109] sm:$0xff] %vm2433_vm10, %v2378_v22  ;;  %v2556_v46 = vld [vmem:[#allocation2 + $0x139] sm:$0xff] }
 0x49a   : > { %2461 = vst.msk [vmem:[#allocation2 + $0x159] sm:$0xff] %vm2433_vm10, %v2392_v56  ;;  %2646 = vrot.lane.b32.xlu0 %v2556_v46, %s7241_s14  ;;  %v8962_v1 = vld [vmem:[#allocation2 + $0xf8] sm:$0xff] }
 0x49b   : > { %7088 = vmatmul.msk.f32.gmra.mxu3 %vm171_vm0, %v3976_v53  ;;  %3929 = vst.msk [vmem:[#allocation3 + $0x108] sm:$0xff] %vm2433_vm10, %v8952_v39  ;;  %v8966_v24 = vld [vmem:[#allocation2 + $0x138] sm:$0xff] }
 0x49c   : > { %3930 = vst.msk [vmem:[#allocation3 + $0x118] sm:$0xff] %vm2433_vm10, %v8957_v50 }
 0x49d   : > { %2519 = vst.msk [vmem:[#allocation3 + $0x150] sm:$0xff] %vm2433_vm10, %v8962_v1 }
 0x49e   : > { %2524 = vst.msk [vmem:[#allocation3 + $0x1a0] sm:$0xff] %vm2433_vm10, %v8966_v24 }
 0x49f   : > { %v2384_v7 = vpop.permute.xlu1 %2383  ;;  %v2398_v18 = vpop.permute.xlu2 %2397 }
 0x4a0   : > { %v8974_v29 = vld [vmem:[#allocation2 + $0x109] sm:$0xff]  ;;  %2457 = vst.msk [vmem:[#allocation2 + $0x129] sm:$0xff] %vm2433_vm10, %v2384_v7 }
 0x4a1   : > { %11264 = vst [vmem:[#allocation35_spill] sm:$0xff] %v8974_v29  ;;  %v8976_v36 = vld [vmem:[#allocation2 + $0x10a] sm:$0xff]  ;;  %2638 = vrot.lane.b32.xlu2 %v8974_v29, %s7241_s14  ;;  %v2559_v58 = vld [vmem:[#allocation2 + $0x159] sm:$0xff]  ;;  %v2726_v7 = vld [vmem:[#allocation2 + $0x22] sm:$0xff] }
 0x4a2   : > { %v8981_v20 = vld [vmem:[#allocation2 + $0x15a] sm:$0xff]  ;;  %2464 = vst.msk [vmem:[#allocation2 + $0x181] sm:$0xff] %vm2433_vm10, %v2398_v18  ;;  %2652 = vrot.lane.b32.xlu0 %v2559_v58, %s7241_s14  ;;  %v8985_v63 = vld [vmem:[#allocation2 + $0x108] sm:$0xff]  ;;  %v8990_v10 = vld [vmem:[#allocation2 + $0x110] sm:$0xff] }
 0x4a3   : > { %v3978_v14 = vld [vmem:[#allocation3 + $0x108] sm:$0xff]  ;;  %3931 = vst.msk [vmem:[#allocation3 + $0x128] sm:$0xff] %vm2433_vm10, %v8976_v36  ;;  %v3980_v38 = vld [vmem:[#allocation3 + $0x118] sm:$0xff] }
 0x4a4   : > { %7089 = vmatmul.msk.f32.gmra.mxu3 %vm171_vm0, %v3978_v14  ;;  %3938 = vst.msk [vmem:[#allocation3 + $0x198] sm:$0xff] %vm2433_vm10, %v8981_v20 }
 0x4a5   : > { %2520 = vst.msk [vmem:[#allocation3 + $0x160] sm:$0xff] %vm2433_vm10, %v8985_v63 }
 0x4a6   : > { %2521 = vst.msk [vmem:[#allocation3 + $0x170] sm:$0xff] %vm2433_vm10, %v8990_v10 }
 0x4a7   : > { %v2390_v27 = vpop.permute.xlu1 %2389  ;;  %v2597_v62 = vpop.permute.xlu2 %2596  ;;  %v8998_v48 = vld [vmem:[#allocation2 + $0x129] sm:$0xff] }
 0x4a8   : > { %11265 = vst [vmem:[#allocation44_spill] sm:$0xff] %v8998_v48  ;;  %v2382_v33 = vpop.permute.xlu0 %2381  ;;  %v9003_v35 = vld [vmem:[#allocation2 + $0x12a] sm:$0xff] }
 0x4a9   : > { %2460 = vst.msk [vmem:[#allocation2 + $0x151] sm:$0xff] %vm2433_vm10, %v2390_v27  ;;  %2644 = vrot.lane.b32.xlu2 %v8998_v48, %s7241_s14 }
 0x4aa   : > { %2692 = vst.msk [vmem:[#allocation3 + $0x10] sm:$0xff] %vm2690_vm11, %v2597_v62  ;;  %2787 = vrot.lane.b32.xlu0 %v2723_v37, %s7242_s19  ;;  %v3982_v46 = vld [vmem:[#allocation3 + $0x128] sm:$0xff] }
 0x4ab   : > { %2456 = vst.msk [vmem:[#allocation2 + $0x121] sm:$0xff] %vm2433_vm10, %v2382_v33 }
 0x4ac   : > { %7090 = vmatmul.msk.f32.gmra.mxu3 %vm171_vm0, %v3980_v38  ;;  %3934 = vst.msk [vmem:[#allocation3 + $0x158] sm:$0xff] %vm2433_vm10, %v9003_v35 }
 0x4af   : > { %v2396_v30 = vpop.permute.xlu1 %2395  ;;  %v2603_v22 = vpop.permute.xlu2 %2602 }
 0x4b0   : > { %v9011_v56 = vld [vmem:[#allocation2 + $0x151] sm:$0xff]  ;;  %2463 = vst.msk [vmem:[#allocation2 + $0x171] sm:$0xff] %vm2433_vm10, %v2396_v30  ;;  %v2388_v53 = vpop.permute.xlu0 %2387 }
 0x4b1   : > { %11266 = vst [vmem:[#allocation39_spill] sm:$0xff] %v9011_v56  ;;  %2650 = vrot.lane.b32.xlu2 %v9011_v56, %s7241_s14  ;;  %v9022_v14 = vld [vmem:[#allocation2 + $0x152] sm:$0xff] }
 0x4b2   : > { %2695 = vst.msk [vmem:[#allocation3 + $0x40] sm:$0xff] %vm2690_vm11, %v2603_v22  ;;  %2793 = vrot.lane.b32.xlu0 %v2726_v7, %s7242_s19  ;;  %v9018_v18 = vld [vmem:[#allocation2 + $0x121] sm:$0xff]  ;;  %v9032_v27 = vld [vmem:[#allocation2 + $0x150] sm:$0xff]  ;;  %v9036_v62 = vld [vmem:[#allocation2 + $0x158] sm:$0xff] }
 0x4b3   : > { %11267 = vst [vmem:[#allocation37_spill] sm:$0xff] %v9018_v18  ;;  %v9020_v58 = vld [vmem:[#allocation2 + $0x122] sm:$0xff]  ;;  %2642 = vrot.lane.b32.xlu1 %v9018_v18, %s7241_s14  ;;  %v2732_v18 = vld [vmem:[#allocation2 + $0x6a] sm:$0xff] }
 0x4b4   : > { %2459 = vst.msk [vmem:[#allocation2 + $0x141] sm:$0xff] %vm2433_vm10, %v2388_v53  ;;  %7091 = vmatmul.msk.f32.gmra.mxu3 %vm171_vm0, %v3982_v46  ;;  %v9028_v37 = vld [vmem:[#allocation2 + $0x128] sm:$0xff] }
 0x4b5   : > { %3933 = vst.msk [vmem:[#allocation3 + $0x148] sm:$0xff] %vm2433_vm10, %v9020_v58  ;;  %v3984_v53 = vld [vmem:[#allocation3 + $0x138] sm:$0xff] }
 0x4b6   : > { %3937 = vst.msk [vmem:[#allocation3 + $0x188] sm:$0xff] %vm2433_vm10, %v9022_v14  ;;  %v2729_v46 = vld [vmem:[#allocation2 + $0x4a] sm:$0xff] }
 0x4b7   : > { %2523 = vst.msk [vmem:[#allocation3 + $0x190] sm:$0xff] %vm2433_vm10, %v9028_v37  ;;  %v2595_v33 = vpop.permute.xlu1 %2594  ;;  %v2609_v38 = vpop.permute.xlu2 %2608  ;;  %v9042_v30 = vld [vmem:[#allocation2 + $0x171] sm:$0xff] }
 0x4b8   : > { %2526 = vst.msk [vmem:[#allocation3 + $0x1c0] sm:$0xff] %vm2433_vm10, %v9032_v27  ;;  %v2394_v22 = vpop.permute.xlu0 %2393 }
 0x4b9   : > { %11268 = vst [vmem:[#allocation47_spill] sm:$0xff] %v9042_v30  ;;  %2656 = vrot.lane.b32.xlu2 %v9042_v30, %s7241_s14 }
 0x4ba   : > { %2527 = vst.msk [vmem:[#allocation3 + $0x1d0] sm:$0xff] %vm2433_vm10, %v9036_v62  ;;  %2799 = vrot.lane.b32.xlu0 %v2729_v46, %s7242_s19 }
 0x4bb   : > { %2691 = vst.msk [vmem:[#allocation3] sm:$0xff] %vm2690_vm11, %v2595_v33  ;;  %v9051_v7 = vld [vmem:[#allocation2 + $0x141] sm:$0xff]  ;;  %v9061_v33 = vld [vmem:[#allocation2 + $0x172] sm:$0xff] }
 0x4bc   : > { %2698 = vst.msk [vmem:[#allocation3 + $0x70] sm:$0xff] %vm2690_vm11, %v2609_v38  ;;  %v9053_v41 = vld [vmem:[#allocation2 + $0x13a] sm:$0xff]  ;;  %v9055_v25 = vld [vmem:[#allocation2 + $0x142] sm:$0xff]  ;;  %7092 = vmatmul.msk.f32.gmra.mxu3 %vm171_vm0, %v3984_v53  ;;  %2648 = vrot.lane.b32.xlu1 %v9051_v7, %s7241_s14 }
 0x4bd   : > { %11269 = vst [vmem:[#allocation42_spill] sm:$0xff] %v9051_v7  ;;  %v9065_v38 = vld [vmem:[#allocation2 + $0x120] sm:$0xff]  ;;  %v3986_v56 = vld [vmem:[#allocation3 + $0x148] sm:$0xff] }
 0x4be   : > { %2462 = vst.msk [vmem:[#allocation2 + $0x169] sm:$0xff] %vm2433_vm10, %v2394_v22  ;;  %v9069_v46 = vld [vmem:[#allocation2 + $0x140] sm:$0xff] }
 0x4bf   : > { %3935 = vst.msk [vmem:[#allocation3 + $0x168] sm:$0xff] %vm2433_vm10, %v9053_v41  ;;  %v2601_v22 = vpop.permute.xlu1 %2600  ;;  %v2615_v53 = vpop.permute.xlu2 %2614  ;;  %v9075_v7 = vld [vmem:[#allocation2 + $0x1a] sm:$0xff] }
 0x4c0   : > { %3936 = vst.msk [vmem:[#allocation3 + $0x178] sm:$0xff] %vm2433_vm10, %v9055_v25  ;;  %v2400_v30 = vpop.permute.xlu0 %2399 }
 0x4c1   : > { %3940 = vst.msk [vmem:[#allocation3 + $0x1b8] sm:$0xff] %vm2433_vm10, %v9061_v33  ;;  %2791 = vrot.lane.b32.xlu2 %v9075_v7, %s7242_s19 }
 0x4c2   : > { %2522 = vst.msk [vmem:[#allocation3 + $0x180] sm:$0xff] %vm2433_vm10, %v9065_v38  ;;  %2805 = vrot.lane.b32.xlu0 %v2732_v18, %s7242_s19 }
 0x4c3   : > { %11270 = vst [vmem:[#allocation40_spill] sm:$0xff] %v9075_v7  ;;  %v9102_v7 = vld [vmem:[#allocation2 + $0x3a] sm:$0xff] }
 0x4c4   : > { %2525 = vst.msk [vmem:[#allocation3 + $0x1b0] sm:$0xff] %vm2433_vm10, %v9069_v46  ;;  %7093 = vmatmul.msk.f32.gmra.mxu3 %vm171_vm0, %v3986_v56 }
 0x4c5   : > { %2694 = vst.msk [vmem:[#allocation3 + $0x30] sm:$0xff] %vm2690_vm11, %v2601_v22  ;;  %v9084_v49 = vld [vmem:[#allocation2 + $0x169] sm:$0xff] }
 0x4c6   : > { %2701 = vst.msk [vmem:[#allocation3 + $0xa0] sm:$0xff] %vm2690_vm11, %v2615_v53  ;;  %v9086_v48 = vld [vmem:[#allocation2 + $0x16a] sm:$0xff]  ;;  %2654 = vrot.lane.b32.xlu1 %v9084_v49, %s7241_s14 }
 0x4c7   : > { %11271 = vst [vmem:[#allocation50_spill] sm:$0xff] %v9084_v49  ;;  %v9088_v29 = vld [vmem:[#allocation2 + $0x170] sm:$0xff]  ;;  %v9094_v22 = vld [vmem:[#allocation2 + $0x168] sm:$0xff]  ;;  %v2607_v18 = vpop.permute.xlu1 %2606  ;;  %v2621_v53 = vpop.permute.xlu2 %2620 }
 0x4c8   : > { %2465 = vst.msk [vmem:[#allocation2 + $0x189] sm:$0xff] %vm2433_vm10, %v2400_v30  ;;  %v2724_v30 = vld [vmem:[#allocation2 + $0xa] sm:$0xff]  ;;  %v2599_v56 = vpop.permute.xlu0 %2598 }
 0x4c9   : > { %3939 = vst.msk [vmem:[#allocation3 + $0x1a8] sm:$0xff] %vm2433_vm10, %v9086_v48  ;;  %2797 = vrot.lane.b32.xlu2 %v9102_v7, %s7242_s19  ;;  %v3988_v49 = vld [vmem:[#allocation3 + $0x158] sm:$0xff] }
 0x4ca   : > { %2529 = vst.msk [vmem:[#allocation3 + $0x1f0] sm:$0xff] %vm2433_vm10, %v9088_v29  ;;  %2811 = vrot.lane.b32.xlu0 %v8837_v21, %s7242_s19 }
 0x4cb   : > { %2528 = vst.msk [vmem:[#allocation3 + $0x1e0] sm:$0xff] %vm2433_vm10, %v9094_v22 }
 0x4cc   : > { %11272 = vst [vmem:[#allocation45_spill] sm:$0xff] %v9102_v7  ;;  %7094 = vmatmul.msk.f32.gmra.mxu3 %vm171_vm0, %v3988_v49  ;;  %v3990_v49 = vld [vmem:[#allocation3 + $0x168] sm:$0xff] }
 0x4cd   : > { %2697 = vst.msk [vmem:[#allocation3 + $0x60] sm:$0xff] %vm2690_vm11, %v2607_v18 }
 0x4ce   : > { %2704 = vst.msk [vmem:[#allocation3 + $0xd0] sm:$0xff] %vm2690_vm11, %v2621_v53  ;;  %2789 = vrot.lane.b32.xlu1 %v2724_v30, %s7242_s19  ;;  %v9123_v53 = vld [vmem:[#allocation2 + $0x32] sm:$0xff] }
 0x4cf   : > { %v3909_v12 = vld [vmem:[#allocation2 + $0x182] sm:$0xff]  ;;  %v3910_v55 = vld [vmem:[#allocation2 + $0x18a] sm:$0xff]  ;;  %2693 = vst.msk [vmem:[#allocation3 + $0x20] sm:$0xff] %vm2690_vm11, %v2599_v56  ;;  %v2613_v18 = vpop.permute.xlu1 %2612  ;;  %v2627_v7 = vpop.permute.xlu2 %2626 }
 0x4d0   : > { %3941 = vst.msk [vmem:[#allocation3 + $0x1c8] sm:$0xff] %vm2433_vm10, %v3909_v12  ;;  %v2605_v21 = vpop.permute.xlu0 %2604 }
 0x4d1   : > { %3942 = vst.msk [vmem:[#allocation3 + $0x1d8] sm:$0xff] %vm2433_vm10, %v3910_v55  ;;  %2803 = vrot.lane.b32.xlu2 %v9115_v17, %s7242_s19  ;;  %vm5764_vm10 = vcmask 884544  }
 0x4d2   : > { %2700 = vst.msk [vmem:[#allocation3 + $0x90] sm:$0xff] %vm2690_vm11, %v2613_v18  ;;  %2817 = vrot.lane.b32.xlu0 %v8870_v45, %s7242_s19  ;;  %v3992_v45 = vld [vmem:[#allocation3 + $0x178] sm:$0xff] }
 0x4d3   : > { %2707 = vst.msk [vmem:[#allocation3 + $0x100] sm:$0xff] %vm2690_vm11, %v2627_v7  ;;  %v9135_v7 = vld [vmem:[#allocation2 + $0x52] sm:$0xff] }
 0x4d4   : > { %2696 = vst.msk [vmem:[#allocation3 + $0x50] sm:$0xff] %vm2690_vm11, %v2605_v21  ;;  %7095 = vmatmul.msk.f32.gmra.mxu3 %vm171_vm0, %v3990_v49  ;;  %v2946_v21 = vld [vmem:[#allocation2 + $0x180] sm:$0xff] }
 0x4d5   : > { %v3110_v49 = vld [vmem:[#allocation2 + $0x21] sm:$0xff] }
 0x4d6   : > { %2795 = vrot.lane.b32.xlu1 %v9123_v53, %s7242_s19 }
 0x4d7   : > { %v2619_v55 = vpop.permute.xlu1 %2618 }
 0x4d8   : > { %2703 = vst.msk [vmem:[#allocation3 + $0xc0] sm:$0xff] %vm2690_vm11, %v2619_v55  ;;  %v2611_v12 = vpop.permute.xlu0 %2610 }
 0x4d9   : > { %2809 = vrot.lane.b32.xlu2 %v8776_v28, %s7242_s19  ;;  %2699 = vst.msk [vmem:[#allocation3 + $0x80] sm:$0xff] %vm2690_vm11, %v2611_v12  ;;  %v3994_v28 = vld [vmem:[#allocation3 + $0x188] sm:$0xff]  ;;  %v9298_v12 = vld [vmem:[#allocation2 + $0x49] sm:$0xff] }
 0x4da   : > { %2823 = vrot.lane.b32.xlu0 %v8924_v16, %s7242_s19 }
 0x4dc   : > { %7096 = vmatmul.msk.f32.gmra.mxu3 %vm171_vm0, %v3992_v45  ;;  %v3109_v45 = vld [vmem:[#allocation2 + $0x19] sm:$0xff] }
 0x4de   : > { %2801 = vrot.lane.b32.xlu1 %v9135_v7, %s7242_s19 }
 0x4df   : > { %v2625_v30 = vpop.permute.xlu1 %2624 }
 0x4e0   : > { %2706 = vst.msk [vmem:[#allocation3 + $0xf0] sm:$0xff] %vm2690_vm11, %v2625_v30  ;;  %v2617_v56 = vpop.permute.xlu0 %2616 }
 0x4e1   : > { %2815 = vrot.lane.b32.xlu2 %v8868_v40, %s7242_s19  ;;  %2702 = vst.msk [vmem:[#allocation3 + $0xb0] sm:$0xff] %vm2690_vm11, %v2617_v56  ;;  %v3996_v40 = vld [vmem:[#allocation3 + $0x198] sm:$0xff] }
 0x4e2   : > { %2829 = vrot.lane.b32.xlu0 %v8957_v50, %s7242_s19  ;;  %v2633_v16 = vpop.permute.xlu2 %2632 }
 0x4e3   : > { %2710 = vst.msk [vmem:[#allocation3 + $0x130] sm:$0xff] %vm2690_vm11, %v2633_v16  ;;  %v9312_v16 = vld [vmem:[#allocation2 + $0x39] sm:$0xff] }
 0x4e4   : > { %7097 = vmatmul.msk.f32.gmra.mxu3 %vm171_vm0, %v3994_v28  ;;  %v9308_v28 = vld [vmem:[#allocation2 + $0x69] sm:$0xff] }
 0x4e6   : > { %2807 = vrot.lane.b32.xlu1 %v8799_v5, %s7242_s19  ;;  %v3998_v5 = vld [vmem:[#allocation3 + $0x1a8] sm:$0xff] }
 0x4e8   : > { %v2623_v18 = vpop.permute.xlu0 %2622 }
 0x4e9   : > { %2821 = vrot.lane.b32.xlu2 %v8856_v44, %s7242_s19  ;;  %2705 = vst.msk [vmem:[#allocation3 + $0xe0] sm:$0xff] %vm2690_vm11, %v2623_v18  ;;  %v11274_v18 = vld [vmem:[#allocation34_spill] sm:$0xff] }
 0x4ea   : > { %2835 = vrot.lane.b32.xlu0 %v9020_v58, %s7242_s19 }
 0x4ec   : > { %7098 = vmatmul.msk.f32.gmra.mxu3 %vm171_vm0, %v3996_v40 }
 0x4ee   : > { %2813 = vrot.lane.b32.xlu1 %v8839_v32, %s7242_s19  ;;  %v4000_v32 = vld [vmem:[#allocation3 + $0x1b8] sm:$0xff] }
 0x4f0   : > { %v2629_v50 = vpop.permute.xlu0 %2628 }
 0x4f1   : > { %2827 = vrot.lane.b32.xlu2 %v8952_v39, %s7242_s19  ;;  %2708 = vst.msk [vmem:[#allocation3 + $0x110] sm:$0xff] %vm2690_vm11, %v2629_v50 }
 0x4f2   : > { %2841 = vrot.lane.b32.xlu0 %v9055_v25, %s7242_s19  ;;  %v2631_v44 = vpop.permute.xlu1 %2630 }
 0x4f3   : > { %2709 = vst.msk [vmem:[#allocation3 + $0x120] sm:$0xff] %vm2690_vm11, %v2631_v44  ;;  %v9321_v44 = vld [vmem:[#allocation2 + $0x91] sm:$0xff] }
 0x4f4   : > { %7099 = vmatmul.msk.f32.gmra.mxu3 %vm171_vm0, %v3998_v5 }
 0x4f6   : > { %2819 = vrot.lane.b32.xlu1 %v8888_v9, %s7242_s19  ;;  %v4002_v9 = vld [vmem:[#allocation3 + $0x1c8] sm:$0xff] }
 0x4f8   : > { %v2635_v58 = vpop.permute.xlu0 %2634 }
 0x4f9   : > { %2833 = vrot.lane.b32.xlu2 %v8941_v3, %s7242_s19  ;;  %2711 = vst.msk [vmem:[#allocation3 + $0x140] sm:$0xff] %vm2690_vm11, %v2635_v58  ;;  %v9325_v58 = vld [vmem:[#allocation2 + $0x61] sm:$0xff] }
 0x4fa   : > { %2847 = vrot.lane.b32.xlu0 %v9086_v48, %s7242_s19 }
 0x4fb   : > { %v2639_v25 = vpop.permute.xlu2 %2638 }
 0x4fc   : > { %7100 = vmatmul.msk.f32.gmra.mxu3 %vm171_vm0, %v4000_v32  ;;  %2713 = vst.msk [vmem:[#allocation3 + $0x160] sm:$0xff] %vm2690_vm11, %v2639_v25  ;;  %v11275_v32 = vld [vmem:[#allocation41_spill] sm:$0xff] }
 0x4fe   : > { %2825 = vrot.lane.b32.xlu1 %v8926_v19, %s7242_s19 }
 0x501   : > { %2839 = vrot.lane.b32.xlu2 %v9053_v41, %s7242_s19  ;;  %v4004_v41 = vld [vmem:[#allocation3 + $0x1d8] sm:$0xff] }
 0x502   : > { %2982 = vrot.lane.b32.xlu0 %v8729_v34, %s7243_s20 }
 0x503   : > { %v2645_v3 = vpop.permute.xlu2 %2644  ;;  %v2641_v39 = vpop.permute.xlu0 %2640 }
 0x504   : > { %7101 = vmatmul.msk.f32.gmra.mxu3 %vm171_vm0, %v4002_v9  ;;  %2716 = vst.msk [vmem:[#allocation3 + $0x190] sm:$0xff] %vm2690_vm11, %v2645_v3 }
 0x505   : > { %2714 = vst.msk [vmem:[#allocation3 + $0x170] sm:$0xff] %vm2690_vm11, %v2641_v39  ;;  %v9334_v39 = vld [vmem:[#allocation2 + $0xb1] sm:$0xff] }
 0x506   : > { %2831 = vrot.lane.b32.xlu1 %v8976_v36, %s7242_s19 }
 0x509   : > { %2845 = vrot.lane.b32.xlu2 %v8981_v20, %s7242_s19 }
 0x50a   : > { %2988 = vrot.lane.b32.xlu0 %v8752_v4, %s7243_s20  ;;  %v2637_v34 = vpop.permute.xlu1 %2636 }
 0x50b   : > { %v2651_v19 = vpop.permute.xlu2 %2650  ;;  %2712 = vst.msk [vmem:[#allocation3 + $0x150] sm:$0xff] %vm2690_vm11, %v2637_v34  ;;  %v11276_v34 = vld [vmem:[#allocation35_spill] sm:$0xff] }
 0x50c   : > { %7102 = vmatmul.msk.f32.gmra.mxu3 %vm171_vm0, %v4004_v41  ;;  %v2647_v36 = vpop.permute.xlu0 %2646  ;;  %2719 = vst.msk [vmem:[#allocation3 + $0x1c0] sm:$0xff] %vm2690_vm11, %v2651_v19  ;;  %v9338_v41 = vld [vmem:[#allocation2 + $0x81] sm:$0xff] }
 0x50d   : > { %2717 = vst.msk [vmem:[#allocation3 + $0x1a0] sm:$0xff] %vm2690_vm11, %v2647_v36 }
 0x50e   : > { %2837 = vrot.lane.b32.xlu1 %v9003_v35, %s7242_s19 }
 0x511   : > { %2980 = vrot.lane.b32.xlu2 %v8709_v60, %s7243_s20 }
 0x512   : > { %2994 = vrot.lane.b32.xlu0 %v8787_v57, %s7243_s20 }
 0x513   : > { %v2657_v4 = vpop.permute.xlu2 %2656 }
 0x514   : > { %2722 = vst.msk [vmem:[#allocation3 + $0x1f0] sm:$0xff] %vm2690_vm11, %v2657_v4  ;;  %v2653_v20 = vpop.permute.xlu0 %2652 }
 0x515   : > { %2720 = vst.msk [vmem:[#allocation3 + $0x1d0] sm:$0xff] %vm2690_vm11, %v2653_v20  ;;  %v9347_v20 = vld [vmem:[#allocation2 + $0xd9] sm:$0xff] }
 0x516   : > { %2843 = vrot.lane.b32.xlu1 %v9022_v14, %s7242_s19 }
 0x519   : > { %2986 = vrot.lane.b32.xlu2 %v8737_v51, %s7243_s20 }
 0x51a   : > { %3000 = vrot.lane.b32.xlu0 %v8825_v2, %s7243_s20 }
 0x51b   : > { %v2792_v60 = vpop.permute.xlu2 %2791 }
 0x51c   : > { %2886 = vst.msk [vmem:[#allocation3 + $0x20] sm:$0xff] %vm2883_vm12, %v2792_v60  ;;  %v2788_v57 = vpop.permute.xlu0 %2787  ;;  %v9351_v60 = vld [vmem:[#allocation2 + $0xa9] sm:$0xff] }
 0x51d   : > { %2884 = vst.msk [vmem:[#allocation3] sm:$0xff] %vm2883_vm12, %v2788_v57  ;;  %v11277_v57 = vld [vmem:[#allocation44_spill] sm:$0xff] }
 0x51e   : > { %2849 = vrot.lane.b32.xlu1 %v9061_v33, %s7242_s19 }
 0x521   : > { %2992 = vrot.lane.b32.xlu2 %v8746_v8, %s7243_s20 }
 0x522   : > { %3006 = vrot.lane.b32.xlu0 %v8873_v23, %s7243_s20 }
 0x523   : > { %v2798_v48 = vpop.permute.xlu2 %2797 }
 0x524   : > { %2889 = vst.msk [vmem:[#allocation3 + $0x50] sm:$0xff] %vm2883_vm12, %v2798_v48  ;;  %v2794_v2 = vpop.permute.xlu0 %2793 }
 0x525   : > { %v2643_v35 = vpop.permute.xlu1 %2642  ;;  %2887 = vst.msk [vmem:[#allocation3 + $0x30] sm:$0xff] %vm2883_vm12, %v2794_v2 }
 0x526   : > { %2984 = vrot.lane.b32.xlu1 %v8735_v54, %s7243_s20  ;;  %2715 = vst.msk [vmem:[#allocation3 + $0x180] sm:$0xff] %vm2690_vm11, %v2643_v35 }
 0x529   : > { %2998 = vrot.lane.b32.xlu2 %v8804_v47, %s7243_s20 }
 0x52a   : > { %3012 = vrot.lane.b32.xlu0 %v8914_v43, %s7243_s20 }
 0x52b   : > { %v2804_v8 = vpop.permute.xlu2 %2803 }
 0x52c   : > { %2892 = vst.msk [vmem:[#allocation3 + $0x80] sm:$0xff] %vm2883_vm12, %v2804_v8  ;;  %v2800_v54 = vpop.permute.xlu0 %2799  ;;  %v11278_v8 = vld [vmem:[#allocation36_spill] sm:$0xff] }
 0x52d   : > { %2890 = vst.msk [vmem:[#allocation3 + $0x60] sm:$0xff] %vm2883_vm12, %v2800_v54  ;;  %v9362_v54 = vld [vmem:[#allocation2 + $0xc9] sm:$0xff] }
 0x52e   : > { %2990 = vrot.lane.b32.xlu1 %v8765_v13, %s7243_s20  ;;  %v2649_v23 = vpop.permute.xlu1 %2648 }
 0x52f   : > { %2718 = vst.msk [vmem:[#allocation3 + $0x1b0] sm:$0xff] %vm2690_vm11, %v2649_v23  ;;  %v11279_v23 = vld [vmem:[#allocation39_spill] sm:$0xff] }
 0x531   : > { %3004 = vrot.lane.b32.xlu2 %v8816_v6, %s7243_s20 }
 0x532   : > { %3018 = vrot.lane.b32.xlu0 %v8962_v1, %s7243_s20 }
 0x533   : > { %v2810_v47 = vpop.permute.xlu2 %2809 }
 0x534   : > { %2895 = vst.msk [vmem:[#allocation3 + $0xb0] sm:$0xff] %vm2883_vm12, %v2810_v47  ;;  %v2806_v13 = vpop.permute.xlu0 %2805 }
 0x535   : > { %2893 = vst.msk [vmem:[#allocation3 + $0x90] sm:$0xff] %vm2883_vm12, %v2806_v13 }
 0x536   : > { %2996 = vrot.lane.b32.xlu1 %v8801_v42, %s7243_s20 }
 0x538   : > { %v2655_v43 = vpop.permute.xlu1 %2654 }
 0x539   : > { %2721 = vst.msk [vmem:[#allocation3 + $0x1e0] sm:$0xff] %vm2690_vm11, %v2655_v43  ;;  %3010 = vrot.lane.b32.xlu2 %v8893_v11, %s7243_s20  ;;  %vm5957_vm11 = vcmask 1015744  }
 0x53a   : > { %3024 = vrot.lane.b32.xlu0 %v9065_v38, %s7243_s20  ;;  %v2947_v38 = vld [vmem:[#allocation2 + $0x188] sm:$0xff] }
 0x53b   : > { %v2816_v6 = vpop.permute.xlu2 %2815 }
 0x53c   : > { %2898 = vst.msk [vmem:[#allocation3 + $0xe0] sm:$0xff] %vm2883_vm12, %v2816_v6  ;;  %v2812_v42 = vpop.permute.xlu0 %2811  ;;  %v11280_v6 = vld [vmem:[#allocation37_spill] sm:$0xff] }
 0x53d   : > { %2896 = vst.msk [vmem:[#allocation3 + $0xc0] sm:$0xff] %vm2883_vm12, %v2812_v42  ;;  %v9373_v42 = vld [vmem:[#allocation2 + $0xf1] sm:$0xff] }
 0x53e   : > { %3002 = vrot.lane.b32.xlu1 %v8842_v15, %s7243_s20 }
 0x540   : > { %v2790_v1 = vpop.permute.xlu1 %2789 }
 0x541   : > { %2885 = vst.msk [vmem:[#allocation3 + $0x10] sm:$0xff] %vm2883_vm12, %v2790_v1  ;;  %3016 = vrot.lane.b32.xlu2 %v8907_v59, %s7243_s20  ;;  %v11281_v1 = vld [vmem:[#allocation47_spill] sm:$0xff] }
 0x542   : > { %3030 = vrot.lane.b32.xlu0 %v9069_v46, %s7243_s20 }
 0x543   : > { %v2822_v11 = vpop.permute.xlu2 %2821 }
 0x544   : > { %2901 = vst.msk [vmem:[#allocation3 + $0x110] sm:$0xff] %vm2883_vm12, %v2822_v11  ;;  %v2818_v15 = vpop.permute.xlu0 %2817 }
 0x545   : > { %2899 = vst.msk [vmem:[#allocation3 + $0xf0] sm:$0xff] %vm2883_vm12, %v2818_v15 }
 0x546   : > { %3008 = vrot.lane.b32.xlu1 %v8890_v31, %s7243_s20 }
 0x548   : > { %v2796_v14 = vpop.permute.xlu1 %2795 }
 0x549   : > { %2888 = vst.msk [vmem:[#allocation3 + $0x40] sm:$0xff] %vm2883_vm12, %v2796_v14  ;;  %3022 = vrot.lane.b32.xlu2 %v8990_v10, %s7243_s20 }
 0x54a   : > { %3036 = vrot.lane.b32.xlu0 %v9094_v22, %s7243_s20 }
 0x54b   : > { %v2828_v59 = vpop.permute.xlu2 %2827 }
 0x54c   : > { %2904 = vst.msk [vmem:[#allocation3 + $0x140] sm:$0xff] %vm2883_vm12, %v2828_v59  ;;  %v2824_v31 = vpop.permute.xlu0 %2823  ;;  %v11282_v59 = vld [vmem:[#allocation42_spill] sm:$0xff] }
 0x54d   : > { %2902 = vst.msk [vmem:[#allocation3 + $0x120] sm:$0xff] %vm2883_vm12, %v2824_v31  ;;  %v9384_v31 = vld [vmem:[#allocation2 + $0x111] sm:$0xff] }
 0x54e   : > { %3014 = vrot.lane.b32.xlu1 %v8934_v52, %s7243_s20 }
 0x550   : > { %v2802_v33 = vpop.permute.xlu1 %2801 }
 0x551   : > { %2891 = vst.msk [vmem:[#allocation3 + $0x70] sm:$0xff] %vm2883_vm12, %v2802_v33  ;;  %3028 = vrot.lane.b32.xlu2 %v8966_v24, %s7243_s20  ;;  %v11283_v33 = vld [vmem:[#allocation40_spill] sm:$0xff] }
 0x552   : > { %3042 = vrot.lane.b32.xlu0 %v2947_v38, %s7243_s20 }
 0x553   : > { %v2834_v10 = vpop.permute.xlu2 %2833 }
 0x554   : > { %2907 = vst.msk [vmem:[#allocation3 + $0x170] sm:$0xff] %vm2883_vm12, %v2834_v10  ;;  %v2830_v52 = vpop.permute.xlu0 %2829 }
 0x555   : > { %2905 = vst.msk [vmem:[#allocation3 + $0x150] sm:$0xff] %vm2883_vm12, %v2830_v52 }
 0x556   : > { %3020 = vrot.lane.b32.xlu1 %v8985_v63, %s7243_s20 }
 0x558   : > { %v2808_v46 = vpop.permute.xlu1 %2807 }
 0x559   : > { %2894 = vst.msk [vmem:[#allocation3 + $0xa0] sm:$0xff] %vm2883_vm12, %v2808_v46  ;;  %3034 = vrot.lane.b32.xlu2 %v9036_v62, %s7243_s20  ;;  %v11284_v46 = vld [vmem:[#allocation50_spill] sm:$0xff] }
 0x55a   : > { %3177 = vrot.lane.b32.xlu0 %v8831_v26, %s7244_s21 }
 0x55b   : > { %v2840_v24 = vpop.permute.xlu2 %2839 }
 0x55c   : > { %2910 = vst.msk [vmem:[#allocation3 + $0x1a0] sm:$0xff] %vm2883_vm12, %v2840_v24  ;;  %v2836_v63 = vpop.permute.xlu0 %2835  ;;  %v9395_v24 = vld [vmem:[#allocation2 + $0x139] sm:$0xff] }
 0x55d   : > { %2908 = vst.msk [vmem:[#allocation3 + $0x180] sm:$0xff] %vm2883_vm12, %v2836_v63  ;;  %v11285_v63 = vld [vmem:[#allocation45_spill] sm:$0xff] }
 0x55e   : > { %3026 = vrot.lane.b32.xlu1 %v9028_v37, %s7243_s20 }
 0x560   : > { %v2814_v22 = vpop.permute.xlu1 %2813 }
 0x561   : > { %2897 = vst.msk [vmem:[#allocation3 + $0xd0] sm:$0xff] %vm2883_vm12, %v2814_v22  ;;  %3040 = vrot.lane.b32.xlu2 %v2946_v21, %s7243_s20 }
 0x562   : > { %3183 = vrot.lane.b32.xlu0 %v8850_v61, %s7244_s21 }
 0x563   : > { %v2846_v26 = vpop.permute.xlu2 %2845 }
 0x564   : > { %2913 = vst.msk [vmem:[#allocation3 + $0x1d0] sm:$0xff] %vm2883_vm12, %v2846_v26  ;;  %v2842_v37 = vpop.permute.xlu0 %2841 }
 0x565   : > { %2911 = vst.msk [vmem:[#allocation3 + $0x1b0] sm:$0xff] %vm2883_vm12, %v2842_v37  ;;  %v9404_v37 = vld [vmem:[#allocation2 + $0x189] sm:$0xff] }
 0x566   : > { %3032 = vrot.lane.b32.xlu1 %v9032_v27, %s7243_s20 }
 0x568   : > { %v2820_v62 = vpop.permute.xlu1 %2819 }
 0x569   : > { %2900 = vst.msk [vmem:[#allocation3 + $0x100] sm:$0xff] %vm2883_vm12, %v2820_v62  ;;  %3175 = vrot.lane.b32.xlu2 %v3110_v49, %s7244_s21  ;;  %v9408_v62 = vld [vmem:[#allocation2 + $0x159] sm:$0xff] }
 0x56a   : > { %3189 = vrot.lane.b32.xlu0 %v8862_v0, %s7244_s21  ;;  %v11273_v0 = vld [vmem:[#allocation38_spill] sm:$0xff] }
 0x56b   : > { %v2981_v61 = vpop.permute.xlu2 %2980 }
 0x56c   : > { %3077 = vst.msk [vmem:[#allocation3] sm:$0xff] %vm3076_vm13, %v2981_v61  ;;  %v2848_v27 = vpop.permute.xlu0 %2847 }
 0x56d   : > { %2914 = vst.msk [vmem:[#allocation3 + $0x1e0] sm:$0xff] %vm2883_vm12, %v2848_v27 }
 0x56e   : > { %3038 = vrot.lane.b32.xlu1 %v9088_v29, %s7243_s20 }
 0x570   : > { %v2826_v55 = vpop.permute.xlu1 %2825 }
 0x571   : > { %2903 = vst.msk [vmem:[#allocation3 + $0x130] sm:$0xff] %vm2883_vm12, %v2826_v55  ;;  %3181 = vrot.lane.b32.xlu2 %v9298_v12, %s7244_s21  ;;  %v3311_v55 = vld [vmem:[#allocation2 + $0x82] sm:$0xff] }
 0x572   : > { %3195 = vrot.lane.b32.xlu0 %v11273_v0, %s7244_s21 }
 0x573   : > { %v2987_v29 = vpop.permute.xlu2 %2986 }
 0x574   : > { %3080 = vst.msk [vmem:[#allocation3 + $0x30] sm:$0xff] %vm3076_vm13, %v2987_v29  ;;  %v2983_v30 = vpop.permute.xlu0 %2982 }
 0x575   : > { %3078 = vst.msk [vmem:[#allocation3 + $0x10] sm:$0xff] %vm3076_vm13, %v2983_v30  ;;  %v3303_v30 = vld [vmem:[#allocation2 + $0x22] sm:$0xff] }
 0x576   : > { %3173 = vrot.lane.b32.xlu1 %v3109_v45, %s7244_s21  ;;  %v9419_v45 = vld [vmem:[#allocation2 + $0x181] sm:$0xff] }
 0x578   : > { %v2832_v56 = vpop.permute.xlu1 %2831 }
 0x579   : > { %2906 = vst.msk [vmem:[#allocation3 + $0x160] sm:$0xff] %vm2883_vm12, %v2832_v56  ;;  %3187 = vrot.lane.b32.xlu2 %v9308_v28, %s7244_s21 }
 0x57a   : > { %3201 = vrot.lane.b32.xlu0 %v11274_v18, %s7244_s21 }
 0x57b   : > { %v2993_v40 = vpop.permute.xlu2 %2992 }
 0x57c   : > { %3083 = vst.msk [vmem:[#allocation3 + $0x60] sm:$0xff] %vm3076_vm13, %v2993_v40  ;;  %v2989_v50 = vpop.permute.xlu0 %2988 }
 0x57d   : > { %3081 = vst.msk [vmem:[#allocation3 + $0x40] sm:$0xff] %vm3076_vm13, %v2989_v50  ;;  %v3310_v50 = vld [vmem:[#allocation2 + $0x7a] sm:$0xff] }
 0x57e   : > { %3179 = vrot.lane.b32.xlu1 %v9312_v16, %s7244_s21 }
 0x580   : > { %v2838_v5 = vpop.permute.xlu1 %2837 }
 0x581   : > { %2909 = vst.msk [vmem:[#allocation3 + $0x190] sm:$0xff] %vm2883_vm12, %v2838_v5  ;;  %3193 = vrot.lane.b32.xlu2 %v9321_v44, %s7244_s21  ;;  %v3495_v5 = vld [vmem:[#allocation2 + $0x30] sm:$0xff] }
 0x582   : > { %3207 = vrot.lane.b32.xlu0 %v11275_v32, %s7244_s21 }
 0x583   : > { %v2999_v25 = vpop.permute.xlu2 %2998 }
 0x584   : > { %3086 = vst.msk [vmem:[#allocation3 + $0x90] sm:$0xff] %vm3076_vm13, %v2999_v25  ;;  %v2995_v9 = vpop.permute.xlu0 %2994 }
 0x585   : > { %3084 = vst.msk [vmem:[#allocation3 + $0x70] sm:$0xff] %vm3076_vm13, %v2995_v9 }
 0x586   : > { %3185 = vrot.lane.b32.xlu1 %v9325_v58, %s7244_s21 }
 0x588   : > { %v2844_v3 = vpop.permute.xlu1 %2843 }
 0x589   : > { %2912 = vst.msk [vmem:[#allocation3 + $0x1c0] sm:$0xff] %vm2883_vm12, %v2844_v3  ;;  %3199 = vrot.lane.b32.xlu2 %v9334_v39, %s7244_s21  ;;  %v3313_v3 = vld [vmem:[#allocation2 + $0x9a] sm:$0xff] }
 0x58a   : > { %3213 = vrot.lane.b32.xlu0 %v11276_v34, %s7244_s21  ;;  %v3309_v34 = vld [vmem:[#allocation2 + $0x6a] sm:$0xff] }
 0x58b   : > { %v3005_v19 = vpop.permute.xlu2 %3004 }
 0x58c   : > { %3089 = vst.msk [vmem:[#allocation3 + $0xc0] sm:$0xff] %vm3076_vm13, %v3005_v19  ;;  %v3001_v36 = vpop.permute.xlu0 %3000 }
 0x58d   : > { %3087 = vst.msk [vmem:[#allocation3 + $0xa0] sm:$0xff] %vm3076_vm13, %v3001_v36 }
 0x58e   : > { %3191 = vrot.lane.b32.xlu1 %v9338_v41, %s7244_s21 }
 0x590   : > { %v2850_v4 = vpop.permute.xlu1 %2849 }
 0x591   : > { %2915 = vst.msk [vmem:[#allocation3 + $0x1f0] sm:$0xff] %vm2883_vm12, %v2850_v4  ;;  %3205 = vrot.lane.b32.xlu2 %v9347_v20, %s7244_s21  ;;  %vm6651_vm12 = vcmask 130144  }
 0x592   : > { %3219 = vrot.lane.b32.xlu0 %v11277_v57, %s7244_s21  ;;  %v3316_v57 = vld [vmem:[#allocation2 + $0xc2] sm:$0xff] }
 0x593   : > { %v3011_v48 = vpop.permute.xlu2 %3010 }
 0x594   : > { %3092 = vst.msk [vmem:[#allocation3 + $0xf0] sm:$0xff] %vm3076_vm13, %v3011_v48  ;;  %v3007_v2 = vpop.permute.xlu0 %3006  ;;  %v3312_v48 = vld [vmem:[#allocation2 + $0x92] sm:$0xff] }
 0x595   : > { %3090 = vst.msk [vmem:[#allocation3 + $0xd0] sm:$0xff] %vm3076_vm13, %v3007_v2 }
 0x596   : > { %3197 = vrot.lane.b32.xlu1 %v9351_v60, %s7244_s21 }
 0x598   : > { %v2985_v35 = vpop.permute.xlu1 %2984 }
 0x599   : > { %3079 = vst.msk [vmem:[#allocation3 + $0x20] sm:$0xff] %vm3076_vm13, %v2985_v35  ;;  %3211 = vrot.lane.b32.xlu2 %v11278_v8, %s7244_s21  ;;  %v3317_v8 = vld [vmem:[#allocation2 + $0xca] sm:$0xff] }
 0x59a   : > { %3225 = vrot.lane.b32.xlu0 %v11279_v23, %s7244_s21  ;;  %v3691_v23 = vld [vmem:[#allocation2 + $0x51] sm:$0xff] }
 0x59b   : > { %v3017_v47 = vpop.permute.xlu2 %3016 }
 0x59c   : > { %3095 = vst.msk [vmem:[#allocation3 + $0x120] sm:$0xff] %vm3076_vm13, %v3017_v47  ;;  %v3013_v13 = vpop.permute.xlu0 %3012  ;;  %v3315_v47 = vld [vmem:[#allocation2 + $0xb2] sm:$0xff] }
 0x59d   : > { %3093 = vst.msk [vmem:[#allocation3 + $0x100] sm:$0xff] %vm3076_vm13, %v3013_v13 }
 0x59e   : > { %3203 = vrot.lane.b32.xlu1 %v9362_v54, %s7244_s21 }
 0x5a0   : > { %v2991_v43 = vpop.permute.xlu1 %2990 }
 0x5a1   : > { %3082 = vst.msk [vmem:[#allocation3 + $0x50] sm:$0xff] %vm3076_vm13, %v2991_v43  ;;  %3217 = vrot.lane.b32.xlu2 %v11280_v6, %s7244_s21  ;;  %v3497_v6 = vld [vmem:[#allocation2 + $0x48] sm:$0xff] }
 0x5a2   : > { %3231 = vrot.lane.b32.xlu0 %v11281_v1, %s7244_s21  ;;  %v3688_v1 = vld [vmem:[#allocation2 + $0x31] sm:$0xff] }
 0x5a3   : > { %v3023_v11 = vpop.permute.xlu2 %3022 }
 0x5a4   : > { %3098 = vst.msk [vmem:[#allocation3 + $0x150] sm:$0xff] %vm3076_vm13, %v3023_v11  ;;  %v3019_v15 = vpop.permute.xlu0 %3018 }
 0x5a5   : > { %3096 = vst.msk [vmem:[#allocation3 + $0x130] sm:$0xff] %vm3076_vm13, %v3019_v15 }
 0x5a6   : > { %3209 = vrot.lane.b32.xlu1 %v9373_v42, %s7244_s21 }
 0x5a8   : > { %v2997_v14 = vpop.permute.xlu1 %2996 }
 0x5a9   : > { %3085 = vst.msk [vmem:[#allocation3 + $0x80] sm:$0xff] %vm3076_vm13, %v2997_v14  ;;  %3223 = vrot.lane.b32.xlu2 %v11282_v59, %s7244_s21  ;;  %v3498_v59 = vld [vmem:[#allocation2 + $0x50] sm:$0xff] }
 0x5aa   : > { %3366 = vrot.lane.b32.xlu0 %v11283_v33, %s7245_s22  ;;  %v3320_v33 = vld [vmem:[#allocation2 + $0xf2] sm:$0xff] }
 0x5ab   : > { %v3029_v38 = vpop.permute.xlu2 %3028 }
 0x5ac   : > { %3101 = vst.msk [vmem:[#allocation3 + $0x180] sm:$0xff] %vm3076_vm13, %v3029_v38  ;;  %v3025_v10 = vpop.permute.xlu0 %3024 }
 0x5ad   : > { %3099 = vst.msk [vmem:[#allocation3 + $0x160] sm:$0xff] %vm3076_vm13, %v3025_v10 }
 0x5ae   : > { %3215 = vrot.lane.b32.xlu1 %v9384_v31, %s7244_s21 }
 0x5b0   : > { %v3003_v52 = vpop.permute.xlu1 %3002 }
 0x5b1   : > { %3088 = vst.msk [vmem:[#allocation3 + $0xb0] sm:$0xff] %vm3076_vm13, %v3003_v52  ;;  %3229 = vrot.lane.b32.xlu2 %v11284_v46, %s7244_s21  ;;  %v3499_v52 = vld [vmem:[#allocation2 + $0x60] sm:$0xff] }
 0x5b2   : > { %3372 = vrot.lane.b32.xlu0 %v11285_v63, %s7245_s22  ;;  %v3321_v46 = vld [vmem:[#allocation2 + $0xfa] sm:$0xff] }
 0x5b3   : > { %v3035_v22 = vpop.permute.xlu2 %3034  ;;  %v3318_v63 = vld [vmem:[#allocation2 + $0xda] sm:$0xff] }
 0x5b4   : > { %3104 = vst.msk [vmem:[#allocation3 + $0x1b0] sm:$0xff] %vm3076_vm13, %v3035_v22  ;;  %v3031_v21 = vpop.permute.xlu0 %3030 }
 0x5b5   : > { %3102 = vst.msk [vmem:[#allocation3 + $0x190] sm:$0xff] %vm3076_vm13, %v3031_v21 }
 0x5b6   : > { %3221 = vrot.lane.b32.xlu1 %v9395_v24, %s7244_s21 }
 0x5b8   : > { %v3009_v26 = vpop.permute.xlu1 %3008 }
 0x5b9   : > { %3091 = vst.msk [vmem:[#allocation3 + $0xe0] sm:$0xff] %vm3076_vm13, %v3009_v26  ;;  %3235 = vrot.lane.b32.xlu2 %v9404_v37, %s7244_s21  ;;  %v3503_v26 = vld [vmem:[#allocation2 + $0x90] sm:$0xff] }
 0x5ba   : > { %3378 = vrot.lane.b32.xlu0 %v9115_v17, %s7245_s22 }
 0x5bb   : > { %v3041_v49 = vpop.permute.xlu2 %3040 }
 0x5bc   : > { %3107 = vst.msk [vmem:[#allocation3 + $0x1e0] sm:$0xff] %vm3076_vm13, %v3041_v49  ;;  %v3037_v61 = vpop.permute.xlu0 %3036  ;;  %v3319_v49 = vld [vmem:[#allocation2 + $0xe2] sm:$0xff] }
 0x5bd   : > { %3105 = vst.msk [vmem:[#allocation3 + $0x1c0] sm:$0xff] %vm3076_vm13, %v3037_v61 }
 0x5be   : > { %3227 = vrot.lane.b32.xlu1 %v9408_v62, %s7244_s21 }
 0x5c0   : > { %v3015_v27 = vpop.permute.xlu1 %3014 }
 0x5c1   : > { %3094 = vst.msk [vmem:[#allocation3 + $0x110] sm:$0xff] %vm3076_vm13, %v3015_v27  ;;  %3370 = vrot.lane.b32.xlu2 %v9123_v53, %s7245_s22  ;;  %v3314_v53 = vld [vmem:[#allocation2 + $0xaa] sm:$0xff] }
 0x5c2   : > { %3384 = vrot.lane.b32.xlu0 %v3311_v55, %s7245_s22 }
 0x5c3   : > { %v3176_v17 = vpop.permute.xlu2 %3175 }
 0x5c4   : > { %3271 = vst.msk [vmem:[#allocation3 + $0x10] sm:$0xff] %vm3269_vm14, %v3176_v17  ;;  %v3043_v0 = vpop.permute.xlu0 %3042  ;;  %v3694_v17 = vld [vmem:[#allocation2 + $0x79] sm:$0xff] }
 0x5c5   : > { %3108 = vst.msk [vmem:[#allocation3 + $0x1f0] sm:$0xff] %vm3076_vm13, %v3043_v0  ;;  %v3504_v0 = vld [vmem:[#allocation2 + $0x98] sm:$0xff] }
 0x5c6   : > { %3233 = vrot.lane.b32.xlu1 %v9419_v45, %s7244_s21 }
 0x5c8   : > { %v3021_v29 = vpop.permute.xlu1 %3020 }
 0x5c9   : > { %3097 = vst.msk [vmem:[#allocation3 + $0x140] sm:$0xff] %vm3076_vm13, %v3021_v29  ;;  %3376 = vrot.lane.b32.xlu2 %v9135_v7, %s7245_s22  ;;  %v3306_v7 = vld [vmem:[#allocation2 + $0x4a] sm:$0xff] }
 0x5ca   : > { %3390 = vrot.lane.b32.xlu0 %v3314_v53, %s7245_s22 }
 0x5cb   : > { %v3182_v56 = vpop.permute.xlu2 %3181 }
 0x5cc   : > { %3274 = vst.msk [vmem:[#allocation3 + $0x40] sm:$0xff] %vm3269_vm14, %v3182_v56  ;;  %v3178_v18 = vpop.permute.xlu0 %3177  ;;  %v3505_v56 = vld [vmem:[#allocation2 + $0xa8] sm:$0xff] }
 0x5cd   : > { %3272 = vst.msk [vmem:[#allocation3 + $0x20] sm:$0xff] %vm3269_vm14, %v3178_v18  ;;  %v3501_v18 = vld [vmem:[#allocation2 + $0x78] sm:$0xff] }
 0x5ce   : > { %3368 = vrot.lane.b32.xlu1 %v3303_v30, %s7245_s22 }
 0x5d0   : > { %v3027_v40 = vpop.permute.xlu1 %3026 }
 0x5d1   : > { %3100 = vst.msk [vmem:[#allocation3 + $0x170] sm:$0xff] %vm3076_vm13, %v3027_v40  ;;  %3382 = vrot.lane.b32.xlu2 %v3310_v50, %s7245_s22 }
 0x5d2   : > { %3559 = vrot.lane.b32.xlu0 %v3495_v5, %s7246_s23 }
 0x5d3   : > { %v3188_v32 = vpop.permute.xlu2 %3187 }
 0x5d4   : > { %3277 = vst.msk [vmem:[#allocation3 + $0x70] sm:$0xff] %vm3269_vm14, %v3188_v32  ;;  %v3184_v25 = vpop.permute.xlu0 %3183  ;;  %v3322_v32 = vld [vmem:[#allocation2 + $0x10a] sm:$0xff] }
 0x5d5   : > { %3275 = vst.msk [vmem:[#allocation3 + $0x50] sm:$0xff] %vm3269_vm14, %v3184_v25  ;;  %v3502_v25 = vld [vmem:[#allocation2 + $0x80] sm:$0xff] }
 0x5d6   : > { %3374 = vrot.lane.b32.xlu1 %v3306_v7, %s7245_s22  ;;  %v7069_v7 = vld [vmem:[%s11090_s1 + $0x100] sm:$0xff] }
 0x5d8   : > { %v3033_v9 = vpop.permute.xlu1 %3032 }
 0x5d9   : > { %3103 = vst.msk [vmem:[#allocation3 + $0x1a0] sm:$0xff] %vm3076_vm13, %v3033_v9  ;;  %3388 = vrot.lane.b32.xlu2 %v3313_v3, %s7245_s22  ;;  %v7068_v3 = vld [vmem:[%s11090_s1 + $0xf8] sm:$0xff] }
 0x5da   : > { %3561 = vrot.lane.b32.xlu0 %v8737_v51, %s7246_s23 }
 0x5db   : > { %v3194_v19 = vpop.permute.xlu2 %3193 }
 0x5dc   : > { %3280 = vst.msk [vmem:[#allocation3 + $0xa0] sm:$0xff] %vm3269_vm14, %v3194_v19  ;;  %v3190_v36 = vpop.permute.xlu0 %3189 }
 0x5dd   : > { %3278 = vst.msk [vmem:[#allocation3 + $0x80] sm:$0xff] %vm3269_vm14, %v3190_v36  ;;  %v7066_v36 = vld [vmem:[%s11090_s1 + $0xe8] sm:$0xff] }
 0x5de   : > { %3380 = vrot.lane.b32.xlu1 %v3309_v34, %s7245_s22 }
 0x5e0   : > { %v3039_v4 = vpop.permute.xlu1 %3038 }
 0x5e1   : > { %3106 = vst.msk [vmem:[#allocation3 + $0x1d0] sm:$0xff] %vm3076_vm13, %v3039_v4  ;;  %3394 = vrot.lane.b32.xlu2 %v3316_v57, %s7245_s22  ;;  %v3323_v4 = vld [vmem:[#allocation2 + $0x112] sm:$0xff]  ;;  %v3700_v57 = vld [vmem:[#allocation2 + $0xc1] sm:$0xff] }
 0x5e2   : > { %3756 = vrot.lane.b32.xlu0 %v9298_v12, %s7247_s24 }
 0x5e3   : > { %v3200_v51 = vpop.permute.xlu2 %3199 }
 0x5e4   : > { %3283 = vst.msk [vmem:[#allocation3 + $0xd0] sm:$0xff] %vm3269_vm14, %v3200_v51  ;;  %v3196_v2 = vpop.permute.xlu0 %3195  ;;  %v7065_v51 = vld [vmem:[%s11090_s1 + $0xe0] sm:$0xff] }
 0x5e5   : > { %3281 = vst.msk [vmem:[#allocation3 + $0xb0] sm:$0xff] %vm3269_vm14, %v3196_v2 }
 0x5e6   : > { %3386 = vrot.lane.b32.xlu1 %v3312_v48, %s7245_s22 }
 0x5e8   : > { %v3174_v35 = vpop.permute.xlu1 %3173 }
 0x5e9   : > { %3270 = vst.msk [vmem:[#allocation3] sm:$0xff] %vm3269_vm14, %v3174_v35  ;;  %3396 = vrot.lane.b32.xlu2 %v3317_v8, %s7245_s22  ;;  %v7064_v8 = vld [vmem:[%s11090_s1 + $0xd8] sm:$0xff] }
 0x5ea   : > { %3758 = vrot.lane.b32.xlu0 %v3691_v23, %s7247_s24  ;;  %v3506_v23 = vld [vmem:[#allocation2 + $0xb0] sm:$0xff] }
 0x5eb   : > { %v3206_v12 = vpop.permute.xlu2 %3205 }
 0x5ec   : > { %3286 = vst.msk [vmem:[#allocation3 + $0x100] sm:$0xff] %vm3269_vm14, %v3206_v12  ;;  %v3202_v13 = vpop.permute.xlu0 %3201 }
 0x5ed   : > { %3284 = vst.msk [vmem:[#allocation3 + $0xe0] sm:$0xff] %vm3269_vm14, %v3202_v13 }
 0x5ee   : > { %3392 = vrot.lane.b32.xlu1 %v3315_v47, %s7245_s22  ;;  %v3697_v47 = vld [vmem:[#allocation2 + $0x99] sm:$0xff] }
 0x5f0   : > { %v3180_v43 = vpop.permute.xlu1 %3179 }
 0x5f1   : > { %3273 = vst.msk [vmem:[#allocation3 + $0x30] sm:$0xff] %vm3269_vm14, %v3180_v43  ;;  %3563 = vrot.lane.b32.xlu2 %v3497_v6, %s7246_s23  ;;  %v7062_v6 = vld [vmem:[%s11090_s1 + $0xc8] sm:$0xff] }
 0x5f2   : > { %3760 = vrot.lane.b32.xlu0 %v9325_v58, %s7247_s24 }
 0x5f3   : > { %v3212_v11 = vpop.permute.xlu2 %3211 }
 0x5f4   : > { %3289 = vst.msk [vmem:[#allocation3 + $0x130] sm:$0xff] %vm3269_vm14, %v3212_v11  ;;  %v3208_v15 = vpop.permute.xlu0 %3207  ;;  %v3326_v11 = vld [vmem:[#allocation2 + $0x13a] sm:$0xff] }
 0x5f5   : > { %3287 = vst.msk [vmem:[#allocation3 + $0x110] sm:$0xff] %vm3269_vm14, %v3208_v15 }
 0x5f6   : > { %3752 = vrot.lane.b32.xlu1 %v3688_v1, %s7247_s24  ;;  %v7061_v1 = vld [vmem:[%s11090_s1 + $0xc0] sm:$0xff] }
 0x5f8   : > { %v3186_v14 = vpop.permute.xlu1 %3185 }
 0x5f9   : > { %3276 = vst.msk [vmem:[#allocation3 + $0x60] sm:$0xff] %vm3269_vm14, %v3186_v14  ;;  %3565 = vrot.lane.b32.xlu2 %v3498_v59, %s7246_s23  ;;  %v7060_v14 = vld [vmem:[%s11090_s1 + $0xb8] sm:$0xff] }
 0x5fa   : > { %3402 = vrot.lane.b32.xlu0 %v3320_v33, %s7245_s22 }
 0x5fb   : > { %v3218_v58 = vpop.permute.xlu2 %3217 }
 0x5fc   : > { %3292 = vst.msk [vmem:[#allocation3 + $0x160] sm:$0xff] %vm3269_vm14, %v3218_v58  ;;  %v3214_v38 = vpop.permute.xlu0 %3213  ;;  %v7059_v58 = vld [vmem:[%s11090_s1 + $0xb0] sm:$0xff] }
 0x5fd   : > { %3290 = vst.msk [vmem:[#allocation3 + $0x140] sm:$0xff] %vm3269_vm14, %v3214_v38  ;;  %v3508_v38 = vld [vmem:[#allocation2 + $0xc8] sm:$0xff] }
 0x5fe   : > { %3754 = vrot.lane.b32.xlu1 %v9312_v16, %s7247_s24 }
 0x600   : > { %v3192_v10 = vpop.permute.xlu1 %3191 }
 0x601   : > { %3279 = vst.msk [vmem:[#allocation3 + $0x90] sm:$0xff] %vm3269_vm14, %v3192_v10  ;;  %3567 = vrot.lane.b32.xlu2 %v3499_v52, %s7246_s23  ;;  %v3327_v10 = vld [vmem:[#allocation2 + $0x142] sm:$0xff] }
 0x602   : > { %3404 = vrot.lane.b32.xlu0 %v3321_v46, %s7245_s22  ;;  %v3324_v52 = vld [vmem:[#allocation2 + $0x122] sm:$0xff] }
 0x603   : > { %v3224_v22 = vpop.permute.xlu2 %3223 }
 0x604   : > { %3295 = vst.msk [vmem:[#allocation3 + $0x190] sm:$0xff] %vm3269_vm14, %v3224_v22  ;;  %v3220_v16 = vpop.permute.xlu0 %3219 }
 0x605   : > { %3293 = vst.msk [vmem:[#allocation3 + $0x170] sm:$0xff] %vm3269_vm14, %v3220_v16 }
 0x606   : > { %3398 = vrot.lane.b32.xlu1 %v3318_v63, %s7245_s22  ;;  %v7057_v63 = vld [vmem:[%s11090_s1 + $0xa0] sm:$0xff] }
 0x608   : > { %v3198_v21 = vpop.permute.xlu1 %3197 }
 0x609   : > { %3282 = vst.msk [vmem:[#allocation3 + $0xc0] sm:$0xff] %vm3269_vm14, %v3198_v21  ;;  %3762 = vrot.lane.b32.xlu2 %v9308_v28, %s7247_s24  ;;  %v3500_v28 = vld [vmem:[#allocation2 + $0x68] sm:$0xff]  ;;  %v7056_v21 = vld [vmem:[%s11090_s1 + $0x98] sm:$0xff] }
 0x60a   : > { %3575 = vrot.lane.b32.xlu0 %v3503_v26, %s7246_s23  ;;  %v7055_v26 = vld [vmem:[%s11090_s1 + $0x90] sm:$0xff] }
 0x60b   : > { %v3230_v61 = vpop.permute.xlu2 %3229 }
 0x60c   : > { %3298 = vst.msk [vmem:[#allocation3 + $0x1c0] sm:$0xff] %vm3269_vm14, %v3230_v61  ;;  %v3226_v27 = vpop.permute.xlu0 %3225  ;;  %v3325_v61 = vld [vmem:[#allocation2 + $0x12a] sm:$0xff] }
 0x60d   : > { %3296 = vst.msk [vmem:[#allocation3 + $0x1a0] sm:$0xff] %vm3269_vm14, %v3226_v27  ;;  %v7230_v27 = vld [vmem:[%s11090_s1 + $0x118] sm:$0xff] }
 0x60e   : > { %3400 = vrot.lane.b32.xlu1 %v3319_v49, %s7245_s22  ;;  %v3512_v49 = vld [vmem:[#allocation2 + $0xf8] sm:$0xff] }
 0x610   : > { %v3204_v55 = vpop.permute.xlu1 %3203 }
 0x611   : > { %3285 = vst.msk [vmem:[#allocation3 + $0xf0] sm:$0xff] %vm3269_vm14, %v3204_v55  ;;  %3764 = vrot.lane.b32.xlu2 %v3694_v17, %s7247_s24 }
 0x612   : > { %3577 = vrot.lane.b32.xlu0 %v3504_v0, %s7246_s23 }
 0x613   : > { %v3236_v29 = vpop.permute.xlu2 %3235 }
 0x614   : > { %3301 = vst.msk [vmem:[#allocation3 + $0x1f0] sm:$0xff] %vm3269_vm14, %v3236_v29  ;;  %v3232_v53 = vpop.permute.xlu0 %3231  ;;  %v3513_v29 = vld [vmem:[#allocation2 + $0x108] sm:$0xff] }
 0x615   : > { %3299 = vst.msk [vmem:[#allocation3 + $0x1d0] sm:$0xff] %vm3269_vm14, %v3232_v53  ;;  %v3509_v53 = vld [vmem:[#allocation2 + $0xd8] sm:$0xff] }
 0x616   : > { %3569 = vrot.lane.b32.xlu1 %v3500_v28, %s7246_s23  ;;  %v3703_v28 = vld [vmem:[#allocation2 + $0xe1] sm:$0xff] }
 0x618   : > { %v3210_v30 = vpop.permute.xlu1 %3209 }
 0x619   : > { %3288 = vst.msk [vmem:[#allocation3 + $0x120] sm:$0xff] %vm3269_vm14, %v3210_v30  ;;  %3766 = vrot.lane.b32.xlu2 %v9338_v41, %s7247_s24  ;;  %v7070_v41 = vld [vmem:[%s11090_s1 + $0x108] sm:$0xff] }
 0x61a   : > { %3579 = vrot.lane.b32.xlu0 %v3505_v56, %s7246_s23  ;;  %4124 = vmatpush.msra.mxu2 %v7070_v41 }
 0x61b   : > { %v3371_v40 = vpop.permute.xlu2 %3370 }
 0x61c   : > { %3465 = vst.msk [vmem:[#allocation3 + $0x20] sm:$0xff] %vm3462_vm15, %v3371_v40  ;;  %v3367_v50 = vpop.permute.xlu0 %3366  ;;  %4125 = vmatpush.msra.mxu2 %v7069_v7  ;;  %v3514_v40 = vld [vmem:[#allocation2 + $0x110] sm:$0xff] }
 0x61d   : > { %3463 = vst.msk [vmem:[#allocation3] sm:$0xff] %vm3462_vm15, %v3367_v50  ;;  %v3510_v50 = vld [vmem:[#allocation2 + $0xe0] sm:$0xff] }
 0x61e   : > { %3571 = vrot.lane.b32.xlu1 %v3501_v18, %s7246_s23  ;;  %4126 = vmatpush.msra.mxu2 %v7068_v3 }
 0x620   : > { %v3216_v5 = vpop.permute.xlu1 %3215 }
 0x621   : > { %3291 = vst.msk [vmem:[#allocation3 + $0x150] sm:$0xff] %vm3269_vm14, %v3216_v5  ;;  %3406 = vrot.lane.b32.xlu2 %v3322_v32, %s7245_s22  ;;  %v3328_v32 = vld [vmem:[#allocation2 + $0x152] sm:$0xff] }
 0x622   : > { %3774 = vrot.lane.b32.xlu0 %v9334_v39, %s7247_s24  ;;  %v7067_v39 = vld [vmem:[%s11090_s1 + $0xf0] sm:$0xff] }
 0x623   : > { %v3377_v9 = vpop.permute.xlu2 %3376  ;;  %4127 = vmatpush.msra.mxu2 %v7067_v39  ;;  %v3709_v39 = vld [vmem:[#allocation2 + $0x129] sm:$0xff] }
 0x624   : > { %3468 = vst.msk [vmem:[#allocation3 + $0x50] sm:$0xff] %vm3462_vm15, %v3377_v9  ;;  %v3373_v34 = vpop.permute.xlu0 %3372 }
 0x625   : > { %3466 = vst.msk [vmem:[#allocation3 + $0x30] sm:$0xff] %vm3462_vm15, %v3373_v34  ;;  %4128 = vmatpush.msra.mxu2 %v7066_v36  ;;  %v3705_v36 = vld [vmem:[#allocation2 + $0xf9] sm:$0xff] }
 0x626   : > { %3573 = vrot.lane.b32.xlu1 %v3502_v25, %s7246_s23  ;;  %v3708_v25 = vld [vmem:[#allocation2 + $0x121] sm:$0xff] }
 0x627   : > { %4129 = vmatpush.msra.mxu2 %v7065_v51 }
 0x628   : > { %v3222_v19 = vpop.permute.xlu1 %3221 }
 0x629   : > { %3294 = vst.msk [vmem:[#allocation3 + $0x180] sm:$0xff] %vm3269_vm14, %v3222_v19  ;;  %3408 = vrot.lane.b32.xlu2 %v3323_v4, %s7245_s22  ;;  %4130 = vmatpush.msra.mxu2 %v7064_v8  ;;  %v3329_v19 = vld [vmem:[#allocation2 + $0x15a] sm:$0xff] }
 0x62a   : > { %3776 = vrot.lane.b32.xlu0 %v3700_v57, %s7247_s24 }
 0x62b   : > { %v3383_v48 = vpop.permute.xlu2 %3382 }
 0x62c   : > { %3471 = vst.msk [vmem:[#allocation3 + $0x80] sm:$0xff] %vm3462_vm15, %v3383_v48  ;;  %v3379_v2 = vpop.permute.xlu0 %3378 }
 0x62d   : > { %3469 = vst.msk [vmem:[#allocation3 + $0x60] sm:$0xff] %vm3462_vm15, %v3379_v2  ;;  %v3515_v2 = vld [vmem:[#allocation2 + $0x120] sm:$0xff] }
 0x62e   : > { %3768 = vrot.lane.b32.xlu1 %v9321_v44, %s7247_s24  ;;  %v7063_v44 = vld [vmem:[%s11090_s1 + $0xd0] sm:$0xff] }
 0x62f   : > { %4131 = vmatpush.msra.mxu2 %v7063_v44 }
 0x630   : > { %v3228_v35 = vpop.permute.xlu1 %3227 }
 0x631   : > { %3297 = vst.msk [vmem:[#allocation3 + $0x1b0] sm:$0xff] %vm3269_vm14, %v3228_v35  ;;  %3581 = vrot.lane.b32.xlu2 %v3506_v23, %s7246_s23  ;;  %4132 = vmatpush.msra.mxu2 %v7062_v6  ;;  %v3706_v35 = vld [vmem:[#allocation2 + $0x109] sm:$0xff] }
 0x632   : > { %3778 = vrot.lane.b32.xlu0 %v9362_v54, %s7247_s24  ;;  %v3507_v54 = vld [vmem:[#allocation2 + $0xc0] sm:$0xff] }
 0x633   : > { %v3389_v12 = vpop.permute.xlu2 %3388  ;;  %4133 = vmatpush.msra.mxu2 %v7061_v1 }
 0x634   : > { %3474 = vst.msk [vmem:[#allocation3 + $0xb0] sm:$0xff] %vm3462_vm15, %v3389_v12  ;;  %v3385_v13 = vpop.permute.xlu0 %3384  ;;  %v3516_v12 = vld [vmem:[#allocation2 + $0x128] sm:$0xff] }
 0x635   : > { %3472 = vst.msk [vmem:[#allocation3 + $0x90] sm:$0xff] %vm3462_vm15, %v3385_v13  ;;  %4134 = vmatpush.msra.mxu2 %v7060_v14  ;;  %v3332_v13 = vld [vmem:[#allocation2 + $0x182] sm:$0xff] }
 0x636   : > { %3770 = vrot.lane.b32.xlu1 %v3697_v47, %s7247_s24 }
 0x637   : > { %4135 = vmatpush.msra.mxu2 %v7059_v58  ;;  %v3711_v58 = vld [vmem:[#allocation2 + $0x141] sm:$0xff] }
 0x638   : > { %v3234_v43 = vpop.permute.xlu1 %3233 }
 0x639   : > { %3300 = vst.msk [vmem:[#allocation3 + $0x1e0] sm:$0xff] %vm3269_vm14, %v3234_v43  ;;  %3583 = vrot.lane.b32.xlu2 %v3507_v54, %s7246_s23  ;;  %v3517_v54 = vld [vmem:[#allocation2 + $0x138] sm:$0xff] }
 0x63a   : > { %3414 = vrot.lane.b32.xlu0 %v3326_v11, %s7245_s22  ;;  %v3333_v11 = vld [vmem:[#allocation2 + $0x18a] sm:$0xff] }
 0x63b   : > { %v3395_v15 = vpop.permute.xlu2 %3394 }
 0x63c   : > { %3477 = vst.msk [vmem:[#allocation3 + $0xe0] sm:$0xff] %vm3462_vm15, %v3395_v15  ;;  %v3391_v59 = vpop.permute.xlu0 %3390  ;;  %v3330_v15 = vld [vmem:[#allocation2 + $0x16a] sm:$0xff] }
 0x63d   : > { %3475 = vst.msk [vmem:[#allocation3 + $0xc0] sm:$0xff] %vm3462_vm15, %v3391_v59 }
 0x63e   : > { %3772 = vrot.lane.b32.xlu1 %v9351_v60, %s7247_s24  ;;  %v7058_v60 = vld [vmem:[%s11090_s1 + $0xa8] sm:$0xff] }
 0x63f   : > { %4136 = vmatpush.msra.mxu2 %v7058_v60  ;;  %v3521_v60 = vld [vmem:[#allocation2 + $0x168] sm:$0xff] }
 0x640   : > { %v3369_v33 = vpop.permute.xlu1 %3368 }
 0x641   : > { %3464 = vst.msk [vmem:[#allocation3 + $0x10] sm:$0xff] %vm3462_vm15, %v3369_v33  ;;  %3585 = vrot.lane.b32.xlu2 %v3508_v38, %s7246_s23  ;;  %4137 = vmatpush.msra.mxu2 %v7057_v63  ;;  %v3331_v38 = vld [vmem:[#allocation2 + $0x172] sm:$0xff] }
 0x642   : > { %3416 = vrot.lane.b32.xlu0 %v3327_v10, %s7245_s22 }
 0x643   : > { %v3397_v46 = vpop.permute.xlu2 %3396  ;;  %4138 = vmatpush.msra.mxu2 %v7056_v21  ;;  %v3518_v21 = vld [vmem:[#allocation2 + $0x140] sm:$0xff] }
 0x644   : > { %3478 = vst.msk [vmem:[#allocation3 + $0xf0] sm:$0xff] %vm3462_vm15, %v3397_v46  ;;  %v3560_v22 = vpop.permute.xlu0 %3559 }
 0x645   : > { %3656 = vst.msk [vmem:[#allocation3] sm:$0xff] %vm3655_vm1, %v3560_v22  ;;  %4139 = vmatpush.msra.mxu2 %v7055_v26  ;;  %v3712_v22 = vld [vmem:[#allocation2 + $0x151] sm:$0xff] }
 0x646   : > { %3410 = vrot.lane.b32.xlu1 %v3324_v52, %s7245_s22 }
 0x647   : > { %4251 = vmatpush.msrb.mxu2 %v7230_v27 }
 0x648   : > { %v3375_v16 = vpop.permute.xlu1 %3374 }
 0x649   : > { %3467 = vst.msk [vmem:[#allocation3 + $0x40] sm:$0xff] %vm3462_vm15, %v3375_v16  ;;  %3780 = vrot.lane.b32.xlu2 %v9347_v20, %s7247_s24  ;;  %v7231_v20 = vld [vmem:[%s11090_s1 + $0x110] sm:$0xff] }
 0x64a   : > { %3593 = vrot.lane.b32.xlu0 %v3512_v49, %s7246_s23  ;;  %4252 = vmatpush.msrb.mxu2 %v7231_v20  ;;  %v3715_v16 = vld [vmem:[#allocation2 + $0x171] sm:$0xff] }
 0x64b   : > { %v3564_v55 = vpop.permute.xlu2 %3563 }
 0x64c   : > { %3658 = vst.msk [vmem:[#allocation3 + $0x20] sm:$0xff] %vm3655_vm1, %v3564_v55  ;;  %v3562_v17 = vpop.permute.xlu0 %3561  ;;  %v3519_v55 = vld [vmem:[#allocation2 + $0x150] sm:$0xff] }
 0x64d   : > { %3657 = vst.msk [vmem:[#allocation3 + $0x10] sm:$0xff] %vm3655_vm1, %v3562_v17 }
 0x64e   : > { %3412 = vrot.lane.b32.xlu1 %v3325_v61, %s7245_s22 }
 0x650   : > { %v3381_v0 = vpop.permute.xlu1 %3380 }
 0x651   : > { %3470 = vst.msk [vmem:[#allocation3 + $0x70] sm:$0xff] %vm3462_vm15, %v3381_v0  ;;  %3782 = vrot.lane.b32.xlu2 %v3703_v28, %s7247_s24 }
 0x652   : > { %3595 = vrot.lane.b32.xlu0 %v3513_v29, %s7246_s23  ;;  %v3522_v29 = vld [vmem:[#allocation2 + $0x170] sm:$0xff] }
 0x653   : > { %v3566_v30 = vpop.permute.xlu2 %3565 }
 0x654   : > { %3659 = vst.msk [vmem:[#allocation3 + $0x30] sm:$0xff] %vm3655_vm1, %v3566_v30  ;;  %v3757_v56 = vpop.permute.xlu0 %3756 }
 0x655   : > { %3851 = vst.msk [vmem:[#allocation3 + $0x20] sm:$0xff] %vm3848_vm3, %v3757_v56 }
 0x656   : > { %3587 = vrot.lane.b32.xlu1 %v3509_v53, %s7246_s23 }
 0x658   : > { %v3387_v18 = vpop.permute.xlu1 %3386 }
 0x659   : > { %3473 = vst.msk [vmem:[#allocation3 + $0xa0] sm:$0xff] %vm3462_vm15, %v3387_v18  ;;  %3784 = vrot.lane.b32.xlu2 %v9373_v42, %s7247_s24  ;;  %v3511_v42 = vld [vmem:[#allocation2 + $0xf0] sm:$0xff]  ;;  %v3524_v18 = vld [vmem:[#allocation2 + $0x188] sm:$0xff] }
 0x65a   : > { %3597 = vrot.lane.b32.xlu0 %v3514_v40, %s7246_s23  ;;  %v3714_v40 = vld [vmem:[#allocation2 + $0x169] sm:$0xff] }
 0x65b   : > { %v3568_v5 = vpop.permute.xlu2 %3567 }
 0x65c   : > { %3660 = vst.msk [vmem:[#allocation3 + $0x40] sm:$0xff] %vm3655_vm1, %v3568_v5  ;;  %v3759_v41 = vpop.permute.xlu0 %3758  ;;  %v3949_v1 = vld [vmem:[#allocation3 + $0x20] sm:$0xff] }
 0x65d   : > { %3852 = vst.msk [vmem:[#allocation3 + $0x30] sm:$0xff] %vm3848_vm3, %v3759_v41 }
 0x65e   : > { %3589 = vrot.lane.b32.xlu1 %v3510_v50, %s7246_s23 }
 0x660   : > { %v3393_v7 = vpop.permute.xlu1 %3392 }
 0x661   : > { %3476 = vst.msk [vmem:[#allocation3 + $0xd0] sm:$0xff] %vm3462_vm15, %v3393_v7  ;;  %3418 = vrot.lane.b32.xlu2 %v3328_v32, %s7245_s22  ;;  %v3523_v7 = vld [vmem:[#allocation2 + $0x180] sm:$0xff] }
 0x662   : > { %3792 = vrot.lane.b32.xlu0 %v3708_v25, %s7247_s24 }
 0x663   : > { %v3763_v9 = vpop.permute.xlu2 %3762 }
 0x664   : > { %v3761_v3 = vpop.permute.xlu0 %3760  ;;  %v3951_v33 = vld [vmem:[#allocation3 + $0x30] sm:$0xff] }
 0x665   : > { %3853 = vst.msk [vmem:[#allocation3 + $0x40] sm:$0xff] %vm3848_vm3, %v3761_v3  ;;  %v3525_v3 = vld [vmem:[#allocation2 + $0x198] sm:$0xff] }
 0x666   : > { %3591 = vrot.lane.b32.xlu1 %v3511_v42, %s7246_s23 }
 0x668   : > { %v3753_v34 = vpop.permute.xlu1 %3752 }
 0x669   : > { %3849 = vst.msk [vmem:[#allocation3] sm:$0xff] %vm3848_vm3, %v3753_v34  ;;  %3420 = vrot.lane.b32.xlu2 %v3329_v19, %s7245_s22 }
 0x66a   : > { %3794 = vrot.lane.b32.xlu0 %v3709_v39, %s7247_s24 }
 0x66b   : > { %v3765_v4 = vpop.permute.xlu2 %3764 }
 0x66c   : > { %v3403_v57 = vpop.permute.xlu0 %3402  ;;  %v3953_v63 = vld [vmem:[#allocation3 + $0x40] sm:$0xff] }
 0x66d   : > { %3481 = vst.msk [vmem:[#allocation3 + $0x120] sm:$0xff] %vm3462_vm15, %v3403_v57 }
 0x66e   : > { %3786 = vrot.lane.b32.xlu1 %v3705_v36, %s7247_s24 }
 0x670   : > { %v3755_v48 = vpop.permute.xlu1 %3754  ;;  %v3945_v51 = vld [vmem:[#allocation3] sm:$0xff] }
 0x671   : > { %3850 = vst.msk [vmem:[#allocation3 + $0x10] sm:$0xff] %vm3848_vm3, %v3755_v48  ;;  %4140 = vmatmul.f32.vlgmr.msra.gmra.mxu2 %v3945_v51  ;;  %3599 = vrot.lane.b32.xlu2 %v3515_v2, %s7246_s23 }
 0x672   : > { %3796 = vrot.lane.b32.xlu0 %v9395_v24, %s7247_s24 }
 0x673   : > { %v9622_v8 = vpop.permute.xlu2 %3766 }
 0x674   : > { %v3405_v44 = vpop.permute.xlu0 %3404 }
 0x675   : > { %3482 = vst.msk [vmem:[#allocation3 + $0x130] sm:$0xff] %vm3462_vm15, %v3405_v44 }
 0x676   : > { %3788 = vrot.lane.b32.xlu1 %v3706_v35, %s7247_s24 }
 0x678   : > { %v3399_v23 = vpop.permute.xlu1 %3398  ;;  %v3947_v47 = vld [vmem:[#allocation3 + $0x10] sm:$0xff] }
 0x679   : > { %3479 = vst.msk [vmem:[#allocation3 + $0x100] sm:$0xff] %vm3462_vm15, %v3399_v23  ;;  %4143 = vmatmul.f32.gmra.mxu2 %v3947_v47  ;;  %3601 = vrot.lane.b32.xlu2 %v3516_v12, %s7246_s23 }
 0x67a   : > { %3426 = vrot.lane.b32.xlu0 %v3332_v13, %s7245_s22 }
 0x67b   : > { %v3407_v24 = vpop.permute.xlu2 %3406 }
 0x67c   : > { %3483 = vst.msk [vmem:[#allocation3 + $0x140] sm:$0xff] %vm3462_vm15, %v3407_v24  ;;  %v3576_v43 = vpop.permute.xlu0 %3575 }
 0x67d   : > { %3664 = vst.msk [vmem:[#allocation3 + $0x80] sm:$0xff] %vm3655_vm1, %v3576_v43  ;;  %v3526_v43 = vld [vmem:[#allocation2 + $0x1a0] sm:$0xff] }
 0x67e   : > { %3790 = vrot.lane.b32.xlu1 %v9384_v31, %s7247_s24 }
 0x680   : > { %v3401_v6 = vpop.permute.xlu1 %3400 }
 0x681   : > { %3480 = vst.msk [vmem:[#allocation3 + $0x110] sm:$0xff] %vm3462_vm15, %v3401_v6  ;;  %4146 = vmatmul.f32.gmra.mxu2 %v3949_v1  ;;  %3603 = vrot.lane.b32.xlu2 %v3517_v54, %s7246_s23 }
 0x682   : > { %3428 = vrot.lane.b32.xlu0 %v3333_v11, %s7245_s22 }
 0x683   : > { %v3409_v31 = vpop.permute.xlu2 %3408 }
 0x684   : > { %3484 = vst.msk [vmem:[#allocation3 + $0x150] sm:$0xff] %vm3462_vm15, %v3409_v31  ;;  %v3578_v14 = vpop.permute.xlu0 %3577 }
 0x685   : > { %3665 = vst.msk [vmem:[#allocation3 + $0x90] sm:$0xff] %vm3655_vm1, %v3578_v14 }
 0x686   : > { %3422 = vrot.lane.b32.xlu1 %v3330_v15, %s7245_s22  ;;  %v3719_v15 = vld [vmem:[#allocation2 + $0x1a1] sm:$0xff] }
 0x688   : > { %v3570_v59 = vpop.permute.xlu1 %3569 }
 0x689   : > { %3661 = vst.msk [vmem:[#allocation3 + $0x50] sm:$0xff] %vm3655_vm1, %v3570_v59  ;;  %4149 = vmatmul.f32.gmra.mxu2 %v3951_v33  ;;  %3798 = vrot.lane.b32.xlu2 %v3711_v58, %s7247_s24 }
 0x68a   : > { %3854 = vst.msk [vmem:[#allocation3 + $0x50] sm:$0xff] %vm3848_vm3, %v3763_v9  ;;  %3611 = vrot.lane.b32.xlu0 %v3521_v60, %s7246_s23 }
 0x68b   : > { %v3582_v10 = vpop.permute.xlu2 %3581 }
 0x68c   : > { %3667 = vst.msk [vmem:[#allocation3 + $0xb0] sm:$0xff] %vm3655_vm1, %v3582_v10  ;;  %v3580_v52 = vpop.permute.xlu0 %3579 }
 0x68d   : > { %3666 = vst.msk [vmem:[#allocation3 + $0xa0] sm:$0xff] %vm3655_vm1, %v3580_v52 }
 0x68e   : > { %3424 = vrot.lane.b32.xlu1 %v3331_v38, %s7245_s22 }
 0x690   : > { %v3572_v46 = vpop.permute.xlu1 %3571 }
 0x691   : > { %3662 = vst.msk [vmem:[#allocation3 + $0x60] sm:$0xff] %vm3655_vm1, %v3572_v46  ;;  %4152 = vmatmul.f32.gmra.mxu2 %v3953_v63  ;;  %3800 = vrot.lane.b32.xlu2 %v3712_v22, %s7247_s24  ;;  %v3955_v27 = vld [vmem:[#allocation3 + $0x50] sm:$0xff] }
 0x692   : > { %3855 = vst.msk [vmem:[#allocation3 + $0x60] sm:$0xff] %vm3848_vm3, %v3765_v4  ;;  %3806 = vrot.lane.b32.xlu0 %v3715_v16, %s7247_s24  ;;  %v3718_v4 = vld [vmem:[#allocation2 + $0x199] sm:$0xff] }
 0x693   : > { %v3584_v26 = vpop.permute.xlu2 %3583 }
 0x694   : > { %3668 = vst.msk [vmem:[#allocation3 + $0xc0] sm:$0xff] %vm3655_vm1, %v3584_v26  ;;  %v3775_v49 = vpop.permute.xlu0 %3774 }
 0x695   : > { %3860 = vst.msk [vmem:[#allocation3 + $0xb0] sm:$0xff] %vm3848_vm3, %v3775_v49 }
 0x696   : > { %3605 = vrot.lane.b32.xlu1 %v3518_v21, %s7246_s23 }
 0x698   : > { %v3574_v61 = vpop.permute.xlu1 %3573 }
 0x699   : > { %3663 = vst.msk [vmem:[#allocation3 + $0x70] sm:$0xff] %vm3655_vm1, %v3574_v61  ;;  %4155 = vmatmul.f32.gmra.mxu2 %v3955_v27  ;;  %3802 = vrot.lane.b32.xlu2 %v9408_v62, %s7247_s24  ;;  %v3957_v28 = vld [vmem:[#allocation3 + $0x60] sm:$0xff]  ;;  %v3520_v62 = vld [vmem:[#allocation2 + $0x158] sm:$0xff] }
 0x69a   : > { %3856 = vst.msk [vmem:[#allocation3 + $0x70] sm:$0xff] %vm3848_vm3, %v9622_v8  ;;  %3808 = vrot.lane.b32.xlu0 %v9419_v45, %s7247_s24 }
 0x69b   : > { %v3586_v17 = vpop.permute.xlu2 %3585 }
 0x69c   : > { %3669 = vst.msk [vmem:[#allocation3 + $0xd0] sm:$0xff] %vm3655_vm1, %v3586_v17  ;;  %v3777_v20 = vpop.permute.xlu0 %3776  ;;  %v3967_v2 = vld [vmem:[#allocation3 + $0xb0] sm:$0xff] }
 0x69d   : > { %3861 = vst.msk [vmem:[#allocation3 + $0xc0] sm:$0xff] %vm3848_vm3, %v3777_v20 }
 0x69e   : > { %3607 = vrot.lane.b32.xlu1 %v3519_v55, %s7246_s23 }
 0x6a0   : > { %v3769_v0 = vpop.permute.xlu1 %3768 }
 0x6a1   : > { %3857 = vst.msk [vmem:[#allocation3 + $0x80] sm:$0xff] %vm3848_vm3, %v3769_v0  ;;  %4158 = vmatmul.f32.gmra.mxu2 %v3957_v28  ;;  %3613 = vrot.lane.b32.xlu2 %v3522_v29, %s7246_s23  ;;  %v3959_v56 = vld [vmem:[#allocation3 + $0x70] sm:$0xff] }
 0x6a2   : > { %3810 = vrot.lane.b32.xlu0 %v9404_v37, %s7247_s24 }
 0x6a3   : > { %v3781_v45 = vpop.permute.xlu2 %3780 }
 0x6a4   : > { %v3779_v53 = vpop.permute.xlu0 %3778  ;;  %v3969_v23 = vld [vmem:[#allocation3 + $0xc0] sm:$0xff] }
 0x6a5   : > { %3862 = vst.msk [vmem:[#allocation3 + $0xd0] sm:$0xff] %vm3848_vm3, %v3779_v53 }
 0x6a6   : > { %3609 = vrot.lane.b32.xlu1 %v3520_v62, %s7246_s23 }
 0x6a8   : > { %v3771_v30 = vpop.permute.xlu1 %3770  ;;  %v3961_v41 = vld [vmem:[#allocation3 + $0x80] sm:$0xff] }
 0x6a9   : > { %3858 = vst.msk [vmem:[#allocation3 + $0x90] sm:$0xff] %vm3848_vm3, %v3771_v30  ;;  %4161 = vmatmul.f32.gmra.mxu2 %v3959_v56  ;;  %3617 = vrot.lane.b32.xlu2 %v3524_v18, %s7246_s23 }
 0x6ab   : > { %v3783_v50 = vpop.permute.xlu2 %3782 }
 0x6ac   : > { %v3415_v5 = vpop.permute.xlu0 %3414  ;;  %v3971_v24 = vld [vmem:[#allocation3 + $0xd0] sm:$0xff] }
 0x6ad   : > { %3487 = vst.msk [vmem:[#allocation3 + $0x180] sm:$0xff] %vm3462_vm15, %v3415_v5 }
 0x6ae   : > { %3804 = vrot.lane.b32.xlu1 %v3714_v40, %s7247_s24 }
 0x6b0   : > { %v3773_v37 = vpop.permute.xlu1 %3772  ;;  %v3963_v9 = vld [vmem:[#allocation3 + $0x90] sm:$0xff] }
 0x6b1   : > { %3859 = vst.msk [vmem:[#allocation3 + $0xa0] sm:$0xff] %vm3848_vm3, %v3773_v37  ;;  %4164 = vmatmul.f32.gmra.mxu2 %v3961_v41  ;;  %3621 = vrot.lane.b32.xlu2 %v3526_v43, %s7246_s23 }
 0x6b3   : > { %v3785_v32 = vpop.permute.xlu2 %3784 }
 0x6b4   : > { %v3417_v25 = vpop.permute.xlu0 %3416 }
 0x6b5   : > { %3488 = vst.msk [vmem:[#allocation3 + $0x190] sm:$0xff] %vm3462_vm15, %v3417_v25 }
 0x6b6   : > { %3615 = vrot.lane.b32.xlu1 %v3523_v7, %s7246_s23 }
 0x6b8   : > { %v3411_v42 = vpop.permute.xlu1 %3410  ;;  %v3965_v36 = vld [vmem:[#allocation3 + $0xa0] sm:$0xff] }
 0x6b9   : > { %3485 = vst.msk [vmem:[#allocation3 + $0x160] sm:$0xff] %vm3462_vm15, %v3411_v42  ;;  %4167 = vmatmul.f32.gmra.mxu2 %v3963_v9  ;;  %3814 = vrot.lane.b32.xlu2 %v3719_v15, %s7247_s24 }
 0x6bb   : > { %v3419_v34 = vpop.permute.xlu2 %3418 }
 0x6bc   : > { %3489 = vst.msk [vmem:[#allocation3 + $0x1a0] sm:$0xff] %vm3462_vm15, %v3419_v34  ;;  %v3594_v19 = vpop.permute.xlu0 %3593 }
 0x6bd   : > { %3673 = vst.msk [vmem:[#allocation3 + $0x110] sm:$0xff] %vm3655_vm1, %v3594_v19 }
 0x6be   : > { %3619 = vrot.lane.b32.xlu1 %v3525_v3, %s7246_s23 }
 0x6c0   : > { %v3413_v39 = vpop.permute.xlu1 %3412 }
 0x6c1   : > { %3486 = vst.msk [vmem:[#allocation3 + $0x170] sm:$0xff] %vm3462_vm15, %v3413_v39  ;;  %4170 = vmatmul.f32.gmra.mxu2 %v3965_v36 }
 0x6c3   : > { %v3421_v57 = vpop.permute.xlu2 %3420 }
 0x6c4   : > { %3490 = vst.msk [vmem:[#allocation3 + $0x1b0] sm:$0xff] %vm3462_vm15, %v3421_v57  ;;  %v3596_v48 = vpop.permute.xlu0 %3595 }
 0x6c5   : > { %3674 = vst.msk [vmem:[#allocation3 + $0x120] sm:$0xff] %vm3655_vm1, %v3596_v48 }
 0x6c6   : > { %3812 = vrot.lane.b32.xlu1 %v3718_v4, %s7247_s24  ;;  %v9742_v4 = vpop.f32.mrf.mxu3 }
 0x6c8   : > { %v3588_v51 = vpop.permute.xlu1 %3587 }
 0x6c9   : > { %3670 = vst.msk [vmem:[#allocation3 + $0xe0] sm:$0xff] %vm3655_vm1, %v3588_v51  ;;  %4173 = vmatmul.f32.gmra.mxu2 %v3967_v2  ;;  %v4006_v51 = vld [vmem:[#allocation3 + $0x1e8] sm:$0xff] }
 0x6ca   : > { %3863 = vst.msk [vmem:[#allocation3 + $0xe0] sm:$0xff] %vm3848_vm3, %v3781_v45  ;;  %v6020_v2 = vld [vmem:[#allocation2 + $0x19a] sm:$0xff]  ;;  %7103 = vmatmul.msk.f32.gmra.mxu3 %vm171_vm0, %v4006_v51 }
 0x6cb   : > { %v3600_v35 = vpop.permute.xlu2 %3599  ;;  %6052 = vst.msk [vmem:[#allocation3 + $0x1e8] sm:$0xff] %vm4542_vm4, %v6020_v2 }
 0x6cc   : > { %3676 = vst.msk [vmem:[#allocation3 + $0x140] sm:$0xff] %vm3655_vm1, %v3600_v35  ;;  %v3598_v8 = vpop.permute.xlu0 %3597 }
 0x6cd   : > { %3675 = vst.msk [vmem:[#allocation3 + $0x130] sm:$0xff] %vm3655_vm1, %v3598_v8 }
 0x6d0   : > { %v3590_v44 = vpop.permute.xlu1 %3589 }
 0x6d1   : > { %3671 = vst.msk [vmem:[#allocation3 + $0xf0] sm:$0xff] %vm3655_vm1, %v3590_v44  ;;  %4176 = vmatmul.f32.gmra.mxu2 %v3969_v23  ;;  %v3973_v11 = vld [vmem:[#allocation3 + $0xe0] sm:$0xff]  ;;  %v4008_v44 = vld [vmem:[#allocation3 + $0x1f8] sm:$0xff] }
 0x6d2   : > { %3864 = vst.msk [vmem:[#allocation3 + $0xf0] sm:$0xff] %vm3848_vm3, %v3783_v50  ;;  %v6021_v23 = vld [vmem:[#allocation2 + $0x1a2] sm:$0xff] }
 0x6d3   : > { %v3602_v47 = vpop.permute.xlu2 %3601  ;;  %6053 = vst.msk [vmem:[#allocation3 + $0x1f8] sm:$0xff] %vm4542_vm4, %v6021_v23 }
 0x6d4   : > { %3677 = vst.msk [vmem:[#allocation3 + $0x150] sm:$0xff] %vm3655_vm1, %v3602_v47  ;;  %v3793_v12 = vpop.permute.xlu0 %3792  ;;  %v9749_v47 = vpop.f32.mrf.mxu3  ;;  %7104 = vmatmul.msk.f32.gmra.mxu3 %vm171_vm0, %v4008_v44 }
 0x6d5   : > { %3869 = vst.msk [vmem:[#allocation3 + $0x140] sm:$0xff] %vm3848_vm3, %v3793_v12 }
 0x6d8   : > { %v3592_v13 = vpop.permute.xlu1 %3591 }
 0x6d9   : > { %3672 = vst.msk [vmem:[#allocation3 + $0x100] sm:$0xff] %vm3655_vm1, %v3592_v13  ;;  %4179 = vmatmul.f32.gmra.mxu2 %v3971_v24  ;;  %v3975_v33 = vld [vmem:[#allocation3 + $0xf0] sm:$0xff] }
 0x6da   : > { %3865 = vst.msk [vmem:[#allocation3 + $0x100] sm:$0xff] %vm3848_vm3, %v3785_v32 }
 0x6db   : > { %v3604_v6 = vpop.permute.xlu2 %3603 }
 0x6dc   : > { %3678 = vst.msk [vmem:[#allocation3 + $0x160] sm:$0xff] %vm3655_vm1, %v3604_v6  ;;  %v3795_v1 = vpop.permute.xlu0 %3794  ;;  %v3985_v53 = vld [vmem:[#allocation3 + $0x140] sm:$0xff] }
 0x6dd   : > { %3870 = vst.msk [vmem:[#allocation3 + $0x150] sm:$0xff] %vm3848_vm3, %v3795_v1 }
 0x6e0   : > { %v3787_v54 = vpop.permute.xlu1 %3786 }
 0x6e1   : > { %3866 = vst.msk [vmem:[#allocation3 + $0x110] sm:$0xff] %vm3848_vm3, %v3787_v54  ;;  %4182 = vmatmul.f32.gmra.mxu2 %v3973_v11  ;;  %v3977_v10 = vld [vmem:[#allocation3 + $0x100] sm:$0xff] }
 0x6e3   : > { %v3799_v31 = vpop.permute.xlu2 %3798 }
 0x6e4   : > { %v3797_v14 = vpop.permute.xlu0 %3796  ;;  %v3987_v40 = vld [vmem:[#allocation3 + $0x150] sm:$0xff] }
 0x6e5   : > { %3871 = vst.msk [vmem:[#allocation3 + $0x160] sm:$0xff] %vm3848_vm3, %v3797_v14  ;;  %v9764_v14 = vpop.f32.mrf.mxu3 }
 0x6e8   : > { %v3789_v59 = vpop.permute.xlu1 %3788  ;;  %v3979_v16 = vld [vmem:[#allocation3 + $0x110] sm:$0xff] }
 0x6e9   : > { %3867 = vst.msk [vmem:[#allocation3 + $0x120] sm:$0xff] %vm3848_vm3, %v3789_v59  ;;  %4185 = vmatmul.f32.gmra.mxu2 %v3975_v33  ;;  %v3948_v33 = vld [vmem:[#allocation3 + $0x18] sm:$0xff] }
 0x6eb   : > { %v3801_v58 = vpop.permute.xlu2 %3800 }
 0x6ec   : > { %v3427_v60 = vpop.permute.xlu0 %3426  ;;  %v3989_v37 = vld [vmem:[#allocation3 + $0x160] sm:$0xff] }
 0x6ed   : > { %3493 = vst.msk [vmem:[#allocation3 + $0x1e0] sm:$0xff] %vm3462_vm15, %v3427_v60 }
 0x6f0   : > { %v3791_v38 = vpop.permute.xlu1 %3790  ;;  %v3981_v27 = vld [vmem:[#allocation3 + $0x120] sm:$0xff] }
 0x6f1   : > { %3868 = vst.msk [vmem:[#allocation3 + $0x130] sm:$0xff] %vm3848_vm3, %v3791_v38  ;;  %4188 = vmatmul.f32.gmra.mxu2 %v3977_v10  ;;  %v3950_v38 = vld [vmem:[#allocation3 + $0x28] sm:$0xff] }
 0x6f3   : > { %v3803_v46 = vpop.permute.xlu2 %3802 }
 0x6f4   : > { %v9702_v52 = vpop.f32.mrf.mxu2  ;;  %v3429_v63 = vpop.permute.xlu0 %3428 }
 0x6f5   : > { %3494 = vst.msk [vmem:[#allocation3 + $0x1f0] sm:$0xff] %vm3462_vm15, %v3429_v63  ;;  %v3952_v63 = vld [vmem:[#allocation3 + $0x38] sm:$0xff] }
 0x6f8   : > { %v3423_v22 = vpop.permute.xlu1 %3422  ;;  %v3983_v28 = vld [vmem:[#allocation3 + $0x130] sm:$0xff] }
 0x6f9   : > { %3491 = vst.msk [vmem:[#allocation3 + $0x1c0] sm:$0xff] %vm3462_vm15, %v3423_v22  ;;  %4191 = vmatmul.f32.gmra.mxu2 %v3979_v16 }
 0x6fb   : > { %v3614_v26 = vpop.permute.xlu2 %3613 }
 0x6fc   : > { %v9706_v21 = vpop.f32.mrf.mxu2  ;;  %3683 = vst.msk [vmem:[#allocation3 + $0x1b0] sm:$0xff] %vm3655_vm1, %v3614_v26  ;;  %v3612_v49 = vpop.permute.xlu0 %3611  ;;  %v3954_v26 = vld [vmem:[#allocation3 + $0x48] sm:$0xff] }
 0x6fd   : > { %3682 = vst.msk [vmem:[#allocation3 + $0x1a0] sm:$0xff] %vm3655_vm1, %v3612_v49 }
 0x700   : > { %v3425_v61 = vpop.permute.xlu1 %3424 }
 0x701   : > { %3492 = vst.msk [vmem:[#allocation3 + $0x1d0] sm:$0xff] %vm3462_vm15, %v3425_v61  ;;  %4194 = vmatmul.f32.gmra.mxu2 %v3981_v27  ;;  %v3956_v61 = vld [vmem:[#allocation3 + $0x58] sm:$0xff] }
 0x703   : > { %v3618_v17 = vpop.permute.xlu2 %3617 }
 0x704   : > { %v9711_v55 = vpop.f32.mrf.mxu2  ;;  %3685 = vst.msk [vmem:[#allocation3 + $0x1d0] sm:$0xff] %vm3655_vm1, %v3618_v17  ;;  %v3807_v20 = vpop.permute.xlu0 %3806 }
 0x705   : > { %3876 = vst.msk [vmem:[#allocation3 + $0x1b0] sm:$0xff] %vm3848_vm3, %v3807_v20 }
 0x708   : > { %v3606_v0 = vpop.permute.xlu1 %3605 }
 0x709   : > { %3679 = vst.msk [vmem:[#allocation3 + $0x170] sm:$0xff] %vm3655_vm1, %v3606_v0  ;;  %4197 = vmatmul.f32.gmra.mxu2 %v3983_v28 }
 0x70a   : > { %3872 = vst.msk [vmem:[#allocation3 + $0x170] sm:$0xff] %vm3848_vm3, %v3799_v31  ;;  %v3946_v31 = vld [vmem:[#allocation3 + $0x8] sm:$0xff] }
 0x70b   : > { %v3622_v39 = vpop.permute.xlu2 %3621 }
 0x70c   : > { %v9717_v29 = vpop.f32.mrf.mxu2  ;;  %v3809_v62 = vpop.permute.xlu0 %3808  ;;  %3687 = vst.msk [vmem:[#allocation3 + $0x1f0] sm:$0xff] %vm3655_vm1, %v3622_v39  ;;  %v3999_v8 = vld [vmem:[#allocation3 + $0x1b0] sm:$0xff] }
 0x710   : > { %v3608_v45 = vpop.permute.xlu1 %3607 }
 0x711   : > { %3680 = vst.msk [vmem:[#allocation3 + $0x180] sm:$0xff] %vm3655_vm1, %v3608_v45  ;;  %4200 = vmatmul.f32.gmra.mxu2 %v3985_v53  ;;  %v3991_v32 = vld [vmem:[#allocation3 + $0x170] sm:$0xff] }
 0x712   : > { %3873 = vst.msk [vmem:[#allocation3 + $0x180] sm:$0xff] %vm3848_vm3, %v3801_v58  ;;  %v9769_v58 = vpop.f32.mrf.mxu3 }
 0x713   : > { %v3815_v48 = vpop.permute.xlu2 %3814 }
 0x714   : > { %v9721_v30 = vpop.f32.mrf.mxu2  ;;  %v3811_v56 = vpop.permute.xlu0 %3810  ;;  %3880 = vst.msk [vmem:[#allocation3 + $0x1f0] sm:$0xff] %vm3848_vm3, %v3815_v48 }
 0x715   : > { %3878 = vst.msk [vmem:[#allocation3 + $0x1d0] sm:$0xff] %vm3848_vm3, %v3811_v56 }
 0x718   : > { %v3610_v18 = vpop.permute.xlu1 %3609 }
 0x719   : > { %3681 = vst.msk [vmem:[#allocation3 + $0x190] sm:$0xff] %vm3655_vm1, %v3610_v18  ;;  %4203 = vmatmul.f32.gmra.mxu2 %v3987_v40  ;;  %v3993_v42 = vld [vmem:[#allocation3 + $0x180] sm:$0xff] }
 0x71a   : > { %3874 = vst.msk [vmem:[#allocation3 + $0x190] sm:$0xff] %vm3848_vm3, %v3803_v46  ;;  %v9776_v46 = vpop.f32.mrf.mxu3 }
 0x71b   : > { %v4007_v11 = vld [vmem:[#allocation3 + $0x1f0] sm:$0xff] }
 0x71c   : > { %v9726_v50 = vpop.f32.mrf.mxu2  ;;  %v4003_v43 = vld [vmem:[#allocation3 + $0x1d0] sm:$0xff] }
 0x720   : > { %v3805_v5 = vpop.permute.xlu1 %3804 }
 0x721   : > { %3875 = vst.msk [vmem:[#allocation3 + $0x1a0] sm:$0xff] %vm3848_vm3, %v3805_v5  ;;  %4206 = vmatmul.f32.gmra.mxu2 %v3989_v37  ;;  %v3995_v34 = vld [vmem:[#allocation3 + $0x190] sm:$0xff] }
 0x722   : > { %v9781_v16 = vpop.f32.mrf.mxu3 }
 0x724   : > { %v9729_v41 = vpop.f32.mrf.mxu2 }
 0x728   : > { %v3616_v7 = vpop.permute.xlu1 %3615  ;;  %v3997_v57 = vld [vmem:[#allocation3 + $0x1a0] sm:$0xff] }
 0x729   : > { %3684 = vst.msk [vmem:[#allocation3 + $0x1c0] sm:$0xff] %vm3655_vm1, %v3616_v7  ;;  %4209 = vmatmul.f32.gmra.mxu2 %v3991_v32 }
 0x72a   : > { %3877 = vst.msk [vmem:[#allocation3 + $0x1c0] sm:$0xff] %vm3848_vm3, %v3809_v62  ;;  %v9787_v27 = vpop.f32.mrf.mxu3 }
 0x72c   : > { %v9733_v25 = vpop.f32.mrf.mxu2 }
 0x730   : > { %v3620_v9 = vpop.permute.xlu1 %3619 }
 0x731   : > { %4212 = vmatmul.f32.gmra.mxu2 %v3993_v42  ;;  %3686 = vst.msk [vmem:[#allocation3 + $0x1e0] sm:$0xff] %vm3655_vm1, %v3620_v9  ;;  %v4001_v13 = vld [vmem:[#allocation3 + $0x1c0] sm:$0xff] }
 0x732   : > { %v9791_v20 = vpop.f32.mrf.mxu3 }
 0x734   : > { %v9736_v3 = vpop.f32.mrf.mxu2 }
 0x738   : > { %v3813_v19 = vpop.permute.xlu1 %3812 }
 0x739   : > { %4215 = vmatmul.f32.gmra.mxu2 %v3995_v34  ;;  %3879 = vst.msk [vmem:[#allocation3 + $0x1e0] sm:$0xff] %vm3848_vm3, %v3813_v19 }
 0x73a   : > { %v9797_v62 = vpop.f32.mrf.mxu3 }
 0x73c   : > { %v9740_v36 = vpop.f32.mrf.mxu2 }
 0x740   : > { %v4005_v1 = vld [vmem:[#allocation3 + $0x1e0] sm:$0xff] }
 0x741   : > { %4218 = vmatmul.f32.gmra.mxu2 %v3997_v57 }
 0x742   : > { %v9801_v53 = vpop.f32.mrf.mxu3 }
 0x744   : > { %v9747_v35 = vpop.f32.mrf.mxu2 }
 0x749   : > { %4221 = vmatmul.f32.gmra.mxu2 %v3999_v8 }
 0x74a   : > { %v9805_v18 = vpop.f32.mrf.mxu3 }
 0x74c   : > { %v9753_v12 = vpop.f32.mrf.mxu2 }
 0x751   : > { %4224 = vmatmul.f32.gmra.mxu2 %v4001_v13 }
 0x752   : > { %v9809_v5 = vpop.f32.mrf.mxu3 }
 0x754   : > { %v9755_v24 = vpop.f32.mrf.mxu2 }
 0x759   : > { %4227 = vmatmul.f32.gmra.mxu2 %v4003_v43 }
 0x75a   : > { %v9815_v32 = vpop.f32.mrf.mxu3 }
 0x75c   : > { %v9757_v6 = vpop.f32.mrf.mxu2 }
 0x761   : > { %4230 = vmatmul.f32.gmra.mxu2 %v4005_v1 }
 0x762   : > { %v9819_v9 = vpop.f32.mrf.mxu3 }
 0x764   : > { %v9759_v54 = vpop.f32.mrf.mxu2 }
 0x769   : > { %4233 = vmatmul.f32.gmra.mxu2 %v4007_v11 }
 0x76a   : > { %v9823_v19 = vpop.f32.mrf.mxu3 }
 0x76c   : > { %v9761_v15 = vpop.f32.mrf.mxu2 }
 0x771   : > { %7073 = vmatmul.msk.f32.vlgmr.msrb.gmra.mxu2 %vm171_vm0, %v3946_v31 }
 0x772   : > { %v9827_v57 = vpop.f32.mrf.mxu3 }
 0x774   : > { %v9766_v59 = vpop.f32.mrf.mxu2 }
 0x779   : > { %7074 = vmatmul.msk.f32.gmra.mxu2 %vm171_vm0, %v3948_v33 }
 0x77a   : > { %v9832_v13 = vpop.f32.mrf.mxu3 }
 0x77c   : > { %v9771_v60 = vpop.f32.mrf.mxu2 }
 0x781   : > { %7075 = vmatmul.msk.f32.gmra.mxu2 %vm171_vm0, %v3950_v38 }
 0x782   : > { %v9836_v38 = vpop.f32.mrf.mxu3 }
 0x784   : > { %v9774_v10 = vpop.f32.mrf.mxu2 }
 0x789   : > { %7076 = vmatmul.msk.f32.gmra.mxu2 %vm171_vm0, %v3952_v63 }
 0x78c   : > { %v9779_v22 = vpop.f32.mrf.mxu2 }
 0x791   : > { %7077 = vmatmul.msk.f32.gmra.mxu2 %vm171_vm0, %v3954_v26 }
 0x794   : > { %v9784_v49 = vpop.f32.mrf.mxu2 }
 0x799   : > { %7078 = vmatmul.msk.f32.gmra.mxu2 %vm171_vm0, %v3956_v61 }
 0x79c   : > { %v9789_v17 = vpop.f32.mrf.mxu2 }
 0x7a4   : > { %v9793_v0 = vpop.f32.mrf.mxu2 }
 0x7ac   : > { %v9795_v28 = vpop.f32.mrf.mxu2 }
 0x7b4   : > { %v9799_v45 = vpop.f32.mrf.mxu2 }
 0x7bc   : > { %v9803_v56 = vpop.f32.mrf.mxu2 }
 0x7c4   : > { %v9807_v40 = vpop.f32.mrf.mxu2 }
 0x7cc   : > { %v9811_v37 = vpop.f32.mrf.mxu2 }
 0x7d4   : > { %v9813_v7 = vpop.f32.mrf.mxu2 }
 0x7dc   : > { %v9817_v42 = vpop.f32.mrf.mxu2 }
 0x7e4   : > { %v9821_v34 = vpop.f32.mrf.mxu2 }
 0x7ec   : > { %v9825_v39 = vpop.f32.mrf.mxu2 }
 0x7f4   : > { %v4254_v48 = vpop.f32.mrf.mxu2 }
 0x7f5   : > { %v4255_v51 = vadd.f32 %v4254_v48, %v9702_v52 }
 0x7f7   : > { %v4350_v2 = vmul.f32 0.2, %v4255_v51 }
 0x7f9   : > { %v4382_v8 = vmax.f32 %v4255_v51, %v4350_v2  ;;  %v9842_v51 = vpop.f32.mrf.mxu3 }
 0x7fb   : > { %4446 = vrot.lane.b32.xlu0 %v4382_v8, %s7249_s7 }
 0x7fc   : > { %v4257_v44 = vpop.f32.mrf.mxu2 }
 0x7fd   : > { %v4258_v23 = vadd.f32 %v4257_v44, %v9706_v21  ;;  %v4273_v21 = vadd.f32 %v9742_v4, %v9729_v41 }
 0x7ff   : > { %v4351_v43 = vmul.f32 0.2, %v4258_v23 }
 0x801   : > { %v4383_v1 = vmax.f32 %v4258_v23, %v4351_v43  ;;  %v4276_v43 = vadd.f32 %v9749_v47, %v9733_v25  ;;  %v9852_v41 = vpop.f32.mrf.mxu3  ;;  %v4279_v25 = vadd.f32 %v9764_v14, %v9736_v3  ;;  %v4285_v47 = vadd.f32 %v9776_v46, %v9747_v35 }
 0x802   : > { %v4288_v35 = vadd.f32 %v9781_v16, %v9753_v12  ;;  %v4294_v46 = vadd.f32 %v9791_v20, %v9757_v6  ;;  %v4297_v12 = vadd.f32 %v9797_v62, %v9759_v54  ;;  %v4303_v6 = vadd.f32 %v9805_v18, %v9766_v59 }
 0x803   : > { %4448 = vrot.lane.b32.xlu1 %v4383_v1, %s7249_s7  ;;  %v4306_v54 = vadd.f32 %v9809_v5, %v9771_v60  ;;  %v4312_v59 = vadd.f32 %v9819_v9, %v9779_v22  ;;  %v4315_v60 = vadd.f32 %v9823_v19, %v9784_v49  ;;  %v4321_v22 = vadd.f32 %v9832_v13, %v9793_v0 }
 0x804   : > { %v4260_v11 = vpop.f32.mrf.mxu2  ;;  %v4364_v20 = vmul.f32 0.2, %v4297_v12  ;;  %v4324_v49 = vadd.f32 %v9836_v38, %v9795_v28  ;;  %v4330_v0 = vadd.f32 %v9852_v41, %v9803_v56 }
 0x805   : > { %v4261_v31 = vadd.f32 %v4260_v11, %v9711_v55  ;;  %v4356_v55 = vmul.f32 0.2, %v4273_v21  ;;  %v4357_v11 = vmul.f32 0.2, %v4276_v43 }
 0x807   : > { %v4352_v33 = vmul.f32 0.2, %v4261_v31  ;;  %v4388_v23 = vmax.f32 %v4273_v21, %v4356_v55 }
 0x809   : > { %v4384_v52 = vmax.f32 %v4261_v31, %v4352_v33 }
 0x80b   : > { %4450 = vrot.lane.b32.xlu2 %v4384_v52, %s7249_s7  ;;  %v4389_v52 = vmax.f32 %v4276_v43, %v4357_v11 }
 0x80c   : > { %v4263_v63 = vpop.f32.mrf.mxu2 }
 0x80d   : > { %v4264_v26 = vadd.f32 %v4263_v63, %v9717_v29  ;;  %v4282_v29 = vadd.f32 %v9769_v58, %v9740_v36  ;;  %v4291_v63 = vadd.f32 %v9787_v27, %v9755_v24  ;;  %v4300_v27 = vadd.f32 %v9801_v53, %v9761_v15 }
 0x80e   : > { %v4309_v15 = vadd.f32 %v9815_v32, %v9774_v10  ;;  %v4366_v53 = vmul.f32 0.2, %v4303_v6  ;;  %v4318_v10 = vadd.f32 %v9827_v57, %v9789_v17  ;;  %v4367_v32 = vmul.f32 0.2, %v4306_v54 }
 0x80f   : > { %v4353_v61 = vmul.f32 0.2, %v4264_v26  ;;  %v4362_v21 = vmul.f32 0.2, %v4291_v63  ;;  %v4365_v55 = vmul.f32 0.2, %v4300_v27  ;;  %v4327_v17 = vadd.f32 %v9842_v51, %v9799_v45 }
 0x810   : > { %v4368_v43 = vmul.f32 0.2, %v4309_v15  ;;  %v4371_v11 = vmul.f32 0.2, %v4318_v10  ;;  %v4370_v57 = vmul.f32 0.2, %v4315_v60 }
 0x811   : > { %v4385_v48 = vmax.f32 %v4264_v26, %v4353_v61  ;;  %v4360_v26 = vmul.f32 0.2, %v4285_v47  ;;  %v9864_v61 = vpop.f32.mrf.mxu3  ;;  %v4394_v24 = vmax.f32 %v4291_v63, %v4362_v21  ;;  %v4397_v16 = vmax.f32 %v4300_v27, %v4365_v55 }
 0x812   : > { %v4400_v18 = vmax.f32 %v4309_v15, %v4368_v43  ;;  %v4403_v5 = vmax.f32 %v4318_v10, %v4371_v11  ;;  %v4373_v51 = vmul.f32 0.2, %v4324_v49  ;;  %v4333_v28 = vadd.f32 %v9864_v61, %v9807_v40 }
 0x813   : > { %4452 = vrot.lane.b32.xlu0 %v4385_v48, %s7249_s7  ;;  %v4392_v14 = vmax.f32 %v4285_v47, %v4360_v26  ;;  %v4361_v48 = vmul.f32 0.2, %v4288_v35 }
 0x814   : > { %v4266_v2 = vpop.f32.mrf.mxu2  ;;  %v4405_v63 = vmax.f32 %v4324_v49, %v4373_v51  ;;  %v4376_v41 = vmul.f32 0.2, %v4333_v28 }
 0x815   : > { %v4267_v8 = vadd.f32 %v4266_v2, %v9721_v30  ;;  %v4359_v30 = vmul.f32 0.2, %v4282_v29  ;;  %v4363_v2 = vmul.f32 0.2, %v4294_v46 }
 0x817   : > { %v4354_v44 = vmul.f32 0.2, %v4267_v8  ;;  %v4391_v58 = vmax.f32 %v4282_v29, %v4359_v30  ;;  %v4398_v29 = vmax.f32 %v4303_v6, %v4366_v53 }
 0x819   : > { %v4386_v1 = vmax.f32 %v4267_v8, %v4354_v44  ;;  %v4335_v8 = vpop.f32.mrf.mxu3  ;;  %v4393_v44 = vmax.f32 %v4288_v35, %v4361_v48  ;;  %v4640_v48 = vld [vmem:[#allocation2 + $0x9] sm:$0xff] }
 0x81a   : > { %v4336_v45 = vadd.f32 %v4335_v8, %v9811_v37 }
 0x81b   : > { %4454 = vrot.lane.b32.xlu1 %v4386_v1, %s7249_s7  ;;  %4458 = vrot.lane.b32.xlu0 %v4388_v23, %s7249_s7  ;;  %v4395_v23 = vmax.f32 %v4294_v46, %v4363_v2  ;;  %v4396_v1 = vmax.f32 %v4297_v12, %v4364_v20 }
 0x81c   : > { %v4269_v4 = vpop.f32.mrf.mxu2 }
 0x81d   : > { %v4270_v31 = vadd.f32 %v4269_v4, %v9726_v50  ;;  %v4358_v50 = vmul.f32 0.2, %v4279_v25  ;;  %v4369_v4 = vmul.f32 0.2, %v4312_v59 }
 0x81f   : > { %v4355_v33 = vmul.f32 0.2, %v4270_v31  ;;  %v4390_v3 = vmax.f32 %v4279_v25, %v4358_v50  ;;  %v4401_v30 = vmax.f32 %v4312_v59, %v4369_v4  ;;  %v4402_v25 = vmax.f32 %v4315_v60, %v4370_v57 }
 0x821   : > { %v4387_v36 = vmax.f32 %v4270_v31, %v4355_v33  ;;  %v4338_v62 = vpop.f32.mrf.mxu3  ;;  %v4399_v31 = vmax.f32 %v4306_v54, %v4367_v32  ;;  %v4372_v33 = vmul.f32 0.2, %v4321_v22 }
 0x822   : > { %v4339_v56 = vadd.f32 %v4338_v62, %v9813_v7 }
 0x823   : > { %4456 = vrot.lane.b32.xlu2 %v4387_v36, %s7249_s7  ;;  %4460 = vrot.lane.b32.xlu1 %v4389_v52, %s7249_s7  ;;  %v4374_v52 = vmul.f32 0.2, %v4327_v17  ;;  %v4404_v47 = vmax.f32 %v4321_v22, %v4372_v33  ;;  %v4375_v36 = vmul.f32 0.2, %v4330_v0 }
 0x824   : > { %4464 = vrot.lane.b32.xlu0 %v4391_v58, %s7249_s7  ;;  %v4377_v58 = vmul.f32 0.2, %v4336_v45  ;;  %v4378_v26 = vmul.f32 0.2, %v4339_v56 }
 0x825   : > { %v4406_v19 = vmax.f32 %v4327_v17, %v4374_v52  ;;  %v4407_v50 = vmax.f32 %v4330_v0, %v4375_v36 }
 0x826   : > { %v4409_v38 = vmax.f32 %v4336_v45, %v4377_v58  ;;  %v4410_v35 = vmax.f32 %v4339_v56, %v4378_v26 }
 0x829   : > { %v4341_v9 = vpop.f32.mrf.mxu3 }
 0x82a   : > { %v4342_v46 = vadd.f32 %v4341_v9, %v9817_v42 }
 0x82b   : > { %4462 = vrot.lane.b32.xlu2 %v4390_v3, %s7249_s7  ;;  %4466 = vrot.lane.b32.xlu1 %v4392_v14, %s7249_s7  ;;  %v4408_v14 = vmax.f32 %v4333_v28, %v4376_v41 }
 0x82c   : > { %4470 = vrot.lane.b32.xlu0 %v4394_v24, %s7249_s7 }
 0x831   : > { %v4344_v13 = vpop.f32.mrf.mxu3 }
 0x832   : > { %v4345_v37 = vadd.f32 %v4344_v13, %v9821_v34  ;;  %v4379_v34 = vmul.f32 0.2, %v4342_v46 }
 0x833   : > { %4468 = vrot.lane.b32.xlu2 %v4393_v44, %s7249_s7  ;;  %4472 = vrot.lane.b32.xlu1 %v4395_v23, %s7249_s7  ;;  %v7122_v44 = vld [vmem:[%s11090_s1 + $0x1a8] sm:$0xff]  ;;  %v7121_v23 = vld [vmem:[%s11090_s1 + $0x1a0] sm:$0xff] }
 0x834   : > { %4476 = vrot.lane.b32.xlu0 %v4397_v16, %s7249_s7  ;;  %v4380_v21 = vmul.f32 0.2, %v4345_v37  ;;  %v4411_v24 = vmax.f32 %v4342_v46, %v4379_v34  ;;  %6360 = vmatpush.msrb.mxu3 %v7122_v44 }
 0x836   : > { %v4412_v7 = vmax.f32 %v4345_v37, %v4380_v21  ;;  %6361 = vmatpush.msrb.mxu3 %v7121_v23 }
 0x839   : > { %v4347_v3 = vpop.f32.mrf.mxu3 }
 0x83a   : > { %v4348_v40 = vadd.f32 %v4347_v3, %v9825_v39  ;;  %v4639_v39 = vld [vmem:[#allocation2 + $0x1] sm:$0xff] }
 0x83b   : > { %4474 = vrot.lane.b32.xlu2 %v4396_v1, %s7249_s7  ;;  %4478 = vrot.lane.b32.xlu1 %v4398_v29, %s7249_s7 }
 0x83c   : > { %4482 = vrot.lane.b32.xlu0 %v4400_v18, %s7249_s7  ;;  %v4381_v61 = vmul.f32 0.2, %v4348_v40 }
 0x83e   : > { %v4413_v27 = vmax.f32 %v4348_v40, %v4381_v61 }
 0x843   : > { %4480 = vrot.lane.b32.xlu2 %v4399_v31, %s7249_s7  ;;  %4484 = vrot.lane.b32.xlu1 %v4401_v30, %s7249_s7 }
 0x844   : > { %4488 = vrot.lane.b32.xlu0 %v4403_v5, %s7249_s7 }
 0x84b   : > { %4486 = vrot.lane.b32.xlu2 %v4402_v25, %s7249_s7  ;;  %4490 = vrot.lane.b32.xlu1 %v4404_v47, %s7249_s7 }
 0x84c   : > { %4494 = vrot.lane.b32.xlu0 %v4406_v19, %s7249_s7 }
 0x853   : > { %4492 = vrot.lane.b32.xlu2 %v4405_v63, %s7249_s7  ;;  %4496 = vrot.lane.b32.xlu1 %v4407_v50, %s7249_s7 }
 0x854   : > { %4500 = vrot.lane.b32.xlu0 %v4409_v38, %s7249_s7 }
 0x85b   : > { %4498 = vrot.lane.b32.xlu2 %v4408_v14, %s7249_s7  ;;  %4502 = vrot.lane.b32.xlu1 %v4410_v35, %s7249_s7 }
 0x85c   : > { %4506 = vrot.lane.b32.xlu0 %v4412_v7, %s7249_s7 }
 0x863   : > { %4504 = vrot.lane.b32.xlu2 %v4411_v24, %s7249_s7  ;;  %4508 = vrot.lane.b32.xlu1 %v4413_v27, %s7249_s7 }
 0x864   : > { %4705 = vrot.lane.b32.xlu0 %v4640_v48, %s7241_s14 }
 0x865   : > { %v4451_v42 = vpop.permute.xlu2 %4450 }
 0x866   : > { %4545 = vst.msk [vmem:[#allocation2 + $0x31] sm:$0xff] %vm4542_vm4, %v4451_v42 }
 0x86b   : > { %4703 = vrot.lane.b32.xlu2 %v4639_v39, %s7241_s14 }
 0x86d   : > { %v4447_v2 = vpop.permute.xlu0 %4446  ;;  %v9927_v55 = vld [vmem:[#allocation2 + $0x31] sm:$0xff] }
 0x86e   : > { %v9929_v8 = vld [vmem:[#allocation2 + $0x30] sm:$0xff]  ;;  %4543 = vst.msk [vmem:[#allocation2 + $0x19] sm:$0xff] %vm4542_vm4, %v4447_v2  ;;  %4711 = vrot.lane.b32.xlu0 %v9927_v55, %s7241_s14 }
 0x86f   : > { %4611 = vst.msk [vmem:[#allocation3 + $0x40] sm:$0xff] %vm4542_vm4, %v9929_v8 }
 0x875   : > { %v4449_v12 = vpop.permute.xlu1 %4448  ;;  %v9942_v6 = vld [vmem:[#allocation2 + $0x19] sm:$0xff] }
 0x876   : > { %v9944_v16 = vld [vmem:[#allocation2 + $0x18] sm:$0xff]  ;;  %4544 = vst.msk [vmem:[#allocation2 + $0x21] sm:$0xff] %vm4542_vm4, %v4449_v12  ;;  %4707 = vrot.lane.b32.xlu1 %v9942_v6, %s7241_s14 }
 0x877   : > { %4609 = vst.msk [vmem:[#allocation3 + $0x20] sm:$0xff] %vm4542_vm4, %v9944_v16 }
 0x87d   : > { %v4457_v15 = vpop.permute.xlu2 %4456  ;;  %v9951_v20 = vld [vmem:[#allocation2 + $0x21] sm:$0xff] }
 0x87e   : > { %v9953_v53 = vld [vmem:[#allocation2 + $0x20] sm:$0xff]  ;;  %4548 = vst.msk [vmem:[#allocation2 + $0x51] sm:$0xff] %vm4542_vm4, %v4457_v15  ;;  %4709 = vrot.lane.b32.xlu2 %v9951_v20, %s7241_s14 }
 0x87f   : > { %4610 = vst.msk [vmem:[#allocation3 + $0x30] sm:$0xff] %vm4542_vm4, %v9953_v53 }
 0x885   : > { %v4463_v43 = vpop.permute.xlu2 %4462  ;;  %v4453_v1 = vpop.permute.xlu0 %4452  ;;  %v9960_v29 = vld [vmem:[#allocation2 + $0x51] sm:$0xff] }
 0x886   : > { %v9962_v54 = vld [vmem:[#allocation2 + $0x52] sm:$0xff]  ;;  %4551 = vst.msk [vmem:[#allocation2 + $0x79] sm:$0xff] %vm4542_vm4, %v4463_v43  ;;  %4717 = vrot.lane.b32.xlu0 %v9960_v29, %s7241_s14  ;;  %v4575_v43 = vld [vmem:[#allocation2] sm:$0xff] }
 0x887   : > { %4546 = vst.msk [vmem:[#allocation2 + $0x39] sm:$0xff] %vm4542_vm4, %v4453_v1 }
 0x888   : > { %6025 = vst.msk [vmem:[#allocation3 + $0x38] sm:$0xff] %vm4542_vm4, %v9962_v54 }
 0x889   : > { %4607 = vst.msk [vmem:[#allocation3] sm:$0xff] %vm4542_vm4, %v4575_v43 }
 0x88d   : > { %v4469_v59 = vpop.permute.xlu2 %4468  ;;  %v4455_v62 = vpop.permute.xlu1 %4454  ;;  %v9970_v18 = vld [vmem:[#allocation2 + $0x79] sm:$0xff] }
 0x88e   : > { %4554 = vst.msk [vmem:[#allocation2 + $0x99] sm:$0xff] %vm4542_vm4, %v4469_v59  ;;  %v4459_v10 = vpop.permute.xlu0 %4458  ;;  %4723 = vrot.lane.b32.xlu0 %v9970_v18, %s7241_s14  ;;  %v9975_v32 = vld [vmem:[#allocation2 + $0x39] sm:$0xff] }
 0x88f   : > { %v9977_v4 = vld [vmem:[#allocation2 + $0x32] sm:$0xff]  ;;  %4547 = vst.msk [vmem:[#allocation2 + $0x49] sm:$0xff] %vm4542_vm4, %v4455_v62  ;;  %4713 = vrot.lane.b32.xlu1 %v9975_v32, %s7241_s14  ;;  %v9982_v11 = vld [vmem:[#allocation2 + $0x3a] sm:$0xff]  ;;  %v6061_v12 = vld [vmem:[#allocation3 + $0x38] sm:$0xff] }
 0x890   : > { %4549 = vst.msk [vmem:[#allocation2 + $0x61] sm:$0xff] %vm4542_vm4, %v4459_v10  ;;  %v9985_v31 = vld [vmem:[#allocation2 + $0x38] sm:$0xff] }
 0x891   : > { %6022 = vst.msk [vmem:[#allocation3 + $0x8] sm:$0xff] %vm4542_vm4, %v9977_v4  ;;  %v9989_v30 = vld [vmem:[#allocation2 + $0x78] sm:$0xff] }
 0x892   : > { %6023 = vst.msk [vmem:[#allocation3 + $0x18] sm:$0xff] %vm4542_vm4, %v9982_v11 }
 0x893   : > { %4612 = vst.msk [vmem:[#allocation3 + $0x50] sm:$0xff] %vm4542_vm4, %v9985_v31 }
 0x894   : > { %4617 = vst.msk [vmem:[#allocation3 + $0xa0] sm:$0xff] %vm4542_vm4, %v9989_v30 }
 0x895   : > { %v4475_v60 = vpop.permute.xlu2 %4474  ;;  %v4461_v22 = vpop.permute.xlu1 %4460  ;;  %v4652_v5 = vld [vmem:[#allocation2 + $0x99] sm:$0xff] }
 0x896   : > { %4557 = vst.msk [vmem:[#allocation2 + $0xc1] sm:$0xff] %vm4542_vm4, %v4475_v60  ;;  %v4465_v17 = vpop.permute.xlu0 %4464  ;;  %v9998_v9 = vld [vmem:[#allocation2 + $0x49] sm:$0xff]  ;;  %4729 = vrot.lane.b32.xlu0 %v4652_v5, %s7241_s14  ;;  %v10008_v52 = vld [vmem:[#allocation2 + $0x9a] sm:$0xff] }
 0x897   : > { %v10001_v57 = vld [vmem:[#allocation2 + $0x4a] sm:$0xff]  ;;  %4550 = vst.msk [vmem:[#allocation2 + $0x69] sm:$0xff] %vm4542_vm4, %v4461_v22  ;;  %4715 = vrot.lane.b32.xlu2 %v9998_v9, %s7241_s14  ;;  %v10006_v33 = vld [vmem:[#allocation2 + $0x61] sm:$0xff] }
 0x898   : > { %4552 = vst.msk [vmem:[#allocation2 + $0x81] sm:$0xff] %vm4542_vm4, %v4465_v17  ;;  %v6055_v25 = vld [vmem:[#allocation3 + $0x8] sm:$0xff]  ;;  %4719 = vrot.lane.b32.xlu1 %v10006_v33, %s7241_s14  ;;  %v10013_v47 = vld [vmem:[#allocation2 + $0x48] sm:$0xff]  ;;  %v10018_v49 = vld [vmem:[#allocation2 + $0x50] sm:$0xff] }
 0x899   : > { %7123 = vmatmul.msk.f32.vlgmr.msrb.gmra.mxu3 %vm171_vm0, %v6055_v25  ;;  %6024 = vst.msk [vmem:[#allocation3 + $0x28] sm:$0xff] %vm4542_vm4, %v10001_v57  ;;  %v10022_v0 = vld [vmem:[#allocation2 + $0x60] sm:$0xff]  ;;  %v6057_v28 = vld [vmem:[#allocation3 + $0x18] sm:$0xff] }
 0x89a   : > { %6031 = vst.msk [vmem:[#allocation3 + $0x98] sm:$0xff] %vm4542_vm4, %v10008_v52 }
 0x89b   : > { %4613 = vst.msk [vmem:[#allocation3 + $0x60] sm:$0xff] %vm4542_vm4, %v10013_v47 }
 0x89c   : > { %4614 = vst.msk [vmem:[#allocation3 + $0x70] sm:$0xff] %vm4542_vm4, %v10018_v49 }
 0x89d   : > { %v4481_v19 = vpop.permute.xlu2 %4480  ;;  %v4467_v45 = vpop.permute.xlu1 %4466  ;;  %v4655_v13 = vld [vmem:[#allocation2 + $0xc1] sm:$0xff]  ;;  %4615 = vst.msk [vmem:[#allocation3 + $0x80] sm:$0xff] %vm4542_vm4, %v10022_v0 }
 0x89e   : > { %4560 = vst.msk [vmem:[#allocation2 + $0xe1] sm:$0xff] %vm4542_vm4, %v4481_v19  ;;  %v4471_v51 = vpop.permute.xlu0 %4470  ;;  %v10031_v36 = vld [vmem:[#allocation2 + $0x69] sm:$0xff]  ;;  %4735 = vrot.lane.b32.xlu0 %v4655_v13, %s7241_s14 }
 0x89f   : > { %v10034_v58 = vld [vmem:[#allocation2 + $0x62] sm:$0xff]  ;;  %4553 = vst.msk [vmem:[#allocation2 + $0x91] sm:$0xff] %vm4542_vm4, %v4467_v45  ;;  %4721 = vrot.lane.b32.xlu2 %v10031_v36, %s7241_s14  ;;  %v10039_v50 = vld [vmem:[#allocation2 + $0x6a] sm:$0xff]  ;;  %v10043_v56 = vld [vmem:[#allocation2 + $0x7a] sm:$0xff] }
 0x8a0   : > { %v4650_v63 = vld [vmem:[#allocation2 + $0x81] sm:$0xff]  ;;  %4555 = vst.msk [vmem:[#allocation2 + $0xa9] sm:$0xff] %vm4542_vm4, %v4471_v51  ;;  %v6059_v7 = vld [vmem:[#allocation3 + $0x28] sm:$0xff] }
 0x8a1   : > { %4725 = vrot.lane.b32.xlu1 %v4650_v63, %s7241_s14  ;;  %7124 = vmatmul.msk.f32.gmra.mxu3 %vm171_vm0, %v6057_v28  ;;  %6026 = vst.msk [vmem:[#allocation3 + $0x48] sm:$0xff] %vm4542_vm4, %v10034_v58  ;;  %v10048_v38 = vld [vmem:[#allocation2 + $0x82] sm:$0xff] }
 0x8a2   : > { %6027 = vst.msk [vmem:[#allocation3 + $0x58] sm:$0xff] %vm4542_vm4, %v10039_v50  ;;  %v10052_v37 = vld [vmem:[#allocation2 + $0x68] sm:$0xff]  ;;  %v10079_v24 = vld [vmem:[#allocation2 + $0x80] sm:$0xff] }
 0x8a3   : > { %6028 = vst.msk [vmem:[#allocation3 + $0x68] sm:$0xff] %vm4542_vm4, %v10043_v56  ;;  %v4576_v13 = vld [vmem:[#allocation2 + $0x8] sm:$0xff]  ;;  %v10127_v63 = vld [vmem:[#allocation2 + $0xc0] sm:$0xff] }
 0x8a4   : > { %6029 = vst.msk [vmem:[#allocation3 + $0x78] sm:$0xff] %vm4542_vm4, %v10048_v38 }
 0x8a5   : > { %v4487_v41 = vpop.permute.xlu2 %4486  ;;  %v4473_v26 = vpop.permute.xlu1 %4472  ;;  %v4658_v21 = vld [vmem:[#allocation2 + $0xe1] sm:$0xff]  ;;  %4616 = vst.msk [vmem:[#allocation3 + $0x90] sm:$0xff] %vm4542_vm4, %v10052_v37 }
 0x8a6   : > { %4563 = vst.msk [vmem:[#allocation2 + $0x109] sm:$0xff] %vm4542_vm4, %v4487_v41  ;;  %v4477_v3 = vpop.permute.xlu0 %4476  ;;  %v4651_v14 = vld [vmem:[#allocation2 + $0x91] sm:$0xff]  ;;  %4741 = vrot.lane.b32.xlu0 %v4658_v21, %s7241_s14  ;;  %v10075_v61 = vld [vmem:[#allocation2 + $0xe2] sm:$0xff] }
 0x8a7   : > { %v10062_v35 = vld [vmem:[#allocation2 + $0x92] sm:$0xff]  ;;  %4556 = vst.msk [vmem:[#allocation2 + $0xb1] sm:$0xff] %vm4542_vm4, %v4473_v26  ;;  %4727 = vrot.lane.b32.xlu2 %v4651_v14, %s7241_s14  ;;  %v4653_v46 = vld [vmem:[#allocation2 + $0xa9] sm:$0xff] }
 0x8a8   : > { %v10066_v40 = vld [vmem:[#allocation2 + $0x90] sm:$0xff]  ;;  %4558 = vst.msk [vmem:[#allocation2 + $0xc9] sm:$0xff] %vm4542_vm4, %v4477_v3  ;;  %v10070_v34 = vld [vmem:[#allocation2 + $0x98] sm:$0xff] }
 0x8a9   : > { %4731 = vrot.lane.b32.xlu1 %v4653_v46, %s7241_s14  ;;  %7125 = vmatmul.msk.f32.gmra.mxu3 %vm171_vm0, %v6059_v7  ;;  %6030 = vst.msk [vmem:[#allocation3 + $0x88] sm:$0xff] %vm4542_vm4, %v10062_v35  ;;  %v6063_v19 = vld [vmem:[#allocation3 + $0x48] sm:$0xff] }
 0x8aa   : > { %4619 = vst.msk [vmem:[#allocation3 + $0xc0] sm:$0xff] %vm4542_vm4, %v10066_v40 }
 0x8ab   : > { %4620 = vst.msk [vmem:[#allocation3 + $0xd0] sm:$0xff] %vm4542_vm4, %v10070_v34 }
 0x8ac   : > { %6037 = vst.msk [vmem:[#allocation3 + $0xf8] sm:$0xff] %vm4542_vm4, %v10075_v61 }
 0x8ad   : > { %v4493_v27 = vpop.permute.xlu2 %4492  ;;  %v4479_v48 = vpop.permute.xlu1 %4478  ;;  %v4661_v42 = vld [vmem:[#allocation2 + $0x109] sm:$0xff]  ;;  %4618 = vst.msk [vmem:[#allocation3 + $0xb0] sm:$0xff] %vm4542_vm4, %v10079_v24 }
 0x8ae   : > { %4566 = vst.msk [vmem:[#allocation2 + $0x129] sm:$0xff] %vm4542_vm4, %v4493_v27  ;;  %v4483_v39 = vpop.permute.xlu0 %4482  ;;  %v4654_v2 = vld [vmem:[#allocation2 + $0xb1] sm:$0xff]  ;;  %4747 = vrot.lane.b32.xlu0 %v4661_v42, %s7241_s14  ;;  %v6065_v27 = vld [vmem:[#allocation3 + $0x58] sm:$0xff] }
 0x8af   : > { %v10089_v44 = vld [vmem:[#allocation2 + $0xaa] sm:$0xff]  ;;  %4559 = vst.msk [vmem:[#allocation2 + $0xd9] sm:$0xff] %vm4542_vm4, %v4479_v48  ;;  %4733 = vrot.lane.b32.xlu2 %v4654_v2, %s7241_s14  ;;  %v10095_v15 = vld [vmem:[#allocation2 + $0xb2] sm:$0xff]  ;;  %v10100_v1 = vld [vmem:[#allocation2 + $0xc2] sm:$0xff] }
 0x8b0   : > { %v4656_v23 = vld [vmem:[#allocation2 + $0xc9] sm:$0xff]  ;;  %4561 = vst.msk [vmem:[#allocation2 + $0xf1] sm:$0xff] %vm4542_vm4, %v4483_v39 }
 0x8b1   : > { %4737 = vrot.lane.b32.xlu1 %v4656_v23, %s7241_s14  ;;  %7126 = vmatmul.msk.f32.gmra.mxu3 %vm171_vm0, %v6061_v12  ;;  %6032 = vst.msk [vmem:[#allocation3 + $0xa8] sm:$0xff] %vm4542_vm4, %v10089_v44  ;;  %v10103_v59 = vld [vmem:[#allocation2 + $0xca] sm:$0xff] }
 0x8b2   : > { %6033 = vst.msk [vmem:[#allocation3 + $0xb8] sm:$0xff] %vm4542_vm4, %v10095_v15  ;;  %v10119_v45 = vld [vmem:[#allocation2 + $0xb0] sm:$0xff]  ;;  %v10145_v48 = vld [vmem:[#allocation2 + $0xa8] sm:$0xff] }
 0x8b3   : > { %6034 = vst.msk [vmem:[#allocation3 + $0xc8] sm:$0xff] %vm4542_vm4, %v10100_v1 }
 0x8b4   : > { %6035 = vst.msk [vmem:[#allocation3 + $0xd8] sm:$0xff] %vm4542_vm4, %v10103_v59 }
 0x8b5   : > { %v4499_v62 = vpop.permute.xlu2 %4498  ;;  %v4485_v10 = vpop.permute.xlu1 %4484  ;;  %v4664_v60 = vld [vmem:[#allocation2 + $0x129] sm:$0xff]  ;;  %4608 = vst.msk [vmem:[#allocation3 + $0x10] sm:$0xff] %vm4542_vm4, %v4576_v13 }
 0x8b6   : > { %4569 = vst.msk [vmem:[#allocation2 + $0x151] sm:$0xff] %vm4542_vm4, %v4499_v62  ;;  %v4489_v22 = vpop.permute.xlu0 %4488  ;;  %v4657_v5 = vld [vmem:[#allocation2 + $0xd9] sm:$0xff]  ;;  %4753 = vrot.lane.b32.xlu0 %v4664_v60, %s7241_s14 }
 0x8b7   : > { %v10113_v17 = vld [vmem:[#allocation2 + $0xda] sm:$0xff]  ;;  %4562 = vst.msk [vmem:[#allocation2 + $0xf9] sm:$0xff] %vm4542_vm4, %v4485_v10  ;;  %4739 = vrot.lane.b32.xlu2 %v4657_v5, %s7241_s14  ;;  %v4659_v25 = vld [vmem:[#allocation2 + $0xf1] sm:$0xff] }
 0x8b8   : > { %4564 = vst.msk [vmem:[#allocation2 + $0x111] sm:$0xff] %vm4542_vm4, %v4489_v22  ;;  %v10124_v51 = vld [vmem:[#allocation2 + $0xd8] sm:$0xff]  ;;  %v10150_v42 = vld [vmem:[#allocation2 + $0xe0] sm:$0xff]  ;;  %v10166_v22 = vld [vmem:[#allocation2 + $0xc8] sm:$0xff] }
 0x8b9   : > { %4743 = vrot.lane.b32.xlu1 %v4659_v25, %s7241_s14  ;;  %7127 = vmatmul.msk.f32.gmra.mxu3 %vm171_vm0, %v6063_v19  ;;  %6036 = vst.msk [vmem:[#allocation3 + $0xe8] sm:$0xff] %vm4542_vm4, %v10113_v17  ;;  %v6067_v5 = vld [vmem:[#allocation3 + $0x68] sm:$0xff]  ;;  %v10170_v25 = vld [vmem:[#allocation2 + $0x108] sm:$0xff]  ;;  %v10176_v13 = vld [vmem:[#allocation2 + $0xf0] sm:$0xff] }
 0x8ba   : > { %4622 = vst.msk [vmem:[#allocation3 + $0xf0] sm:$0xff] %vm4542_vm4, %v10119_v45 }
 0x8bb   : > { %4625 = vst.msk [vmem:[#allocation3 + $0x120] sm:$0xff] %vm4542_vm4, %v10124_v51 }
 0x8bc   : > { %4623 = vst.msk [vmem:[#allocation3 + $0x100] sm:$0xff] %vm4542_vm4, %v10127_v63 }
 0x8bd   : > { %v4505_v28 = vpop.permute.xlu2 %4504  ;;  %v4491_v41 = vpop.permute.xlu1 %4490  ;;  %v4667_v26 = vld [vmem:[#allocation2 + $0x151] sm:$0xff]  ;;  %4621 = vst.msk [vmem:[#allocation3 + $0xe0] sm:$0xff] %vm4542_vm4, %v10145_v48 }
 0x8be   : > { %4572 = vst.msk [vmem:[#allocation2 + $0x171] sm:$0xff] %vm4542_vm4, %v4505_v28  ;;  %v4495_v21 = vpop.permute.xlu0 %4494  ;;  %v4660_v3 = vld [vmem:[#allocation2 + $0xf9] sm:$0xff]  ;;  %4759 = vrot.lane.b32.xlu0 %v4667_v26, %s7241_s14 }
 0x8bf   : > { %v10137_v14 = vld [vmem:[#allocation2 + $0xf2] sm:$0xff]  ;;  %4565 = vst.msk [vmem:[#allocation2 + $0x121] sm:$0xff] %vm4542_vm4, %v4491_v41  ;;  %4745 = vrot.lane.b32.xlu2 %v4660_v3, %s7241_s14  ;;  %v10152_v39 = vld [vmem:[#allocation2 + $0xfa] sm:$0xff]  ;;  %v6008_v19 = vld [vmem:[#allocation2 + $0x10a] sm:$0xff] }
 0x8c0   : > { %v4662_v46 = vld [vmem:[#allocation2 + $0x111] sm:$0xff]  ;;  %4567 = vst.msk [vmem:[#allocation2 + $0x139] sm:$0xff] %vm4542_vm4, %v4495_v21  ;;  %v10181_v26 = vld [vmem:[#allocation2 + $0x1a] sm:$0xff] }
 0x8c1   : > { %v10141_v7 = vld [vmem:[#allocation2 + $0xf8] sm:$0xff]  ;;  %4749 = vrot.lane.b32.xlu1 %v4662_v46, %s7241_s14  ;;  %7128 = vmatmul.msk.f32.gmra.mxu3 %vm171_vm0, %v6065_v27  ;;  %6038 = vst.msk [vmem:[#allocation3 + $0x108] sm:$0xff] %vm4542_vm4, %v10137_v14 }
 0x8c2   : > { %4628 = vst.msk [vmem:[#allocation3 + $0x150] sm:$0xff] %vm4542_vm4, %v10141_v7 }
 0x8c3   : > { %4626 = vst.msk [vmem:[#allocation3 + $0x130] sm:$0xff] %vm4542_vm4, %v10150_v42 }
 0x8c4   : > { %6039 = vst.msk [vmem:[#allocation3 + $0x118] sm:$0xff] %vm4542_vm4, %v10152_v39 }
 0x8c5   : > { %v4497_v2 = vpop.permute.xlu1 %4496  ;;  %v4670_v23 = vld [vmem:[#allocation2 + $0x171] sm:$0xff]  ;;  %v4704_v60 = vpop.permute.xlu2 %4703  ;;  %4624 = vst.msk [vmem:[#allocation3 + $0x110] sm:$0xff] %vm4542_vm4, %v10166_v22 }
 0x8c6   : > { %4568 = vst.msk [vmem:[#allocation2 + $0x141] sm:$0xff] %vm4542_vm4, %v4497_v2  ;;  %v4501_v12 = vpop.permute.xlu0 %4500  ;;  %v4663_v43 = vld [vmem:[#allocation2 + $0x121] sm:$0xff]  ;;  %4765 = vrot.lane.b32.xlu0 %v4670_v23, %s7241_s14  ;;  %v6009_v2 = vld [vmem:[#allocation2 + $0x112] sm:$0xff] }
 0x8c7   : > { %v4599_v62 = vld [vmem:[#allocation2 + $0x120] sm:$0xff]  ;;  %4570 = vst.msk [vmem:[#allocation2 + $0x159] sm:$0xff] %vm4542_vm4, %v4501_v12  ;;  %4751 = vrot.lane.b32.xlu2 %v4663_v43, %s7241_s14  ;;  %v4600_v27 = vld [vmem:[#allocation2 + $0x128] sm:$0xff]  ;;  %v10192_v12 = vld [vmem:[#allocation2 + $0x110] sm:$0xff] }
 0x8c8   : > { %v4665_v10 = vld [vmem:[#allocation2 + $0x139] sm:$0xff]  ;;  %4800 = vst.msk [vmem:[#allocation3] sm:$0xff] %vm4799_vm5, %v4704_v60  ;;  %v6069_v23 = vld [vmem:[#allocation3 + $0x78] sm:$0xff]  ;;  %v4603_v43 = vld [vmem:[#allocation2 + $0x150] sm:$0xff] }
 0x8c9   : > { %4755 = vrot.lane.b32.xlu1 %v4665_v10, %s7241_s14  ;;  %7129 = vmatmul.msk.f32.gmra.mxu3 %vm171_vm0, %v6067_v5  ;;  %4631 = vst.msk [vmem:[#allocation3 + $0x180] sm:$0xff] %vm4542_vm4, %v4599_v62  ;;  %v6010_v62 = vld [vmem:[#allocation2 + $0x122] sm:$0xff] }
 0x8ca   : > { %4629 = vst.msk [vmem:[#allocation3 + $0x160] sm:$0xff] %vm4542_vm4, %v10170_v25  ;;  %v4832_v5 = vld [vmem:[#allocation2 + $0x2] sm:$0xff] }
 0x8cb   : > { %6040 = vst.msk [vmem:[#allocation3 + $0x128] sm:$0xff] %vm4542_vm4, %v6008_v19 }
 0x8cc   : > { %4627 = vst.msk [vmem:[#allocation3 + $0x140] sm:$0xff] %vm4542_vm4, %v10176_v13 }
 0x8cd   : > { %v4503_v28 = vpop.permute.xlu1 %4502  ;;  %v4666_v41 = vld [vmem:[#allocation2 + $0x141] sm:$0xff]  ;;  %4632 = vst.msk [vmem:[#allocation3 + $0x190] sm:$0xff] %vm4542_vm4, %v4600_v27  ;;  %v6011_v27 = vld [vmem:[#allocation2 + $0x12a] sm:$0xff] }
 0x8ce   : > { %v4602_v21 = vld [vmem:[#allocation2 + $0x140] sm:$0xff]  ;;  %4571 = vst.msk [vmem:[#allocation2 + $0x169] sm:$0xff] %vm4542_vm4, %v4503_v28  ;;  %v4507_v3 = vpop.permute.xlu0 %4506  ;;  %4900 = vrot.lane.b32.xlu0 %v10181_v26, %s7242_s19 }
 0x8cf   : > { %v4668_v46 = vld [vmem:[#allocation2 + $0x159] sm:$0xff]  ;;  %4573 = vst.msk [vmem:[#allocation2 + $0x181] sm:$0xff] %vm4542_vm4, %v4507_v3  ;;  %4757 = vrot.lane.b32.xlu2 %v4666_v41, %s7241_s14 }
 0x8d0   : > { %4634 = vst.msk [vmem:[#allocation3 + $0x1b0] sm:$0xff] %vm4542_vm4, %v4602_v21  ;;  %v4601_v41 = vld [vmem:[#allocation2 + $0x138] sm:$0xff] }
 0x8d1   : > { %4761 = vrot.lane.b32.xlu1 %v4668_v46, %s7241_s14  ;;  %7130 = vmatmul.msk.f32.gmra.mxu3 %vm171_vm0, %v6069_v23  ;;  %6041 = vst.msk [vmem:[#allocation3 + $0x138] sm:$0xff] %vm4542_vm4, %v6009_v2  ;;  %v6071_v21 = vld [vmem:[#allocation3 + $0x88] sm:$0xff] }
 0x8d2   : > { %4630 = vst.msk [vmem:[#allocation3 + $0x170] sm:$0xff] %vm4542_vm4, %v10192_v12  ;;  %v4604_v2 = vld [vmem:[#allocation2 + $0x158] sm:$0xff] }
 0x8d3   : > { %4635 = vst.msk [vmem:[#allocation3 + $0x1c0] sm:$0xff] %vm4542_vm4, %v4603_v43  ;;  %v6012_v23 = vld [vmem:[#allocation2 + $0x13a] sm:$0xff]  ;;  %v4833_v43 = vld [vmem:[#allocation2 + $0xa] sm:$0xff] }
 0x8d4   : > { %6042 = vst.msk [vmem:[#allocation3 + $0x148] sm:$0xff] %vm4542_vm4, %v6010_v62  ;;  %v6013_v62 = vld [vmem:[#allocation2 + $0x142] sm:$0xff] }
 0x8d5   : > { %v4509_v10 = vpop.permute.xlu1 %4508  ;;  %v4669_v60 = vld [vmem:[#allocation2 + $0x169] sm:$0xff]  ;;  %4633 = vst.msk [vmem:[#allocation3 + $0x1a0] sm:$0xff] %vm4542_vm4, %v4601_v41 }
 0x8d6   : > { %v4605_v19 = vld [vmem:[#allocation2 + $0x168] sm:$0xff]  ;;  %4574 = vst.msk [vmem:[#allocation2 + $0x189] sm:$0xff] %vm4542_vm4, %v4509_v10  ;;  %4906 = vrot.lane.b32.xlu0 %v9982_v11, %s7242_s19  ;;  %v4706_v28 = vpop.permute.xlu0 %4705  ;;  %v4606_v46 = vld [vmem:[#allocation2 + $0x170] sm:$0xff] }
 0x8d7   : > { %4763 = vrot.lane.b32.xlu2 %v4669_v60, %s7241_s14  ;;  %4801 = vst.msk [vmem:[#allocation3 + $0x10] sm:$0xff] %vm4799_vm5, %v4706_v28  ;;  %v6014_v10 = vld [vmem:[#allocation2 + $0x152] sm:$0xff]  ;;  %v10218_v60 = vld [vmem:[#allocation2 + $0x22] sm:$0xff]  ;;  %v6016_v41 = vld [vmem:[#allocation2 + $0x16a] sm:$0xff] }
 0x8d8   : > { %v4710_v3 = vpop.permute.xlu2 %4709  ;;  %4637 = vst.msk [vmem:[#allocation3 + $0x1e0] sm:$0xff] %vm4542_vm4, %v4605_v19  ;;  %v6073_v19 = vld [vmem:[#allocation3 + $0x98] sm:$0xff] }
 0x8d9   : > { %4896 = vrot.lane.b32.xlu1 %v4832_v5, %s7242_s19  ;;  %7131 = vmatmul.msk.f32.gmra.mxu3 %vm171_vm0, %v6071_v21  ;;  %4803 = vst.msk [vmem:[#allocation3 + $0x30] sm:$0xff] %vm4799_vm5, %v4710_v3  ;;  %v6015_v5 = vld [vmem:[#allocation2 + $0x15a] sm:$0xff]  ;;  %v6017_v21 = vld [vmem:[#allocation2 + $0x172] sm:$0xff] }
 0x8da   : > { %4638 = vst.msk [vmem:[#allocation3 + $0x1f0] sm:$0xff] %vm4542_vm4, %v4606_v46  ;;  %v7120_v3 = vld [vmem:[%s11090_s1 + $0x198] sm:$0xff] }
 0x8db   : > { %6043 = vst.msk [vmem:[#allocation3 + $0x158] sm:$0xff] %vm4542_vm4, %v6011_v27  ;;  %6233 = vmatpush.msrb.mxu1 %v7120_v3 }
 0x8dc   : > { %4636 = vst.msk [vmem:[#allocation3 + $0x1d0] sm:$0xff] %vm4542_vm4, %v4604_v2  ;;  %v6075_v2 = vld [vmem:[#allocation3 + $0xa8] sm:$0xff] }
 0x8dd   : > { %6044 = vst.msk [vmem:[#allocation3 + $0x168] sm:$0xff] %vm4542_vm4, %v6012_v23  ;;  %v6018_v46 = vld [vmem:[#allocation2 + $0x182] sm:$0xff]  ;;  %v6019_v27 = vld [vmem:[#allocation2 + $0x18a] sm:$0xff] }
 0x8de   : > { %4912 = vrot.lane.b32.xlu0 %v10034_v58, %s7242_s19  ;;  %6045 = vst.msk [vmem:[#allocation3 + $0x178] sm:$0xff] %vm4542_vm4, %v6013_v62  ;;  %v6077_v62 = vld [vmem:[#allocation3 + $0xb8] sm:$0xff] }
 0x8df   : > { %4898 = vrot.lane.b32.xlu2 %v4833_v43, %s7242_s19  ;;  %6046 = vst.msk [vmem:[#allocation3 + $0x188] sm:$0xff] %vm4542_vm4, %v6014_v10  ;;  %v7119_v43 = vld [vmem:[%s11090_s1 + $0x190] sm:$0xff] }
 0x8e0   : > { %v4712_v28 = vpop.permute.xlu0 %4711  ;;  %6047 = vst.msk [vmem:[#allocation3 + $0x198] sm:$0xff] %vm4542_vm4, %v6015_v5  ;;  %6234 = vmatpush.msrb.mxu1 %v7119_v43  ;;  %v6079_v5 = vld [vmem:[#allocation3 + $0xc8] sm:$0xff] }
 0x8e1   : > { %4902 = vrot.lane.b32.xlu1 %v10218_v60, %s7242_s19  ;;  %7132 = vmatmul.msk.f32.gmra.mxu3 %vm171_vm0, %v6073_v19  ;;  %4804 = vst.msk [vmem:[#allocation3 + $0x40] sm:$0xff] %vm4799_vm5, %v4712_v28 }
 0x8e2   : > { %6048 = vst.msk [vmem:[#allocation3 + $0x1a8] sm:$0xff] %vm4542_vm4, %v6016_v41  ;;  %v7118_v41 = vld [vmem:[%s11090_s1 + $0x188] sm:$0xff] }
 0x8e3   : > { %6049 = vst.msk [vmem:[#allocation3 + $0x1b8] sm:$0xff] %vm4542_vm4, %v6017_v21  ;;  %6235 = vmatpush.msrb.mxu1 %v7118_v41 }
 0x8e4   : > { %6050 = vst.msk [vmem:[#allocation3 + $0x1c8] sm:$0xff] %vm4542_vm4, %v6018_v46 }
 0x8e5   : > { %6051 = vst.msk [vmem:[#allocation3 + $0x1d8] sm:$0xff] %vm4542_vm4, %v6019_v27 }
 0x8e6   : > { %4918 = vrot.lane.b32.xlu0 %v10048_v38, %s7242_s19 }
 0x8e7   : > { %4904 = vrot.lane.b32.xlu2 %v9977_v4, %s7242_s19 }
 0x8e8   : > { %v4708_v23 = vpop.permute.xlu1 %4707 }
 0x8e9   : > { %4908 = vrot.lane.b32.xlu1 %v10001_v57, %s7242_s19  ;;  %7133 = vmatmul.msk.f32.gmra.mxu3 %vm171_vm0, %v6075_v2  ;;  %4802 = vst.msk [vmem:[#allocation3 + $0x20] sm:$0xff] %vm4799_vm5, %v4708_v23  ;;  %v7117_v23 = vld [vmem:[%s11090_s1 + $0x180] sm:$0xff] }
 0x8ea   : > { %6236 = vmatpush.msrb.mxu1 %v7117_v23 }
 0x8ee   : > { %4924 = vrot.lane.b32.xlu0 %v10089_v44, %s7242_s19 }
 0x8ef   : > { %4910 = vrot.lane.b32.xlu2 %v9962_v54, %s7242_s19 }
 0x8f1   : > { %4914 = vrot.lane.b32.xlu1 %v10039_v50, %s7242_s19  ;;  %7134 = vmatmul.msk.f32.gmra.mxu3 %vm171_vm0, %v6077_v62  ;;  %v4716_v10 = vpop.permute.xlu2 %4715 }
 0x8f2   : > { %4806 = vst.msk [vmem:[#allocation3 + $0x60] sm:$0xff] %vm4799_vm5, %v4716_v10 }
 0x8f6   : > { %4930 = vrot.lane.b32.xlu0 %v10103_v59, %s7242_s19  ;;  %v6081_v59 = vld [vmem:[#allocation3 + $0xd8] sm:$0xff] }
 0x8f7   : > { %4916 = vrot.lane.b32.xlu2 %v10043_v56, %s7242_s19 }
 0x8f8   : > { %v4718_v19 = vpop.permute.xlu0 %4717 }
 0x8f9   : > { %4920 = vrot.lane.b32.xlu1 %v10062_v35, %s7242_s19  ;;  %7135 = vmatmul.msk.f32.gmra.mxu3 %vm171_vm0, %v6079_v5  ;;  %v4722_v28 = vpop.permute.xlu2 %4721  ;;  %4807 = vst.msk [vmem:[#allocation3 + $0x70] sm:$0xff] %vm4799_vm5, %v4718_v19  ;;  %v7116_v5 = vld [vmem:[%s11090_s1 + $0x178] sm:$0xff] }
 0x8fa   : > { %4809 = vst.msk [vmem:[#allocation3 + $0x90] sm:$0xff] %vm4799_vm5, %v4722_v28  ;;  %6237 = vmatpush.msrb.mxu1 %v7116_v5 }
 0x8fe   : > { %4936 = vrot.lane.b32.xlu0 %v10137_v14, %s7242_s19  ;;  %v6083_v14 = vld [vmem:[#allocation3 + $0xe8] sm:$0xff] }
 0x8ff   : > { %4922 = vrot.lane.b32.xlu2 %v10008_v52, %s7242_s19 }
 0x900   : > { %v4724_v21 = vpop.permute.xlu0 %4723 }
 0x901   : > { %4926 = vrot.lane.b32.xlu1 %v10095_v15, %s7242_s19  ;;  %7136 = vmatmul.msk.f32.gmra.mxu3 %vm171_vm0, %v6081_v59  ;;  %v4728_v3 = vpop.permute.xlu2 %4727  ;;  %v4714_v46 = vpop.permute.xlu1 %4713  ;;  %4810 = vst.msk [vmem:[#allocation3 + $0xa0] sm:$0xff] %vm4799_vm5, %v4724_v21  ;;  %v7115_v59 = vld [vmem:[%s11090_s1 + $0x170] sm:$0xff] }
 0x902   : > { %4812 = vst.msk [vmem:[#allocation3 + $0xc0] sm:$0xff] %vm4799_vm5, %v4728_v3  ;;  %6238 = vmatpush.msrb.mxu1 %v7115_v59 }
 0x903   : > { %4805 = vst.msk [vmem:[#allocation3 + $0x50] sm:$0xff] %vm4799_vm5, %v4714_v46 }
 0x906   : > { %5282 = vrot.lane.b32.xlu0 %v9942_v6, %s7244_s21 }
 0x907   : > { %4928 = vrot.lane.b32.xlu2 %v10100_v1, %s7242_s19  ;;  %v6085_v1 = vld [vmem:[#allocation3 + $0xf8] sm:$0xff] }
 0x908   : > { %v4730_v27 = vpop.permute.xlu0 %4729 }
 0x909   : > { %4932 = vrot.lane.b32.xlu1 %v10113_v17, %s7242_s19  ;;  %7137 = vmatmul.msk.f32.gmra.mxu3 %vm171_vm0, %v6083_v14  ;;  %v4734_v2 = vpop.permute.xlu2 %4733  ;;  %4813 = vst.msk [vmem:[#allocation3 + $0xd0] sm:$0xff] %vm4799_vm5, %v4730_v27  ;;  %v7114_v27 = vld [vmem:[%s11090_s1 + $0x168] sm:$0xff] }
 0x90a   : > { %4815 = vst.msk [vmem:[#allocation3 + $0xf0] sm:$0xff] %vm4799_vm5, %v4734_v2  ;;  %v4720_v6 = vpop.permute.xlu1 %4719  ;;  %6239 = vmatpush.msrb.mxu1 %v7114_v27  ;;  %v6109_v27 = vld [vmem:[#allocation3 + $0x1b8] sm:$0xff] }
 0x90b   : > { %4808 = vst.msk [vmem:[#allocation3 + $0x80] sm:$0xff] %vm4799_vm5, %v4720_v6 }
 0x90e   : > { %5861 = vrot.lane.b32.xlu0 %v9927_v55, %s7247_s24 }
 0x90f   : > { %4934 = vrot.lane.b32.xlu2 %v10075_v61, %s7242_s19  ;;  %v6087_v61 = vld [vmem:[#allocation3 + $0x108] sm:$0xff] }
 0x910   : > { %v4736_v43 = vpop.permute.xlu0 %4735 }
 0x911   : > { %4938 = vrot.lane.b32.xlu1 %v10152_v39, %s7242_s19  ;;  %7138 = vmatmul.msk.f32.gmra.mxu3 %vm171_vm0, %v6085_v1  ;;  %v4740_v62 = vpop.permute.xlu2 %4739  ;;  %4816 = vst.msk [vmem:[#allocation3 + $0x100] sm:$0xff] %vm4799_vm5, %v4736_v43  ;;  %v6097_v1 = vld [vmem:[#allocation3 + $0x158] sm:$0xff] }
 0x912   : > { %4818 = vst.msk [vmem:[#allocation3 + $0x120] sm:$0xff] %vm4799_vm5, %v4740_v62 }
 0x913   : > { %v4726_v10 = vpop.permute.xlu1 %4725 }
 0x914   : > { %4811 = vst.msk [vmem:[#allocation3 + $0xb0] sm:$0xff] %vm4799_vm5, %v4726_v10 }
 0x916   : > { %5477 = vrot.lane.b32.xlu0 %v10218_v60, %s7245_s22 }
 0x917   : > { %5089 = vrot.lane.b32.xlu2 %v9944_v16, %s7243_s20  ;;  %v6089_v16 = vld [vmem:[#allocation3 + $0x118] sm:$0xff] }
 0x918   : > { %v4742_v39 = vpop.permute.xlu0 %4741 }
 0x919   : > { %5475 = vrot.lane.b32.xlu1 %v10181_v26, %s7245_s22  ;;  %7139 = vmatmul.msk.f32.gmra.mxu3 %vm171_vm0, %v6087_v61  ;;  %v4746_v19 = vpop.permute.xlu2 %4745  ;;  %4819 = vst.msk [vmem:[#allocation3 + $0x130] sm:$0xff] %vm4799_vm5, %v4742_v39  ;;  %v7112_v61 = vld [vmem:[%s11090_s1 + $0x158] sm:$0xff] }
 0x91a   : > { %4821 = vst.msk [vmem:[#allocation3 + $0x150] sm:$0xff] %vm4799_vm5, %v4746_v19 }
 0x91b   : > { %v4732_v28 = vpop.permute.xlu1 %4731 }
 0x91c   : > { %4814 = vst.msk [vmem:[#allocation3 + $0xe0] sm:$0xff] %vm4799_vm5, %v4732_v28 }
 0x91e   : > { %5093 = vrot.lane.b32.xlu0 %v9929_v8, %s7243_s20 }
 0x91f   : > { %5668 = vrot.lane.b32.xlu2 %v9929_v8, %s7246_s23  ;;  %v6091_v8 = vld [vmem:[#allocation3 + $0x128] sm:$0xff] }
 0x920   : > { %v4748_v26 = vpop.permute.xlu0 %4747 }
 0x921   : > { %5091 = vrot.lane.b32.xlu1 %v9953_v53, %s7243_s20  ;;  %7140 = vmatmul.msk.f32.gmra.mxu3 %vm171_vm0, %v6089_v16  ;;  %v4752_v60 = vpop.permute.xlu2 %4751  ;;  %4822 = vst.msk [vmem:[#allocation3 + $0x160] sm:$0xff] %vm4799_vm5, %v4748_v26  ;;  %v7111_v16 = vld [vmem:[%s11090_s1 + $0x150] sm:$0xff] }
 0x922   : > { %4824 = vst.msk [vmem:[#allocation3 + $0x180] sm:$0xff] %vm4799_vm5, %v4752_v60 }
 0x923   : > { %v4738_v41 = vpop.permute.xlu1 %4737 }
 0x924   : > { %4817 = vst.msk [vmem:[#allocation3 + $0x110] sm:$0xff] %vm4799_vm5, %v4738_v41 }
 0x926   : > { %5672 = vrot.lane.b32.xlu0 %v10013_v47, %s7246_s23 }
 0x927   : > { %5284 = vrot.lane.b32.xlu2 %v9951_v20, %s7244_s21  ;;  %v6093_v20 = vld [vmem:[#allocation3 + $0x138] sm:$0xff] }
 0x928   : > { %v4754_v53 = vpop.permute.xlu0 %4753 }
 0x929   : > { %5670 = vrot.lane.b32.xlu1 %v9985_v31, %s7246_s23  ;;  %7141 = vmatmul.msk.f32.gmra.mxu3 %vm171_vm0, %v6091_v8  ;;  %v4758_v21 = vpop.permute.xlu2 %4757  ;;  %4825 = vst.msk [vmem:[#allocation3 + $0x190] sm:$0xff] %vm4799_vm5, %v4754_v53 }
 0x92a   : > { %4827 = vst.msk [vmem:[#allocation3 + $0x1b0] sm:$0xff] %vm4799_vm5, %v4758_v21 }
 0x92b   : > { %v4744_v3 = vpop.permute.xlu1 %4743 }
 0x92c   : > { %4820 = vst.msk [vmem:[#allocation3 + $0x140] sm:$0xff] %vm4799_vm5, %v4744_v3 }
 0x92e   : > { %5288 = vrot.lane.b32.xlu0 %v9975_v32, %s7244_s21 }
 0x92f   : > { %5863 = vrot.lane.b32.xlu2 %v9975_v32, %s7247_s24 }
 0x930   : > { %v4760_v46 = vpop.permute.xlu0 %4759 }
 0x931   : > { %5286 = vrot.lane.b32.xlu1 %v9927_v55, %s7244_s21  ;;  %7142 = vmatmul.msk.f32.gmra.mxu3 %vm171_vm0, %v6093_v20  ;;  %v4764_v14 = vpop.permute.xlu2 %4763  ;;  %4828 = vst.msk [vmem:[#allocation3 + $0x1c0] sm:$0xff] %vm4799_vm5, %v4760_v46  ;;  %v6095_v55 = vld [vmem:[#allocation3 + $0x148] sm:$0xff] }
 0x932   : > { %4830 = vst.msk [vmem:[#allocation3 + $0x1e0] sm:$0xff] %vm4799_vm5, %v4764_v14 }
 0x933   : > { %v4750_v2 = vpop.permute.xlu1 %4749 }
 0x934   : > { %4823 = vst.msk [vmem:[#allocation3 + $0x170] sm:$0xff] %vm4799_vm5, %v4750_v2 }
 0x936   : > { %5867 = vrot.lane.b32.xlu0 %v9960_v29, %s7247_s24 }
 0x937   : > { %5479 = vrot.lane.b32.xlu2 %v9977_v4, %s7245_s22  ;;  %v7113_v4 = vld [vmem:[%s11090_s1 + $0x160] sm:$0xff] }
 0x938   : > { %v4766_v32 = vpop.permute.xlu0 %4765  ;;  %6240 = vmatpush.msrb.mxu1 %v7113_v4 }
 0x939   : > { %5865 = vrot.lane.b32.xlu1 %v9998_v9, %s7247_s24  ;;  %7143 = vmatmul.msk.f32.gmra.mxu3 %vm171_vm0, %v6095_v55  ;;  %v4899_v23 = vpop.permute.xlu2 %4898  ;;  %4831 = vst.msk [vmem:[#allocation3 + $0x1f0] sm:$0xff] %vm4799_vm5, %v4766_v32 }
 0x93a   : > { %4994 = vst.msk [vmem:[#allocation3 + $0x10] sm:$0xff] %vm4992_vm6, %v4899_v23  ;;  %6241 = vmatpush.msrb.mxu1 %v7112_v61  ;;  %v5806_v61 = vld [vmem:[#allocation2 + $0x99] sm:$0xff] }
 0x93b   : > { %v4756_v6 = vpop.permute.xlu1 %4755 }
 0x93c   : > { %4826 = vst.msk [vmem:[#allocation3 + $0x1a0] sm:$0xff] %vm4799_vm5, %v4756_v6  ;;  %6242 = vmatpush.msrb.mxu1 %v7111_v16  ;;  %v6111_v6 = vld [vmem:[#allocation3 + $0x1c8] sm:$0xff] }
 0x93e   : > { %5483 = vrot.lane.b32.xlu0 %v10001_v57, %s7245_s22 }
 0x93f   : > { %5095 = vrot.lane.b32.xlu2 %v9985_v31, %s7243_s20  ;;  %v6099_v31 = vld [vmem:[#allocation3 + $0x168] sm:$0xff] }
 0x940   : > { %v4901_v43 = vpop.permute.xlu0 %4900 }
 0x941   : > { %5481 = vrot.lane.b32.xlu1 %v9982_v11, %s7245_s22  ;;  %7144 = vmatmul.msk.f32.gmra.mxu3 %vm171_vm0, %v6097_v1  ;;  %v4905_v62 = vpop.permute.xlu2 %4904  ;;  %4995 = vst.msk [vmem:[#allocation3 + $0x20] sm:$0xff] %vm4992_vm6, %v4901_v43 }
 0x942   : > { %4997 = vst.msk [vmem:[#allocation3 + $0x40] sm:$0xff] %vm4992_vm6, %v4905_v62  ;;  %v5804_v62 = vld [vmem:[#allocation2 + $0x81] sm:$0xff] }
 0x943   : > { %v4762_v10 = vpop.permute.xlu1 %4761 }
 0x944   : > { %4829 = vst.msk [vmem:[#allocation3 + $0x1d0] sm:$0xff] %vm4799_vm5, %v4762_v10  ;;  %v5226_v10 = vld [vmem:[#allocation2 + $0x79] sm:$0xff] }
 0x946   : > { %5099 = vrot.lane.b32.xlu0 %v10018_v49, %s7243_s20 }
 0x947   : > { %5674 = vrot.lane.b32.xlu2 %v10018_v49, %s7246_s23  ;;  %v6101_v49 = vld [vmem:[#allocation3 + $0x178] sm:$0xff] }
 0x948   : > { %v4907_v11 = vpop.permute.xlu0 %4906 }
 0x949   : > { %5097 = vrot.lane.b32.xlu1 %v10013_v47, %s7243_s20  ;;  %7145 = vmatmul.msk.f32.gmra.mxu3 %vm171_vm0, %v6099_v31  ;;  %v4911_v57 = vpop.permute.xlu2 %4910  ;;  %4998 = vst.msk [vmem:[#allocation3 + $0x50] sm:$0xff] %vm4992_vm6, %v4907_v11  ;;  %v10385_v47 = vpop.f32.mrf.mxu3 }
 0x94a   : > { %5000 = vst.msk [vmem:[#allocation3 + $0x70] sm:$0xff] %vm4992_vm6, %v4911_v57 }
 0x94b   : > { %v4897_v5 = vpop.permute.xlu1 %4896 }
 0x94c   : > { %4993 = vst.msk [vmem:[#allocation3] sm:$0xff] %vm4992_vm6, %v4897_v5 }
 0x94e   : > { %5678 = vrot.lane.b32.xlu0 %v10052_v37, %s7246_s23 }
 0x94f   : > { %5290 = vrot.lane.b32.xlu2 %v9998_v9, %s7244_s21  ;;  %v6103_v9 = vld [vmem:[#allocation3 + $0x188] sm:$0xff] }
 0x950   : > { %v4913_v39 = vpop.permute.xlu0 %4912 }
 0x951   : > { %5676 = vrot.lane.b32.xlu1 %v10022_v0, %s7246_s23  ;;  %7146 = vmatmul.msk.f32.gmra.mxu3 %vm171_vm0, %v6101_v49  ;;  %v4917_v19 = vpop.permute.xlu2 %4916  ;;  %5001 = vst.msk [vmem:[#allocation3 + $0x80] sm:$0xff] %vm4992_vm6, %v4913_v39  ;;  %v10404_v60 = vpop.f32.mrf.mxu3  ;;  %v5805_v49 = vld [vmem:[#allocation2 + $0x91] sm:$0xff] }
 0x952   : > { %5003 = vst.msk [vmem:[#allocation3 + $0xa0] sm:$0xff] %vm4992_vm6, %v4917_v19 }
 0x953   : > { %v4903_v28 = vpop.permute.xlu1 %4902 }
 0x954   : > { %4996 = vst.msk [vmem:[#allocation3 + $0x30] sm:$0xff] %vm4992_vm6, %v4903_v28 }
 0x956   : > { %5294 = vrot.lane.b32.xlu0 %v10006_v33, %s7244_s21 }
 0x957   : > { %5869 = vrot.lane.b32.xlu2 %v10006_v33, %s7247_s24 }
 0x958   : > { %v4919_v26 = vpop.permute.xlu0 %4918 }
 0x959   : > { %5292 = vrot.lane.b32.xlu1 %v9960_v29, %s7244_s21  ;;  %7147 = vmatmul.msk.f32.gmra.mxu3 %vm171_vm0, %v6103_v9  ;;  %v4923_v41 = vpop.permute.xlu2 %4922  ;;  %5004 = vst.msk [vmem:[#allocation3 + $0xb0] sm:$0xff] %vm4992_vm6, %v4919_v26  ;;  %v6105_v29 = vld [vmem:[#allocation3 + $0x198] sm:$0xff]  ;;  %v10419_v21 = vpop.f32.mrf.mxu3 }
 0x95a   : > { %5006 = vst.msk [vmem:[#allocation3 + $0xd0] sm:$0xff] %vm4992_vm6, %v4923_v41 }
 0x95b   : > { %v4909_v59 = vpop.permute.xlu1 %4908 }
 0x95c   : > { %4999 = vst.msk [vmem:[#allocation3 + $0x60] sm:$0xff] %vm4992_vm6, %v4909_v59 }
 0x95e   : > { %5873 = vrot.lane.b32.xlu0 %v9970_v18, %s7247_s24  ;;  %v6107_v18 = vld [vmem:[#allocation3 + $0x1a8] sm:$0xff] }
 0x95f   : > { %5485 = vrot.lane.b32.xlu2 %v9962_v54, %s7245_s22  ;;  %v7110_v54 = vld [vmem:[%s11090_s1 + $0x148] sm:$0xff] }
 0x960   : > { %v4925_v33 = vpop.permute.xlu0 %4924  ;;  %6243 = vmatpush.msrb.mxu1 %v7110_v54  ;;  %v5809_v54 = vld [vmem:[#allocation2 + $0xc1] sm:$0xff] }
 0x961   : > { %5871 = vrot.lane.b32.xlu1 %v10031_v36, %s7247_s24  ;;  %7148 = vmatmul.msk.f32.gmra.mxu3 %vm171_vm0, %v6105_v29  ;;  %v4929_v8 = vpop.permute.xlu2 %4928  ;;  %5007 = vst.msk [vmem:[#allocation3 + $0xe0] sm:$0xff] %vm4992_vm6, %v4925_v33  ;;  %v10435_v14 = vpop.f32.mrf.mxu3  ;;  %v5807_v29 = vld [vmem:[#allocation2 + $0xa9] sm:$0xff] }
 0x962   : > { %5009 = vst.msk [vmem:[#allocation3 + $0x100] sm:$0xff] %vm4992_vm6, %v4929_v8 }
 0x963   : > { %v4915_v53 = vpop.permute.xlu1 %4914 }
 0x964   : > { %5002 = vst.msk [vmem:[#allocation3 + $0x90] sm:$0xff] %vm4992_vm6, %v4915_v53 }
 0x966   : > { %5489 = vrot.lane.b32.xlu0 %v10039_v50, %s7245_s22  ;;  %v7107_v50 = vld [vmem:[%s11090_s1 + $0x130] sm:$0xff] }
 0x967   : > { %5101 = vrot.lane.b32.xlu2 %v10022_v0, %s7243_s20  ;;  %v7109_v0 = vld [vmem:[%s11090_s1 + $0x140] sm:$0xff] }
 0x968   : > { %v4931_v3 = vpop.permute.xlu0 %4930  ;;  %6244 = vmatpush.msrb.mxu1 %v7109_v0 }
 0x969   : > { %5487 = vrot.lane.b32.xlu1 %v10034_v58, %s7245_s22  ;;  %7149 = vmatmul.msk.f32.gmra.mxu3 %vm171_vm0, %v6107_v18  ;;  %v4935_v20 = vpop.permute.xlu2 %4934  ;;  %5010 = vst.msk [vmem:[#allocation3 + $0x110] sm:$0xff] %vm4992_vm6, %v4931_v3  ;;  %v7108_v58 = vld [vmem:[%s11090_s1 + $0x138] sm:$0xff]  ;;  %v10464_v23 = vpop.f32.mrf.mxu3 }
 0x96a   : > { %5012 = vst.msk [vmem:[#allocation3 + $0x130] sm:$0xff] %vm4992_vm6, %v4935_v20  ;;  %6245 = vmatpush.msrb.mxu1 %v7108_v58  ;;  %v5808_v18 = vld [vmem:[#allocation2 + $0xb1] sm:$0xff] }
 0x96b   : > { %v4921_v46 = vpop.permute.xlu1 %4920 }
 0x96c   : > { %5005 = vst.msk [vmem:[#allocation3 + $0xc0] sm:$0xff] %vm4992_vm6, %v4921_v46  ;;  %6246 = vmatpush.msrb.mxu1 %v7107_v50 }
 0x96e   : > { %5105 = vrot.lane.b32.xlu0 %v9989_v30, %s7243_s20 }
 0x96f   : > { %5680 = vrot.lane.b32.xlu2 %v9989_v30, %s7246_s23  ;;  %v7106_v30 = vld [vmem:[%s11090_s1 + $0x128] sm:$0xff] }
 0x970   : > { %v4937_v2 = vpop.permute.xlu0 %4936  ;;  %6247 = vmatpush.msrb.mxu1 %v7106_v30  ;;  %v5810_v30 = vld [vmem:[#allocation2 + $0xc9] sm:$0xff] }
 0x971   : > { %5103 = vrot.lane.b32.xlu1 %v10052_v37, %s7243_s20  ;;  %7150 = vmatmul.msk.f32.gmra.mxu3 %vm171_vm0, %v6109_v27  ;;  %v5090_v55 = vpop.permute.xlu2 %5089  ;;  %5013 = vst.msk [vmem:[#allocation3 + $0x140] sm:$0xff] %vm4992_vm6, %v4937_v2  ;;  %v7105_v37 = vld [vmem:[%s11090_s1 + $0x120] sm:$0xff]  ;;  %v10476_v11 = vpop.f32.mrf.mxu3 }
 0x972   : > { %5186 = vst.msk [vmem:[#allocation3] sm:$0xff] %vm5185_vm7, %v5090_v55  ;;  %6248 = vmatpush.msrb.mxu1 %v7105_v37 }
 0x973   : > { %v4927_v32 = vpop.permute.xlu1 %4926 }
 0x974   : > { %5008 = vst.msk [vmem:[#allocation3 + $0xf0] sm:$0xff] %vm4992_vm6, %v4927_v32 }
 0x976   : > { %5684 = vrot.lane.b32.xlu0 %v10066_v40, %s7246_s23 }
 0x977   : > { %5296 = vrot.lane.b32.xlu2 %v10031_v36, %s7244_s21  ;;  %v6113_v36 = vld [vmem:[#allocation3 + $0x1d8] sm:$0xff] }
 0x978   : > { %v5283_v4 = vpop.permute.xlu0 %5282 }
 0x979   : > { %5682 = vrot.lane.b32.xlu1 %v10079_v24, %s7246_s23  ;;  %7151 = vmatmul.msk.f32.gmra.mxu3 %vm171_vm0, %v6111_v6  ;;  %v5669_v1 = vpop.permute.xlu2 %5668  ;;  %5379 = vst.msk [vmem:[#allocation3] sm:$0xff] %vm5378_vm8, %v5283_v4  ;;  %v5812_v4 = vld [vmem:[#allocation2 + $0xe1] sm:$0xff] }
 0x97b   : > { %v4933_v43 = vpop.permute.xlu1 %4932 }
 0x97c   : > { %5011 = vst.msk [vmem:[#allocation3 + $0x120] sm:$0xff] %vm4992_vm6, %v4933_v43  ;;  %v5811_v43 = vld [vmem:[#allocation2 + $0xd9] sm:$0xff] }
 0x97e   : > { %5300 = vrot.lane.b32.xlu0 %v5804_v62, %s7244_s21 }
 0x97f   : > { %5875 = vrot.lane.b32.xlu2 %v5804_v62, %s7247_s24 }
 0x980   : > { %v5862_v31 = vpop.permute.xlu0 %5861 }
 0x981   : > { %5298 = vrot.lane.b32.xlu1 %v5226_v10, %s7244_s21  ;;  %7152 = vmatmul.msk.f32.gmra.mxu3 %vm171_vm0, %v6113_v36  ;;  %v5285_v57 = vpop.permute.xlu2 %5284 }
 0x983   : > { %v4939_v5 = vpop.permute.xlu1 %4938 }
 0x984   : > { %5014 = vst.msk [vmem:[#allocation3 + $0x150] sm:$0xff] %vm4992_vm6, %v4939_v5 }
 0x986   : > { %5879 = vrot.lane.b32.xlu0 %v5806_v61, %s7247_s24 }
 0x987   : > { %5491 = vrot.lane.b32.xlu2 %v10043_v56, %s7245_s22 }
 0x988   : > { %v5478_v39 = vpop.permute.xlu0 %5477 }
 0x989   : > { %5877 = vrot.lane.b32.xlu1 %v5805_v49, %s7247_s24  ;;  %v5864_v19 = vpop.permute.xlu2 %5863 }
 0x98b   : > { %v5476_v28 = vpop.permute.xlu1 %5475 }
 0x98c   : > { %5572 = vst.msk [vmem:[#allocation3] sm:$0xff] %vm5571_vm9, %v5476_v28 }
 0x98d   : > { %5765 = vst.msk [vmem:[#allocation3] sm:$0xff] %vm5764_vm10, %v5669_v1  ;;  %v5425_v1 = vld [vmem:[#allocation2 + $0xc2] sm:$0xff] }
 0x98e   : > { %5958 = vst.msk [vmem:[#allocation3] sm:$0xff] %vm5957_vm11, %v5862_v31  ;;  %5495 = vrot.lane.b32.xlu0 %v10062_v35, %s7245_s22 }
 0x98f   : > { %5107 = vrot.lane.b32.xlu2 %v10079_v24, %s7243_s20 }
 0x990   : > { %v5094_v56 = vpop.permute.xlu0 %5093 }
 0x991   : > { %5493 = vrot.lane.b32.xlu1 %v10048_v38, %s7245_s22  ;;  %v5480_v16 = vpop.permute.xlu2 %5479  ;;  %5188 = vst.msk [vmem:[#allocation3 + $0x20] sm:$0xff] %vm5185_vm7, %v5094_v56 }
 0x993   : > { %v5092_v9 = vpop.permute.xlu1 %5091 }
 0x994   : > { %5187 = vst.msk [vmem:[#allocation3 + $0x10] sm:$0xff] %vm5185_vm7, %v5092_v9 }
 0x995   : > { %5380 = vst.msk [vmem:[#allocation3 + $0x10] sm:$0xff] %vm5378_vm8, %v5285_v57  ;;  %v6054_v26 = vld [vmem:[#allocation3] sm:$0xff] }
 0x996   : > { %5573 = vst.msk [vmem:[#allocation3 + $0x10] sm:$0xff] %vm5571_vm9, %v5478_v39  ;;  %6249 = vmatmul.f32.vlgmr.msrb.gmra.mxu1 %v6054_v26  ;;  %5111 = vrot.lane.b32.xlu0 %v10070_v34, %s7243_s20  ;;  %v5426_v57 = vld [vmem:[#allocation2 + $0xca] sm:$0xff] }
 0x997   : > { %5686 = vrot.lane.b32.xlu2 %v10070_v34, %s7246_s23 }
 0x998   : > { %v5673_v38 = vpop.permute.xlu0 %5672 }
 0x999   : > { %5109 = vrot.lane.b32.xlu1 %v10066_v40, %s7243_s20  ;;  %v5096_v35 = vpop.permute.xlu2 %5095 }
 0x99a   : > { %5189 = vst.msk [vmem:[#allocation3 + $0x30] sm:$0xff] %vm5185_vm7, %v5096_v35  ;;  %v5428_v35 = vld [vmem:[#allocation2 + $0xe2] sm:$0xff] }
 0x99b   : > { %v5671_v24 = vpop.permute.xlu1 %5670 }
 0x99c   : > { %5766 = vst.msk [vmem:[#allocation3 + $0x10] sm:$0xff] %vm5764_vm10, %v5671_v24  ;;  %v5814_v24 = vld [vmem:[#allocation2 + $0xf9] sm:$0xff] }
 0x99d   : > { %5959 = vst.msk [vmem:[#allocation3 + $0x10] sm:$0xff] %vm5957_vm11, %v5864_v19 }
 0x99e   : > { %5690 = vrot.lane.b32.xlu0 %v10119_v45, %s7246_s23 }
 0x99f   : > { %5302 = vrot.lane.b32.xlu2 %v5805_v49, %s7244_s21 }
 0x9a0   : > { %v5289_v34 = vpop.permute.xlu0 %5288 }
 0x9a1   : > { %5688 = vrot.lane.b32.xlu1 %v10145_v48, %s7246_s23  ;;  %v5675_v41 = vpop.permute.xlu2 %5674  ;;  %5382 = vst.msk [vmem:[#allocation3 + $0x30] sm:$0xff] %vm5378_vm8, %v5289_v34 }
 0x9a3   : > { %v5287_v40 = vpop.permute.xlu1 %5286 }
 0x9a4   : > { %5381 = vst.msk [vmem:[#allocation3 + $0x20] sm:$0xff] %vm5378_vm8, %v5287_v40  ;;  %v6056_v59 = vld [vmem:[#allocation3 + $0x10] sm:$0xff] }
 0x9a5   : > { %5574 = vst.msk [vmem:[#allocation3 + $0x20] sm:$0xff] %vm5571_vm9, %v5480_v16  ;;  %6252 = vmatmul.f32.gmra.mxu1 %v6056_v59  ;;  %v5813_v16 = vld [vmem:[#allocation2 + $0xf1] sm:$0xff] }
 0x9a6   : > { %5767 = vst.msk [vmem:[#allocation3 + $0x20] sm:$0xff] %vm5764_vm10, %v5673_v38  ;;  %5306 = vrot.lane.b32.xlu0 %v5807_v29, %s7244_s21  ;;  %v5815_v38 = vld [vmem:[#allocation2 + $0x109] sm:$0xff] }
 0x9a7   : > { %5881 = vrot.lane.b32.xlu2 %v5807_v29, %s7247_s24  ;;  %v5430_v29 = vld [vmem:[#allocation2 + $0xfa] sm:$0xff] }
 0x9a8   : > { %v5868_v33 = vpop.permute.xlu0 %5867 }
 0x9a9   : > { %5304 = vrot.lane.b32.xlu1 %v5806_v61, %s7244_s21  ;;  %v5291_v8 = vpop.permute.xlu2 %5290 }
 0x9ab   : > { %v5866_v53 = vpop.permute.xlu1 %5865 }
 0x9ac   : > { %5960 = vst.msk [vmem:[#allocation3 + $0x20] sm:$0xff] %vm5957_vm11, %v5866_v53 }
 0x9ae   : > { %5885 = vrot.lane.b32.xlu0 %v5809_v54, %s7247_s24 }
 0x9af   : > { %5497 = vrot.lane.b32.xlu2 %v10008_v52, %s7245_s22 }
 0x9b0   : > { %v5484_v3 = vpop.permute.xlu0 %5483 }
 0x9b1   : > { %5883 = vrot.lane.b32.xlu1 %v5808_v18, %s7247_s24  ;;  %v5870_v20 = vpop.permute.xlu2 %5869 }
 0x9b3   : > { %v5482_v46 = vpop.permute.xlu1 %5481  ;;  %v6058_v0 = vld [vmem:[#allocation3 + $0x20] sm:$0xff] }
 0x9b4   : > { %5575 = vst.msk [vmem:[#allocation3 + $0x30] sm:$0xff] %vm5571_vm9, %v5482_v46  ;;  %6255 = vmatmul.f32.gmra.mxu1 %v6058_v0  ;;  %v5624_v0 = vld [vmem:[#allocation2 + $0x120] sm:$0xff] }
 0x9b5   : > { %5768 = vst.msk [vmem:[#allocation3 + $0x30] sm:$0xff] %vm5764_vm10, %v5675_v41 }
 0x9b6   : > { %5961 = vst.msk [vmem:[#allocation3 + $0x30] sm:$0xff] %vm5957_vm11, %v5868_v33  ;;  %5501 = vrot.lane.b32.xlu0 %v10095_v15, %s7245_s22  ;;  %v5429_v33 = vld [vmem:[#allocation2 + $0xf2] sm:$0xff] }
 0x9b7   : > { %5113 = vrot.lane.b32.xlu2 %v10145_v48, %s7243_s20 }
 0x9b8   : > { %v5100_v52 = vpop.permute.xlu0 %5099 }
 0x9b9   : > { %5499 = vrot.lane.b32.xlu1 %v10089_v44, %s7245_s22  ;;  %v5486_v58 = vpop.permute.xlu2 %5485  ;;  %5191 = vst.msk [vmem:[#allocation3 + $0x50] sm:$0xff] %vm5185_vm7, %v5100_v52 }
 0x9bb   : > { %v5098_v50 = vpop.permute.xlu1 %5097 }
 0x9bc   : > { %5190 = vst.msk [vmem:[#allocation3 + $0x40] sm:$0xff] %vm5185_vm7, %v5098_v50 }
 0x9bd   : > { %5383 = vst.msk [vmem:[#allocation3 + $0x40] sm:$0xff] %vm5378_vm8, %v5291_v8  ;;  %v6060_v27 = vld [vmem:[#allocation3 + $0x30] sm:$0xff] }
 0x9be   : > { %5576 = vst.msk [vmem:[#allocation3 + $0x40] sm:$0xff] %vm5571_vm9, %v5484_v3  ;;  %6258 = vmatmul.f32.gmra.mxu1 %v6060_v27  ;;  %5117 = vrot.lane.b32.xlu0 %v10127_v63, %s7243_s20  ;;  %v5816_v27 = vld [vmem:[#allocation2 + $0x111] sm:$0xff] }
 0x9bf   : > { %5692 = vrot.lane.b32.xlu2 %v10127_v63, %s7246_s23 }
 0x9c0   : > { %v5679_v44 = vpop.permute.xlu0 %5678 }
 0x9c1   : > { %5115 = vrot.lane.b32.xlu1 %v10119_v45, %s7243_s20  ;;  %v5102_v15 = vpop.permute.xlu2 %5101 }
 0x9c2   : > { %5192 = vst.msk [vmem:[#allocation3 + $0x60] sm:$0xff] %vm5185_vm7, %v5102_v15 }
 0x9c3   : > { %v5677_v48 = vpop.permute.xlu1 %5676 }
 0x9c4   : > { %5769 = vst.msk [vmem:[#allocation3 + $0x40] sm:$0xff] %vm5764_vm10, %v5677_v48 }
 0x9c5   : > { %5962 = vst.msk [vmem:[#allocation3 + $0x40] sm:$0xff] %vm5957_vm11, %v5870_v20 }
 0x9c6   : > { %5696 = vrot.lane.b32.xlu0 %v10124_v51, %s7246_s23 }
 0x9c7   : > { %5308 = vrot.lane.b32.xlu2 %v5808_v18, %s7244_s21 }
 0x9c8   : > { %v5295_v63 = vpop.permute.xlu0 %5294 }
 0x9c9   : > { %5694 = vrot.lane.b32.xlu1 %v10166_v22, %s7246_s23  ;;  %v5681_v2 = vpop.permute.xlu2 %5680  ;;  %5385 = vst.msk [vmem:[#allocation3 + $0x60] sm:$0xff] %vm5378_vm8, %v5295_v63  ;;  %v10629_v63 = vld [vmem:[#allocation2 + $0x129] sm:$0xff] }
 0x9cb   : > { %v5293_v45 = vpop.permute.xlu1 %5292 }
 0x9cc   : > { %5384 = vst.msk [vmem:[#allocation3 + $0x50] sm:$0xff] %vm5378_vm8, %v5293_v45  ;;  %v6062_v55 = vld [vmem:[#allocation3 + $0x40] sm:$0xff]  ;;  %v5817_v45 = vld [vmem:[#allocation2 + $0x121] sm:$0xff] }
 0x9cd   : > { %5577 = vst.msk [vmem:[#allocation3 + $0x50] sm:$0xff] %vm5571_vm9, %v5486_v58  ;;  %6261 = vmatmul.f32.gmra.mxu1 %v6062_v55 }
 0x9ce   : > { %5770 = vst.msk [vmem:[#allocation3 + $0x50] sm:$0xff] %vm5764_vm10, %v5679_v44  ;;  %5312 = vrot.lane.b32.xlu0 %v5810_v30, %s7244_s21 }
 0x9cf   : > { %5887 = vrot.lane.b32.xlu2 %v5810_v30, %s7247_s24 }
 0x9d0   : > { %v5874_v32 = vpop.permute.xlu0 %5873 }
 0x9d1   : > { %5310 = vrot.lane.b32.xlu1 %v5809_v54, %s7244_s21  ;;  %v5297_v37 = vpop.permute.xlu2 %5296 }
 0x9d3   : > { %v5872_v6 = vpop.permute.xlu1 %5871 }
 0x9d4   : > { %5963 = vst.msk [vmem:[#allocation3 + $0x50] sm:$0xff] %vm5957_vm11, %v5872_v6  ;;  %v5432_v6 = vld [vmem:[#allocation2 + $0x112] sm:$0xff] }
 0x9d6   : > { %5891 = vrot.lane.b32.xlu0 %v5812_v4, %s7247_s24 }
 0x9d7   : > { %5503 = vrot.lane.b32.xlu2 %v5425_v1, %s7245_s22 }
 0x9d8   : > { %v5490_v62 = vpop.permute.xlu0 %5489 }
 0x9d9   : > { %5889 = vrot.lane.b32.xlu1 %v5811_v43, %s7247_s24  ;;  %v5876_v10 = vpop.permute.xlu2 %5875 }
 0x9db   : > { %v5488_v36 = vpop.permute.xlu1 %5487  ;;  %v6064_v31 = vld [vmem:[#allocation3 + $0x50] sm:$0xff] }
 0x9dc   : > { %5578 = vst.msk [vmem:[#allocation3 + $0x60] sm:$0xff] %vm5571_vm9, %v5488_v36  ;;  %6264 = vmatmul.f32.gmra.mxu1 %v6064_v31  ;;  %v5625_v36 = vld [vmem:[#allocation2 + $0x128] sm:$0xff] }
 0x9dd   : > { %5771 = vst.msk [vmem:[#allocation3 + $0x60] sm:$0xff] %vm5764_vm10, %v5681_v2  ;;  %v5431_v2 = vld [vmem:[#allocation2 + $0x10a] sm:$0xff] }
 0x9de   : > { %5964 = vst.msk [vmem:[#allocation3 + $0x60] sm:$0xff] %vm5957_vm11, %v5874_v32  ;;  %5507 = vrot.lane.b32.xlu0 %v10113_v17, %s7245_s22 }
 0x9df   : > { %5119 = vrot.lane.b32.xlu2 %v10166_v22, %s7243_s20 }
 0x9e0   : > { %v5106_v5 = vpop.permute.xlu0 %5105 }
 0x9e1   : > { %5505 = vrot.lane.b32.xlu1 %v5426_v57, %s7245_s22  ;;  %v5492_v61 = vpop.permute.xlu2 %5491  ;;  %5194 = vst.msk [vmem:[#allocation3 + $0x80] sm:$0xff] %vm5185_vm7, %v5106_v5 }
 0x9e3   : > { %v5104_v49 = vpop.permute.xlu1 %5103 }
 0x9e4   : > { %5193 = vst.msk [vmem:[#allocation3 + $0x70] sm:$0xff] %vm5185_vm7, %v5104_v49 }
 0x9e5   : > { %5386 = vst.msk [vmem:[#allocation3 + $0x70] sm:$0xff] %vm5378_vm8, %v5297_v37  ;;  %v6066_v39 = vld [vmem:[#allocation3 + $0x60] sm:$0xff] }
 0x9e6   : > { %5579 = vst.msk [vmem:[#allocation3 + $0x70] sm:$0xff] %vm5571_vm9, %v5490_v62  ;;  %6267 = vmatmul.f32.gmra.mxu1 %v6066_v39  ;;  %5123 = vrot.lane.b32.xlu0 %v10150_v42, %s7243_s20 }
 0x9e7   : > { %5698 = vrot.lane.b32.xlu2 %v10150_v42, %s7246_s23 }
 0x9e8   : > { %v5685_v17 = vpop.permute.xlu0 %5684 }
 0x9e9   : > { %5121 = vrot.lane.b32.xlu1 %v10124_v51, %s7243_s20  ;;  %v5108_v22 = vpop.permute.xlu2 %5107 }
 0x9ea   : > { %5195 = vst.msk [vmem:[#allocation3 + $0x90] sm:$0xff] %vm5185_vm7, %v5108_v22 }
 0x9eb   : > { %v5683_v19 = vpop.permute.xlu1 %5682 }
 0x9ec   : > { %5772 = vst.msk [vmem:[#allocation3 + $0x70] sm:$0xff] %vm5764_vm10, %v5683_v19 }
 0x9ed   : > { %5965 = vst.msk [vmem:[#allocation3 + $0x70] sm:$0xff] %vm5957_vm11, %v5876_v10  ;;  %v10646_v10 = vld [vmem:[#allocation2 + $0x139] sm:$0xff] }
 0x9ee   : > { %5702 = vrot.lane.b32.xlu0 %v10141_v7, %s7246_s23 }
 0x9ef   : > { %5314 = vrot.lane.b32.xlu2 %v5811_v43, %s7244_s21 }
 0x9f0   : > { %v5301_v42 = vpop.permute.xlu0 %5300 }
 0x9f1   : > { %5700 = vrot.lane.b32.xlu1 %v10176_v13, %s7246_s23  ;;  %v5687_v28 = vpop.permute.xlu2 %5686  ;;  %5388 = vst.msk [vmem:[#allocation3 + $0x90] sm:$0xff] %vm5378_vm8, %v5301_v42 }
 0x9f3   : > { %v5299_v51 = vpop.permute.xlu1 %5298 }
 0x9f4   : > { %5387 = vst.msk [vmem:[#allocation3 + $0x80] sm:$0xff] %vm5378_vm8, %v5299_v51  ;;  %v6068_v56 = vld [vmem:[#allocation3 + $0x70] sm:$0xff] }
 0x9f5   : > { %5580 = vst.msk [vmem:[#allocation3 + $0x80] sm:$0xff] %vm5571_vm9, %v5492_v61  ;;  %6270 = vmatmul.f32.gmra.mxu1 %v6068_v56  ;;  %v5433_v61 = vld [vmem:[#allocation2 + $0x122] sm:$0xff]  ;;  %v5626_v56 = vld [vmem:[#allocation2 + $0x138] sm:$0xff] }
 0x9f6   : > { %5773 = vst.msk [vmem:[#allocation3 + $0x80] sm:$0xff] %vm5764_vm10, %v5685_v17  ;;  %5318 = vrot.lane.b32.xlu0 %v5813_v16, %s7244_s21  ;;  %v10664_v51 = vld [vmem:[#allocation2 + $0x140] sm:$0xff] }
 0x9f7   : > { %5893 = vrot.lane.b32.xlu2 %v5813_v16, %s7247_s24 }
 0x9f8   : > { %v5880_v7 = vpop.permute.xlu0 %5879 }
 0x9f9   : > { %5316 = vrot.lane.b32.xlu1 %v5812_v4, %s7244_s21  ;;  %v5303_v9 = vpop.permute.xlu2 %5302 }
 0x9fb   : > { %v5878_v26 = vpop.permute.xlu1 %5877 }
 0x9fc   : > { %5966 = vst.msk [vmem:[#allocation3 + $0x80] sm:$0xff] %vm5957_vm11, %v5878_v26 }
 0x9fe   : > { %5897 = vrot.lane.b32.xlu0 %v5815_v38, %s7247_s24 }
 0x9ff   : > { %5509 = vrot.lane.b32.xlu2 %v5428_v35, %s7245_s22 }
 0xa00   : > { %v5496_v34 = vpop.permute.xlu0 %5495 }
 0xa01   : > { %5895 = vrot.lane.b32.xlu1 %v5814_v24, %s7247_s24  ;;  %v5882_v41 = vpop.permute.xlu2 %5881 }
 0xa03   : > { %v5494_v40 = vpop.permute.xlu1 %5493  ;;  %v6070_v59 = vld [vmem:[#allocation3 + $0x80] sm:$0xff] }
 0xa04   : > { %5581 = vst.msk [vmem:[#allocation3 + $0x90] sm:$0xff] %vm5571_vm9, %v5494_v40  ;;  %6273 = vmatmul.f32.gmra.mxu1 %v6070_v59  ;;  %v10678_v40 = vld [vmem:[#allocation2 + $0x13a] sm:$0xff]  ;;  %v5434_v59 = vld [vmem:[#allocation2 + $0x12a] sm:$0xff] }
 0xa05   : > { %5774 = vst.msk [vmem:[#allocation3 + $0x90] sm:$0xff] %vm5764_vm10, %v5687_v28 }
 0xa06   : > { %5967 = vst.msk [vmem:[#allocation3 + $0x90] sm:$0xff] %vm5957_vm11, %v5880_v7  ;;  %5513 = vrot.lane.b32.xlu0 %v5430_v29, %s7245_s22  ;;  %v5820_v29 = vld [vmem:[#allocation2 + $0x141] sm:$0xff] }
 0xa07   : > { %5125 = vrot.lane.b32.xlu2 %v10176_v13, %s7243_s20  ;;  %v5044_v13 = vld [vmem:[#allocation2 + $0xf8] sm:$0xff] }
 0xa08   : > { %v5112_v8 = vpop.permute.xlu0 %5111 }
 0xa09   : > { %5511 = vrot.lane.b32.xlu1 %v5429_v33, %s7245_s22  ;;  %v5498_v53 = vpop.permute.xlu2 %5497  ;;  %5197 = vst.msk [vmem:[#allocation3 + $0xb0] sm:$0xff] %vm5185_vm7, %v5112_v8 }
 0xa0b   : > { %v5110_v54 = vpop.permute.xlu1 %5109 }
 0xa0c   : > { %5196 = vst.msk [vmem:[#allocation3 + $0xa0] sm:$0xff] %vm5185_vm7, %v5110_v54 }
 0xa0d   : > { %5389 = vst.msk [vmem:[#allocation3 + $0xa0] sm:$0xff] %vm5378_vm8, %v5303_v9  ;;  %v6072_v18 = vld [vmem:[#allocation3 + $0x90] sm:$0xff] }
 0xa0e   : > { %5582 = vst.msk [vmem:[#allocation3 + $0xa0] sm:$0xff] %vm5571_vm9, %v5496_v34  ;;  %6276 = vmatmul.f32.gmra.mxu1 %v6072_v18  ;;  %5129 = vrot.lane.b32.xlu0 %v10170_v25, %s7243_s20 }
 0xa0f   : > { %5704 = vrot.lane.b32.xlu2 %v10170_v25, %s7246_s23 }
 0xa10   : > { %v5691_v3 = vpop.permute.xlu0 %5690 }
 0xa11   : > { %5127 = vrot.lane.b32.xlu1 %v5044_v13, %s7243_s20  ;;  %v5114_v20 = vpop.permute.xlu2 %5113 }
 0xa12   : > { %5198 = vst.msk [vmem:[#allocation3 + $0xc0] sm:$0xff] %vm5185_vm7, %v5114_v20 }
 0xa13   : > { %v5689_v46 = vpop.permute.xlu1 %5688  ;;  %v6250_v31 = vpop.f32.mrf.mxu1 }
 0xa14   : > { %5775 = vst.msk [vmem:[#allocation3 + $0xa0] sm:$0xff] %vm5764_vm10, %v5689_v46  ;;  %v6364_v28 = vadd.f32 %v10385_v47, %v6250_v31 }
 0xa15   : > { %5968 = vst.msk [vmem:[#allocation3 + $0xa0] sm:$0xff] %vm5957_vm11, %v5882_v41 }
 0xa16   : > { %5708 = vrot.lane.b32.xlu0 %v5624_v0, %s7246_s23 }
 0xa17   : > { %5320 = vrot.lane.b32.xlu2 %v5814_v24, %s7244_s21 }
 0xa18   : > { %v5307_v25 = vpop.permute.xlu0 %5306 }
 0xa19   : > { %5706 = vrot.lane.b32.xlu1 %v10192_v12, %s7246_s23  ;;  %v5693_v52 = vpop.permute.xlu2 %5692  ;;  %5391 = vst.msk [vmem:[#allocation3 + $0xc0] sm:$0xff] %vm5378_vm8, %v5307_v25 }
 0xa1b   : > { %v5305_v58 = vpop.permute.xlu1 %5304 }
 0xa1c   : > { %5390 = vst.msk [vmem:[#allocation3 + $0xb0] sm:$0xff] %vm5378_vm8, %v5305_v58  ;;  %v6074_v50 = vld [vmem:[#allocation3 + $0xa0] sm:$0xff] }
 0xa1d   : > { %5583 = vst.msk [vmem:[#allocation3 + $0xb0] sm:$0xff] %vm5571_vm9, %v5498_v53  ;;  %6279 = vmatmul.f32.gmra.mxu1 %v6074_v50 }
 0xa1e   : > { %5776 = vst.msk [vmem:[#allocation3 + $0xb0] sm:$0xff] %vm5764_vm10, %v5691_v3  ;;  %5324 = vrot.lane.b32.xlu0 %v5816_v27, %s7244_s21 }
 0xa1f   : > { %5899 = vrot.lane.b32.xlu2 %v5816_v27, %s7247_s24 }
 0xa20   : > { %v5886_v44 = vpop.permute.xlu0 %5885 }
 0xa21   : > { %5322 = vrot.lane.b32.xlu1 %v5815_v38, %s7244_s21  ;;  %v5309_v15 = vpop.permute.xlu2 %5308 }
 0xa22   : > { %v6253_v39 = vpop.f32.mrf.mxu1 }
 0xa23   : > { %v5884_v48 = vpop.permute.xlu1 %5883  ;;  %v6367_v42 = vadd.f32 %v10404_v60, %v6253_v39  ;;  %v6459_v60 = vmul.f32 0.2, %v6364_v28  ;;  %v10733_v39 = vpop.f32.mrf.mxu3 }
 0xa24   : > { %5969 = vst.msk [vmem:[#allocation3 + $0xb0] sm:$0xff] %vm5957_vm11, %v5884_v48 }
 0xa25   : > { %v6460_v16 = vmul.f32 0.2, %v6367_v42  ;;  %v6491_v38 = vmax.f32 %v6364_v28, %v6459_v60  ;;  %v5437_v28 = vld [vmem:[#allocation2 + $0x152] sm:$0xff] }
 0xa26   : > { %5903 = vrot.lane.b32.xlu0 %v10629_v63, %s7247_s24 }
 0xa27   : > { %5515 = vrot.lane.b32.xlu2 %v5431_v2, %s7245_s22  ;;  %v6492_v47 = vmax.f32 %v6367_v42, %v6460_v16  ;;  %v6717_v42 = vld [vmem:[%s11091_s2 + $0x8] sm:$0xff]  ;;  %v6716_v16 = vld [vmem:[%s11091_s2] sm:$0xff] }
 0xa28   : > { %v5502_v55 = vpop.permute.xlu0 %5501  ;;  %6828 = vmatpush.msrb.mxu0 %v6717_v42 }
 0xa29   : > { %5901 = vrot.lane.b32.xlu1 %v5817_v45, %s7247_s24  ;;  %v5888_v30 = vpop.permute.xlu2 %5887 }
 0xa2a   : > { %6829 = vmatpush.msrb.mxu0 %v6716_v16 }
 0xa2b   : > { %v5500_v32 = vpop.permute.xlu1 %5499  ;;  %v6076_v37 = vld [vmem:[#allocation3 + $0xb0] sm:$0xff] }
 0xa2c   : > { %5584 = vst.msk [vmem:[#allocation3 + $0xc0] sm:$0xff] %vm5571_vm9, %v5500_v32  ;;  %6282 = vmatmul.f32.gmra.mxu1 %v6076_v37 }
 0xa2d   : > { %5777 = vst.msk [vmem:[#allocation3 + $0xc0] sm:$0xff] %vm5764_vm10, %v5693_v52 }
 0xa2e   : > { %5970 = vst.msk [vmem:[#allocation3 + $0xc0] sm:$0xff] %vm5957_vm11, %v5886_v44  ;;  %5326 = vrot.lane.b32.xlu0 %v5817_v45, %s7244_s21 }
 0xa2f   : > { %5131 = vrot.lane.b32.xlu2 %v10192_v12, %s7243_s20 }
 0xa30   : > { %v5118_v4 = vpop.permute.xlu0 %5117 }
 0xa31   : > { %5517 = vrot.lane.b32.xlu1 %v5432_v6, %s7245_s22  ;;  %v5504_v1 = vpop.permute.xlu2 %5503  ;;  %5200 = vst.msk [vmem:[#allocation3 + $0xe0] sm:$0xff] %vm5185_vm7, %v5118_v4  ;;  %v6256_v20 = vpop.f32.mrf.mxu1 }
 0xa32   : > { %v6370_v46 = vadd.f32 %v10419_v21, %v6256_v20  ;;  %v10703_v21 = vld [vmem:[#allocation2 + $0x159] sm:$0xff] }
 0xa33   : > { %v5116_v43 = vpop.permute.xlu1 %5115 }
 0xa34   : > { %5199 = vst.msk [vmem:[#allocation3 + $0xd0] sm:$0xff] %vm5185_vm7, %v5116_v43  ;;  %v6461_v58 = vmul.f32 0.2, %v6370_v46 }
 0xa35   : > { %5392 = vst.msk [vmem:[#allocation3 + $0xd0] sm:$0xff] %vm5378_vm8, %v5309_v15  ;;  %v6078_v62 = vld [vmem:[#allocation3 + $0xc0] sm:$0xff] }
 0xa36   : > { %5585 = vst.msk [vmem:[#allocation3 + $0xd0] sm:$0xff] %vm5571_vm9, %v5502_v55  ;;  %6285 = vmatmul.f32.gmra.mxu1 %v6078_v62  ;;  %5905 = vrot.lane.b32.xlu0 %v10646_v10, %s7247_s24  ;;  %v6493_v44 = vmax.f32 %v6370_v46, %v6461_v58  ;;  %v5821_v15 = vld [vmem:[#allocation2 + $0x151] sm:$0xff]  ;;  %v5436_v55 = vld [vmem:[#allocation2 + $0x142] sm:$0xff] }
 0xa37   : > { %5710 = vrot.lane.b32.xlu2 %v5625_v36, %s7246_s23  ;;  %v10719_v62 = vld [vmem:[#allocation2 + $0x168] sm:$0xff] }
 0xa38   : > { %v5697_v12 = vpop.permute.xlu0 %5696  ;;  %v5439_v58 = vld [vmem:[#allocation2 + $0x16a] sm:$0xff] }
 0xa39   : > { %4940 = vrot.lane.b32.xlu1 %v5431_v2, %s7242_s19  ;;  %v5120_v57 = vpop.permute.xlu2 %5119 }
 0xa3a   : > { %5201 = vst.msk [vmem:[#allocation3 + $0xf0] sm:$0xff] %vm5185_vm7, %v5120_v57 }
 0xa3b   : > { %v5695_v5 = vpop.permute.xlu1 %5694 }
 0xa3c   : > { %5778 = vst.msk [vmem:[#allocation3 + $0xd0] sm:$0xff] %vm5764_vm10, %v5695_v5 }
 0xa3d   : > { %5971 = vst.msk [vmem:[#allocation3 + $0xd0] sm:$0xff] %vm5957_vm11, %v5888_v30 }
 0xa3e   : > { %5135 = vrot.lane.b32.xlu0 %v5625_v36, %s7243_s20 }
 0xa3f   : > { %5133 = vrot.lane.b32.xlu2 %v5624_v0, %s7243_s20  ;;  %v5628_v0 = vld [vmem:[#allocation2 + $0x150] sm:$0xff] }
 0xa40   : > { %v5313_v49 = vpop.permute.xlu0 %5312 }
 0xa41   : > { %5519 = vrot.lane.b32.xlu1 %v5433_v61, %s7245_s22  ;;  %v5699_v17 = vpop.permute.xlu2 %5698  ;;  %5394 = vst.msk [vmem:[#allocation3 + $0xf0] sm:$0xff] %vm5378_vm8, %v5313_v49 }
 0xa43   : > { %v5311_v22 = vpop.permute.xlu1 %5310 }
 0xa44   : > { %5393 = vst.msk [vmem:[#allocation3 + $0xe0] sm:$0xff] %vm5378_vm8, %v5311_v22  ;;  %v6080_v19 = vld [vmem:[#allocation3 + $0xd0] sm:$0xff] }
 0xa45   : > { %5586 = vst.msk [vmem:[#allocation3 + $0xe0] sm:$0xff] %vm5571_vm9, %v5504_v1  ;;  %6288 = vmatmul.f32.gmra.mxu1 %v6080_v19  ;;  %v10738_v19 = vld [vmem:[#allocation2 + $0x15a] sm:$0xff] }
 0xa46   : > { %5779 = vst.msk [vmem:[#allocation3 + $0xe0] sm:$0xff] %vm5764_vm10, %v5697_v12  ;;  %5714 = vrot.lane.b32.xlu0 %v10664_v51, %s7246_s23 }
 0xa47   : > { %5712 = vrot.lane.b32.xlu2 %v5626_v56, %s7246_s23 }
 0xa48   : > { %v5892_v7 = vpop.permute.xlu0 %5891 }
 0xa49   : > { %4942 = vrot.lane.b32.xlu1 %v5432_v6, %s7242_s19  ;;  %v5315_v9 = vpop.permute.xlu2 %5314 }
 0xa4b   : > { %v5890_v26 = vpop.permute.xlu1 %5889 }
 0xa4c   : > { %5972 = vst.msk [vmem:[#allocation3 + $0xe0] sm:$0xff] %vm5957_vm11, %v5890_v26 }
 0xa4e   : > { %6557 = vrot.lane.b32.xlu0 %v6492_v47, %s7250_s8 }
 0xa4f   : > { %6555 = vrot.lane.b32.xlu2 %v6491_v38, %s7250_s8 }
 0xa50   : > { %v5508_v35 = vpop.permute.xlu0 %5507 }
 0xa51   : > { %5328 = vrot.lane.b32.xlu1 %v10629_v63, %s7244_s21  ;;  %v5894_v24 = vpop.permute.xlu2 %5893  ;;  %v6259_v63 = vpop.f32.mrf.mxu1 }
 0xa52   : > { %v6373_v43 = vadd.f32 %v10435_v14, %v6259_v63 }
 0xa53   : > { %v5506_v34 = vpop.permute.xlu1 %5505  ;;  %v6082_v41 = vld [vmem:[#allocation3 + $0xe0] sm:$0xff] }
 0xa54   : > { %5587 = vst.msk [vmem:[#allocation3 + $0xf0] sm:$0xff] %vm5571_vm9, %v5506_v34  ;;  %6291 = vmatmul.f32.gmra.mxu1 %v6082_v41 }
 0xa55   : > { %5780 = vst.msk [vmem:[#allocation3 + $0xf0] sm:$0xff] %vm5764_vm10, %v5699_v17 }
 0xa56   : > { %5973 = vst.msk [vmem:[#allocation3 + $0xf0] sm:$0xff] %vm5957_vm11, %v5892_v7  ;;  %5523 = vrot.lane.b32.xlu0 %v10678_v40, %s7245_s22 }
 0xa57   : > { %5521 = vrot.lane.b32.xlu2 %v5434_v59, %s7245_s22 }
 0xa58   : > { %v5124_v33 = vpop.permute.xlu0 %5123 }
 0xa59   : > { %5907 = vrot.lane.b32.xlu1 %v5820_v29, %s7247_s24  ;;  %v5510_v8 = vpop.permute.xlu2 %5509  ;;  %5203 = vst.msk [vmem:[#allocation3 + $0x110] sm:$0xff] %vm5185_vm7, %v5124_v33  ;;  %v6262_v32 = vpop.f32.mrf.mxu1 }
 0xa5a   : > { %v6376_v1 = vadd.f32 %v10464_v23, %v6262_v32  ;;  %v6462_v23 = vmul.f32 0.2, %v6373_v43 }
 0xa5b   : > { %v5122_v53 = vpop.permute.xlu1 %5121 }
 0xa5c   : > { %5202 = vst.msk [vmem:[#allocation3 + $0x100] sm:$0xff] %vm5185_vm7, %v5122_v53  ;;  %v6463_v36 = vmul.f32 0.2, %v6376_v1 }
 0xa5d   : > { %5395 = vst.msk [vmem:[#allocation3 + $0x100] sm:$0xff] %vm5378_vm8, %v5315_v9  ;;  %v6084_v54 = vld [vmem:[#allocation3 + $0xf0] sm:$0xff]  ;;  %v6384_v9 = vpop.f32.mrf.mxu3 }
 0xa5e   : > { %5588 = vst.msk [vmem:[#allocation3 + $0x100] sm:$0xff] %vm5571_vm9, %v5508_v35  ;;  %6294 = vmatmul.f32.gmra.mxu1 %v6084_v54  ;;  %4946 = vrot.lane.b32.xlu0 %v5434_v59, %s7242_s19  ;;  %v6495_v57 = vmax.f32 %v6376_v1, %v6463_v36 }
 0xa5f   : > { %4944 = vrot.lane.b32.xlu2 %v5433_v61, %s7242_s19  ;;  %v6494_v61 = vmax.f32 %v6373_v43, %v6462_v23 }
 0xa60   : > { %v5703_v18 = vpop.permute.xlu0 %5702 }
 0xa61   : > { %5137 = vrot.lane.b32.xlu1 %v5626_v56, %s7243_s20  ;;  %v5126_v13 = vpop.permute.xlu2 %5125  ;;  %v6265_v47 = vpop.f32.mrf.mxu1 }
 0xa62   : > { %5204 = vst.msk [vmem:[#allocation3 + $0x120] sm:$0xff] %vm5185_vm7, %v5126_v13  ;;  %v6379_v41 = vadd.f32 %v10476_v11, %v6265_v47  ;;  %v10768_v11 = vld [vmem:[#allocation2 + $0x181] sm:$0xff]  ;;  %v5824_v13 = vld [vmem:[#allocation2 + $0x171] sm:$0xff] }
 0xa63   : > { %v5701_v3 = vpop.permute.xlu1 %5700 }
 0xa64   : > { %5781 = vst.msk [vmem:[#allocation3 + $0x100] sm:$0xff] %vm5764_vm10, %v5701_v3 }
 0xa65   : > { %5974 = vst.msk [vmem:[#allocation3 + $0x100] sm:$0xff] %vm5957_vm11, %v5894_v24  ;;  %v10758_v34 = vpop.f32.mrf.mxu3 }
 0xa66   : > { %5332 = vrot.lane.b32.xlu0 %v5820_v29, %s7244_s21 }
 0xa67   : > { %5330 = vrot.lane.b32.xlu2 %v10646_v10, %s7244_s21  ;;  %v5629_v10 = vld [vmem:[#allocation2 + $0x158] sm:$0xff] }
 0xa68   : > { %v5319_v25 = vpop.permute.xlu0 %5318 }
 0xa69   : > { %5716 = vrot.lane.b32.xlu1 %v5628_v0, %s7246_s23  ;;  %v5705_v52 = vpop.permute.xlu2 %5704  ;;  %5397 = vst.msk [vmem:[#allocation3 + $0x120] sm:$0xff] %vm5378_vm8, %v5319_v25  ;;  %v6268_v59 = vpop.f32.mrf.mxu1 }
 0xa6b   : > { %v5317_v50 = vpop.permute.xlu1 %5316 }
 0xa6c   : > { %5396 = vst.msk [vmem:[#allocation3 + $0x110] sm:$0xff] %vm5378_vm8, %v5317_v50  ;;  %v6086_v27 = vld [vmem:[#allocation3 + $0x100] sm:$0xff] }
 0xa6d   : > { %5589 = vst.msk [vmem:[#allocation3 + $0x110] sm:$0xff] %vm5571_vm9, %v5510_v8  ;;  %6297 = vmatmul.f32.gmra.mxu1 %v6086_v27  ;;  %v6464_v8 = vmul.f32 0.2, %v6379_v41  ;;  %v10772_v3 = vpop.f32.mrf.mxu3 }
 0xa6e   : > { %5782 = vst.msk [vmem:[#allocation3 + $0x110] sm:$0xff] %vm5764_vm10, %v5703_v18  ;;  %5911 = vrot.lane.b32.xlu0 %v10703_v21, %s7247_s24 }
 0xa6f   : > { %5909 = vrot.lane.b32.xlu2 %v5821_v15, %s7247_s24  ;;  %v6496_v18 = vmax.f32 %v6379_v41, %v6464_v8 }
 0xa70   : > { %v5898_v48 = vpop.permute.xlu0 %5897 }
 0xa71   : > { %6559 = vrot.lane.b32.xlu1 %v6493_v44, %s7250_s8  ;;  %v5321_v2 = vpop.permute.xlu2 %5320 }
 0xa72   : > { %v6271_v20 = vpop.f32.mrf.mxu1 }
 0xa73   : > { %v5896_v45 = vpop.permute.xlu1 %5895  ;;  %v6385_v63 = vadd.f32 %v6384_v9, %v6271_v20  ;;  %v5634_v9 = vld [vmem:[#allocation2 + $0x198] sm:$0xff] }
 0xa74   : > { %5975 = vst.msk [vmem:[#allocation3 + $0x110] sm:$0xff] %vm5957_vm11, %v5896_v45  ;;  %v10793_v45 = vld [vmem:[#allocation2 + $0x188] sm:$0xff] }
 0xa76   : > { %5141 = vrot.lane.b32.xlu0 %v5628_v0, %s7243_s20 }
 0xa77   : > { %5139 = vrot.lane.b32.xlu2 %v10664_v51, %s7243_s20  ;;  %v5823_v51 = vld [vmem:[#allocation2 + $0x169] sm:$0xff] }
 0xa78   : > { %v5514_v30 = vpop.permute.xlu0 %5513 }
 0xa79   : > { %5525 = vrot.lane.b32.xlu1 %v5436_v55, %s7245_s22  ;;  %v5900_v37 = vpop.permute.xlu2 %5899 }
 0xa7b   : > { %v5512_v6 = vpop.permute.xlu1 %5511  ;;  %v6088_v4 = vld [vmem:[#allocation3 + $0x110] sm:$0xff] }
 0xa7c   : > { %5590 = vst.msk [vmem:[#allocation3 + $0x120] sm:$0xff] %vm5571_vm9, %v5512_v6  ;;  %6300 = vmatmul.f32.gmra.mxu1 %v6088_v4 }
 0xa7d   : > { %5783 = vst.msk [vmem:[#allocation3 + $0x120] sm:$0xff] %vm5764_vm10, %v5705_v52 }
 0xa7e   : > { %5976 = vst.msk [vmem:[#allocation3 + $0x120] sm:$0xff] %vm5957_vm11, %v5898_v48  ;;  %5720 = vrot.lane.b32.xlu0 %v10719_v62, %s7246_s23 }
 0xa7f   : > { %5718 = vrot.lane.b32.xlu2 %v5629_v10, %s7246_s23 }
 0xa80   : > { %v5130_v12 = vpop.permute.xlu0 %5129 }
 0xa81   : > { %4948 = vrot.lane.b32.xlu1 %v10678_v40, %s7242_s19  ;;  %v5516_v31 = vpop.permute.xlu2 %5515  ;;  %5206 = vst.msk [vmem:[#allocation3 + $0x140] sm:$0xff] %vm5185_vm7, %v5130_v12  ;;  %v5631_v40 = vld [vmem:[#allocation2 + $0x170] sm:$0xff]  ;;  %v10783_v50 = vpop.f32.mrf.mxu1 }
 0xa83   : > { %v5128_v14 = vpop.permute.xlu1 %5127 }
 0xa84   : > { %5205 = vst.msk [vmem:[#allocation3 + $0x130] sm:$0xff] %vm5185_vm7, %v5128_v14 }
 0xa85   : > { %5398 = vst.msk [vmem:[#allocation3 + $0x130] sm:$0xff] %vm5378_vm8, %v5321_v2  ;;  %v6090_v5 = vld [vmem:[#allocation3 + $0x120] sm:$0xff]  ;;  %v6382_v2 = vadd.f32 %v10733_v39, %v6268_v59  ;;  %v5828_v59 = vld [vmem:[#allocation2 + $0x1a1] sm:$0xff] }
 0xa86   : > { %5591 = vst.msk [vmem:[#allocation3 + $0x130] sm:$0xff] %vm5571_vm9, %v5514_v30  ;;  %6303 = vmatmul.f32.gmra.mxu1 %v6090_v5  ;;  %6563 = vrot.lane.b32.xlu0 %v6495_v57, %s7250_s8  ;;  %v6466_v30 = vmul.f32 0.2, %v6385_v63  ;;  %v5441_v5 = vld [vmem:[#allocation2 + $0x182] sm:$0xff] }
 0xa87   : > { %6561 = vrot.lane.b32.xlu2 %v6494_v61, %s7250_s8  ;;  %v6465_v6 = vmul.f32 0.2, %v6382_v2  ;;  %v5440_v61 = vld [vmem:[#allocation2 + $0x172] sm:$0xff] }
 0xa88   : > { %v5709_v49 = vpop.permute.xlu0 %5708 }
 0xa89   : > { %5334 = vrot.lane.b32.xlu1 %v5821_v15, %s7244_s21  ;;  %v5132_v17 = vpop.permute.xlu2 %5131  ;;  %v6497_v36 = vmax.f32 %v6382_v2, %v6465_v6  ;;  %v5635_v2 = vld [vmem:[#allocation2 + $0x1a0] sm:$0xff] }
 0xa8a   : > { %5207 = vst.msk [vmem:[#allocation3 + $0x150] sm:$0xff] %vm5185_vm7, %v5132_v17 }
 0xa8b   : > { %v5707_v22 = vpop.permute.xlu1 %5706  ;;  %v10798_v32 = vpop.f32.mrf.mxu1 }
 0xa8c   : > { %5784 = vst.msk [vmem:[#allocation3 + $0x130] sm:$0xff] %vm5764_vm10, %v5707_v22 }
 0xa8d   : > { %5977 = vst.msk [vmem:[#allocation3 + $0x130] sm:$0xff] %vm5957_vm11, %v5900_v37 }
 0xa8e   : > { %5529 = vrot.lane.b32.xlu0 %v10738_v19, %s7245_s22 }
 0xa8f   : > { %5527 = vrot.lane.b32.xlu2 %v5437_v28, %s7245_s22 }
 0xa90   : > { %v5325_v56 = vpop.permute.xlu0 %5324 }
 0xa91   : > { %5913 = vrot.lane.b32.xlu1 %v5823_v51, %s7247_s24  ;;  %v5711_v7 = vpop.permute.xlu2 %5710  ;;  %5400 = vst.msk [vmem:[#allocation3 + $0x150] sm:$0xff] %vm5378_vm8, %v5325_v56 }
 0xa93   : > { %v5323_v60 = vpop.permute.xlu1 %5322 }
 0xa94   : > { %5399 = vst.msk [vmem:[#allocation3 + $0x140] sm:$0xff] %vm5378_vm8, %v5323_v60  ;;  %v6092_v26 = vld [vmem:[#allocation3 + $0x130] sm:$0xff] }
 0xa95   : > { %5592 = vst.msk [vmem:[#allocation3 + $0x140] sm:$0xff] %vm5571_vm9, %v5516_v31  ;;  %6306 = vmatmul.f32.gmra.mxu1 %v6092_v26  ;;  %v6388_v26 = vadd.f32 %v10758_v34, %v10783_v50 }
 0xa96   : > { %5785 = vst.msk [vmem:[#allocation3 + $0x140] sm:$0xff] %vm5764_vm10, %v5709_v49  ;;  %4952 = vrot.lane.b32.xlu0 %v5437_v28, %s7242_s19  ;;  %v5826_v49 = vld [vmem:[#allocation2 + $0x189] sm:$0xff] }
 0xa97   : > { %4950 = vrot.lane.b32.xlu2 %v5436_v55, %s7242_s19  ;;  %v5632_v55 = vld [vmem:[#allocation2 + $0x180] sm:$0xff]  ;;  %v6467_v41 = vmul.f32 0.2, %v6388_v26 }
 0xa98   : > { %v5904_v38 = vpop.permute.xlu0 %5903 }
 0xa99   : > { %5143 = vrot.lane.b32.xlu1 %v5629_v10, %s7243_s20  ;;  %v5134_v35 = vpop.permute.xlu2 %5133 }
 0xa9a   : > { %v10807_v12 = vpop.f32.mrf.mxu1 }
 0xa9b   : > { %v5902_v24 = vpop.permute.xlu1 %5901 }
 0xa9c   : > { %5978 = vst.msk [vmem:[#allocation3 + $0x140] sm:$0xff] %vm5957_vm11, %v5902_v24 }
 0xa9e   : > { %5338 = vrot.lane.b32.xlu0 %v5823_v51, %s7244_s21 }
 0xa9f   : > { %5336 = vrot.lane.b32.xlu2 %v10703_v21, %s7244_s21  ;;  %v10786_v21 = vpop.f32.mrf.mxu3 }
 0xaa0   : > { %v5327_v29 = vpop.permute.xlu0 %5326 }
 0xaa1   : > { %5722 = vrot.lane.b32.xlu1 %v5631_v40, %s7246_s23  ;;  %v5713_v33 = vpop.permute.xlu2 %5712 }
 0xaa3   : > { %v5518_v53 = vpop.permute.xlu1 %5517  ;;  %v6094_v54 = vld [vmem:[#allocation3 + $0x140] sm:$0xff] }
 0xaa4   : > { %5593 = vst.msk [vmem:[#allocation3 + $0x150] sm:$0xff] %vm5571_vm9, %v5518_v53  ;;  %6309 = vmatmul.f32.gmra.mxu1 %v6094_v54 }
 0xaa5   : > { %5786 = vst.msk [vmem:[#allocation3 + $0x150] sm:$0xff] %vm5764_vm10, %v5711_v7 }
 0xaa6   : > { %5979 = vst.msk [vmem:[#allocation3 + $0x150] sm:$0xff] %vm5957_vm11, %v5904_v38  ;;  %5917 = vrot.lane.b32.xlu0 %v10768_v11, %s7247_s24 }
 0xaa7   : > { %5915 = vrot.lane.b32.xlu2 %v5824_v13, %s7247_s24  ;;  %v6396_v43 = vpop.f32.mrf.mxu3 }
 0xaa8   : > { %v5906_v46 = vpop.permute.xlu0 %5905 }
 0xaa9   : > { %6565 = vrot.lane.b32.xlu1 %v6496_v18, %s7250_s8  ;;  %v6556_v0 = vpop.permute.xlu2 %6555  ;;  %v6283_v39 = vpop.f32.mrf.mxu1 }
 0xaaa   : > { %6652 = vst.msk [vmem:[#allocation2 + $0x19] sm:$0xff] %vm6651_vm12, %v6556_v0  ;;  %v6397_v34 = vadd.f32 %v6396_v43, %v6283_v39 }
 0xaab   : > { %v4941_v25 = vpop.permute.xlu1 %4940 }
 0xaac   : > { %5015 = vst.msk [vmem:[#allocation3 + $0x160] sm:$0xff] %vm4992_vm6, %v4941_v25  ;;  %v6470_v8 = vmul.f32 0.2, %v6397_v34  ;;  %v6391_v25 = vadd.f32 %v10772_v3, %v10798_v32 }
 0xaad   : > { %5208 = vst.msk [vmem:[#allocation3 + $0x160] sm:$0xff] %vm5185_vm7, %v5134_v35  ;;  %v6096_v52 = vld [vmem:[#allocation3 + $0x150] sm:$0xff] }
 0xaae   : > { %5401 = vst.msk [vmem:[#allocation3 + $0x160] sm:$0xff] %vm5378_vm8, %v5327_v29  ;;  %6312 = vmatmul.f32.gmra.mxu1 %v6096_v52  ;;  %5147 = vrot.lane.b32.xlu0 %v5631_v40, %s7243_s20  ;;  %v5827_v29 = vld [vmem:[#allocation2 + $0x199] sm:$0xff]  ;;  %v5442_v52 = vld [vmem:[#allocation2 + $0x18a] sm:$0xff] }
 0xaaf   : > { %5145 = vrot.lane.b32.xlu2 %v10719_v62, %s7243_s20  ;;  %v6498_v62 = vmax.f32 %v6385_v63, %v6466_v30  ;;  %v10813_v57 = vpop.f32.mrf.mxu3 }
 0xab0   : > { %v5136_v27 = vpop.permute.xlu0 %5135 }
 0xab1   : > { %5531 = vrot.lane.b32.xlu1 %v5439_v58, %s7245_s22  ;;  %v5522_v44 = vpop.permute.xlu2 %5521  ;;  %v6684_v15 = vld [vmem:[#allocation2 + $0x19] sm:$0xff] }
 0xab2   : > { %7155 = vmatmul.msk.f32.vlgmr.msrb.gmra.mxu0 %vm171_vm0, %v6684_v15  ;;  %v6468_v15 = vmul.f32 0.2, %v6391_v25 }
 0xab3   : > { %v5520_v48 = vpop.permute.xlu1 %5519  ;;  %v10825_v51 = vpop.f32.mrf.mxu1 }
 0xab4   : > { %5594 = vst.msk [vmem:[#allocation3 + $0x160] sm:$0xff] %vm5571_vm9, %v5520_v48  ;;  %v6500_v30 = vmax.f32 %v6391_v25, %v6468_v15  ;;  %v6400_v32 = vadd.f32 %v10813_v57, %v10825_v51 }
 0xab5   : > { %5787 = vst.msk [vmem:[#allocation3 + $0x160] sm:$0xff] %vm5764_vm10, %v5713_v33  ;;  %v6499_v33 = vmax.f32 %v6388_v26, %v6467_v41 }
 0xab6   : > { %5980 = vst.msk [vmem:[#allocation3 + $0x160] sm:$0xff] %vm5957_vm11, %v5906_v46  ;;  %5726 = vrot.lane.b32.xlu0 %v10793_v45, %s7246_s23  ;;  %v6502_v46 = vmax.f32 %v6397_v34, %v6470_v8  ;;  %v6471_v43 = vmul.f32 0.2, %v6400_v32 }
 0xab7   : > { %5724 = vrot.lane.b32.xlu2 %v5632_v55, %s7246_s23  ;;  %v10822_v28 = vpop.f32.mrf.mxu3 }
 0xab8   : > { %v5715_v37 = vpop.permute.xlu0 %5714 }
 0xab9   : > { %4954 = vrot.lane.b32.xlu1 %v10738_v19, %s7242_s19  ;;  %v4945_v4 = vpop.permute.xlu2 %4944 }
 0xaba   : > { %5017 = vst.msk [vmem:[#allocation3 + $0x180] sm:$0xff] %vm4992_vm6, %v4945_v4 }
 0xabb   : > { %v4943_v1 = vpop.permute.xlu1 %4942 }
 0xabc   : > { %5016 = vst.msk [vmem:[#allocation3 + $0x170] sm:$0xff] %vm4992_vm6, %v4943_v1 }
 0xabd   : > { %5209 = vst.msk [vmem:[#allocation3 + $0x170] sm:$0xff] %vm5185_vm7, %v5136_v27  ;;  %v6098_v10 = vld [vmem:[#allocation3 + $0x160] sm:$0xff] }
 0xabe   : > { %6315 = vmatmul.f32.gmra.mxu1 %v6098_v10  ;;  %6569 = vrot.lane.b32.xlu0 %v6498_v62, %s7250_s8 }
 0xabf   : > { %6567 = vrot.lane.b32.xlu2 %v6497_v36, %s7250_s8  ;;  %v6405_v35 = vpop.f32.mrf.mxu3 }
 0xac0   : > { %v6558_v23 = vpop.permute.xlu0 %6557 }
 0xac1   : > { %5340 = vrot.lane.b32.xlu1 %v5824_v13, %s7244_s21  ;;  %v5331_v31 = vpop.permute.xlu2 %5330  ;;  %6653 = vst.msk [vmem:[#allocation2 + $0x21] sm:$0xff] %vm6651_vm12, %v6558_v23  ;;  %v6503_v23 = vmax.f32 %v6400_v32, %v6471_v43 }
 0xac2   : > { %v10838_v47 = vpop.f32.mrf.mxu1 }
 0xac3   : > { %v5329_v14 = vpop.permute.xlu1 %5328 }
 0xac4   : > { %5402 = vst.msk [vmem:[#allocation3 + $0x170] sm:$0xff] %vm5378_vm8, %v5329_v14 }
 0xac5   : > { %5595 = vst.msk [vmem:[#allocation3 + $0x170] sm:$0xff] %vm5571_vm9, %v5522_v44 }
 0xac6   : > { %5788 = vst.msk [vmem:[#allocation3 + $0x170] sm:$0xff] %vm5764_vm10, %v5715_v37  ;;  %5535 = vrot.lane.b32.xlu0 %v5441_v5, %s7245_s22 }
 0xac7   : > { %5533 = vrot.lane.b32.xlu2 %v5440_v61, %s7245_s22  ;;  %v6408_v13 = vpop.f32.mrf.mxu3 }
 0xac8   : > { %v5524_v17 = vpop.permute.xlu0 %5523  ;;  %v6685_v22 = vld [vmem:[#allocation2 + $0x21] sm:$0xff] }
 0xac9   : > { %5919 = vrot.lane.b32.xlu1 %v5826_v49, %s7247_s24  ;;  %v5910_v19 = vpop.permute.xlu2 %5909  ;;  %7156 = vmatmul.msk.f32.gmra.mxu0 %vm171_vm0, %v6685_v22 }
 0xacb   : > { %v5908_v42 = vpop.permute.xlu1 %5907 }
 0xacc   : > { %5981 = vst.msk [vmem:[#allocation3 + $0x170] sm:$0xff] %vm5957_vm11, %v5908_v42 }
 0xace   : > { %4958 = vrot.lane.b32.xlu0 %v5440_v61, %s7242_s19 }
 0xacf   : > { %4956 = vrot.lane.b32.xlu2 %v5439_v58, %s7242_s19 }
 0xad0   : > { %v4947_v56 = vpop.permute.xlu0 %4946 }
 0xad1   : > { %5149 = vrot.lane.b32.xlu1 %v5632_v55, %s7243_s20  ;;  %v5140_v16 = vpop.permute.xlu2 %5139  ;;  %5018 = vst.msk [vmem:[#allocation3 + $0x190] sm:$0xff] %vm4992_vm6, %v4947_v56  ;;  %v6292_v53 = vpop.f32.mrf.mxu1 }
 0xad2   : > { %5211 = vst.msk [vmem:[#allocation3 + $0x190] sm:$0xff] %vm5185_vm7, %v5140_v16  ;;  %v6406_v0 = vadd.f32 %v6405_v35, %v6292_v53  ;;  %v6411_v55 = vpop.f32.mrf.mxu3 }
 0xad3   : > { %v5138_v7 = vpop.permute.xlu1 %5137  ;;  %v6100_v60 = vld [vmem:[#allocation3 + $0x170] sm:$0xff] }
 0xad4   : > { %5210 = vst.msk [vmem:[#allocation3 + $0x180] sm:$0xff] %vm5185_vm7, %v5138_v7  ;;  %6318 = vmatmul.f32.gmra.mxu1 %v6100_v60  ;;  %v6473_v58 = vmul.f32 0.2, %v6406_v0 }
 0xad5   : > { %5403 = vst.msk [vmem:[#allocation3 + $0x180] sm:$0xff] %vm5378_vm8, %v5331_v31 }
 0xad6   : > { %5596 = vst.msk [vmem:[#allocation3 + $0x180] sm:$0xff] %vm5571_vm9, %v5524_v17  ;;  %5344 = vrot.lane.b32.xlu0 %v5826_v49, %s7244_s21  ;;  %v6505_v3 = vmax.f32 %v6406_v0, %v6473_v58 }
 0xad7   : > { %5342 = vrot.lane.b32.xlu2 %v10768_v11, %s7244_s21  ;;  %s10911_s21 = scalar_lea.vmem %s11092_s3, %s7189_s15 }
 0xad8   : > { %v5333_v38 = vpop.permute.xlu0 %5332 }
 0xad9   : > { %5728 = vrot.lane.b32.xlu1 %v5634_v9, %s7246_s23  ;;  %v5719_v24 = vpop.permute.xlu2 %5718  ;;  %5404 = vst.msk [vmem:[#allocation3 + $0x190] sm:$0xff] %vm5378_vm8, %v5333_v38 }
 0xada   : > { %v6414_v14 = vpop.f32.mrf.mxu3 }
 0xadb   : > { %v5717_v40 = vpop.permute.xlu1 %5716  ;;  %v6295_v50 = vpop.f32.mrf.mxu1 }
 0xadc   : > { %5789 = vst.msk [vmem:[#allocation3 + $0x180] sm:$0xff] %vm5764_vm10, %v5717_v40  ;;  %v6409_v31 = vadd.f32 %v6408_v13, %v6295_v50 }
 0xadd   : > { %5982 = vst.msk [vmem:[#allocation3 + $0x180] sm:$0xff] %vm5957_vm11, %v5910_v19 }
 0xade   : > { %5923 = vrot.lane.b32.xlu0 %v5828_v59, %s7247_s24  ;;  %v6474_v17 = vmul.f32 0.2, %v6409_v31 }
 0xadf   : > { %5921 = vrot.lane.b32.xlu2 %v5827_v29, %s7247_s24 }
 0xae0   : > { %v5912_v54 = vpop.permute.xlu0 %5911  ;;  %v6506_v56 = vmax.f32 %v6409_v31, %v6474_v17 }
 0xae1   : > { %6571 = vrot.lane.b32.xlu1 %v6499_v33, %s7250_s8  ;;  %v6562_v11 = vpop.permute.xlu2 %6561 }
 0xae2   : > { %6655 = vst.msk [vmem:[#allocation2 + $0x39] sm:$0xff] %vm6651_vm12, %v6562_v11  ;;  %v6417_v60 = vpop.f32.mrf.mxu3 }
 0xae3   : > { %v6560_v18 = vpop.permute.xlu1 %6559 }
 0xae4   : > { %6654 = vst.msk [vmem:[#allocation2 + $0x31] sm:$0xff] %vm6651_vm12, %v6560_v18  ;;  %v6102_v20 = vld [vmem:[#allocation3 + $0x180] sm:$0xff] }
 0xae5   : > { %6321 = vmatmul.f32.gmra.mxu1 %v6102_v20 }
 0xae6   : > { %6577 = vrot.lane.b32.xlu0 %v6502_v46, %s7250_s8 }
 0xae7   : > { %5151 = vrot.lane.b32.xlu2 %v10793_v45, %s7243_s20  ;;  %v6394_v45 = vadd.f32 %v10786_v21, %v10807_v12  ;;  %v6403_v12 = vadd.f32 %v10822_v28, %v10838_v47 }
 0xae8   : > { %v5142_v27 = vpop.permute.xlu0 %5141 }
 0xae9   : > { %5537 = vrot.lane.b32.xlu1 %v5442_v52, %s7245_s22  ;;  %v5528_v44 = vpop.permute.xlu2 %5527  ;;  %v6469_v4 = vmul.f32 0.2, %v6394_v45  ;;  %v6687_v21 = vld [vmem:[#allocation2 + $0x39] sm:$0xff]  ;;  %v6472_v61 = vmul.f32 0.2, %v6403_v12 }
 0xaea   : > { %v6298_v37 = vpop.f32.mrf.mxu1  ;;  %v6420_v8 = vpop.f32.mrf.mxu3 }
 0xaeb   : > { %v5526_v48 = vpop.permute.xlu1 %5525  ;;  %v6686_v63 = vld [vmem:[#allocation2 + $0x31] sm:$0xff]  ;;  %v6501_v36 = vmax.f32 %v6394_v45, %v6469_v4  ;;  %v6504_v42 = vmax.f32 %v6403_v12, %v6472_v61  ;;  %v6412_v28 = vadd.f32 %v6411_v55, %v6298_v37 }
 0xaec   : > { %5597 = vst.msk [vmem:[#allocation3 + $0x190] sm:$0xff] %vm5571_vm9, %v5526_v48  ;;  %7157 = vmatmul.msk.f32.gmra.mxu0 %vm171_vm0, %v6686_v63  ;;  %v11286_v12 = vld [vmem:[#allocation4_spill] sm:$0xff] }
 0xaed   : > { %5790 = vst.msk [vmem:[#allocation3 + $0x190] sm:$0xff] %vm5764_vm10, %v5719_v24  ;;  %v6475_v9 = vmul.f32 0.2, %v6412_v28 }
 0xaee   : > { %5983 = vst.msk [vmem:[#allocation3 + $0x190] sm:$0xff] %vm5957_vm11, %v5912_v54  ;;  %6583 = vrot.lane.b32.xlu0 %v6505_v3, %s7250_s8 }
 0xaef   : > { %5730 = vrot.lane.b32.xlu2 %v5635_v2, %s7246_s23  ;;  %v6507_v24 = vmax.f32 %v6412_v28, %v6475_v9  ;;  %v11287_v9 = vld [vmem:[#allocation6_spill] sm:$0xff] }
 0xaf0   : > { %v5721_v6 = vpop.permute.xlu0 %5720 }
 0xaf1   : > { %6573 = vrot.lane.b32.xlu1 %v6500_v30, %s7250_s8  ;;  %v4951_v1 = vpop.permute.xlu2 %4950 }
 0xaf2   : > { %5020 = vst.msk [vmem:[#allocation3 + $0x1b0] sm:$0xff] %vm4992_vm6, %v4951_v1  ;;  %v6423_v50 = vpop.f32.mrf.mxu3 }
 0xaf3   : > { %v4949_v62 = vpop.permute.xlu1 %4948 }
 0xaf4   : > { %5019 = vst.msk [vmem:[#allocation3 + $0x1a0] sm:$0xff] %vm4992_vm6, %v4949_v62  ;;  %7158 = vmatmul.msk.f32.gmra.mxu0 %vm171_vm0, %v6687_v21  ;;  %v6115_v62 = vld [vmem:[#allocation3 + $0x1e8] sm:$0xff] }
 0xaf5   : > { %5212 = vst.msk [vmem:[#allocation3 + $0x1a0] sm:$0xff] %vm5185_vm7, %v5142_v27  ;;  %v6104_v10 = vld [vmem:[#allocation3 + $0x190] sm:$0xff]  ;;  %7153 = vmatmul.msk.f32.gmra.mxu3 %vm171_vm0, %v6115_v62 }
 0xaf6   : > { %6324 = vmatmul.f32.gmra.mxu1 %v6104_v10 }
 0xaf7   : > { %6575 = vrot.lane.b32.xlu2 %v6501_v36, %s7250_s8 }
 0xaf8   : > { %v6564_v5 = vpop.permute.xlu0 %6563 }
 0xaf9   : > { %6579 = vrot.lane.b32.xlu1 %v6503_v23, %s7250_s8  ;;  %v6301_v57 = vpop.f32.mrf.mxu1  ;;  %v5337_v39 = vpop.permute.xlu2 %5336  ;;  %6656 = vst.msk [vmem:[#allocation2 + $0x49] sm:$0xff] %vm6651_vm12, %v6564_v5 }
 0xafa   : > { %v6415_v49 = vadd.f32 %v6414_v14, %v6301_v57  ;;  %v6426_v30 = vpop.f32.mrf.mxu3 }
 0xafb   : > { %v5335_v22 = vpop.permute.xlu1 %5334 }
 0xafc   : > { %v6476_v19 = vmul.f32 0.2, %v6415_v49  ;;  %5405 = vst.msk [vmem:[#allocation3 + $0x1a0] sm:$0xff] %vm5378_vm8, %v5335_v22 }
 0xafd   : > { %5598 = vst.msk [vmem:[#allocation3 + $0x1a0] sm:$0xff] %vm5571_vm9, %v5528_v44 }
 0xafe   : > { %v6508_v51 = vmax.f32 %v6415_v49, %v6476_v19  ;;  %5791 = vst.msk [vmem:[#allocation3 + $0x1a0] sm:$0xff] %vm5764_vm10, %v5721_v6 }
 0xaff   : > { %6581 = vrot.lane.b32.xlu2 %v6504_v42, %s7250_s8 }
 0xb00   : > { %6589 = vrot.lane.b32.xlu0 %v6508_v51, %s7250_s8  ;;  %v5530_v16 = vpop.permute.xlu0 %5529  ;;  %v6688_v7 = vld [vmem:[#allocation2 + $0x49] sm:$0xff] }
 0xb01   : > { %6585 = vrot.lane.b32.xlu1 %v6506_v56, %s7250_s8  ;;  %v5916_v26 = vpop.permute.xlu2 %5915  ;;  %7159 = vmatmul.msk.f32.gmra.mxu0 %vm171_vm0, %v6688_v7 }
 0xb02   : > { %v6429_v49 = vpop.f32.mrf.mxu3 }
 0xb03   : > { %v5914_v47 = vpop.permute.xlu1 %5913  ;;  %v6304_v38 = vpop.f32.mrf.mxu1 }
 0xb04   : > { %5984 = vst.msk [vmem:[#allocation3 + $0x1a0] sm:$0xff] %vm5957_vm11, %v5914_v47  ;;  %v6418_v35 = vadd.f32 %v6417_v60, %v6304_v38 }
 0xb06   : > { %v6477_v41 = vmul.f32 0.2, %v6418_v35 }
 0xb07   : > { %6587 = vrot.lane.b32.xlu2 %v6507_v24, %s7250_s8  ;;  %v6117_v24 = vld [vmem:[#allocation3 + $0x1f8] sm:$0xff] }
 0xb08   : > { %v6509_v40 = vmax.f32 %v6418_v35, %v6477_v41  ;;  %v4953_v59 = vpop.permute.xlu0 %4952  ;;  %7154 = vmatmul.msk.f32.gmra.mxu3 %vm171_vm0, %v6117_v24 }
 0xb09   : > { %v5146_v34 = vpop.permute.xlu2 %5145  ;;  %5021 = vst.msk [vmem:[#allocation3 + $0x1c0] sm:$0xff] %vm4992_vm6, %v4953_v59 }
 0xb0a   : > { %6591 = vrot.lane.b32.xlu1 %v6509_v40, %s7250_s8  ;;  %5214 = vst.msk [vmem:[#allocation3 + $0x1c0] sm:$0xff] %vm5185_vm7, %v5146_v34  ;;  %v6432_v41 = vpop.f32.mrf.mxu3 }
 0xb0b   : > { %v5144_v29 = vpop.permute.xlu1 %5143  ;;  %v6106_v33 = vld [vmem:[#allocation3 + $0x1a0] sm:$0xff] }
 0xb0c   : > { %5213 = vst.msk [vmem:[#allocation3 + $0x1b0] sm:$0xff] %vm5185_vm7, %v5144_v29  ;;  %6327 = vmatmul.f32.gmra.mxu1 %v6106_v33 }
 0xb0d   : > { %5406 = vst.msk [vmem:[#allocation3 + $0x1b0] sm:$0xff] %vm5378_vm8, %v5337_v39 }
 0xb0e   : > { %5599 = vst.msk [vmem:[#allocation3 + $0x1b0] sm:$0xff] %vm5571_vm9, %v5530_v16 }
 0xb10   : > { %v5339_v53 = vpop.permute.xlu0 %5338 }
 0xb11   : > { %v5725_v11 = vpop.permute.xlu2 %5724  ;;  %5407 = vst.msk [vmem:[#allocation3 + $0x1c0] sm:$0xff] %vm5378_vm8, %v5339_v53 }
 0xb12   : > { %v6307_v54 = vpop.f32.mrf.mxu1 }
 0xb13   : > { %v6421_v18 = vadd.f32 %v6420_v8, %v6307_v54  ;;  %v5723_v13 = vpop.permute.xlu1 %5722 }
 0xb14   : > { %5792 = vst.msk [vmem:[#allocation3 + $0x1b0] sm:$0xff] %vm5764_vm10, %v5723_v13 }
 0xb15   : > { %v6478_v20 = vmul.f32 0.2, %v6421_v18  ;;  %5985 = vst.msk [vmem:[#allocation3 + $0x1b0] sm:$0xff] %vm5957_vm11, %v5916_v26 }
 0xb17   : > { %v6510_v46 = vmax.f32 %v6421_v18, %v6478_v20 }
 0xb18   : > { %v5918_v0 = vpop.permute.xlu0 %5917 }
 0xb19   : > { %6593 = vrot.lane.b32.xlu2 %v6510_v46, %s7250_s8  ;;  %v6568_v25 = vpop.permute.xlu2 %6567  ;;  %v6435_v46 = vpop.f32.mrf.mxu3 }
 0xb1a   : > { %6658 = vst.msk [vmem:[#allocation2 + $0x61] sm:$0xff] %vm6651_vm12, %v6568_v25 }
 0xb1b   : > { %v6566_v52 = vpop.permute.xlu1 %6565 }
 0xb1c   : > { %6657 = vst.msk [vmem:[#allocation2 + $0x51] sm:$0xff] %vm6651_vm12, %v6566_v52  ;;  %v6108_v58 = vld [vmem:[#allocation3 + $0x1b0] sm:$0xff] }
 0xb1d   : > { %6330 = vmatmul.f32.gmra.mxu1 %v6108_v58 }
 0xb20   : > { %v5148_v44 = vpop.permute.xlu0 %5147 }
 0xb21   : > { %v6310_v27 = vpop.f32.mrf.mxu1  ;;  %v5534_v48 = vpop.permute.xlu2 %5533  ;;  %v6690_v4 = vld [vmem:[#allocation2 + $0x61] sm:$0xff] }
 0xb22   : > { %v6424_v15 = vadd.f32 %v6423_v50, %v6310_v27 }
 0xb23   : > { %v5532_v63 = vpop.permute.xlu1 %5531  ;;  %v6689_v3 = vld [vmem:[#allocation2 + $0x51] sm:$0xff] }
 0xb24   : > { %v6479_v2 = vmul.f32 0.2, %v6424_v15  ;;  %5600 = vst.msk [vmem:[#allocation3 + $0x1c0] sm:$0xff] %vm5571_vm9, %v5532_v63  ;;  %7160 = vmatmul.msk.f32.gmra.mxu0 %vm171_vm0, %v6689_v3  ;;  %v11288_v63 = vld [vmem:[#allocation8_spill] sm:$0xff] }
 0xb25   : > { %5793 = vst.msk [vmem:[#allocation3 + $0x1c0] sm:$0xff] %vm5764_vm10, %v5725_v11 }
 0xb26   : > { %v6511_v55 = vmax.f32 %v6424_v15, %v6479_v2  ;;  %5986 = vst.msk [vmem:[#allocation3 + $0x1c0] sm:$0xff] %vm5957_vm11, %v5918_v0 }
 0xb28   : > { %6595 = vrot.lane.b32.xlu0 %v6511_v55, %s7250_s8  ;;  %v5727_v45 = vpop.permute.xlu0 %5726 }
 0xb29   : > { %v4957_v32 = vpop.permute.xlu2 %4956 }
 0xb2a   : > { %5023 = vst.msk [vmem:[#allocation3 + $0x1e0] sm:$0xff] %vm4992_vm6, %v4957_v32 }
 0xb2b   : > { %v4955_v37 = vpop.permute.xlu1 %4954  ;;  %v6313_v6 = vpop.f32.mrf.mxu1 }
 0xb2c   : > { %5022 = vst.msk [vmem:[#allocation3 + $0x1d0] sm:$0xff] %vm4992_vm6, %v4955_v37  ;;  %v6427_v1 = vadd.f32 %v6426_v30, %v6313_v6  ;;  %7161 = vmatmul.msk.f32.gmra.mxu0 %vm171_vm0, %v6690_v4  ;;  %v11289_v30 = vld [vmem:[#allocation11_spill] sm:$0xff] }
 0xb2d   : > { %5215 = vst.msk [vmem:[#allocation3 + $0x1d0] sm:$0xff] %vm5185_vm7, %v5148_v44  ;;  %v6110_v43 = vld [vmem:[#allocation3 + $0x1c0] sm:$0xff] }
 0xb2e   : > { %v6480_v21 = vmul.f32 0.2, %v6427_v1  ;;  %6333 = vmatmul.f32.gmra.mxu1 %v6110_v43  ;;  %v6438_v43 = vpop.f32.mrf.mxu3 }
 0xb2f   : > { %v6831_v36 = vpop.f32.mrf.mxu0 }
 0xb30   : > { %v6512_v10 = vmax.f32 %v6427_v1, %v6480_v21  ;;  %v6832_v23 = vadd.f32 %v6831_v36, %v11286_v12  ;;  %v6570_v31 = vpop.permute.xlu0 %6569 }
 0xb31   : > { %v5343_v14 = vpop.permute.xlu2 %5342  ;;  %6659 = vst.msk [vmem:[#allocation2 + $0x69] sm:$0xff] %vm6651_vm12, %v6570_v31 }
 0xb32   : > { %6597 = vrot.lane.b32.xlu1 %v6512_v10, %s7250_s8  ;;  %6927 = vst.msk [vmem:[%s10911_s21] sm:$0xff] %vm324_vm2, %v6832_v23 }
 0xb33   : > { %v5341_v57 = vpop.permute.xlu1 %5340 }
 0xb34   : > { %5408 = vst.msk [vmem:[#allocation3 + $0x1d0] sm:$0xff] %vm5378_vm8, %v5341_v57 }
 0xb35   : > { %5601 = vst.msk [vmem:[#allocation3 + $0x1d0] sm:$0xff] %vm5571_vm9, %v5534_v48 }
 0xb36   : > { %5794 = vst.msk [vmem:[#allocation3 + $0x1d0] sm:$0xff] %vm5764_vm10, %v5727_v45 }
 0xb38   : > { %v5536_v5 = vpop.permute.xlu0 %5535  ;;  %v6691_v61 = vld [vmem:[#allocation2 + $0x69] sm:$0xff] }
 0xb39   : > { %v5922_v39 = vpop.permute.xlu2 %5921  ;;  %7162 = vmatmul.msk.f32.gmra.mxu0 %vm171_vm0, %v6691_v61  ;;  %v6441_v61 = vpop.f32.mrf.mxu3 }
 0xb3b   : > { %v5920_v17 = vpop.permute.xlu1 %5919  ;;  %v6316_v22 = vpop.f32.mrf.mxu1 }
 0xb3c   : > { %5987 = vst.msk [vmem:[#allocation3 + $0x1d0] sm:$0xff] %vm5957_vm11, %v5920_v17  ;;  %v6430_v19 = vadd.f32 %v6429_v49, %v6316_v22 }
 0xb3e   : > { %v6481_v42 = vmul.f32 0.2, %v6430_v19 }
 0xb40   : > { %v6513_v28 = vmax.f32 %v6430_v19, %v6481_v42  ;;  %v4959_v51 = vpop.permute.xlu0 %4958 }
 0xb41   : > { %v5152_v56 = vpop.permute.xlu2 %5151  ;;  %5024 = vst.msk [vmem:[#allocation3 + $0x1f0] sm:$0xff] %vm4992_vm6, %v4959_v51 }
 0xb42   : > { %6599 = vrot.lane.b32.xlu2 %v6513_v28, %s7250_s8  ;;  %5217 = vst.msk [vmem:[#allocation3 + $0x1f0] sm:$0xff] %vm5185_vm7, %v5152_v56  ;;  %v6444_v28 = vpop.f32.mrf.mxu3 }
 0xb43   : > { %v5150_v16 = vpop.permute.xlu1 %5149  ;;  %v6112_v7 = vld [vmem:[#allocation3 + $0x1d0] sm:$0xff] }
 0xb44   : > { %5216 = vst.msk [vmem:[#allocation3 + $0x1e0] sm:$0xff] %vm5185_vm7, %v5150_v16  ;;  %6336 = vmatmul.f32.gmra.mxu1 %v6112_v7 }
 0xb45   : > { %5409 = vst.msk [vmem:[#allocation3 + $0x1e0] sm:$0xff] %vm5378_vm8, %v5343_v14  ;;  %v11290_v14 = vld [vmem:[#allocation5_spill] sm:$0xff] }
 0xb46   : > { %5602 = vst.msk [vmem:[#allocation3 + $0x1e0] sm:$0xff] %vm5571_vm9, %v5536_v5  ;;  %v6834_v60 = vpop.f32.mrf.mxu0 }
 0xb47   : > { %v6835_v26 = vadd.f32 %v6834_v60, %v11287_v9 }
 0xb48   : > { %v5345_v47 = vpop.permute.xlu0 %5344 }
 0xb49   : > { %6928 = vst.msk [vmem:[%s10911_s21 + $0x8] sm:$0xff] %vm324_vm2, %v6835_v26  ;;  %v5731_v38 = vpop.permute.xlu2 %5730 }
 0xb4a   : > { %5410 = vst.msk [vmem:[#allocation3 + $0x1f0] sm:$0xff] %vm5378_vm8, %v5345_v47 }
 0xb4b   : > { %v5729_v35 = vpop.permute.xlu1 %5728 }
 0xb4c   : > { %5795 = vst.msk [vmem:[#allocation3 + $0x1e0] sm:$0xff] %vm5764_vm10, %v5729_v35 }
 0xb4d   : > { %5988 = vst.msk [vmem:[#allocation3 + $0x1e0] sm:$0xff] %vm5957_vm11, %v5922_v39 }
 0xb50   : > { %v5924_v59 = vpop.permute.xlu0 %5923 }
 0xb51   : > { %v6319_v40 = vpop.f32.mrf.mxu1  ;;  %v6576_v29 = vpop.permute.xlu2 %6575 }
 0xb52   : > { %v6433_v34 = vadd.f32 %v6432_v41, %v6319_v40  ;;  %6662 = vst.msk [vmem:[#allocation2 + $0x91] sm:$0xff] %vm6651_vm12, %v6576_v29  ;;  %v6447_v29 = vpop.f32.mrf.mxu3 }
 0xb53   : > { %v6572_v33 = vpop.permute.xlu1 %6571 }
 0xb54   : > { %v6482_v8 = vmul.f32 0.2, %v6433_v34  ;;  %6660 = vst.msk [vmem:[#allocation2 + $0x79] sm:$0xff] %vm6651_vm12, %v6572_v33  ;;  %v6114_v53 = vld [vmem:[#allocation3 + $0x1e0] sm:$0xff] }
 0xb55   : > { %6339 = vmatmul.f32.gmra.mxu1 %v6114_v53 }
 0xb56   : > { %v6514_v54 = vmax.f32 %v6433_v34, %v6482_v8 }
 0xb58   : > { %6601 = vrot.lane.b32.xlu0 %v6514_v54, %s7250_s8  ;;  %v6578_v11 = vpop.permute.xlu0 %6577 }
 0xb59   : > { %v6582_v18 = vpop.permute.xlu2 %6581  ;;  %6663 = vst.msk [vmem:[#allocation2 + $0x99] sm:$0xff] %vm6651_vm12, %v6578_v11  ;;  %v6694_v1 = vld [vmem:[#allocation2 + $0x91] sm:$0xff] }
 0xb5a   : > { %6665 = vst.msk [vmem:[#allocation2 + $0xb1] sm:$0xff] %vm6651_vm12, %v6582_v18 }
 0xb5b   : > { %v5538_v13 = vpop.permute.xlu1 %5537  ;;  %v6692_v20 = vld [vmem:[#allocation2 + $0x79] sm:$0xff] }
 0xb5c   : > { %5603 = vst.msk [vmem:[#allocation3 + $0x1f0] sm:$0xff] %vm5571_vm9, %v5538_v13  ;;  %7163 = vmatmul.msk.f32.gmra.mxu0 %vm171_vm0, %v6692_v20  ;;  %v11293_v20 = vld [vmem:[#allocation7_spill] sm:$0xff] }
 0xb5d   : > { %5796 = vst.msk [vmem:[#allocation3 + $0x1f0] sm:$0xff] %vm5764_vm10, %v5731_v38  ;;  %v11291_v38 = vld [vmem:[#allocation9_spill] sm:$0xff] }
 0xb5e   : > { %5989 = vst.msk [vmem:[#allocation3 + $0x1f0] sm:$0xff] %vm5957_vm11, %v5924_v59  ;;  %v11292_v59 = vld [vmem:[#allocation14_spill] sm:$0xff] }
 0xb60   : > { %v6584_v0 = vpop.permute.xlu0 %6583  ;;  %v6695_v12 = vld [vmem:[#allocation2 + $0x99] sm:$0xff] }
 0xb61   : > { %v6588_v52 = vpop.permute.xlu2 %6587  ;;  %6666 = vst.msk [vmem:[#allocation2 + $0xc1] sm:$0xff] %vm6651_vm12, %v6584_v0  ;;  %v6697_v17 = vld [vmem:[#allocation2 + $0xb1] sm:$0xff] }
 0xb62   : > { %v6322_v25 = vpop.f32.mrf.mxu1  ;;  %6668 = vst.msk [vmem:[#allocation2 + $0xd9] sm:$0xff] %vm6651_vm12, %v6588_v52 }
 0xb63   : > { %v6436_v58 = vadd.f32 %v6435_v46, %v6322_v25  ;;  %v6574_v50 = vpop.permute.xlu1 %6573  ;;  %v6450_v25 = vpop.f32.mrf.mxu3 }
 0xb64   : > { %6661 = vst.msk [vmem:[#allocation2 + $0x81] sm:$0xff] %vm6651_vm12, %v6574_v50 }
 0xb65   : > { %v6483_v27 = vmul.f32 0.2, %v6436_v58  ;;  %v6116_v44 = vld [vmem:[#allocation3 + $0x1f0] sm:$0xff] }
 0xb66   : > { %6342 = vmatmul.f32.gmra.mxu1 %v6116_v44 }
 0xb67   : > { %v6515_v15 = vmax.f32 %v6436_v58, %v6483_v27 }
 0xb68   : > { %v6698_v42 = vld [vmem:[#allocation2 + $0xc1] sm:$0xff] }
 0xb69   : > { %v6837_v48 = vpop.f32.mrf.mxu0  ;;  %6603 = vrot.lane.b32.xlu1 %v6515_v15, %s7250_s8  ;;  %v6700_v24 = vld [vmem:[#allocation2 + $0xd9] sm:$0xff] }
 0xb6a   : > { %v6838_v3 = vadd.f32 %v6837_v48, %v11288_v63 }
 0xb6b   : > { %v6580_v2 = vpop.permute.xlu1 %6579  ;;  %v6693_v55 = vld [vmem:[#allocation2 + $0x81] sm:$0xff] }
 0xb6c   : > { %6929 = vst.msk [vmem:[%s10911_s21 + $0x10] sm:$0xff] %vm324_vm2, %v6838_v3  ;;  %7164 = vmatmul.msk.f32.gmra.mxu0 %vm171_vm0, %v6693_v55 }
 0xb6d   : > { %6664 = vst.msk [vmem:[#allocation2 + $0xa9] sm:$0xff] %vm6651_vm12, %v6580_v2 }
 0xb71   : > { %v6840_v45 = vpop.f32.mrf.mxu0 }
 0xb72   : > { %v6841_v32 = vadd.f32 %v6840_v45, %v11289_v30  ;;  %v6590_v37 = vpop.permute.xlu0 %6589 }
 0xb73   : > { %6669 = vst.msk [vmem:[#allocation2 + $0xe1] sm:$0xff] %vm6651_vm12, %v6590_v37  ;;  %v6586_v6 = vpop.permute.xlu1 %6585  ;;  %v6594_v4 = vpop.permute.xlu2 %6593 }
 0xb74   : > { %6930 = vst.msk [vmem:[%s10911_s21 + $0x18] sm:$0xff] %vm324_vm2, %v6841_v32  ;;  %v6325_v62 = vpop.f32.mrf.mxu1  ;;  %7165 = vmatmul.msk.f32.gmra.mxu0 %vm171_vm0, %v6694_v1  ;;  %v6696_v5 = vld [vmem:[#allocation2 + $0xa9] sm:$0xff] }
 0xb75   : > { %6667 = vst.msk [vmem:[#allocation2 + $0xc9] sm:$0xff] %vm6651_vm12, %v6586_v6  ;;  %v6439_v21 = vadd.f32 %v6438_v43, %v6325_v62  ;;  %v11294_v6 = vld [vmem:[#allocation12_spill] sm:$0xff] }
 0xb76   : > { %6671 = vst.msk [vmem:[#allocation2 + $0xf9] sm:$0xff] %vm6651_vm12, %v6594_v4 }
 0xb77   : > { %v6484_v10 = vmul.f32 0.2, %v6439_v21 }
 0xb78   : > { %v6453_v63 = vpop.f32.mrf.mxu3 }
 0xb79   : > { %v6516_v36 = vmax.f32 %v6439_v21, %v6484_v10 }
 0xb7a   : > { %v6701_v8 = vld [vmem:[#allocation2 + $0xe1] sm:$0xff] }
 0xb7b   : > { %6605 = vrot.lane.b32.xlu2 %v6516_v36, %s7250_s8 }
 0xb7c   : > { %v6592_v23 = vpop.permute.xlu1 %6591  ;;  %7166 = vmatmul.msk.f32.gmra.mxu0 %vm171_vm0, %v6695_v12  ;;  %v6699_v7 = vld [vmem:[#allocation2 + $0xc9] sm:$0xff] }
 0xb7d   : > { %6670 = vst.msk [vmem:[#allocation2 + $0xf1] sm:$0xff] %vm6651_vm12, %v6592_v23  ;;  %v6703_v0 = vld [vmem:[#allocation2 + $0xf9] sm:$0xff] }
 0xb7e   : > { %v6843_v31 = vpop.f32.mrf.mxu0 }
 0xb7f   : > { %v6844_v57 = vadd.f32 %v6843_v31, %v11290_v14  ;;  %v11295_v14 = vld [vmem:[#allocation17_spill] sm:$0xff] }
 0xb81   : > { %6931 = vst.msk [vmem:[%s10911_s21 + $0x20] sm:$0xff] %vm324_vm2, %v6844_v57 }
 0xb84   : > { %7167 = vmatmul.msk.f32.gmra.mxu0 %vm171_vm0, %v6696_v5  ;;  %v6702_v18 = vld [vmem:[#allocation2 + $0xf1] sm:$0xff] }
 0xb89   : > { %v6328_v49 = vpop.f32.mrf.mxu1 }
 0xb8a   : > { %v6442_v39 = vadd.f32 %v6441_v61, %v6328_v49  ;;  %v11296_v49 = vld [vmem:[#allocation10_spill] sm:$0xff] }
 0xb8b   : > { %v6456_v62 = vpop.f32.mrf.mxu3 }
 0xb8c   : > { %v6485_v22 = vmul.f32 0.2, %v6442_v39  ;;  %7168 = vmatmul.msk.f32.gmra.mxu0 %vm171_vm0, %v6697_v17 }
 0xb8e   : > { %v6517_v19 = vmax.f32 %v6442_v39, %v6485_v22  ;;  %v11297_v22 = vld [vmem:[#allocation15_spill] sm:$0xff] }
 0xb90   : > { %6607 = vrot.lane.b32.xlu0 %v6517_v19, %s7250_s8 }
 0xb94   : > { %7169 = vmatmul.msk.f32.gmra.mxu0 %vm171_vm0, %v6698_v42 }
 0xb9a   : > { %v6331_v51 = vpop.f32.mrf.mxu1  ;;  %v6596_v56 = vpop.permute.xlu0 %6595 }
 0xb9b   : > { %v6445_v16 = vadd.f32 %v6444_v28, %v6331_v51  ;;  %6672 = vst.msk [vmem:[#allocation2 + $0x109] sm:$0xff] %vm6651_vm12, %v6596_v56  ;;  %v11298_v28 = vld [vmem:[#allocation20_spill] sm:$0xff] }
 0xb9c   : > { %v6600_v60 = vpop.permute.xlu2 %6599  ;;  %7170 = vmatmul.msk.f32.gmra.mxu0 %vm171_vm0, %v6699_v7  ;;  %v11299_v7 = vld [vmem:[#allocation13_spill] sm:$0xff] }
 0xb9d   : > { %v6486_v9 = vmul.f32 0.2, %v6445_v16  ;;  %6674 = vst.msk [vmem:[#allocation2 + $0x121] sm:$0xff] %vm6651_vm12, %v6600_v60 }
 0xb9f   : > { %v6518_v26 = vmax.f32 %v6445_v16, %v6486_v9 }
 0xba1   : > { %v6846_v47 = vpop.f32.mrf.mxu0  ;;  %6609 = vrot.lane.b32.xlu1 %v6518_v26, %s7250_s8 }
 0xba2   : > { %v6847_v35 = vadd.f32 %v6846_v47, %v11291_v38  ;;  %v6704_v50 = vld [vmem:[#allocation2 + $0x109] sm:$0xff]  ;;  %v11300_v38 = vld [vmem:[#allocation18_spill] sm:$0xff] }
 0xba4   : > { %6932 = vst.msk [vmem:[%s10911_s21 + $0x28] sm:$0xff] %vm324_vm2, %v6847_v35  ;;  %v6598_v41 = vpop.permute.xlu1 %6597  ;;  %7171 = vmatmul.msk.f32.gmra.mxu0 %vm171_vm0, %v6700_v24  ;;  %v6706_v55 = vld [vmem:[#allocation2 + $0x121] sm:$0xff] }
 0xba5   : > { %6673 = vst.msk [vmem:[#allocation2 + $0x111] sm:$0xff] %vm6651_vm12, %v6598_v41 }
 0xba9   : > { %v6849_v40 = vpop.f32.mrf.mxu0 }
 0xbaa   : > { %v6850_v34 = vadd.f32 %v6849_v40, %v11292_v59  ;;  %v11301_v40 = vld [vmem:[#allocation23_spill] sm:$0xff] }
 0xbab   : > { %v6334_v33 = vpop.f32.mrf.mxu1 }
 0xbac   : > { %6933 = vst.msk [vmem:[%s10911_s21 + $0x30] sm:$0xff] %vm324_vm2, %v6850_v34  ;;  %v6448_v53 = vadd.f32 %v6447_v29, %v6334_v33  ;;  %7172 = vmatmul.msk.f32.gmra.mxu0 %vm171_vm0, %v6701_v8  ;;  %v6705_v48 = vld [vmem:[#allocation2 + $0x111] sm:$0xff] }
 0xbad   : > { %v11302_v33 = vld [vmem:[#allocation16_spill] sm:$0xff] }
 0xbae   : > { %v6487_v54 = vmul.f32 0.2, %v6448_v53 }
 0xbb0   : > { %v6519_v11 = vmax.f32 %v6448_v53, %v6487_v54 }
 0xbb2   : > { %6611 = vrot.lane.b32.xlu2 %v6519_v11, %s7250_s8  ;;  %v11303_v11 = vld [vmem:[#allocation21_spill] sm:$0xff] }
 0xbb4   : > { %7173 = vmatmul.msk.f32.gmra.mxu0 %vm171_vm0, %v6702_v18 }
 0xbb6   : > { %v6852_v13 = vpop.f32.mrf.mxu0 }
 0xbb7   : > { %v6853_v46 = vadd.f32 %v6852_v13, %v11293_v20  ;;  %v11304_v20 = vld [vmem:[#allocation26_spill] sm:$0xff] }
 0xbb9   : > { %6934 = vst.msk [vmem:[%s10911_s21 + $0x38] sm:$0xff] %vm324_vm2, %v6853_v46 }
 0xbbc   : > { %7174 = vmatmul.msk.f32.gmra.mxu0 %vm171_vm0, %v6703_v0 }
 0xbc1   : > { %v6337_v52 = vpop.f32.mrf.mxu1 }
 0xbc2   : > { %v6451_v58 = vadd.f32 %v6450_v25, %v6337_v52  ;;  %v11305_v25 = vld [vmem:[#allocation19_spill] sm:$0xff] }
 0xbc4   : > { %v6488_v27 = vmul.f32 0.2, %v6451_v58  ;;  %7175 = vmatmul.msk.f32.gmra.mxu0 %vm171_vm0, %v6704_v50 }
 0xbc6   : > { %v6520_v44 = vmax.f32 %v6451_v58, %v6488_v27  ;;  %v11306_v27 = vld [vmem:[#allocation24_spill] sm:$0xff] }
 0xbc8   : > { %6613 = vrot.lane.b32.xlu0 %v6520_v44, %s7250_s8 }
 0xbca   : > { %v6602_v15 = vpop.permute.xlu0 %6601 }
 0xbcb   : > { %6675 = vst.msk [vmem:[#allocation2 + $0x129] sm:$0xff] %vm6651_vm12, %v6602_v15 }
 0xbcc   : > { %7176 = vmatmul.msk.f32.gmra.mxu0 %vm171_vm0, %v6705_v48 }
 0xbd2   : > { %v6340_v3 = vpop.f32.mrf.mxu1  ;;  %v6707_v43 = vld [vmem:[#allocation2 + $0x129] sm:$0xff] }
 0xbd3   : > { %v6454_v2 = vadd.f32 %v6453_v63, %v6340_v3  ;;  %v11307_v3 = vld [vmem:[#allocation29_spill] sm:$0xff] }
 0xbd4   : > { %7177 = vmatmul.msk.f32.gmra.mxu0 %vm171_vm0, %v6706_v55 }
 0xbd5   : > { %v6489_v45 = vmul.f32 0.2, %v6454_v2  ;;  %v6606_v30 = vpop.permute.xlu2 %6605 }
 0xbd6   : > { %6677 = vst.msk [vmem:[#allocation2 + $0x141] sm:$0xff] %vm6651_vm12, %v6606_v30  ;;  %v11308_v30 = vld [vmem:[#allocation22_spill] sm:$0xff] }
 0xbd7   : > { %v6521_v32 = vmax.f32 %v6454_v2, %v6489_v45 }
 0xbd9   : > { %v6855_v37 = vpop.f32.mrf.mxu0  ;;  %6615 = vrot.lane.b32.xlu1 %v6521_v32, %s7250_s8 }
 0xbda   : > { %v6856_v4 = vadd.f32 %v6855_v37, %v11294_v6 }
 0xbdb   : > { %v6604_v1 = vpop.permute.xlu1 %6603 }
 0xbdc   : > { %6935 = vst.msk [vmem:[%s10911_s21 + $0x40] sm:$0xff] %vm324_vm2, %v6856_v4  ;;  %7178 = vmatmul.msk.f32.gmra.mxu0 %vm171_vm0, %v6707_v43  ;;  %v11309_v4 = vld [vmem:[#allocation27_spill] sm:$0xff] }
 0xbdd   : > { %6676 = vst.msk [vmem:[#allocation2 + $0x139] sm:$0xff] %vm6651_vm12, %v6604_v1  ;;  %v6709_v5 = vld [vmem:[#allocation2 + $0x141] sm:$0xff] }
 0xbe3   : > { %v6343_v21 = vpop.f32.mrf.mxu1 }
 0xbe4   : > { %v6708_v10 = vld [vmem:[#allocation2 + $0x139] sm:$0xff]  ;;  %v6457_v36 = vadd.f32 %v6456_v62, %v6343_v21  ;;  %v11310_v21 = vld [vmem:[#allocation31_spill] sm:$0xff] }
 0xbe5   : > { %7179 = vmatmul.msk.f32.gmra.mxu0 %vm171_vm0, %v6708_v10 }
 0xbe6   : > { %v6490_v12 = vmul.f32 0.2, %v6457_v36 }
 0xbe8   : > { %v6522_v23 = vmax.f32 %v6457_v36, %v6490_v12  ;;  %v11311_v12 = vld [vmem:[#allocation25_spill] sm:$0xff] }
 0xbe9   : > { %v6858_v31 = vpop.f32.mrf.mxu0 }
 0xbea   : > { %v6859_v57 = vadd.f32 %v6858_v31, %v11295_v14  ;;  %6617 = vrot.lane.b32.xlu2 %v6522_v23, %s7250_s8  ;;  %v11312_v14 = vld [vmem:[#allocation30_spill] sm:$0xff] }
 0xbec   : > { %6936 = vst.msk [vmem:[%s10911_s21 + $0x48] sm:$0xff] %vm324_vm2, %v6859_v57 }
 0xbed   : > { %7180 = vmatmul.msk.f32.gmra.mxu0 %vm171_vm0, %v6709_v5 }
 0xbf1   : > { %v6861_v61 = vpop.f32.mrf.mxu0 }
 0xbf2   : > { %v6862_v39 = vadd.f32 %v6861_v61, %v11296_v49  ;;  %v11313_v61 = vld [vmem:[#allocation33_spill] sm:$0xff] }
 0xbf4   : > { %6937 = vst.msk [vmem:[%s10911_s21 + $0x50] sm:$0xff] %vm324_vm2, %v6862_v39 }
 0xbf9   : > { %v6864_v17 = vpop.f32.mrf.mxu0 }
 0xbfa   : > { %v6865_v19 = vadd.f32 %v6864_v17, %v11297_v22  ;;  %v11314_v17 = vld [vmem:[#allocation28_spill] sm:$0xff] }
 0xbfc   : > { %6938 = vst.msk [vmem:[%s10911_s21 + $0x58] sm:$0xff] %vm324_vm2, %v6865_v19 }
 0xc01   : > { %v6867_v42 = vpop.f32.mrf.mxu0 }
 0xc02   : > { %v6868_v51 = vadd.f32 %v6867_v42, %v11298_v28  ;;  %v6608_v56 = vpop.permute.xlu0 %6607  ;;  %v11315_v42 = vld [vmem:[#allocation32_spill] sm:$0xff] }
 0xc03   : > { %6678 = vst.msk [vmem:[#allocation2 + $0x151] sm:$0xff] %vm6651_vm12, %v6608_v56  ;;  %v11316_v56 = vld [vmem:[#allocation64_spill] sm:$0xff] }
 0xc04   : > { %6939 = vst.msk [vmem:[%s10911_s21 + $0x60] sm:$0xff] %vm324_vm2, %v6868_v51 }
 0xc09   : > { %v6870_v16 = vpop.f32.mrf.mxu0 }
 0xc0a   : > { %v6871_v60 = vadd.f32 %v6870_v16, %v11299_v7  ;;  %v6710_v9 = vld [vmem:[#allocation2 + $0x151] sm:$0xff] }
 0xc0b   : > { %7181 = vmatmul.msk.f32.gmra.mxu0 %vm171_vm0, %v6710_v9 }
 0xc0c   : > { %6940 = vst.msk [vmem:[%s10911_s21 + $0x68] sm:$0xff] %vm324_vm2, %v6871_v60  ;;  %v6612_v26 = vpop.permute.xlu2 %6611  ;;  %v11317_v60 = vld [vmem:[#allocation65_spill] sm:$0xff] }
 0xc0d   : > { %6680 = vst.msk [vmem:[#allocation2 + $0x169] sm:$0xff] %vm6651_vm12, %v6612_v26 }
 0xc11   : > { %v6873_v47 = vpop.f32.mrf.mxu0 }
 0xc12   : > { %v6874_v35 = vadd.f32 %v6873_v47, %v11300_v38 }
 0xc13   : > { %v6610_v24 = vpop.permute.xlu1 %6609 }
 0xc14   : > { %6941 = vst.msk [vmem:[%s10911_s21 + $0x70] sm:$0xff] %vm324_vm2, %v6874_v35  ;;  %v6712_v53 = vld [vmem:[#allocation2 + $0x169] sm:$0xff] }
 0xc15   : > { %6679 = vst.msk [vmem:[#allocation2 + $0x159] sm:$0xff] %vm6651_vm12, %v6610_v24 }
 0xc19   : > { %v6876_v41 = vpop.f32.mrf.mxu0 }
 0xc1a   : > { %v6877_v59 = vadd.f32 %v6876_v41, %v11301_v40 }
 0xc1c   : > { %6942 = vst.msk [vmem:[%s10911_s21 + $0x78] sm:$0xff] %vm324_vm2, %v6877_v59  ;;  %v6711_v34 = vld [vmem:[#allocation2 + $0x159] sm:$0xff] }
 0xc1d   : > { %7182 = vmatmul.msk.f32.gmra.mxu0 %vm171_vm0, %v6711_v34 }
 0xc21   : > { %v6879_v29 = vpop.f32.mrf.mxu0 }
 0xc22   : > { %v6880_v8 = vadd.f32 %v6879_v29, %v11302_v33 }
 0xc24   : > { %6943 = vst.msk [vmem:[%s10911_s21 + $0x80] sm:$0xff] %vm324_vm2, %v6880_v8 }
 0xc25   : > { %7183 = vmatmul.msk.f32.gmra.mxu0 %vm171_vm0, %v6712_v53 }
 0xc29   : > { %v6882_v54 = vpop.f32.mrf.mxu0 }
 0xc2a   : > { %v6883_v18 = vadd.f32 %v6882_v54, %v11303_v11 }
 0xc2c   : > { %6944 = vst.msk [vmem:[%s10911_s21 + $0x88] sm:$0xff] %vm324_vm2, %v6883_v18 }
 0xc31   : > { %v6885_v13 = vpop.f32.mrf.mxu0 }
 0xc32   : > { %v6886_v46 = vadd.f32 %v6885_v13, %v11304_v20 }
 0xc34   : > { %6945 = vst.msk [vmem:[%s10911_s21 + $0x90] sm:$0xff] %vm324_vm2, %v6886_v46 }
 0xc39   : > { %v6888_v0 = vpop.f32.mrf.mxu0 }
 0xc3a   : > { %v6889_v52 = vadd.f32 %v6888_v0, %v11305_v25  ;;  %v6614_v58 = vpop.permute.xlu0 %6613 }
 0xc3b   : > { %6681 = vst.msk [vmem:[#allocation2 + $0x171] sm:$0xff] %vm6651_vm12, %v6614_v58 }
 0xc3c   : > { %6946 = vst.msk [vmem:[%s10911_s21 + $0x98] sm:$0xff] %vm324_vm2, %v6889_v52 }
 0xc41   : > { %v6891_v50 = vpop.f32.mrf.mxu0 }
 0xc42   : > { %v6892_v44 = vadd.f32 %v6891_v50, %v11306_v27  ;;  %v6713_v15 = vld [vmem:[#allocation2 + $0x171] sm:$0xff] }
 0xc43   : > { %7184 = vmatmul.msk.f32.gmra.mxu0 %vm171_vm0, %v6713_v15 }
 0xc44   : > { %6947 = vst.msk [vmem:[%s10911_s21 + $0xa0] sm:$0xff] %vm324_vm2, %v6892_v44  ;;  %v6618_v48 = vpop.permute.xlu2 %6617 }
 0xc45   : > { %6683 = vst.msk [vmem:[#allocation2 + $0x189] sm:$0xff] %vm6651_vm12, %v6618_v48 }
 0xc49   : > { %v6894_v63 = vpop.f32.mrf.mxu0 }
 0xc4a   : > { %v6895_v2 = vadd.f32 %v6894_v63, %v11307_v3 }
 0xc4b   : > { %v6616_v55 = vpop.permute.xlu1 %6615 }
 0xc4c   : > { %6948 = vst.msk [vmem:[%s10911_s21 + $0xa8] sm:$0xff] %vm324_vm2, %v6895_v2  ;;  %v6715_v43 = vld [vmem:[#allocation2 + $0x189] sm:$0xff] }
 0xc4d   : > { %6682 = vst.msk [vmem:[#allocation2 + $0x181] sm:$0xff] %vm6651_vm12, %v6616_v55 }
 0xc51   : > { %v6897_v45 = vpop.f32.mrf.mxu0 }
 0xc52   : > { %v6898_v32 = vadd.f32 %v6897_v45, %v11308_v30 }
 0xc54   : > { %6949 = vst.msk [vmem:[%s10911_s21 + $0xb0] sm:$0xff] %vm324_vm2, %v6898_v32  ;;  %v6714_v37 = vld [vmem:[#allocation2 + $0x181] sm:$0xff] }
 0xc55   : > { %7185 = vmatmul.msk.f32.gmra.mxu0 %vm171_vm0, %v6714_v37 }
 0xc59   : > { %v6900_v6 = vpop.f32.mrf.mxu0 }
 0xc5a   : > { %v6901_v1 = vadd.f32 %v6900_v6, %v11309_v4 }
 0xc5c   : > { %6950 = vst.msk [vmem:[%s10911_s21 + $0xb8] sm:$0xff] %vm324_vm2, %v6901_v1 }
 0xc5d   : > { %7186 = vmatmul.msk.f32.gmra.mxu0 %vm171_vm0, %v6715_v43 }
 0xc62   : > { %v6903_v62 = vpop.f32.mrf.mxu0 }
 0xc63   : > { %v6904_v10 = vadd.f32 %v6903_v62, %v11310_v21 }
 0xc65   : > { %6951 = vst.msk [vmem:[%s10911_s21 + $0xc0] sm:$0xff] %vm324_vm2, %v6904_v10 }
 0xc6a   : > { %v6906_v36 = vpop.f32.mrf.mxu0 }
 0xc6b   : > { %v6907_v23 = vadd.f32 %v6906_v36, %v11311_v12 }
 0xc6d   : > { %6952 = vst.msk [vmem:[%s10911_s21 + $0xc8] sm:$0xff] %vm324_vm2, %v6907_v23 }
 0xc88   : > { %v6909_v31 = vpop.f32.mrf.mxu0 }
 0xc89   : > { %v6910_v57 = vadd.f32 %v6909_v31, %v11312_v14 }
 0xc8b   : > { %6953 = vst.msk [vmem:[%s10911_s21 + $0xd0] sm:$0xff] %vm324_vm2, %v6910_v57 }
 0xc9a   : > { %v6912_v5 = vpop.f32.mrf.mxu0 }
 0xc9b   : > { %v6913_v49 = vadd.f32 %v6912_v5, %v11313_v61 }
 0xc9d   : > { %6954 = vst.msk [vmem:[%s10911_s21 + $0xd8] sm:$0xff] %vm324_vm2, %v6913_v49 }
 0xca2   : > { %v6915_v39 = vpop.f32.mrf.mxu0 }
 0xca3   : > { %v6916_v22 = vadd.f32 %v6915_v39, %v11314_v17 }
 0xca5   : > { %6955 = vst.msk [vmem:[%s10911_s21 + $0xe0] sm:$0xff] %vm324_vm2, %v6916_v22 }
 0xcc0   : > { %v6918_v19 = vpop.f32.mrf.mxu0 }
 0xcc1   : > { %v6919_v28 = vadd.f32 %v6918_v19, %v11315_v42 }
 0xcc3   : > { %6956 = vst.msk [vmem:[%s10911_s21 + $0xe8] sm:$0xff] %vm324_vm2, %v6919_v28 }
 0xcd2   : > { %v6921_v51 = vpop.f32.mrf.mxu0 }
 0xcd3   : > { %v6922_v16 = vadd.f32 %v6921_v51, %v11316_v56 }
 0xcd5   : > { %6957 = vst.msk [vmem:[%s10911_s21 + $0xf0] sm:$0xff] %vm324_vm2, %v6922_v16 }
 0xcda   : > { %v6924_v7 = vpop.f32.mrf.mxu0 }
 0xcdb   : > { %v6925_v9 = vadd.f32 %v6924_v7, %v11317_v60 }
 0xcdd   : > { %6958 = vst.msk [vmem:[%s10911_s21 + $0xf8] sm:$0xff] %vm324_vm2, %v6925_v9 }
 0xcde PF: > { %s13_s12 = sadd.s32 1, %s7238_s12  }
 0xcdf   : > { %p10_p4 = scmp.ge.s32.totalorder %s13_s12, 4  }
 0xce1   :  { %12 = sbr.rel (!%p10_p4) target bundleno = 1 (0x1), region = 66 }

</bundles_post_ra>
